<compile_context>
chip_gen: v5e
topology: v5e:2x2
jax: 0.10.0
libtpu: 0.0.40
codegen_flags: <defaults>
</compile_context>

<pallas_src>
import jax
import jax.numpy as jnp
from jax.experimental import pallas as pl
from jax.experimental.pallas import tpu as pltpu


def _inception_kernel(x_ref, w1_ref, b1_ref, w3_ref, b3_ref, w5_ref, b5_ref,
                      out_ref, xs_ref):
    # x_ref  : (1, 1, C, tile_h + 4, W + 4)  VMEM f32 (zero-padded halo)
    # w*_ref : flat weights in SMEM; b*_ref : (3,) biases in SMEM
    # out_ref: (1, 9, tile_h, W)             VMEM f32
    # xs_ref : (C * 5, tile_h + 4, W)        VMEM scratch (lane-shifted slabs)
    C = x_ref.shape[2]
    th = out_ref.shape[2]
    W = out_ref.shape[3]

    # Hoist the 5 lane (width) shifts per channel out of the hot tap loop.
    for ci in range(C):
        for kw in range(5):
            xs_ref[ci * 5 + kw] = x_ref[0, 0, ci, :, kw:kw + W]

    # Nine accumulators, initialized with their broadcast bias.
    acc = []
    for co in range(3):
        acc.append(jnp.full((th, W), b1_ref[co], jnp.float32))   # 0..2: 1x1
    for co in range(3):
        acc.append(jnp.full((th, W), b3_ref[co], jnp.float32))   # 3..5: 3x3
    for co in range(3):
        acc.append(jnp.full((th, W), b5_ref[co], jnp.float32))   # 6..8: 5x5

    # Fused tap loop: each (ci, kh, kw) slab is read once (sublane-offset vld
    # from the lane-shift cache) and feeds every branch that uses that tap.
    for ci in range(C):
        for kw in range(5):
            base = ci * 5 + kw
            for kh in range(5):
                slab = xs_ref[base, kh:kh + th, :]
                # 5x5 conv (module's `branch3x3_1`) -> out channels 6..8
                for co in range(3):
                    w = w5_ref[(co * C + ci) * 25 + kh * 5 + kw]
                    acc[6 + co] = acc[6 + co] + w * slab
                # 3x3 conv (module's `branch5x5_1`) -> out channels 3..5
                if 1 <= kh <= 3 and 1 <= kw <= 3:
                    for co in range(3):
                        w = w3_ref[(co * 3 + ci) * 9 + (kh - 1) * 3 + (kw - 1)]
                        acc[3 + co] = acc[3 + co] + w * slab
                # 1x1 conv (`branch1x1`) -> out channels 0..2
                if kh == 2 and kw == 2:
                    for co in range(3):
                        acc[co] = acc[co] + w1_ref[co * C + ci] * slab

    for co in range(9):
        out_ref[0, co] = acc[co]


def _pick_tile_h(H, W):
    """Largest multiple-of-8 divisor of H whose 9 f32 accumulators fit in
    roughly half of the vector register file."""
    if H % 8 != 0:
        return H
    budget_elems = 32 * 1024          # ~128 KiB of the 256 KiB vreg file
    best = 8
    for t in range(8, H + 1, 8):
        if H % t == 0 and 9 * t * W <= budget_elems:
            best = t
    return best


def inception_a(x, params, tile_h=None):
    """x: (N, C, H, W) float32 NCHW. Returns (N, 9, H, W) float32."""
    N, C, H, W = x.shape
    w1, b1, w3, b3, w5, b5 = params
    assert w3.shape == (3, 3, 3, 3), "branch5x5_1 requires 3 input channels"
    assert C == 3, "InceptionA.forward only works with in_channels == 3"

    if tile_h is None:
        tile_h = _pick_tile_h(H, W)
    assert H % tile_h == 0 and (tile_h == H or tile_h % 8 == 0)
    T = H // tile_h

    # Pad once with the maximum padding (2) and build T overlapping
    # (tile_h + 4)-row windows (2-row halo each side): every block stays a
    # plain, auto-double-buffered BlockSpec tile.
    x_pad = jnp.pad(x, ((0, 0), (0, 0), (2, 2), (2, 2)))
    if T == 1:
        x_tiles = x_pad[:, None]                               # (N, 1, C, H+4, W+4)
    else:
        x_tiles = jnp.stack(
            [x_pad[:, :, t * tile_h:t * tile_h + tile_h + 4, :]
             for t in range(T)], axis=1)                       # (N, T, C, th+4, W+4)

    smem_spec = pl.BlockSpec(memory_space=pltpu.MemorySpace.SMEM)

    return pl.pallas_call(
        _inception_kernel,
        out_shape=jax.ShapeDtypeStruct((N, 9, H, W), jnp.float32),
        grid=(N, T),
        in_specs=[
            pl.BlockSpec((1, 1, C, tile_h + 4, W + 4),
                         lambda n, t: (n, t, 0, 0, 0)),
            smem_spec,  # w1 flat (3*C,)
            smem_spec,  # b1 (3,)
            smem_spec,  # w3 flat (3*3*9,)
            smem_spec,  # b3 (3,)
            smem_spec,  # w5 flat (3*C*25,)
            smem_spec,  # b5 (3,)
        ],
        out_specs=pl.BlockSpec((1, 9, tile_h, W),
                               lambda n, t: (n, 0, t, 0)),
        scratch_shapes=[pltpu.VMEM((C * 5, tile_h + 4, W), jnp.float32)],
        compiler_params=pltpu.CompilerParams(
            dimension_semantics=("parallel", "parallel")),
    )(x_tiles,
      w1.reshape(-1), b1,
      w3.reshape(-1), b3,
      w5.reshape(-1), b5)


def init_params(key, in_channels):
    """Deterministic synthetic weights with the module's shapes."""
    ks = jax.random.split(key, 6)
    w1 = 0.1 * jax.random.normal(ks[0], (3, in_channels, 1, 1), jnp.float32)
    b1 = 0.1 * jax.random.normal(ks[1], (3,), jnp.float32)
    w3 = 0.1 * jax.random.normal(ks[2], (3, 3, 3, 3), jnp.float32)
    b3 = 0.1 * jax.random.normal(ks[3], (3,), jnp.float32)
    w5 = 0.1 * jax.random.normal(ks[4], (3, in_channels, 5, 5), jnp.float32)
    b5 = 0.1 * jax.random.normal(ks[5], (3,), jnp.float32)
    return w1, b1, w3, b3, w5, b5


def _reference(x, params):
    """Pure-JAX reference (XLA conv) for verification."""
    w1, b1, w3, b3, w5, b5 = params

    def conv(x, w, b, pad):
        y = jax.lax.conv_general_dilated(
            x, w, window_strides=(1, 1),
            padding=((pad, pad), (pad, pad)),
            dimension_numbers=("NCHW", "OIHW", "NCHW"),
            precision=jax.lax.Precision.HIGHEST)
        return y + b[None, :, None, None]

    return jnp.concatenate(
        [conv(x, w1, b1, 0), conv(x, w3, b3, 1), conv(x, w5, b5, 2)], axis=1)


if __name__ == "__main__":
    key = jax.random.PRNGKey(0)
    k_x, k_p = jax.random.split(key)

    N, C, H, W = 2, 3, 16, 16  # module requires C == 3
    x = jax.random.normal(k_x, (N, C, H, W), jnp.float32)
    params = init_params(k_p, C)

    ref = _reference(x, params)

    # Single-tile path (tile_h == H).
    out = jax.block_until_ready(inception_a(x, params))
    assert out.shape == (N, 9, H, W)
    assert jnp.allclose(out, ref, rtol=1e-4, atol=1e-4), "mismatch (full tile)"

    # H-tiled path with the 2-row halo (two tiles of 8 rows).
    out_tiled = jax.block_until_ready(inception_a(x, params, tile_h=8))
    assert jnp.allclose(out_tiled, ref, rtol=1e-4, atol=1e-4), "mismatch (tiled)"

    print("KERNEL_OK")
</pallas_src>

<mosaic_0001>
module attributes {stable_mosaic.version = 11 : i64} {
  func.func @_inception_kernel(%arg0: i32, %arg1: i32, %arg2: memref<1x1x3x20x20xf32, #tpu.memory_space<vmem>>, %arg3: memref<9xf32, #tpu.memory_space<smem>>, %arg4: memref<3xf32, #tpu.memory_space<smem>>, %arg5: memref<81xf32, #tpu.memory_space<smem>>, %arg6: memref<3xf32, #tpu.memory_space<smem>>, %arg7: memref<225xf32, #tpu.memory_space<smem>>, %arg8: memref<3xf32, #tpu.memory_space<smem>>, %arg9: memref<1x9x16x16xf32, #tpu.memory_space<vmem>>, %arg10: memref<15x20x16xf32, #tpu.memory_space<vmem>>) attributes {dimension_semantics = [#tpu.dimension_semantics<parallel>, #tpu.dimension_semantics<parallel>], iteration_bounds = array<i64: 2, 1>, scalar_prefetch = 0 : i64, scratch_operands = 1 : i64, tpu.core_type = #tpu.core_type<tc>, window_params = [{transform_indices = @transform_0, window_bounds = array<i64: 1, 1, 3, 20, 20>}, {transform_indices = @transform_1, window_bounds = array<i64: 9>}, {transform_indices = @transform_2, window_bounds = array<i64: 3>}, {transform_indices = @transform_3, window_bounds = array<i64: 81>}, {transform_indices = @transform_4, window_bounds = array<i64: 3>}, {transform_indices = @transform_5, window_bounds = array<i64: 225>}, {transform_indices = @transform_6, window_bounds = array<i64: 3>}, {transform_indices = @transform_7, window_bounds = array<i64: 1, 9, 16, 16>}]} {
    %c0 = arith.constant 0 : index
    %c0_0 = arith.constant 0 : index
    %c0_1 = arith.constant 0 : index
    %c0_2 = arith.constant 0 : index
    %c0_3 = arith.constant 0 : index
    %0 = vector.load %arg2[%c0, %c0_0, %c0_1, %c0_2, %c0_3] : memref<1x1x3x20x20xf32, #tpu.memory_space<vmem>>, vector<1x1x1x20x16xf32>
    %1 = vector.shape_cast %0 : vector<1x1x1x20x16xf32> to vector<20x16xf32>
    %c0_4 = arith.constant 0 : index
    %c0_5 = arith.constant 0 : index
    %c0_6 = arith.constant 0 : index
    %2 = vector.load %arg10[%c0_4, %c0_5, %c0_6] : memref<15x20x16xf32, #tpu.memory_space<vmem>>, vector<1x20x16xf32>
    %3 = vector.shape_cast %2 : vector<1x20x16xf32> to vector<20x16xf32>
    %4 = vector.shape_cast %1 : vector<20x16xf32> to vector<1x20x16xf32>
    tpu.vector_store %arg10[%c0_4, %c0_5, %c0_6], %4 {strides = array<i32>} : memref<15x20x16xf32, #tpu.memory_space<vmem>>, vector<1x20x16xf32>,
    %c0_7 = arith.constant 0 : index
    %c0_8 = arith.constant 0 : index
    %c0_9 = arith.constant 0 : index
    %c0_10 = arith.constant 0 : index
    %c1 = arith.constant 1 : index
    %5 = vector.load %arg2[%c0_7, %c0_8, %c0_9, %c0_10, %c1] : memref<1x1x3x20x20xf32, #tpu.memory_space<vmem>>, vector<1x1x1x20x16xf32>
    %6 = vector.shape_cast %5 : vector<1x1x1x20x16xf32> to vector<20x16xf32>
    %c1_11 = arith.constant 1 : index
    %c0_12 = arith.constant 0 : index
    %c0_13 = arith.constant 0 : index
    %7 = vector.load %arg10[%c1_11, %c0_12, %c0_13] : memref<15x20x16xf32, #tpu.memory_space<vmem>>, vector<1x20x16xf32>
    %8 = vector.shape_cast %7 : vector<1x20x16xf32> to vector<20x16xf32>
    %9 = vector.shape_cast %6 : vector<20x16xf32> to vector<1x20x16xf32>
    tpu.vector_store %arg10[%c1_11, %c0_12, %c0_13], %9 {strides = array<i32>} : memref<15x20x16xf32, #tpu.memory_space<vmem>>, vector<1x20x16xf32>,
    %c0_14 = arith.constant 0 : index
    %c0_15 = arith.constant 0 : index
    %c0_16 = arith.constant 0 : index
    %c0_17 = arith.constant 0 : index
    %c2 = arith.constant 2 : index
    %10 = vector.load %arg2[%c0_14, %c0_15, %c0_16, %c0_17, %c2] : memref<1x1x3x20x20xf32, #tpu.memory_space<vmem>>, vector<1x1x1x20x16xf32>
    %11 = vector.shape_cast %10 : vector<1x1x1x20x16xf32> to vector<20x16xf32>
    %c2_18 = arith.constant 2 : index
    %c0_19 = arith.constant 0 : index
    %c0_20 = arith.constant 0 : index
    %12 = vector.load %arg10[%c2_18, %c0_19, %c0_20] : memref<15x20x16xf32, #tpu.memory_space<vmem>>, vector<1x20x16xf32>
    %13 = vector.shape_cast %12 : vector<1x20x16xf32> to vector<20x16xf32>
    %14 = vector.shape_cast %11 : vector<20x16xf32> to vector<1x20x16xf32>
    tpu.vector_store %arg10[%c2_18, %c0_19, %c0_20], %14 {strides = array<i32>} : memref<15x20x16xf32, #tpu.memory_space<vmem>>, vector<1x20x16xf32>,
    %c0_21 = arith.constant 0 : index
    %c0_22 = arith.constant 0 : index
    %c0_23 = arith.constant 0 : index
    %c0_24 = arith.constant 0 : index
    %c3 = arith.constant 3 : index
    %15 = vector.load %arg2[%c0_21, %c0_22, %c0_23, %c0_24, %c3] : memref<1x1x3x20x20xf32, #tpu.memory_space<vmem>>, vector<1x1x1x20x16xf32>
    %16 = vector.shape_cast %15 : vector<1x1x1x20x16xf32> to vector<20x16xf32>
    %c3_25 = arith.constant 3 : index
    %c0_26 = arith.constant 0 : index
    %c0_27 = arith.constant 0 : index
    %17 = vector.load %arg10[%c3_25, %c0_26, %c0_27] : memref<15x20x16xf32, #tpu.memory_space<vmem>>, vector<1x20x16xf32>
    %18 = vector.shape_cast %17 : vector<1x20x16xf32> to vector<20x16xf32>
    %19 = vector.shape_cast %16 : vector<20x16xf32> to vector<1x20x16xf32>
    tpu.vector_store %arg10[%c3_25, %c0_26, %c0_27], %19 {strides = array<i32>} : memref<15x20x16xf32, #tpu.memory_space<vmem>>, vector<1x20x16xf32>,
    %c0_28 = arith.constant 0 : index
    %c0_29 = arith.constant 0 : index
    %c0_30 = arith.constant 0 : index
    %c0_31 = arith.constant 0 : index
    %c4 = arith.constant 4 : index
    %20 = vector.load %arg2[%c0_28, %c0_29, %c0_30, %c0_31, %c4] : memref<1x1x3x20x20xf32, #tpu.memory_space<vmem>>, vector<1x1x1x20x16xf32>
    %21 = vector.shape_cast %20 : vector<1x1x1x20x16xf32> to vector<20x16xf32>
    %c4_32 = arith.constant 4 : index
    %c0_33 = arith.constant 0 : index
    %c0_34 = arith.constant 0 : index
    %22 = vector.load %arg10[%c4_32, %c0_33, %c0_34] : memref<15x20x16xf32, #tpu.memory_space<vmem>>, vector<1x20x16xf32>
    %23 = vector.shape_cast %22 : vector<1x20x16xf32> to vector<20x16xf32>
    %24 = vector.shape_cast %21 : vector<20x16xf32> to vector<1x20x16xf32>
    tpu.vector_store %arg10[%c4_32, %c0_33, %c0_34], %24 {strides = array<i32>} : memref<15x20x16xf32, #tpu.memory_space<vmem>>, vector<1x20x16xf32>,
    %c0_35 = arith.constant 0 : index
    %c0_36 = arith.constant 0 : index
    %c1_37 = arith.constant 1 : index
    %c0_38 = arith.constant 0 : index
    %c0_39 = arith.constant 0 : index
    %25 = vector.load %arg2[%c0_35, %c0_36, %c1_37, %c0_38, %c0_39] : memref<1x1x3x20x20xf32, #tpu.memory_space<vmem>>, vector<1x1x1x20x16xf32>
    %26 = vector.shape_cast %25 : vector<1x1x1x20x16xf32> to vector<20x16xf32>
    %c5 = arith.constant 5 : index
    %c0_40 = arith.constant 0 : index
    %c0_41 = arith.constant 0 : index
    %27 = vector.load %arg10[%c5, %c0_40, %c0_41] : memref<15x20x16xf32, #tpu.memory_space<vmem>>, vector<1x20x16xf32>
    %28 = vector.shape_cast %27 : vector<1x20x16xf32> to vector<20x16xf32>
    %29 = vector.shape_cast %26 : vector<20x16xf32> to vector<1x20x16xf32>
    tpu.vector_store %arg10[%c5, %c0_40, %c0_41], %29 {strides = array<i32>} : memref<15x20x16xf32, #tpu.memory_space<vmem>>, vector<1x20x16xf32>,
    %c0_42 = arith.constant 0 : index
    %c0_43 = arith.constant 0 : index
    %c1_44 = arith.constant 1 : index
    %c0_45 = arith.constant 0 : index
    %c1_46 = arith.constant 1 : index
    %30 = vector.load %arg2[%c0_42, %c0_43, %c1_44, %c0_45, %c1_46] : memref<1x1x3x20x20xf32, #tpu.memory_space<vmem>>, vector<1x1x1x20x16xf32>
    %31 = vector.shape_cast %30 : vector<1x1x1x20x16xf32> to vector<20x16xf32>
    %c6 = arith.constant 6 : index
    %c0_47 = arith.constant 0 : index
    %c0_48 = arith.constant 0 : index
    %32 = vector.load %arg10[%c6, %c0_47, %c0_48] : memref<15x20x16xf32, #tpu.memory_space<vmem>>, vector<1x20x16xf32>
    %33 = vector.shape_cast %32 : vector<1x20x16xf32> to vector<20x16xf32>
    %34 = vector.shape_cast %31 : vector<20x16xf32> to vector<1x20x16xf32>
    tpu.vector_store %arg10[%c6, %c0_47, %c0_48], %34 {strides = array<i32>} : memref<15x20x16xf32, #tpu.memory_space<vmem>>, vector<1x20x16xf32>,
    %c0_49 = arith.constant 0 : index
    %c0_50 = arith.constant 0 : index
    %c1_51 = arith.constant 1 : index
    %c0_52 = arith.constant 0 : index
    %c2_53 = arith.constant 2 : index
    %35 = vector.load %arg2[%c0_49, %c0_50, %c1_51, %c0_52, %c2_53] : memref<1x1x3x20x20xf32, #tpu.memory_space<vmem>>, vector<1x1x1x20x16xf32>
    %36 = vector.shape_cast %35 : vector<1x1x1x20x16xf32> to vector<20x16xf32>
    %c7 = arith.constant 7 : index
    %c0_54 = arith.constant 0 : index
    %c0_55 = arith.constant 0 : index
    %37 = vector.load %arg10[%c7, %c0_54, %c0_55] : memref<15x20x16xf32, #tpu.memory_space<vmem>>, vector<1x20x16xf32>
    %38 = vector.shape_cast %37 : vector<1x20x16xf32> to vector<20x16xf32>
    %39 = vector.shape_cast %36 : vector<20x16xf32> to vector<1x20x16xf32>
    tpu.vector_store %arg10[%c7, %c0_54, %c0_55], %39 {strides = array<i32>} : memref<15x20x16xf32, #tpu.memory_space<vmem>>, vector<1x20x16xf32>,
    %c0_56 = arith.constant 0 : index
    %c0_57 = arith.constant 0 : index
    %c1_58 = arith.constant 1 : index
    %c0_59 = arith.constant 0 : index
    %c3_60 = arith.constant 3 : index
    %40 = vector.load %arg2[%c0_56, %c0_57, %c1_58, %c0_59, %c3_60] : memref<1x1x3x20x20xf32, #tpu.memory_space<vmem>>, vector<1x1x1x20x16xf32>
    %41 = vector.shape_cast %40 : vector<1x1x1x20x16xf32> to vector<20x16xf32>
    %c8 = arith.constant 8 : index
    %c0_61 = arith.constant 0 : index
    %c0_62 = arith.constant 0 : index
    %42 = vector.load %arg10[%c8, %c0_61, %c0_62] : memref<15x20x16xf32, #tpu.memory_space<vmem>>, vector<1x20x16xf32>
    %43 = vector.shape_cast %42 : vector<1x20x16xf32> to vector<20x16xf32>
    %44 = vector.shape_cast %41 : vector<20x16xf32> to vector<1x20x16xf32>
    tpu.vector_store %arg10[%c8, %c0_61, %c0_62], %44 {strides = array<i32>} : memref<15x20x16xf32, #tpu.memory_space<vmem>>, vector<1x20x16xf32>,
    %c0_63 = arith.constant 0 : index
    %c0_64 = arith.constant 0 : index
    %c1_65 = arith.constant 1 : index
    %c0_66 = arith.constant 0 : index
    %c4_67 = arith.constant 4 : index
    %45 = vector.load %arg2[%c0_63, %c0_64, %c1_65, %c0_66, %c4_67] : memref<1x1x3x20x20xf32, #tpu.memory_space<vmem>>, vector<1x1x1x20x16xf32>
    %46 = vector.shape_cast %45 : vector<1x1x1x20x16xf32> to vector<20x16xf32>
    %c9 = arith.constant 9 : index
    %c0_68 = arith.constant 0 : index
    %c0_69 = arith.constant 0 : index
    %47 = vector.load %arg10[%c9, %c0_68, %c0_69] : memref<15x20x16xf32, #tpu.memory_space<vmem>>, vector<1x20x16xf32>
    %48 = vector.shape_cast %47 : vector<1x20x16xf32> to vector<20x16xf32>
    %49 = vector.shape_cast %46 : vector<20x16xf32> to vector<1x20x16xf32>
    tpu.vector_store %arg10[%c9, %c0_68, %c0_69], %49 {strides = array<i32>} : memref<15x20x16xf32, #tpu.memory_space<vmem>>, vector<1x20x16xf32>,
    %c0_70 = arith.constant 0 : index
    %c0_71 = arith.constant 0 : index
    %c2_72 = arith.constant 2 : index
    %c0_73 = arith.constant 0 : index
    %c0_74 = arith.constant 0 : index
    %50 = vector.load %arg2[%c0_70, %c0_71, %c2_72, %c0_73, %c0_74] : memref<1x1x3x20x20xf32, #tpu.memory_space<vmem>>, vector<1x1x1x20x16xf32>
    %51 = vector.shape_cast %50 : vector<1x1x1x20x16xf32> to vector<20x16xf32>
    %c10 = arith.constant 10 : index
    %c0_75 = arith.constant 0 : index
    %c0_76 = arith.constant 0 : index
    %52 = vector.load %arg10[%c10, %c0_75, %c0_76] : memref<15x20x16xf32, #tpu.memory_space<vmem>>, vector<1x20x16xf32>
    %53 = vector.shape_cast %52 : vector<1x20x16xf32> to vector<20x16xf32>
    %54 = vector.shape_cast %51 : vector<20x16xf32> to vector<1x20x16xf32>
    tpu.vector_store %arg10[%c10, %c0_75, %c0_76], %54 {strides = array<i32>} : memref<15x20x16xf32, #tpu.memory_space<vmem>>, vector<1x20x16xf32>,
    %c0_77 = arith.constant 0 : index
    %c0_78 = arith.constant 0 : index
    %c2_79 = arith.constant 2 : index
    %c0_80 = arith.constant 0 : index
    %c1_81 = arith.constant 1 : index
    %55 = vector.load %arg2[%c0_77, %c0_78, %c2_79, %c0_80, %c1_81] : memref<1x1x3x20x20xf32, #tpu.memory_space<vmem>>, vector<1x1x1x20x16xf32>
    %56 = vector.shape_cast %55 : vector<1x1x1x20x16xf32> to vector<20x16xf32>
    %c11 = arith.constant 11 : index
    %c0_82 = arith.constant 0 : index
    %c0_83 = arith.constant 0 : index
    %57 = vector.load %arg10[%c11, %c0_82, %c0_83] : memref<15x20x16xf32, #tpu.memory_space<vmem>>, vector<1x20x16xf32>
    %58 = vector.shape_cast %57 : vector<1x20x16xf32> to vector<20x16xf32>
    %59 = vector.shape_cast %56 : vector<20x16xf32> to vector<1x20x16xf32>
    tpu.vector_store %arg10[%c11, %c0_82, %c0_83], %59 {strides = array<i32>} : memref<15x20x16xf32, #tpu.memory_space<vmem>>, vector<1x20x16xf32>,
    %c0_84 = arith.constant 0 : index
    %c0_85 = arith.constant 0 : index
    %c2_86 = arith.constant 2 : index
    %c0_87 = arith.constant 0 : index
    %c2_88 = arith.constant 2 : index
    %60 = vector.load %arg2[%c0_84, %c0_85, %c2_86, %c0_87, %c2_88] : memref<1x1x3x20x20xf32, #tpu.memory_space<vmem>>, vector<1x1x1x20x16xf32>
    %61 = vector.shape_cast %60 : vector<1x1x1x20x16xf32> to vector<20x16xf32>
    %c12 = arith.constant 12 : index
    %c0_89 = arith.constant 0 : index
    %c0_90 = arith.constant 0 : index
    %62 = vector.load %arg10[%c12, %c0_89, %c0_90] : memref<15x20x16xf32, #tpu.memory_space<vmem>>, vector<1x20x16xf32>
    %63 = vector.shape_cast %62 : vector<1x20x16xf32> to vector<20x16xf32>
    %64 = vector.shape_cast %61 : vector<20x16xf32> to vector<1x20x16xf32>
    tpu.vector_store %arg10[%c12, %c0_89, %c0_90], %64 {strides = array<i32>} : memref<15x20x16xf32, #tpu.memory_space<vmem>>, vector<1x20x16xf32>,
    %c0_91 = arith.constant 0 : index
    %c0_92 = arith.constant 0 : index
    %c2_93 = arith.constant 2 : index
    %c0_94 = arith.constant 0 : index
    %c3_95 = arith.constant 3 : index
    %65 = vector.load %arg2[%c0_91, %c0_92, %c2_93, %c0_94, %c3_95] : memref<1x1x3x20x20xf32, #tpu.memory_space<vmem>>, vector<1x1x1x20x16xf32>
    %66 = vector.shape_cast %65 : vector<1x1x1x20x16xf32> to vector<20x16xf32>
    %c13 = arith.constant 13 : index
    %c0_96 = arith.constant 0 : index
    %c0_97 = arith.constant 0 : index
    %67 = vector.load %arg10[%c13, %c0_96, %c0_97] : memref<15x20x16xf32, #tpu.memory_space<vmem>>, vector<1x20x16xf32>
    %68 = vector.shape_cast %67 : vector<1x20x16xf32> to vector<20x16xf32>
    %69 = vector.shape_cast %66 : vector<20x16xf32> to vector<1x20x16xf32>
    tpu.vector_store %arg10[%c13, %c0_96, %c0_97], %69 {strides = array<i32>} : memref<15x20x16xf32, #tpu.memory_space<vmem>>, vector<1x20x16xf32>,
    %c0_98 = arith.constant 0 : index
    %c0_99 = arith.constant 0 : index
    %c2_100 = arith.constant 2 : index
    %c0_101 = arith.constant 0 : index
    %c4_102 = arith.constant 4 : index
    %70 = vector.load %arg2[%c0_98, %c0_99, %c2_100, %c0_101, %c4_102] : memref<1x1x3x20x20xf32, #tpu.memory_space<vmem>>, vector<1x1x1x20x16xf32>
    %71 = vector.shape_cast %70 : vector<1x1x1x20x16xf32> to vector<20x16xf32>
    %c14 = arith.constant 14 : index
    %c0_103 = arith.constant 0 : index
    %c0_104 = arith.constant 0 : index
    %72 = vector.load %arg10[%c14, %c0_103, %c0_104] : memref<15x20x16xf32, #tpu.memory_space<vmem>>, vector<1x20x16xf32>
    %73 = vector.shape_cast %72 : vector<1x20x16xf32> to vector<20x16xf32>
    %74 = vector.shape_cast %71 : vector<20x16xf32> to vector<1x20x16xf32>
    tpu.vector_store %arg10[%c14, %c0_103, %c0_104], %74 {strides = array<i32>} : memref<15x20x16xf32, #tpu.memory_space<vmem>>, vector<1x20x16xf32>,
    %c0_105 = arith.constant 0 : index
    %75 = memref.load %arg4[%c0_105] : memref<3xf32, #tpu.memory_space<smem>>
    %76 = vector.broadcast %75 : f32 to vector<16x16xf32>
    %c1_106 = arith.constant 1 : index
    %77 = memref.load %arg4[%c1_106] : memref<3xf32, #tpu.memory_space<smem>>
    %78 = vector.broadcast %77 : f32 to vector<16x16xf32>
    %c2_107 = arith.constant 2 : index
    %79 = memref.load %arg4[%c2_107] : memref<3xf32, #tpu.memory_space<smem>>
    %80 = vector.broadcast %79 : f32 to vector<16x16xf32>
    %c0_108 = arith.constant 0 : index
    %81 = memref.load %arg6[%c0_108] : memref<3xf32, #tpu.memory_space<smem>>
    %82 = vector.broadcast %81 : f32 to vector<16x16xf32>
    %c1_109 = arith.constant 1 : index
    %83 = memref.load %arg6[%c1_109] : memref<3xf32, #tpu.memory_space<smem>>
    %84 = vector.broadcast %83 : f32 to vector<16x16xf32>
    %c2_110 = arith.constant 2 : index
    %85 = memref.load %arg6[%c2_110] : memref<3xf32, #tpu.memory_space<smem>>
    %86 = vector.broadcast %85 : f32 to vector<16x16xf32>
    %c0_111 = arith.constant 0 : index
    %87 = memref.load %arg8[%c0_111] : memref<3xf32, #tpu.memory_space<smem>>
    %88 = vector.broadcast %87 : f32 to vector<16x16xf32>
    %c1_112 = arith.constant 1 : index
    %89 = memref.load %arg8[%c1_112] : memref<3xf32, #tpu.memory_space<smem>>
    %90 = vector.broadcast %89 : f32 to vector<16x16xf32>
    %c2_113 = arith.constant 2 : index
    %91 = memref.load %arg8[%c2_113] : memref<3xf32, #tpu.memory_space<smem>>
    %92 = vector.broadcast %91 : f32 to vector<16x16xf32>
    %c0_114 = arith.constant 0 : index
    %c0_115 = arith.constant 0 : index
    %c0_116 = arith.constant 0 : index
    %93 = vector.load %arg10[%c0_114, %c0_115, %c0_116] : memref<15x20x16xf32, #tpu.memory_space<vmem>>, vector<1x16x16xf32>
    %94 = vector.shape_cast %93 : vector<1x16x16xf32> to vector<16x16xf32>
    %c0_117 = arith.constant 0 : index
    %95 = memref.load %arg7[%c0_117] : memref<225xf32, #tpu.memory_space<smem>>
    %96 = vector.broadcast %95 : f32 to vector<16x16xf32>
    %97 = arith.mulf %96, %94 : vector<16x16xf32>
    %98 = arith.addf %88, %97 : vector<16x16xf32>
    %c75 = arith.constant 75 : index
    %99 = memref.load %arg7[%c75] : memref<225xf32, #tpu.memory_space<smem>>
    %100 = vector.broadcast %99 : f32 to vector<16x16xf32>
    %101 = arith.mulf %100, %94 : vector<16x16xf32>
    %102 = arith.addf %90, %101 : vector<16x16xf32>
    %c150 = arith.constant 150 : index
    %103 = memref.load %arg7[%c150] : memref<225xf32, #tpu.memory_space<smem>>
    %104 = vector.broadcast %103 : f32 to vector<16x16xf32>
    %105 = arith.mulf %104, %94 : vector<16x16xf32>
    %106 = arith.addf %92, %105 : vector<16x16xf32>
    %c0_118 = arith.constant 0 : index
    %c1_119 = arith.constant 1 : index
    %c0_120 = arith.constant 0 : index
    %107 = vector.load %arg10[%c0_118, %c1_119, %c0_120] : memref<15x20x16xf32, #tpu.memory_space<vmem>>, vector<1x16x16xf32>
    %108 = vector.shape_cast %107 : vector<1x16x16xf32> to vector<16x16xf32>
    %c5_121 = arith.constant 5 : index
    %109 = memref.load %arg7[%c5_121] : memref<225xf32, #tpu.memory_space<smem>>
    %110 = vector.broadcast %109 : f32 to vector<16x16xf32>
    %111 = arith.mulf %110, %108 : vector<16x16xf32>
    %112 = arith.addf %98, %111 : vector<16x16xf32>
    %c80 = arith.constant 80 : index
    %113 = memref.load %arg7[%c80] : memref<225xf32, #tpu.memory_space<smem>>
    %114 = vector.broadcast %113 : f32 to vector<16x16xf32>
    %115 = arith.mulf %114, %108 : vector<16x16xf32>
    %116 = arith.addf %102, %115 : vector<16x16xf32>
    %c155 = arith.constant 155 : index
    %117 = memref.load %arg7[%c155] : memref<225xf32, #tpu.memory_space<smem>>
    %118 = vector.broadcast %117 : f32 to vector<16x16xf32>
    %119 = arith.mulf %118, %108 : vector<16x16xf32>
    %120 = arith.addf %106, %119 : vector<16x16xf32>
    %c0_122 = arith.constant 0 : index
    %c2_123 = arith.constant 2 : index
    %c0_124 = arith.constant 0 : index
    %121 = vector.load %arg10[%c0_122, %c2_123, %c0_124] : memref<15x20x16xf32, #tpu.memory_space<vmem>>, vector<1x16x16xf32>
    %122 = vector.shape_cast %121 : vector<1x16x16xf32> to vector<16x16xf32>
    %c10_125 = arith.constant 10 : index
    %123 = memref.load %arg7[%c10_125] : memref<225xf32, #tpu.memory_space<smem>>
    %124 = vector.broadcast %123 : f32 to vector<16x16xf32>
    %125 = arith.mulf %124, %122 : vector<16x16xf32>
    %126 = arith.addf %112, %125 : vector<16x16xf32>
    %c85 = arith.constant 85 : index
    %127 = memref.load %arg7[%c85] : memref<225xf32, #tpu.memory_space<smem>>
    %128 = vector.broadcast %127 : f32 to vector<16x16xf32>
    %129 = arith.mulf %128, %122 : vector<16x16xf32>
    %130 = arith.addf %116, %129 : vector<16x16xf32>
    %c160 = arith.constant 160 : index
    %131 = memref.load %arg7[%c160] : memref<225xf32, #tpu.memory_space<smem>>
    %132 = vector.broadcast %131 : f32 to vector<16x16xf32>
    %133 = arith.mulf %132, %122 : vector<16x16xf32>
    %134 = arith.addf %120, %133 : vector<16x16xf32>
    %c0_126 = arith.constant 0 : index
    %c3_127 = arith.constant 3 : index
    %c0_128 = arith.constant 0 : index
    %135 = vector.load %arg10[%c0_126, %c3_127, %c0_128] : memref<15x20x16xf32, #tpu.memory_space<vmem>>, vector<1x16x16xf32>
    %136 = vector.shape_cast %135 : vector<1x16x16xf32> to vector<16x16xf32>
    %c15 = arith.constant 15 : index
    %137 = memref.load %arg7[%c15] : memref<225xf32, #tpu.memory_space<smem>>
    %138 = vector.broadcast %137 : f32 to vector<16x16xf32>
    %139 = arith.mulf %138, %136 : vector<16x16xf32>
    %140 = arith.addf %126, %139 : vector<16x16xf32>
    %c90 = arith.constant 90 : index
    %141 = memref.load %arg7[%c90] : memref<225xf32, #tpu.memory_space<smem>>
    %142 = vector.broadcast %141 : f32 to vector<16x16xf32>
    %143 = arith.mulf %142, %136 : vector<16x16xf32>
    %144 = arith.addf %130, %143 : vector<16x16xf32>
    %c165 = arith.constant 165 : index
    %145 = memref.load %arg7[%c165] : memref<225xf32, #tpu.memory_space<smem>>
    %146 = vector.broadcast %145 : f32 to vector<16x16xf32>
    %147 = arith.mulf %146, %136 : vector<16x16xf32>
    %148 = arith.addf %134, %147 : vector<16x16xf32>
    %c0_129 = arith.constant 0 : index
    %c4_130 = arith.constant 4 : index
    %c0_131 = arith.constant 0 : index
    %149 = vector.load %arg10[%c0_129, %c4_130, %c0_131] : memref<15x20x16xf32, #tpu.memory_space<vmem>>, vector<1x16x16xf32>
    %150 = vector.shape_cast %149 : vector<1x16x16xf32> to vector<16x16xf32>
    %c20 = arith.constant 20 : index
    %151 = memref.load %arg7[%c20] : memref<225xf32, #tpu.memory_space<smem>>
    %152 = vector.broadcast %151 : f32 to vector<16x16xf32>
    %153 = arith.mulf %152, %150 : vector<16x16xf32>
    %154 = arith.addf %140, %153 : vector<16x16xf32>
    %c95 = arith.constant 95 : index
    %155 = memref.load %arg7[%c95] : memref<225xf32, #tpu.memory_space<smem>>
    %156 = vector.broadcast %155 : f32 to vector<16x16xf32>
    %157 = arith.mulf %156, %150 : vector<16x16xf32>
    %158 = arith.addf %144, %157 : vector<16x16xf32>
    %c170 = arith.constant 170 : index
    %159 = memref.load %arg7[%c170] : memref<225xf32, #tpu.memory_space<smem>>
    %160 = vector.broadcast %159 : f32 to vector<16x16xf32>
    %161 = arith.mulf %160, %150 : vector<16x16xf32>
    %162 = arith.addf %148, %161 : vector<16x16xf32>
    %c1_132 = arith.constant 1 : index
    %c0_133 = arith.constant 0 : index
    %c0_134 = arith.constant 0 : index
    %163 = vector.load %arg10[%c1_132, %c0_133, %c0_134] : memref<15x20x16xf32, #tpu.memory_space<vmem>>, vector<1x16x16xf32>
    %164 = vector.shape_cast %163 : vector<1x16x16xf32> to vector<16x16xf32>
    %c1_135 = arith.constant 1 : index
    %165 = memref.load %arg7[%c1_135] : memref<225xf32, #tpu.memory_space<smem>>
    %166 = vector.broadcast %165 : f32 to vector<16x16xf32>
    %167 = arith.mulf %166, %164 : vector<16x16xf32>
    %168 = arith.addf %154, %167 : vector<16x16xf32>
    %c76 = arith.constant 76 : index
    %169 = memref.load %arg7[%c76] : memref<225xf32, #tpu.memory_space<smem>>
    %170 = vector.broadcast %169 : f32 to vector<16x16xf32>
    %171 = arith.mulf %170, %164 : vector<16x16xf32>
    %172 = arith.addf %158, %171 : vector<16x16xf32>
    %c151 = arith.constant 151 : index
    %173 = memref.load %arg7[%c151] : memref<225xf32, #tpu.memory_space<smem>>
    %174 = vector.broadcast %173 : f32 to vector<16x16xf32>
    %175 = arith.mulf %174, %164 : vector<16x16xf32>
    %176 = arith.addf %162, %175 : vector<16x16xf32>
    %c1_136 = arith.constant 1 : index
    %c1_137 = arith.constant 1 : index
    %c0_138 = arith.constant 0 : index
    %177 = vector.load %arg10[%c1_136, %c1_137, %c0_138] : memref<15x20x16xf32, #tpu.memory_space<vmem>>, vector<1x16x16xf32>
    %178 = vector.shape_cast %177 : vector<1x16x16xf32> to vector<16x16xf32>
    %c6_139 = arith.constant 6 : index
    %179 = memref.load %arg7[%c6_139] : memref<225xf32, #tpu.memory_space<smem>>
    %180 = vector.broadcast %179 : f32 to vector<16x16xf32>
    %181 = arith.mulf %180, %178 : vector<16x16xf32>
    %182 = arith.addf %168, %181 : vector<16x16xf32>
    %c81 = arith.constant 81 : index
    %183 = memref.load %arg7[%c81] : memref<225xf32, #tpu.memory_space<smem>>
    %184 = vector.broadcast %183 : f32 to vector<16x16xf32>
    %185 = arith.mulf %184, %178 : vector<16x16xf32>
    %186 = arith.addf %172, %185 : vector<16x16xf32>
    %c156 = arith.constant 156 : index
    %187 = memref.load %arg7[%c156] : memref<225xf32, #tpu.memory_space<smem>>
    %188 = vector.broadcast %187 : f32 to vector<16x16xf32>
    %189 = arith.mulf %188, %178 : vector<16x16xf32>
    %190 = arith.addf %176, %189 : vector<16x16xf32>
    %c0_140 = arith.constant 0 : index
    %191 = memref.load %arg5[%c0_140] : memref<81xf32, #tpu.memory_space<smem>>
    %192 = vector.broadcast %191 : f32 to vector<16x16xf32>
    %193 = arith.mulf %192, %178 : vector<16x16xf32>
    %194 = arith.addf %82, %193 : vector<16x16xf32>
    %c27 = arith.constant 27 : index
    %195 = memref.load %arg5[%c27] : memref<81xf32, #tpu.memory_space<smem>>
    %196 = vector.broadcast %195 : f32 to vector<16x16xf32>
    %197 = arith.mulf %196, %178 : vector<16x16xf32>
    %198 = arith.addf %84, %197 : vector<16x16xf32>
    %c54 = arith.constant 54 : index
    %199 = memref.load %arg5[%c54] : memref<81xf32, #tpu.memory_space<smem>>
    %200 = vector.broadcast %199 : f32 to vector<16x16xf32>
    %201 = arith.mulf %200, %178 : vector<16x16xf32>
    %202 = arith.addf %86, %201 : vector<16x16xf32>
    %c1_141 = arith.constant 1 : index
    %c2_142 = arith.constant 2 : index
    %c0_143 = arith.constant 0 : index
    %203 = vector.load %arg10[%c1_141, %c2_142, %c0_143] : memref<15x20x16xf32, #tpu.memory_space<vmem>>, vector<1x16x16xf32>
    %204 = vector.shape_cast %203 : vector<1x16x16xf32> to vector<16x16xf32>
    %c11_144 = arith.constant 11 : index
    %205 = memref.load %arg7[%c11_144] : memref<225xf32, #tpu.memory_space<smem>>
    %206 = vector.broadcast %205 : f32 to vector<16x16xf32>
    %207 = arith.mulf %206, %204 : vector<16x16xf32>
    %208 = arith.addf %182, %207 : vector<16x16xf32>
    %c86 = arith.constant 86 : index
    %209 = memref.load %arg7[%c86] : memref<225xf32, #tpu.memory_space<smem>>
    %210 = vector.broadcast %209 : f32 to vector<16x16xf32>
    %211 = arith.mulf %210, %204 : vector<16x16xf32>
    %212 = arith.addf %186, %211 : vector<16x16xf32>
    %c161 = arith.constant 161 : index
    %213 = memref.load %arg7[%c161] : memref<225xf32, #tpu.memory_space<smem>>
    %214 = vector.broadcast %213 : f32 to vector<16x16xf32>
    %215 = arith.mulf %214, %204 : vector<16x16xf32>
    %216 = arith.addf %190, %215 : vector<16x16xf32>
    %c3_145 = arith.constant 3 : index
    %217 = memref.load %arg5[%c3_145] : memref<81xf32, #tpu.memory_space<smem>>
    %218 = vector.broadcast %217 : f32 to vector<16x16xf32>
    %219 = arith.mulf %218, %204 : vector<16x16xf32>
    %220 = arith.addf %194, %219 : vector<16x16xf32>
    %c30 = arith.constant 30 : index
    %221 = memref.load %arg5[%c30] : memref<81xf32, #tpu.memory_space<smem>>
    %222 = vector.broadcast %221 : f32 to vector<16x16xf32>
    %223 = arith.mulf %222, %204 : vector<16x16xf32>
    %224 = arith.addf %198, %223 : vector<16x16xf32>
    %c57 = arith.constant 57 : index
    %225 = memref.load %arg5[%c57] : memref<81xf32, #tpu.memory_space<smem>>
    %226 = vector.broadcast %225 : f32 to vector<16x16xf32>
    %227 = arith.mulf %226, %204 : vector<16x16xf32>
    %228 = arith.addf %202, %227 : vector<16x16xf32>
    %c1_146 = arith.constant 1 : index
    %c3_147 = arith.constant 3 : index
    %c0_148 = arith.constant 0 : index
    %229 = vector.load %arg10[%c1_146, %c3_147, %c0_148] : memref<15x20x16xf32, #tpu.memory_space<vmem>>, vector<1x16x16xf32>
    %230 = vector.shape_cast %229 : vector<1x16x16xf32> to vector<16x16xf32>
    %c16 = arith.constant 16 : index
    %231 = memref.load %arg7[%c16] : memref<225xf32, #tpu.memory_space<smem>>
    %232 = vector.broadcast %231 : f32 to vector<16x16xf32>
    %233 = arith.mulf %232, %230 : vector<16x16xf32>
    %234 = arith.addf %208, %233 : vector<16x16xf32>
    %c91 = arith.constant 91 : index
    %235 = memref.load %arg7[%c91] : memref<225xf32, #tpu.memory_space<smem>>
    %236 = vector.broadcast %235 : f32 to vector<16x16xf32>
    %237 = arith.mulf %236, %230 : vector<16x16xf32>
    %238 = arith.addf %212, %237 : vector<16x16xf32>
    %c166 = arith.constant 166 : index
    %239 = memref.load %arg7[%c166] : memref<225xf32, #tpu.memory_space<smem>>
    %240 = vector.broadcast %239 : f32 to vector<16x16xf32>
    %241 = arith.mulf %240, %230 : vector<16x16xf32>
    %242 = arith.addf %216, %241 : vector<16x16xf32>
    %c6_149 = arith.constant 6 : index
    %243 = memref.load %arg5[%c6_149] : memref<81xf32, #tpu.memory_space<smem>>
    %244 = vector.broadcast %243 : f32 to vector<16x16xf32>
    %245 = arith.mulf %244, %230 : vector<16x16xf32>
    %246 = arith.addf %220, %245 : vector<16x16xf32>
    %c33 = arith.constant 33 : index
    %247 = memref.load %arg5[%c33] : memref<81xf32, #tpu.memory_space<smem>>
    %248 = vector.broadcast %247 : f32 to vector<16x16xf32>
    %249 = arith.mulf %248, %230 : vector<16x16xf32>
    %250 = arith.addf %224, %249 : vector<16x16xf32>
    %c60 = arith.constant 60 : index
    %251 = memref.load %arg5[%c60] : memref<81xf32, #tpu.memory_space<smem>>
    %252 = vector.broadcast %251 : f32 to vector<16x16xf32>
    %253 = arith.mulf %252, %230 : vector<16x16xf32>
    %254 = arith.addf %228, %253 : vector<16x16xf32>
    %c1_150 = arith.constant 1 : index
    %c4_151 = arith.constant 4 : index
    %c0_152 = arith.constant 0 : index
    %255 = vector.load %arg10[%c1_150, %c4_151, %c0_152] : memref<15x20x16xf32, #tpu.memory_space<vmem>>, vector<1x16x16xf32>
    %256 = vector.shape_cast %255 : vector<1x16x16xf32> to vector<16x16xf32>
    %c21 = arith.constant 21 : index
    %257 = memref.load %arg7[%c21] : memref<225xf32, #tpu.memory_space<smem>>
    %258 = vector.broadcast %257 : f32 to vector<16x16xf32>
    %259 = arith.mulf %258, %256 : vector<16x16xf32>
    %260 = arith.addf %234, %259 : vector<16x16xf32>
    %c96 = arith.constant 96 : index
    %261 = memref.load %arg7[%c96] : memref<225xf32, #tpu.memory_space<smem>>
    %262 = vector.broadcast %261 : f32 to vector<16x16xf32>
    %263 = arith.mulf %262, %256 : vector<16x16xf32>
    %264 = arith.addf %238, %263 : vector<16x16xf32>
    %c171 = arith.constant 171 : index
    %265 = memref.load %arg7[%c171] : memref<225xf32, #tpu.memory_space<smem>>
    %266 = vector.broadcast %265 : f32 to vector<16x16xf32>
    %267 = arith.mulf %266, %256 : vector<16x16xf32>
    %268 = arith.addf %242, %267 : vector<16x16xf32>
    %c2_153 = arith.constant 2 : index
    %c0_154 = arith.constant 0 : index
    %c0_155 = arith.constant 0 : index
    %269 = vector.load %arg10[%c2_153, %c0_154, %c0_155] : memref<15x20x16xf32, #tpu.memory_space<vmem>>, vector<1x16x16xf32>
    %270 = vector.shape_cast %269 : vector<1x16x16xf32> to vector<16x16xf32>
    %c2_156 = arith.constant 2 : index
    %271 = memref.load %arg7[%c2_156] : memref<225xf32, #tpu.memory_space<smem>>
    %272 = vector.broadcast %271 : f32 to vector<16x16xf32>
    %273 = arith.mulf %272, %270 : vector<16x16xf32>
    %274 = arith.addf %260, %273 : vector<16x16xf32>
    %c77 = arith.constant 77 : index
    %275 = memref.load %arg7[%c77] : memref<225xf32, #tpu.memory_space<smem>>
    %276 = vector.broadcast %275 : f32 to vector<16x16xf32>
    %277 = arith.mulf %276, %270 : vector<16x16xf32>
    %278 = arith.addf %264, %277 : vector<16x16xf32>
    %c152 = arith.constant 152 : index
    %279 = memref.load %arg7[%c152] : memref<225xf32, #tpu.memory_space<smem>>
    %280 = vector.broadcast %279 : f32 to vector<16x16xf32>
    %281 = arith.mulf %280, %270 : vector<16x16xf32>
    %282 = arith.addf %268, %281 : vector<16x16xf32>
    %c2_157 = arith.constant 2 : index
    %c1_158 = arith.constant 1 : index
    %c0_159 = arith.constant 0 : index
    %283 = vector.load %arg10[%c2_157, %c1_158, %c0_159] : memref<15x20x16xf32, #tpu.memory_space<vmem>>, vector<1x16x16xf32>
    %284 = vector.shape_cast %283 : vector<1x16x16xf32> to vector<16x16xf32>
    %c7_160 = arith.constant 7 : index
    %285 = memref.load %arg7[%c7_160] : memref<225xf32, #tpu.memory_space<smem>>
    %286 = vector.broadcast %285 : f32 to vector<16x16xf32>
    %287 = arith.mulf %286, %284 : vector<16x16xf32>
    %288 = arith.addf %274, %287 : vector<16x16xf32>
    %c82 = arith.constant 82 : index
    %289 = memref.load %arg7[%c82] : memref<225xf32, #tpu.memory_space<smem>>
    %290 = vector.broadcast %289 : f32 to vector<16x16xf32>
    %291 = arith.mulf %290, %284 : vector<16x16xf32>
    %292 = arith.addf %278, %291 : vector<16x16xf32>
    %c157 = arith.constant 157 : index
    %293 = memref.load %arg7[%c157] : memref<225xf32, #tpu.memory_space<smem>>
    %294 = vector.broadcast %293 : f32 to vector<16x16xf32>
    %295 = arith.mulf %294, %284 : vector<16x16xf32>
    %296 = arith.addf %282, %295 : vector<16x16xf32>
    %c1_161 = arith.constant 1 : index
    %297 = memref.load %arg5[%c1_161] : memref<81xf32, #tpu.memory_space<smem>>
    %298 = vector.broadcast %297 : f32 to vector<16x16xf32>
    %299 = arith.mulf %298, %284 : vector<16x16xf32>
    %300 = arith.addf %246, %299 : vector<16x16xf32>
    %c28 = arith.constant 28 : index
    %301 = memref.load %arg5[%c28] : memref<81xf32, #tpu.memory_space<smem>>
    %302 = vector.broadcast %301 : f32 to vector<16x16xf32>
    %303 = arith.mulf %302, %284 : vector<16x16xf32>
    %304 = arith.addf %250, %303 : vector<16x16xf32>
    %c55 = arith.constant 55 : index
    %305 = memref.load %arg5[%c55] : memref<81xf32, #tpu.memory_space<smem>>
    %306 = vector.broadcast %305 : f32 to vector<16x16xf32>
    %307 = arith.mulf %306, %284 : vector<16x16xf32>
    %308 = arith.addf %254, %307 : vector<16x16xf32>
    %c2_162 = arith.constant 2 : index
    %c2_163 = arith.constant 2 : index
    %c0_164 = arith.constant 0 : index
    %309 = vector.load %arg10[%c2_162, %c2_163, %c0_164] : memref<15x20x16xf32, #tpu.memory_space<vmem>>, vector<1x16x16xf32>
    %310 = vector.shape_cast %309 : vector<1x16x16xf32> to vector<16x16xf32>
    %c12_165 = arith.constant 12 : index
    %311 = memref.load %arg7[%c12_165] : memref<225xf32, #tpu.memory_space<smem>>
    %312 = vector.broadcast %311 : f32 to vector<16x16xf32>
    %313 = arith.mulf %312, %310 : vector<16x16xf32>
    %314 = arith.addf %288, %313 : vector<16x16xf32>
    %c87 = arith.constant 87 : index
    %315 = memref.load %arg7[%c87] : memref<225xf32, #tpu.memory_space<smem>>
    %316 = vector.broadcast %315 : f32 to vector<16x16xf32>
    %317 = arith.mulf %316, %310 : vector<16x16xf32>
    %318 = arith.addf %292, %317 : vector<16x16xf32>
    %c162 = arith.constant 162 : index
    %319 = memref.load %arg7[%c162] : memref<225xf32, #tpu.memory_space<smem>>
    %320 = vector.broadcast %319 : f32 to vector<16x16xf32>
    %321 = arith.mulf %320, %310 : vector<16x16xf32>
    %322 = arith.addf %296, %321 : vector<16x16xf32>
    %c4_166 = arith.constant 4 : index
    %323 = memref.load %arg5[%c4_166] : memref<81xf32, #tpu.memory_space<smem>>
    %324 = vector.broadcast %323 : f32 to vector<16x16xf32>
    %325 = arith.mulf %324, %310 : vector<16x16xf32>
    %326 = arith.addf %300, %325 : vector<16x16xf32>
    %c31 = arith.constant 31 : index
    %327 = memref.load %arg5[%c31] : memref<81xf32, #tpu.memory_space<smem>>
    %328 = vector.broadcast %327 : f32 to vector<16x16xf32>
    %329 = arith.mulf %328, %310 : vector<16x16xf32>
    %330 = arith.addf %304, %329 : vector<16x16xf32>
    %c58 = arith.constant 58 : index
    %331 = memref.load %arg5[%c58] : memref<81xf32, #tpu.memory_space<smem>>
    %332 = vector.broadcast %331 : f32 to vector<16x16xf32>
    %333 = arith.mulf %332, %310 : vector<16x16xf32>
    %334 = arith.addf %308, %333 : vector<16x16xf32>
    %c0_167 = arith.constant 0 : index
    %335 = memref.load %arg3[%c0_167] : memref<9xf32, #tpu.memory_space<smem>>
    %336 = vector.broadcast %335 : f32 to vector<16x16xf32>
    %337 = arith.mulf %336, %310 : vector<16x16xf32>
    %338 = arith.addf %76, %337 : vector<16x16xf32>
    %c3_168 = arith.constant 3 : index
    %339 = memref.load %arg3[%c3_168] : memref<9xf32, #tpu.memory_space<smem>>
    %340 = vector.broadcast %339 : f32 to vector<16x16xf32>
    %341 = arith.mulf %340, %310 : vector<16x16xf32>
    %342 = arith.addf %78, %341 : vector<16x16xf32>
    %c6_169 = arith.constant 6 : index
    %343 = memref.load %arg3[%c6_169] : memref<9xf32, #tpu.memory_space<smem>>
    %344 = vector.broadcast %343 : f32 to vector<16x16xf32>
    %345 = arith.mulf %344, %310 : vector<16x16xf32>
    %346 = arith.addf %80, %345 : vector<16x16xf32>
    %c2_170 = arith.constant 2 : index
    %c3_171 = arith.constant 3 : index
    %c0_172 = arith.constant 0 : index
    %347 = vector.load %arg10[%c2_170, %c3_171, %c0_172] : memref<15x20x16xf32, #tpu.memory_space<vmem>>, vector<1x16x16xf32>
    %348 = vector.shape_cast %347 : vector<1x16x16xf32> to vector<16x16xf32>
    %c17 = arith.constant 17 : index
    %349 = memref.load %arg7[%c17] : memref<225xf32, #tpu.memory_space<smem>>
    %350 = vector.broadcast %349 : f32 to vector<16x16xf32>
    %351 = arith.mulf %350, %348 : vector<16x16xf32>
    %352 = arith.addf %314, %351 : vector<16x16xf32>
    %c92 = arith.constant 92 : index
    %353 = memref.load %arg7[%c92] : memref<225xf32, #tpu.memory_space<smem>>
    %354 = vector.broadcast %353 : f32 to vector<16x16xf32>
    %355 = arith.mulf %354, %348 : vector<16x16xf32>
    %356 = arith.addf %318, %355 : vector<16x16xf32>
    %c167 = arith.constant 167 : index
    %357 = memref.load %arg7[%c167] : memref<225xf32, #tpu.memory_space<smem>>
    %358 = vector.broadcast %357 : f32 to vector<16x16xf32>
    %359 = arith.mulf %358, %348 : vector<16x16xf32>
    %360 = arith.addf %322, %359 : vector<16x16xf32>
    %c7_173 = arith.constant 7 : index
    %361 = memref.load %arg5[%c7_173] : memref<81xf32, #tpu.memory_space<smem>>
    %362 = vector.broadcast %361 : f32 to vector<16x16xf32>
    %363 = arith.mulf %362, %348 : vector<16x16xf32>
    %364 = arith.addf %326, %363 : vector<16x16xf32>
    %c34 = arith.constant 34 : index
    %365 = memref.load %arg5[%c34] : memref<81xf32, #tpu.memory_space<smem>>
    %366 = vector.broadcast %365 : f32 to vector<16x16xf32>
    %367 = arith.mulf %366, %348 : vector<16x16xf32>
    %368 = arith.addf %330, %367 : vector<16x16xf32>
    %c61 = arith.constant 61 : index
    %369 = memref.load %arg5[%c61] : memref<81xf32, #tpu.memory_space<smem>>
    %370 = vector.broadcast %369 : f32 to vector<16x16xf32>
    %371 = arith.mulf %370, %348 : vector<16x16xf32>
    %372 = arith.addf %334, %371 : vector<16x16xf32>
    %c2_174 = arith.constant 2 : index
    %c4_175 = arith.constant 4 : index
    %c0_176 = arith.constant 0 : index
    %373 = vector.load %arg10[%c2_174, %c4_175, %c0_176] : memref<15x20x16xf32, #tpu.memory_space<vmem>>, vector<1x16x16xf32>
    %374 = vector.shape_cast %373 : vector<1x16x16xf32> to vector<16x16xf32>
    %c22 = arith.constant 22 : index
    %375 = memref.load %arg7[%c22] : memref<225xf32, #tpu.memory_space<smem>>
    %376 = vector.broadcast %375 : f32 to vector<16x16xf32>
    %377 = arith.mulf %376, %374 : vector<16x16xf32>
    %378 = arith.addf %352, %377 : vector<16x16xf32>
    %c97 = arith.constant 97 : index
    %379 = memref.load %arg7[%c97] : memref<225xf32, #tpu.memory_space<smem>>
    %380 = vector.broadcast %379 : f32 to vector<16x16xf32>
    %381 = arith.mulf %380, %374 : vector<16x16xf32>
    %382 = arith.addf %356, %381 : vector<16x16xf32>
    %c172 = arith.constant 172 : index
    %383 = memref.load %arg7[%c172] : memref<225xf32, #tpu.memory_space<smem>>
    %384 = vector.broadcast %383 : f32 to vector<16x16xf32>
    %385 = arith.mulf %384, %374 : vector<16x16xf32>
    %386 = arith.addf %360, %385 : vector<16x16xf32>
    %c3_177 = arith.constant 3 : index
    %c0_178 = arith.constant 0 : index
    %c0_179 = arith.constant 0 : index
    %387 = vector.load %arg10[%c3_177, %c0_178, %c0_179] : memref<15x20x16xf32, #tpu.memory_space<vmem>>, vector<1x16x16xf32>
    %388 = vector.shape_cast %387 : vector<1x16x16xf32> to vector<16x16xf32>
    %c3_180 = arith.constant 3 : index
    %389 = memref.load %arg7[%c3_180] : memref<225xf32, #tpu.memory_space<smem>>
    %390 = vector.broadcast %389 : f32 to vector<16x16xf32>
    %391 = arith.mulf %390, %388 : vector<16x16xf32>
    %392 = arith.addf %378, %391 : vector<16x16xf32>
    %c78 = arith.constant 78 : index
    %393 = memref.load %arg7[%c78] : memref<225xf32, #tpu.memory_space<smem>>
    %394 = vector.broadcast %393 : f32 to vector<16x16xf32>
    %395 = arith.mulf %394, %388 : vector<16x16xf32>
    %396 = arith.addf %382, %395 : vector<16x16xf32>
    %c153 = arith.constant 153 : index
    %397 = memref.load %arg7[%c153] : memref<225xf32, #tpu.memory_space<smem>>
    %398 = vector.broadcast %397 : f32 to vector<16x16xf32>
    %399 = arith.mulf %398, %388 : vector<16x16xf32>
    %400 = arith.addf %386, %399 : vector<16x16xf32>
    %c3_181 = arith.constant 3 : index
    %c1_182 = arith.constant 1 : index
    %c0_183 = arith.constant 0 : index
    %401 = vector.load %arg10[%c3_181, %c1_182, %c0_183] : memref<15x20x16xf32, #tpu.memory_space<vmem>>, vector<1x16x16xf32>
    %402 = vector.shape_cast %401 : vector<1x16x16xf32> to vector<16x16xf32>
    %c8_184 = arith.constant 8 : index
    %403 = memref.load %arg7[%c8_184] : memref<225xf32, #tpu.memory_space<smem>>
    %404 = vector.broadcast %403 : f32 to vector<16x16xf32>
    %405 = arith.mulf %404, %402 : vector<16x16xf32>
    %406 = arith.addf %392, %405 : vector<16x16xf32>
    %c83 = arith.constant 83 : index
    %407 = memref.load %arg7[%c83] : memref<225xf32, #tpu.memory_space<smem>>
    %408 = vector.broadcast %407 : f32 to vector<16x16xf32>
    %409 = arith.mulf %408, %402 : vector<16x16xf32>
    %410 = arith.addf %396, %409 : vector<16x16xf32>
    %c158 = arith.constant 158 : index
    %411 = memref.load %arg7[%c158] : memref<225xf32, #tpu.memory_space<smem>>
    %412 = vector.broadcast %411 : f32 to vector<16x16xf32>
    %413 = arith.mulf %412, %402 : vector<16x16xf32>
    %414 = arith.addf %400, %413 : vector<16x16xf32>
    %c2_185 = arith.constant 2 : index
    %415 = memref.load %arg5[%c2_185] : memref<81xf32, #tpu.memory_space<smem>>
    %416 = vector.broadcast %415 : f32 to vector<16x16xf32>
    %417 = arith.mulf %416, %402 : vector<16x16xf32>
    %418 = arith.addf %364, %417 : vector<16x16xf32>
    %c29 = arith.constant 29 : index
    %419 = memref.load %arg5[%c29] : memref<81xf32, #tpu.memory_space<smem>>
    %420 = vector.broadcast %419 : f32 to vector<16x16xf32>
    %421 = arith.mulf %420, %402 : vector<16x16xf32>
    %422 = arith.addf %368, %421 : vector<16x16xf32>
    %c56 = arith.constant 56 : index
    %423 = memref.load %arg5[%c56] : memref<81xf32, #tpu.memory_space<smem>>
    %424 = vector.broadcast %423 : f32 to vector<16x16xf32>
    %425 = arith.mulf %424, %402 : vector<16x16xf32>
    %426 = arith.addf %372, %425 : vector<16x16xf32>
    %c3_186 = arith.constant 3 : index
    %c2_187 = arith.constant 2 : index
    %c0_188 = arith.constant 0 : index
    %427 = vector.load %arg10[%c3_186, %c2_187, %c0_188] : memref<15x20x16xf32, #tpu.memory_space<vmem>>, vector<1x16x16xf32>
    %428 = vector.shape_cast %427 : vector<1x16x16xf32> to vector<16x16xf32>
    %c13_189 = arith.constant 13 : index
    %429 = memref.load %arg7[%c13_189] : memref<225xf32, #tpu.memory_space<smem>>
    %430 = vector.broadcast %429 : f32 to vector<16x16xf32>
    %431 = arith.mulf %430, %428 : vector<16x16xf32>
    %432 = arith.addf %406, %431 : vector<16x16xf32>
    %c88 = arith.constant 88 : index
    %433 = memref.load %arg7[%c88] : memref<225xf32, #tpu.memory_space<smem>>
    %434 = vector.broadcast %433 : f32 to vector<16x16xf32>
    %435 = arith.mulf %434, %428 : vector<16x16xf32>
    %436 = arith.addf %410, %435 : vector<16x16xf32>
    %c163 = arith.constant 163 : index
    %437 = memref.load %arg7[%c163] : memref<225xf32, #tpu.memory_space<smem>>
    %438 = vector.broadcast %437 : f32 to vector<16x16xf32>
    %439 = arith.mulf %438, %428 : vector<16x16xf32>
    %440 = arith.addf %414, %439 : vector<16x16xf32>
    %c5_190 = arith.constant 5 : index
    %441 = memref.load %arg5[%c5_190] : memref<81xf32, #tpu.memory_space<smem>>
    %442 = vector.broadcast %441 : f32 to vector<16x16xf32>
    %443 = arith.mulf %442, %428 : vector<16x16xf32>
    %444 = arith.addf %418, %443 : vector<16x16xf32>
    %c32 = arith.constant 32 : index
    %445 = memref.load %arg5[%c32] : memref<81xf32, #tpu.memory_space<smem>>
    %446 = vector.broadcast %445 : f32 to vector<16x16xf32>
    %447 = arith.mulf %446, %428 : vector<16x16xf32>
    %448 = arith.addf %422, %447 : vector<16x16xf32>
    %c59 = arith.constant 59 : index
    %449 = memref.load %arg5[%c59] : memref<81xf32, #tpu.memory_space<smem>>
    %450 = vector.broadcast %449 : f32 to vector<16x16xf32>
    %451 = arith.mulf %450, %428 : vector<16x16xf32>
    %452 = arith.addf %426, %451 : vector<16x16xf32>
    %c3_191 = arith.constant 3 : index
    %c3_192 = arith.constant 3 : index
    %c0_193 = arith.constant 0 : index
    %453 = vector.load %arg10[%c3_191, %c3_192, %c0_193] : memref<15x20x16xf32, #tpu.memory_space<vmem>>, vector<1x16x16xf32>
    %454 = vector.shape_cast %453 : vector<1x16x16xf32> to vector<16x16xf32>
    %c18 = arith.constant 18 : index
    %455 = memref.load %arg7[%c18] : memref<225xf32, #tpu.memory_space<smem>>
    %456 = vector.broadcast %455 : f32 to vector<16x16xf32>
    %457 = arith.mulf %456, %454 : vector<16x16xf32>
    %458 = arith.addf %432, %457 : vector<16x16xf32>
    %c93 = arith.constant 93 : index
    %459 = memref.load %arg7[%c93] : memref<225xf32, #tpu.memory_space<smem>>
    %460 = vector.broadcast %459 : f32 to vector<16x16xf32>
    %461 = arith.mulf %460, %454 : vector<16x16xf32>
    %462 = arith.addf %436, %461 : vector<16x16xf32>
    %c168 = arith.constant 168 : index
    %463 = memref.load %arg7[%c168] : memref<225xf32, #tpu.memory_space<smem>>
    %464 = vector.broadcast %463 : f32 to vector<16x16xf32>
    %465 = arith.mulf %464, %454 : vector<16x16xf32>
    %466 = arith.addf %440, %465 : vector<16x16xf32>
    %c8_194 = arith.constant 8 : index
    %467 = memref.load %arg5[%c8_194] : memref<81xf32, #tpu.memory_space<smem>>
    %468 = vector.broadcast %467 : f32 to vector<16x16xf32>
    %469 = arith.mulf %468, %454 : vector<16x16xf32>
    %470 = arith.addf %444, %469 : vector<16x16xf32>
    %c35 = arith.constant 35 : index
    %471 = memref.load %arg5[%c35] : memref<81xf32, #tpu.memory_space<smem>>
    %472 = vector.broadcast %471 : f32 to vector<16x16xf32>
    %473 = arith.mulf %472, %454 : vector<16x16xf32>
    %474 = arith.addf %448, %473 : vector<16x16xf32>
    %c62 = arith.constant 62 : index
    %475 = memref.load %arg5[%c62] : memref<81xf32, #tpu.memory_space<smem>>
    %476 = vector.broadcast %475 : f32 to vector<16x16xf32>
    %477 = arith.mulf %476, %454 : vector<16x16xf32>
    %478 = arith.addf %452, %477 : vector<16x16xf32>
    %c3_195 = arith.constant 3 : index
    %c4_196 = arith.constant 4 : index
    %c0_197 = arith.constant 0 : index
    %479 = vector.load %arg10[%c3_195, %c4_196, %c0_197] : memref<15x20x16xf32, #tpu.memory_space<vmem>>, vector<1x16x16xf32>
    %480 = vector.shape_cast %479 : vector<1x16x16xf32> to vector<16x16xf32>
    %c23 = arith.constant 23 : index
    %481 = memref.load %arg7[%c23] : memref<225xf32, #tpu.memory_space<smem>>
    %482 = vector.broadcast %481 : f32 to vector<16x16xf32>
    %483 = arith.mulf %482, %480 : vector<16x16xf32>
    %484 = arith.addf %458, %483 : vector<16x16xf32>
    %c98 = arith.constant 98 : index
    %485 = memref.load %arg7[%c98] : memref<225xf32, #tpu.memory_space<smem>>
    %486 = vector.broadcast %485 : f32 to vector<16x16xf32>
    %487 = arith.mulf %486, %480 : vector<16x16xf32>
    %488 = arith.addf %462, %487 : vector<16x16xf32>
    %c173 = arith.constant 173 : index
    %489 = memref.load %arg7[%c173] : memref<225xf32, #tpu.memory_space<smem>>
    %490 = vector.broadcast %489 : f32 to vector<16x16xf32>
    %491 = arith.mulf %490, %480 : vector<16x16xf32>
    %492 = arith.addf %466, %491 : vector<16x16xf32>
    %c4_198 = arith.constant 4 : index
    %c0_199 = arith.constant 0 : index
    %c0_200 = arith.constant 0 : index
    %493 = vector.load %arg10[%c4_198, %c0_199, %c0_200] : memref<15x20x16xf32, #tpu.memory_space<vmem>>, vector<1x16x16xf32>
    %494 = vector.shape_cast %493 : vector<1x16x16xf32> to vector<16x16xf32>
    %c4_201 = arith.constant 4 : index
    %495 = memref.load %arg7[%c4_201] : memref<225xf32, #tpu.memory_space<smem>>
    %496 = vector.broadcast %495 : f32 to vector<16x16xf32>
    %497 = arith.mulf %496, %494 : vector<16x16xf32>
    %498 = arith.addf %484, %497 : vector<16x16xf32>
    %c79 = arith.constant 79 : index
    %499 = memref.load %arg7[%c79] : memref<225xf32, #tpu.memory_space<smem>>
    %500 = vector.broadcast %499 : f32 to vector<16x16xf32>
    %501 = arith.mulf %500, %494 : vector<16x16xf32>
    %502 = arith.addf %488, %501 : vector<16x16xf32>
    %c154 = arith.constant 154 : index
    %503 = memref.load %arg7[%c154] : memref<225xf32, #tpu.memory_space<smem>>
    %504 = vector.broadcast %503 : f32 to vector<16x16xf32>
    %505 = arith.mulf %504, %494 : vector<16x16xf32>
    %506 = arith.addf %492, %505 : vector<16x16xf32>
    %c4_202 = arith.constant 4 : index
    %c1_203 = arith.constant 1 : index
    %c0_204 = arith.constant 0 : index
    %507 = vector.load %arg10[%c4_202, %c1_203, %c0_204] : memref<15x20x16xf32, #tpu.memory_space<vmem>>, vector<1x16x16xf32>
    %508 = vector.shape_cast %507 : vector<1x16x16xf32> to vector<16x16xf32>
    %c9_205 = arith.constant 9 : index
    %509 = memref.load %arg7[%c9_205] : memref<225xf32, #tpu.memory_space<smem>>
    %510 = vector.broadcast %509 : f32 to vector<16x16xf32>
    %511 = arith.mulf %510, %508 : vector<16x16xf32>
    %512 = arith.addf %498, %511 : vector<16x16xf32>
    %c84 = arith.constant 84 : index
    %513 = memref.load %arg7[%c84] : memref<225xf32, #tpu.memory_space<smem>>
    %514 = vector.broadcast %513 : f32 to vector<16x16xf32>
    %515 = arith.mulf %514, %508 : vector<16x16xf32>
    %516 = arith.addf %502, %515 : vector<16x16xf32>
    %c159 = arith.constant 159 : index
    %517 = memref.load %arg7[%c159] : memref<225xf32, #tpu.memory_space<smem>>
    %518 = vector.broadcast %517 : f32 to vector<16x16xf32>
    %519 = arith.mulf %518, %508 : vector<16x16xf32>
    %520 = arith.addf %506, %519 : vector<16x16xf32>
    %c4_206 = arith.constant 4 : index
    %c2_207 = arith.constant 2 : index
    %c0_208 = arith.constant 0 : index
    %521 = vector.load %arg10[%c4_206, %c2_207, %c0_208] : memref<15x20x16xf32, #tpu.memory_space<vmem>>, vector<1x16x16xf32>
    %522 = vector.shape_cast %521 : vector<1x16x16xf32> to vector<16x16xf32>
    %c14_209 = arith.constant 14 : index
    %523 = memref.load %arg7[%c14_209] : memref<225xf32, #tpu.memory_space<smem>>
    %524 = vector.broadcast %523 : f32 to vector<16x16xf32>
    %525 = arith.mulf %524, %522 : vector<16x16xf32>
    %526 = arith.addf %512, %525 : vector<16x16xf32>
    %c89 = arith.constant 89 : index
    %527 = memref.load %arg7[%c89] : memref<225xf32, #tpu.memory_space<smem>>
    %528 = vector.broadcast %527 : f32 to vector<16x16xf32>
    %529 = arith.mulf %528, %522 : vector<16x16xf32>
    %530 = arith.addf %516, %529 : vector<16x16xf32>
    %c164 = arith.constant 164 : index
    %531 = memref.load %arg7[%c164] : memref<225xf32, #tpu.memory_space<smem>>
    %532 = vector.broadcast %531 : f32 to vector<16x16xf32>
    %533 = arith.mulf %532, %522 : vector<16x16xf32>
    %534 = arith.addf %520, %533 : vector<16x16xf32>
    %c4_210 = arith.constant 4 : index
    %c3_211 = arith.constant 3 : index
    %c0_212 = arith.constant 0 : index
    %535 = vector.load %arg10[%c4_210, %c3_211, %c0_212] : memref<15x20x16xf32, #tpu.memory_space<vmem>>, vector<1x16x16xf32>
    %536 = vector.shape_cast %535 : vector<1x16x16xf32> to vector<16x16xf32>
    %c19 = arith.constant 19 : index
    %537 = memref.load %arg7[%c19] : memref<225xf32, #tpu.memory_space<smem>>
    %538 = vector.broadcast %537 : f32 to vector<16x16xf32>
    %539 = arith.mulf %538, %536 : vector<16x16xf32>
    %540 = arith.addf %526, %539 : vector<16x16xf32>
    %c94 = arith.constant 94 : index
    %541 = memref.load %arg7[%c94] : memref<225xf32, #tpu.memory_space<smem>>
    %542 = vector.broadcast %541 : f32 to vector<16x16xf32>
    %543 = arith.mulf %542, %536 : vector<16x16xf32>
    %544 = arith.addf %530, %543 : vector<16x16xf32>
    %c169 = arith.constant 169 : index
    %545 = memref.load %arg7[%c169] : memref<225xf32, #tpu.memory_space<smem>>
    %546 = vector.broadcast %545 : f32 to vector<16x16xf32>
    %547 = arith.mulf %546, %536 : vector<16x16xf32>
    %548 = arith.addf %534, %547 : vector<16x16xf32>
    %c4_213 = arith.constant 4 : index
    %c4_214 = arith.constant 4 : index
    %c0_215 = arith.constant 0 : index
    %549 = vector.load %arg10[%c4_213, %c4_214, %c0_215] : memref<15x20x16xf32, #tpu.memory_space<vmem>>, vector<1x16x16xf32>
    %550 = vector.shape_cast %549 : vector<1x16x16xf32> to vector<16x16xf32>
    %c24 = arith.constant 24 : index
    %551 = memref.load %arg7[%c24] : memref<225xf32, #tpu.memory_space<smem>>
    %552 = vector.broadcast %551 : f32 to vector<16x16xf32>
    %553 = arith.mulf %552, %550 : vector<16x16xf32>
    %554 = arith.addf %540, %553 : vector<16x16xf32>
    %c99 = arith.constant 99 : index
    %555 = memref.load %arg7[%c99] : memref<225xf32, #tpu.memory_space<smem>>
    %556 = vector.broadcast %555 : f32 to vector<16x16xf32>
    %557 = arith.mulf %556, %550 : vector<16x16xf32>
    %558 = arith.addf %544, %557 : vector<16x16xf32>
    %c174 = arith.constant 174 : index
    %559 = memref.load %arg7[%c174] : memref<225xf32, #tpu.memory_space<smem>>
    %560 = vector.broadcast %559 : f32 to vector<16x16xf32>
    %561 = arith.mulf %560, %550 : vector<16x16xf32>
    %562 = arith.addf %548, %561 : vector<16x16xf32>
    %c5_216 = arith.constant 5 : index
    %c0_217 = arith.constant 0 : index
    %c0_218 = arith.constant 0 : index
    %563 = vector.load %arg10[%c5_216, %c0_217, %c0_218] : memref<15x20x16xf32, #tpu.memory_space<vmem>>, vector<1x16x16xf32>
    %564 = vector.shape_cast %563 : vector<1x16x16xf32> to vector<16x16xf32>
    %c25 = arith.constant 25 : index
    %565 = memref.load %arg7[%c25] : memref<225xf32, #tpu.memory_space<smem>>
    %566 = vector.broadcast %565 : f32 to vector<16x16xf32>
    %567 = arith.mulf %566, %564 : vector<16x16xf32>
    %568 = arith.addf %554, %567 : vector<16x16xf32>
    %c100 = arith.constant 100 : index
    %569 = memref.load %arg7[%c100] : memref<225xf32, #tpu.memory_space<smem>>
    %570 = vector.broadcast %569 : f32 to vector<16x16xf32>
    %571 = arith.mulf %570, %564 : vector<16x16xf32>
    %572 = arith.addf %558, %571 : vector<16x16xf32>
    %c175 = arith.constant 175 : index
    %573 = memref.load %arg7[%c175] : memref<225xf32, #tpu.memory_space<smem>>
    %574 = vector.broadcast %573 : f32 to vector<16x16xf32>
    %575 = arith.mulf %574, %564 : vector<16x16xf32>
    %576 = arith.addf %562, %575 : vector<16x16xf32>
    %c5_219 = arith.constant 5 : index
    %c1_220 = arith.constant 1 : index
    %c0_221 = arith.constant 0 : index
    %577 = vector.load %arg10[%c5_219, %c1_220, %c0_221] : memref<15x20x16xf32, #tpu.memory_space<vmem>>, vector<1x16x16xf32>
    %578 = vector.shape_cast %577 : vector<1x16x16xf32> to vector<16x16xf32>
    %c30_222 = arith.constant 30 : index
    %579 = memref.load %arg7[%c30_222] : memref<225xf32, #tpu.memory_space<smem>>
    %580 = vector.broadcast %579 : f32 to vector<16x16xf32>
    %581 = arith.mulf %580, %578 : vector<16x16xf32>
    %582 = arith.addf %568, %581 : vector<16x16xf32>
    %c105 = arith.constant 105 : index
    %583 = memref.load %arg7[%c105] : memref<225xf32, #tpu.memory_space<smem>>
    %584 = vector.broadcast %583 : f32 to vector<16x16xf32>
    %585 = arith.mulf %584, %578 : vector<16x16xf32>
    %586 = arith.addf %572, %585 : vector<16x16xf32>
    %c180 = arith.constant 180 : index
    %587 = memref.load %arg7[%c180] : memref<225xf32, #tpu.memory_space<smem>>
    %588 = vector.broadcast %587 : f32 to vector<16x16xf32>
    %589 = arith.mulf %588, %578 : vector<16x16xf32>
    %590 = arith.addf %576, %589 : vector<16x16xf32>
    %c5_223 = arith.constant 5 : index
    %c2_224 = arith.constant 2 : index
    %c0_225 = arith.constant 0 : index
    %591 = vector.load %arg10[%c5_223, %c2_224, %c0_225] : memref<15x20x16xf32, #tpu.memory_space<vmem>>, vector<1x16x16xf32>
    %592 = vector.shape_cast %591 : vector<1x16x16xf32> to vector<16x16xf32>
    %c35_226 = arith.constant 35 : index
    %593 = memref.load %arg7[%c35_226] : memref<225xf32, #tpu.memory_space<smem>>
    %594 = vector.broadcast %593 : f32 to vector<16x16xf32>
    %595 = arith.mulf %594, %592 : vector<16x16xf32>
    %596 = arith.addf %582, %595 : vector<16x16xf32>
    %c110 = arith.constant 110 : index
    %597 = memref.load %arg7[%c110] : memref<225xf32, #tpu.memory_space<smem>>
    %598 = vector.broadcast %597 : f32 to vector<16x16xf32>
    %599 = arith.mulf %598, %592 : vector<16x16xf32>
    %600 = arith.addf %586, %599 : vector<16x16xf32>
    %c185 = arith.constant 185 : index
    %601 = memref.load %arg7[%c185] : memref<225xf32, #tpu.memory_space<smem>>
    %602 = vector.broadcast %601 : f32 to vector<16x16xf32>
    %603 = arith.mulf %602, %592 : vector<16x16xf32>
    %604 = arith.addf %590, %603 : vector<16x16xf32>
    %c5_227 = arith.constant 5 : index
    %c3_228 = arith.constant 3 : index
    %c0_229 = arith.constant 0 : index
    %605 = vector.load %arg10[%c5_227, %c3_228, %c0_229] : memref<15x20x16xf32, #tpu.memory_space<vmem>>, vector<1x16x16xf32>
    %606 = vector.shape_cast %605 : vector<1x16x16xf32> to vector<16x16xf32>
    %c40 = arith.constant 40 : index
    %607 = memref.load %arg7[%c40] : memref<225xf32, #tpu.memory_space<smem>>
    %608 = vector.broadcast %607 : f32 to vector<16x16xf32>
    %609 = arith.mulf %608, %606 : vector<16x16xf32>
    %610 = arith.addf %596, %609 : vector<16x16xf32>
    %c115 = arith.constant 115 : index
    %611 = memref.load %arg7[%c115] : memref<225xf32, #tpu.memory_space<smem>>
    %612 = vector.broadcast %611 : f32 to vector<16x16xf32>
    %613 = arith.mulf %612, %606 : vector<16x16xf32>
    %614 = arith.addf %600, %613 : vector<16x16xf32>
    %c190 = arith.constant 190 : index
    %615 = memref.load %arg7[%c190] : memref<225xf32, #tpu.memory_space<smem>>
    %616 = vector.broadcast %615 : f32 to vector<16x16xf32>
    %617 = arith.mulf %616, %606 : vector<16x16xf32>
    %618 = arith.addf %604, %617 : vector<16x16xf32>
    %c5_230 = arith.constant 5 : index
    %c4_231 = arith.constant 4 : index
    %c0_232 = arith.constant 0 : index
    %619 = vector.load %arg10[%c5_230, %c4_231, %c0_232] : memref<15x20x16xf32, #tpu.memory_space<vmem>>, vector<1x16x16xf32>
    %620 = vector.shape_cast %619 : vector<1x16x16xf32> to vector<16x16xf32>
    %c45 = arith.constant 45 : index
    %621 = memref.load %arg7[%c45] : memref<225xf32, #tpu.memory_space<smem>>
    %622 = vector.broadcast %621 : f32 to vector<16x16xf32>
    %623 = arith.mulf %622, %620 : vector<16x16xf32>
    %624 = arith.addf %610, %623 : vector<16x16xf32>
    %c120 = arith.constant 120 : index
    %625 = memref.load %arg7[%c120] : memref<225xf32, #tpu.memory_space<smem>>
    %626 = vector.broadcast %625 : f32 to vector<16x16xf32>
    %627 = arith.mulf %626, %620 : vector<16x16xf32>
    %628 = arith.addf %614, %627 : vector<16x16xf32>
    %c195 = arith.constant 195 : index
    %629 = memref.load %arg7[%c195] : memref<225xf32, #tpu.memory_space<smem>>
    %630 = vector.broadcast %629 : f32 to vector<16x16xf32>
    %631 = arith.mulf %630, %620 : vector<16x16xf32>
    %632 = arith.addf %618, %631 : vector<16x16xf32>
    %c6_233 = arith.constant 6 : index
    %c0_234 = arith.constant 0 : index
    %c0_235 = arith.constant 0 : index
    %633 = vector.load %arg10[%c6_233, %c0_234, %c0_235] : memref<15x20x16xf32, #tpu.memory_space<vmem>>, vector<1x16x16xf32>
    %634 = vector.shape_cast %633 : vector<1x16x16xf32> to vector<16x16xf32>
    %c26 = arith.constant 26 : index
    %635 = memref.load %arg7[%c26] : memref<225xf32, #tpu.memory_space<smem>>
    %636 = vector.broadcast %635 : f32 to vector<16x16xf32>
    %637 = arith.mulf %636, %634 : vector<16x16xf32>
    %638 = arith.addf %624, %637 : vector<16x16xf32>
    %c101 = arith.constant 101 : index
    %639 = memref.load %arg7[%c101] : memref<225xf32, #tpu.memory_space<smem>>
    %640 = vector.broadcast %639 : f32 to vector<16x16xf32>
    %641 = arith.mulf %640, %634 : vector<16x16xf32>
    %642 = arith.addf %628, %641 : vector<16x16xf32>
    %c176 = arith.constant 176 : index
    %643 = memref.load %arg7[%c176] : memref<225xf32, #tpu.memory_space<smem>>
    %644 = vector.broadcast %643 : f32 to vector<16x16xf32>
    %645 = arith.mulf %644, %634 : vector<16x16xf32>
    %646 = arith.addf %632, %645 : vector<16x16xf32>
    %c6_236 = arith.constant 6 : index
    %c1_237 = arith.constant 1 : index
    %c0_238 = arith.constant 0 : index
    %647 = vector.load %arg10[%c6_236, %c1_237, %c0_238] : memref<15x20x16xf32, #tpu.memory_space<vmem>>, vector<1x16x16xf32>
    %648 = vector.shape_cast %647 : vector<1x16x16xf32> to vector<16x16xf32>
    %c31_239 = arith.constant 31 : index
    %649 = memref.load %arg7[%c31_239] : memref<225xf32, #tpu.memory_space<smem>>
    %650 = vector.broadcast %649 : f32 to vector<16x16xf32>
    %651 = arith.mulf %650, %648 : vector<16x16xf32>
    %652 = arith.addf %638, %651 : vector<16x16xf32>
    %c106 = arith.constant 106 : index
    %653 = memref.load %arg7[%c106] : memref<225xf32, #tpu.memory_space<smem>>
    %654 = vector.broadcast %653 : f32 to vector<16x16xf32>
    %655 = arith.mulf %654, %648 : vector<16x16xf32>
    %656 = arith.addf %642, %655 : vector<16x16xf32>
    %c181 = arith.constant 181 : index
    %657 = memref.load %arg7[%c181] : memref<225xf32, #tpu.memory_space<smem>>
    %658 = vector.broadcast %657 : f32 to vector<16x16xf32>
    %659 = arith.mulf %658, %648 : vector<16x16xf32>
    %660 = arith.addf %646, %659 : vector<16x16xf32>
    %c9_240 = arith.constant 9 : index
    %661 = memref.load %arg5[%c9_240] : memref<81xf32, #tpu.memory_space<smem>>
    %662 = vector.broadcast %661 : f32 to vector<16x16xf32>
    %663 = arith.mulf %662, %648 : vector<16x16xf32>
    %664 = arith.addf %470, %663 : vector<16x16xf32>
    %c36 = arith.constant 36 : index
    %665 = memref.load %arg5[%c36] : memref<81xf32, #tpu.memory_space<smem>>
    %666 = vector.broadcast %665 : f32 to vector<16x16xf32>
    %667 = arith.mulf %666, %648 : vector<16x16xf32>
    %668 = arith.addf %474, %667 : vector<16x16xf32>
    %c63 = arith.constant 63 : index
    %669 = memref.load %arg5[%c63] : memref<81xf32, #tpu.memory_space<smem>>
    %670 = vector.broadcast %669 : f32 to vector<16x16xf32>
    %671 = arith.mulf %670, %648 : vector<16x16xf32>
    %672 = arith.addf %478, %671 : vector<16x16xf32>
    %c6_241 = arith.constant 6 : index
    %c2_242 = arith.constant 2 : index
    %c0_243 = arith.constant 0 : index
    %673 = vector.load %arg10[%c6_241, %c2_242, %c0_243] : memref<15x20x16xf32, #tpu.memory_space<vmem>>, vector<1x16x16xf32>
    %674 = vector.shape_cast %673 : vector<1x16x16xf32> to vector<16x16xf32>
    %c36_244 = arith.constant 36 : index
    %675 = memref.load %arg7[%c36_244] : memref<225xf32, #tpu.memory_space<smem>>
    %676 = vector.broadcast %675 : f32 to vector<16x16xf32>
    %677 = arith.mulf %676, %674 : vector<16x16xf32>
    %678 = arith.addf %652, %677 : vector<16x16xf32>
    %c111 = arith.constant 111 : index
    %679 = memref.load %arg7[%c111] : memref<225xf32, #tpu.memory_space<smem>>
    %680 = vector.broadcast %679 : f32 to vector<16x16xf32>
    %681 = arith.mulf %680, %674 : vector<16x16xf32>
    %682 = arith.addf %656, %681 : vector<16x16xf32>
    %c186 = arith.constant 186 : index
    %683 = memref.load %arg7[%c186] : memref<225xf32, #tpu.memory_space<smem>>
    %684 = vector.broadcast %683 : f32 to vector<16x16xf32>
    %685 = arith.mulf %684, %674 : vector<16x16xf32>
    %686 = arith.addf %660, %685 : vector<16x16xf32>
    %c12_245 = arith.constant 12 : index
    %687 = memref.load %arg5[%c12_245] : memref<81xf32, #tpu.memory_space<smem>>
    %688 = vector.broadcast %687 : f32 to vector<16x16xf32>
    %689 = arith.mulf %688, %674 : vector<16x16xf32>
    %690 = arith.addf %664, %689 : vector<16x16xf32>
    %c39 = arith.constant 39 : index
    %691 = memref.load %arg5[%c39] : memref<81xf32, #tpu.memory_space<smem>>
    %692 = vector.broadcast %691 : f32 to vector<16x16xf32>
    %693 = arith.mulf %692, %674 : vector<16x16xf32>
    %694 = arith.addf %668, %693 : vector<16x16xf32>
    %c66 = arith.constant 66 : index
    %695 = memref.load %arg5[%c66] : memref<81xf32, #tpu.memory_space<smem>>
    %696 = vector.broadcast %695 : f32 to vector<16x16xf32>
    %697 = arith.mulf %696, %674 : vector<16x16xf32>
    %698 = arith.addf %672, %697 : vector<16x16xf32>
    %c6_246 = arith.constant 6 : index
    %c3_247 = arith.constant 3 : index
    %c0_248 = arith.constant 0 : index
    %699 = vector.load %arg10[%c6_246, %c3_247, %c0_248] : memref<15x20x16xf32, #tpu.memory_space<vmem>>, vector<1x16x16xf32>
    %700 = vector.shape_cast %699 : vector<1x16x16xf32> to vector<16x16xf32>
    %c41 = arith.constant 41 : index
    %701 = memref.load %arg7[%c41] : memref<225xf32, #tpu.memory_space<smem>>
    %702 = vector.broadcast %701 : f32 to vector<16x16xf32>
    %703 = arith.mulf %702, %700 : vector<16x16xf32>
    %704 = arith.addf %678, %703 : vector<16x16xf32>
    %c116 = arith.constant 116 : index
    %705 = memref.load %arg7[%c116] : memref<225xf32, #tpu.memory_space<smem>>
    %706 = vector.broadcast %705 : f32 to vector<16x16xf32>
    %707 = arith.mulf %706, %700 : vector<16x16xf32>
    %708 = arith.addf %682, %707 : vector<16x16xf32>
    %c191 = arith.constant 191 : index
    %709 = memref.load %arg7[%c191] : memref<225xf32, #tpu.memory_space<smem>>
    %710 = vector.broadcast %709 : f32 to vector<16x16xf32>
    %711 = arith.mulf %710, %700 : vector<16x16xf32>
    %712 = arith.addf %686, %711 : vector<16x16xf32>
    %c15_249 = arith.constant 15 : index
    %713 = memref.load %arg5[%c15_249] : memref<81xf32, #tpu.memory_space<smem>>
    %714 = vector.broadcast %713 : f32 to vector<16x16xf32>
    %715 = arith.mulf %714, %700 : vector<16x16xf32>
    %716 = arith.addf %690, %715 : vector<16x16xf32>
    %c42 = arith.constant 42 : index
    %717 = memref.load %arg5[%c42] : memref<81xf32, #tpu.memory_space<smem>>
    %718 = vector.broadcast %717 : f32 to vector<16x16xf32>
    %719 = arith.mulf %718, %700 : vector<16x16xf32>
    %720 = arith.addf %694, %719 : vector<16x16xf32>
    %c69 = arith.constant 69 : index
    %721 = memref.load %arg5[%c69] : memref<81xf32, #tpu.memory_space<smem>>
    %722 = vector.broadcast %721 : f32 to vector<16x16xf32>
    %723 = arith.mulf %722, %700 : vector<16x16xf32>
    %724 = arith.addf %698, %723 : vector<16x16xf32>
    %c6_250 = arith.constant 6 : index
    %c4_251 = arith.constant 4 : index
    %c0_252 = arith.constant 0 : index
    %725 = vector.load %arg10[%c6_250, %c4_251, %c0_252] : memref<15x20x16xf32, #tpu.memory_space<vmem>>, vector<1x16x16xf32>
    %726 = vector.shape_cast %725 : vector<1x16x16xf32> to vector<16x16xf32>
    %c46 = arith.constant 46 : index
    %727 = memref.load %arg7[%c46] : memref<225xf32, #tpu.memory_space<smem>>
    %728 = vector.broadcast %727 : f32 to vector<16x16xf32>
    %729 = arith.mulf %728, %726 : vector<16x16xf32>
    %730 = arith.addf %704, %729 : vector<16x16xf32>
    %c121 = arith.constant 121 : index
    %731 = memref.load %arg7[%c121] : memref<225xf32, #tpu.memory_space<smem>>
    %732 = vector.broadcast %731 : f32 to vector<16x16xf32>
    %733 = arith.mulf %732, %726 : vector<16x16xf32>
    %734 = arith.addf %708, %733 : vector<16x16xf32>
    %c196 = arith.constant 196 : index
    %735 = memref.load %arg7[%c196] : memref<225xf32, #tpu.memory_space<smem>>
    %736 = vector.broadcast %735 : f32 to vector<16x16xf32>
    %737 = arith.mulf %736, %726 : vector<16x16xf32>
    %738 = arith.addf %712, %737 : vector<16x16xf32>
    %c7_253 = arith.constant 7 : index
    %c0_254 = arith.constant 0 : index
    %c0_255 = arith.constant 0 : index
    %739 = vector.load %arg10[%c7_253, %c0_254, %c0_255] : memref<15x20x16xf32, #tpu.memory_space<vmem>>, vector<1x16x16xf32>
    %740 = vector.shape_cast %739 : vector<1x16x16xf32> to vector<16x16xf32>
    %c27_256 = arith.constant 27 : index
    %741 = memref.load %arg7[%c27_256] : memref<225xf32, #tpu.memory_space<smem>>
    %742 = vector.broadcast %741 : f32 to vector<16x16xf32>
    %743 = arith.mulf %742, %740 : vector<16x16xf32>
    %744 = arith.addf %730, %743 : vector<16x16xf32>
    %c102 = arith.constant 102 : index
    %745 = memref.load %arg7[%c102] : memref<225xf32, #tpu.memory_space<smem>>
    %746 = vector.broadcast %745 : f32 to vector<16x16xf32>
    %747 = arith.mulf %746, %740 : vector<16x16xf32>
    %748 = arith.addf %734, %747 : vector<16x16xf32>
    %c177 = arith.constant 177 : index
    %749 = memref.load %arg7[%c177] : memref<225xf32, #tpu.memory_space<smem>>
    %750 = vector.broadcast %749 : f32 to vector<16x16xf32>
    %751 = arith.mulf %750, %740 : vector<16x16xf32>
    %752 = arith.addf %738, %751 : vector<16x16xf32>
    %c7_257 = arith.constant 7 : index
    %c1_258 = arith.constant 1 : index
    %c0_259 = arith.constant 0 : index
    %753 = vector.load %arg10[%c7_257, %c1_258, %c0_259] : memref<15x20x16xf32, #tpu.memory_space<vmem>>, vector<1x16x16xf32>
    %754 = vector.shape_cast %753 : vector<1x16x16xf32> to vector<16x16xf32>
    %c32_260 = arith.constant 32 : index
    %755 = memref.load %arg7[%c32_260] : memref<225xf32, #tpu.memory_space<smem>>
    %756 = vector.broadcast %755 : f32 to vector<16x16xf32>
    %757 = arith.mulf %756, %754 : vector<16x16xf32>
    %758 = arith.addf %744, %757 : vector<16x16xf32>
    %c107 = arith.constant 107 : index
    %759 = memref.load %arg7[%c107] : memref<225xf32, #tpu.memory_space<smem>>
    %760 = vector.broadcast %759 : f32 to vector<16x16xf32>
    %761 = arith.mulf %760, %754 : vector<16x16xf32>
    %762 = arith.addf %748, %761 : vector<16x16xf32>
    %c182 = arith.constant 182 : index
    %763 = memref.load %arg7[%c182] : memref<225xf32, #tpu.memory_space<smem>>
    %764 = vector.broadcast %763 : f32 to vector<16x16xf32>
    %765 = arith.mulf %764, %754 : vector<16x16xf32>
    %766 = arith.addf %752, %765 : vector<16x16xf32>
    %c10_261 = arith.constant 10 : index
    %767 = memref.load %arg5[%c10_261] : memref<81xf32, #tpu.memory_space<smem>>
    %768 = vector.broadcast %767 : f32 to vector<16x16xf32>
    %769 = arith.mulf %768, %754 : vector<16x16xf32>
    %770 = arith.addf %716, %769 : vector<16x16xf32>
    %c37 = arith.constant 37 : index
    %771 = memref.load %arg5[%c37] : memref<81xf32, #tpu.memory_space<smem>>
    %772 = vector.broadcast %771 : f32 to vector<16x16xf32>
    %773 = arith.mulf %772, %754 : vector<16x16xf32>
    %774 = arith.addf %720, %773 : vector<16x16xf32>
    %c64 = arith.constant 64 : index
    %775 = memref.load %arg5[%c64] : memref<81xf32, #tpu.memory_space<smem>>
    %776 = vector.broadcast %775 : f32 to vector<16x16xf32>
    %777 = arith.mulf %776, %754 : vector<16x16xf32>
    %778 = arith.addf %724, %777 : vector<16x16xf32>
    %c7_262 = arith.constant 7 : index
    %c2_263 = arith.constant 2 : index
    %c0_264 = arith.constant 0 : index
    %779 = vector.load %arg10[%c7_262, %c2_263, %c0_264] : memref<15x20x16xf32, #tpu.memory_space<vmem>>, vector<1x16x16xf32>
    %780 = vector.shape_cast %779 : vector<1x16x16xf32> to vector<16x16xf32>
    %c37_265 = arith.constant 37 : index
    %781 = memref.load %arg7[%c37_265] : memref<225xf32, #tpu.memory_space<smem>>
    %782 = vector.broadcast %781 : f32 to vector<16x16xf32>
    %783 = arith.mulf %782, %780 : vector<16x16xf32>
    %784 = arith.addf %758, %783 : vector<16x16xf32>
    %c112 = arith.constant 112 : index
    %785 = memref.load %arg7[%c112] : memref<225xf32, #tpu.memory_space<smem>>
    %786 = vector.broadcast %785 : f32 to vector<16x16xf32>
    %787 = arith.mulf %786, %780 : vector<16x16xf32>
    %788 = arith.addf %762, %787 : vector<16x16xf32>
    %c187 = arith.constant 187 : index
    %789 = memref.load %arg7[%c187] : memref<225xf32, #tpu.memory_space<smem>>
    %790 = vector.broadcast %789 : f32 to vector<16x16xf32>
    %791 = arith.mulf %790, %780 : vector<16x16xf32>
    %792 = arith.addf %766, %791 : vector<16x16xf32>
    %c13_266 = arith.constant 13 : index
    %793 = memref.load %arg5[%c13_266] : memref<81xf32, #tpu.memory_space<smem>>
    %794 = vector.broadcast %793 : f32 to vector<16x16xf32>
    %795 = arith.mulf %794, %780 : vector<16x16xf32>
    %796 = arith.addf %770, %795 : vector<16x16xf32>
    %c40_267 = arith.constant 40 : index
    %797 = memref.load %arg5[%c40_267] : memref<81xf32, #tpu.memory_space<smem>>
    %798 = vector.broadcast %797 : f32 to vector<16x16xf32>
    %799 = arith.mulf %798, %780 : vector<16x16xf32>
    %800 = arith.addf %774, %799 : vector<16x16xf32>
    %c67 = arith.constant 67 : index
    %801 = memref.load %arg5[%c67] : memref<81xf32, #tpu.memory_space<smem>>
    %802 = vector.broadcast %801 : f32 to vector<16x16xf32>
    %803 = arith.mulf %802, %780 : vector<16x16xf32>
    %804 = arith.addf %778, %803 : vector<16x16xf32>
    %c1_268 = arith.constant 1 : index
    %805 = memref.load %arg3[%c1_268] : memref<9xf32, #tpu.memory_space<smem>>
    %806 = vector.broadcast %805 : f32 to vector<16x16xf32>
    %807 = arith.mulf %806, %780 : vector<16x16xf32>
    %808 = arith.addf %338, %807 : vector<16x16xf32>
    %c4_269 = arith.constant 4 : index
    %809 = memref.load %arg3[%c4_269] : memref<9xf32, #tpu.memory_space<smem>>
    %810 = vector.broadcast %809 : f32 to vector<16x16xf32>
    %811 = arith.mulf %810, %780 : vector<16x16xf32>
    %812 = arith.addf %342, %811 : vector<16x16xf32>
    %c7_270 = arith.constant 7 : index
    %813 = memref.load %arg3[%c7_270] : memref<9xf32, #tpu.memory_space<smem>>
    %814 = vector.broadcast %813 : f32 to vector<16x16xf32>
    %815 = arith.mulf %814, %780 : vector<16x16xf32>
    %816 = arith.addf %346, %815 : vector<16x16xf32>
    %c7_271 = arith.constant 7 : index
    %c3_272 = arith.constant 3 : index
    %c0_273 = arith.constant 0 : index
    %817 = vector.load %arg10[%c7_271, %c3_272, %c0_273] : memref<15x20x16xf32, #tpu.memory_space<vmem>>, vector<1x16x16xf32>
    %818 = vector.shape_cast %817 : vector<1x16x16xf32> to vector<16x16xf32>
    %c42_274 = arith.constant 42 : index
    %819 = memref.load %arg7[%c42_274] : memref<225xf32, #tpu.memory_space<smem>>
    %820 = vector.broadcast %819 : f32 to vector<16x16xf32>
    %821 = arith.mulf %820, %818 : vector<16x16xf32>
    %822 = arith.addf %784, %821 : vector<16x16xf32>
    %c117 = arith.constant 117 : index
    %823 = memref.load %arg7[%c117] : memref<225xf32, #tpu.memory_space<smem>>
    %824 = vector.broadcast %823 : f32 to vector<16x16xf32>
    %825 = arith.mulf %824, %818 : vector<16x16xf32>
    %826 = arith.addf %788, %825 : vector<16x16xf32>
    %c192 = arith.constant 192 : index
    %827 = memref.load %arg7[%c192] : memref<225xf32, #tpu.memory_space<smem>>
    %828 = vector.broadcast %827 : f32 to vector<16x16xf32>
    %829 = arith.mulf %828, %818 : vector<16x16xf32>
    %830 = arith.addf %792, %829 : vector<16x16xf32>
    %c16_275 = arith.constant 16 : index
    %831 = memref.load %arg5[%c16_275] : memref<81xf32, #tpu.memory_space<smem>>
    %832 = vector.broadcast %831 : f32 to vector<16x16xf32>
    %833 = arith.mulf %832, %818 : vector<16x16xf32>
    %834 = arith.addf %796, %833 : vector<16x16xf32>
    %c43 = arith.constant 43 : index
    %835 = memref.load %arg5[%c43] : memref<81xf32, #tpu.memory_space<smem>>
    %836 = vector.broadcast %835 : f32 to vector<16x16xf32>
    %837 = arith.mulf %836, %818 : vector<16x16xf32>
    %838 = arith.addf %800, %837 : vector<16x16xf32>
    %c70 = arith.constant 70 : index
    %839 = memref.load %arg5[%c70] : memref<81xf32, #tpu.memory_space<smem>>
    %840 = vector.broadcast %839 : f32 to vector<16x16xf32>
    %841 = arith.mulf %840, %818 : vector<16x16xf32>
    %842 = arith.addf %804, %841 : vector<16x16xf32>
    %c7_276 = arith.constant 7 : index
    %c4_277 = arith.constant 4 : index
    %c0_278 = arith.constant 0 : index
    %843 = vector.load %arg10[%c7_276, %c4_277, %c0_278] : memref<15x20x16xf32, #tpu.memory_space<vmem>>, vector<1x16x16xf32>
    %844 = vector.shape_cast %843 : vector<1x16x16xf32> to vector<16x16xf32>
    %c47 = arith.constant 47 : index
    %845 = memref.load %arg7[%c47] : memref<225xf32, #tpu.memory_space<smem>>
    %846 = vector.broadcast %845 : f32 to vector<16x16xf32>
    %847 = arith.mulf %846, %844 : vector<16x16xf32>
    %848 = arith.addf %822, %847 : vector<16x16xf32>
    %c122 = arith.constant 122 : index
    %849 = memref.load %arg7[%c122] : memref<225xf32, #tpu.memory_space<smem>>
    %850 = vector.broadcast %849 : f32 to vector<16x16xf32>
    %851 = arith.mulf %850, %844 : vector<16x16xf32>
    %852 = arith.addf %826, %851 : vector<16x16xf32>
    %c197 = arith.constant 197 : index
    %853 = memref.load %arg7[%c197] : memref<225xf32, #tpu.memory_space<smem>>
    %854 = vector.broadcast %853 : f32 to vector<16x16xf32>
    %855 = arith.mulf %854, %844 : vector<16x16xf32>
    %856 = arith.addf %830, %855 : vector<16x16xf32>
    %c8_279 = arith.constant 8 : index
    %c0_280 = arith.constant 0 : index
    %c0_281 = arith.constant 0 : index
    %857 = vector.load %arg10[%c8_279, %c0_280, %c0_281] : memref<15x20x16xf32, #tpu.memory_space<vmem>>, vector<1x16x16xf32>
    %858 = vector.shape_cast %857 : vector<1x16x16xf32> to vector<16x16xf32>
    %c28_282 = arith.constant 28 : index
    %859 = memref.load %arg7[%c28_282] : memref<225xf32, #tpu.memory_space<smem>>
    %860 = vector.broadcast %859 : f32 to vector<16x16xf32>
    %861 = arith.mulf %860, %858 : vector<16x16xf32>
    %862 = arith.addf %848, %861 : vector<16x16xf32>
    %c103 = arith.constant 103 : index
    %863 = memref.load %arg7[%c103] : memref<225xf32, #tpu.memory_space<smem>>
    %864 = vector.broadcast %863 : f32 to vector<16x16xf32>
    %865 = arith.mulf %864, %858 : vector<16x16xf32>
    %866 = arith.addf %852, %865 : vector<16x16xf32>
    %c178 = arith.constant 178 : index
    %867 = memref.load %arg7[%c178] : memref<225xf32, #tpu.memory_space<smem>>
    %868 = vector.broadcast %867 : f32 to vector<16x16xf32>
    %869 = arith.mulf %868, %858 : vector<16x16xf32>
    %870 = arith.addf %856, %869 : vector<16x16xf32>
    %c8_283 = arith.constant 8 : index
    %c1_284 = arith.constant 1 : index
    %c0_285 = arith.constant 0 : index
    %871 = vector.load %arg10[%c8_283, %c1_284, %c0_285] : memref<15x20x16xf32, #tpu.memory_space<vmem>>, vector<1x16x16xf32>
    %872 = vector.shape_cast %871 : vector<1x16x16xf32> to vector<16x16xf32>
    %c33_286 = arith.constant 33 : index
    %873 = memref.load %arg7[%c33_286] : memref<225xf32, #tpu.memory_space<smem>>
    %874 = vector.broadcast %873 : f32 to vector<16x16xf32>
    %875 = arith.mulf %874, %872 : vector<16x16xf32>
    %876 = arith.addf %862, %875 : vector<16x16xf32>
    %c108 = arith.constant 108 : index
    %877 = memref.load %arg7[%c108] : memref<225xf32, #tpu.memory_space<smem>>
    %878 = vector.broadcast %877 : f32 to vector<16x16xf32>
    %879 = arith.mulf %878, %872 : vector<16x16xf32>
    %880 = arith.addf %866, %879 : vector<16x16xf32>
    %c183 = arith.constant 183 : index
    %881 = memref.load %arg7[%c183] : memref<225xf32, #tpu.memory_space<smem>>
    %882 = vector.broadcast %881 : f32 to vector<16x16xf32>
    %883 = arith.mulf %882, %872 : vector<16x16xf32>
    %884 = arith.addf %870, %883 : vector<16x16xf32>
    %c11_287 = arith.constant 11 : index
    %885 = memref.load %arg5[%c11_287] : memref<81xf32, #tpu.memory_space<smem>>
    %886 = vector.broadcast %885 : f32 to vector<16x16xf32>
    %887 = arith.mulf %886, %872 : vector<16x16xf32>
    %888 = arith.addf %834, %887 : vector<16x16xf32>
    %c38 = arith.constant 38 : index
    %889 = memref.load %arg5[%c38] : memref<81xf32, #tpu.memory_space<smem>>
    %890 = vector.broadcast %889 : f32 to vector<16x16xf32>
    %891 = arith.mulf %890, %872 : vector<16x16xf32>
    %892 = arith.addf %838, %891 : vector<16x16xf32>
    %c65 = arith.constant 65 : index
    %893 = memref.load %arg5[%c65] : memref<81xf32, #tpu.memory_space<smem>>
    %894 = vector.broadcast %893 : f32 to vector<16x16xf32>
    %895 = arith.mulf %894, %872 : vector<16x16xf32>
    %896 = arith.addf %842, %895 : vector<16x16xf32>
    %c8_288 = arith.constant 8 : index
    %c2_289 = arith.constant 2 : index
    %c0_290 = arith.constant 0 : index
    %897 = vector.load %arg10[%c8_288, %c2_289, %c0_290] : memref<15x20x16xf32, #tpu.memory_space<vmem>>, vector<1x16x16xf32>
    %898 = vector.shape_cast %897 : vector<1x16x16xf32> to vector<16x16xf32>
    %c38_291 = arith.constant 38 : index
    %899 = memref.load %arg7[%c38_291] : memref<225xf32, #tpu.memory_space<smem>>
    %900 = vector.broadcast %899 : f32 to vector<16x16xf32>
    %901 = arith.mulf %900, %898 : vector<16x16xf32>
    %902 = arith.addf %876, %901 : vector<16x16xf32>
    %c113 = arith.constant 113 : index
    %903 = memref.load %arg7[%c113] : memref<225xf32, #tpu.memory_space<smem>>
    %904 = vector.broadcast %903 : f32 to vector<16x16xf32>
    %905 = arith.mulf %904, %898 : vector<16x16xf32>
    %906 = arith.addf %880, %905 : vector<16x16xf32>
    %c188 = arith.constant 188 : index
    %907 = memref.load %arg7[%c188] : memref<225xf32, #tpu.memory_space<smem>>
    %908 = vector.broadcast %907 : f32 to vector<16x16xf32>
    %909 = arith.mulf %908, %898 : vector<16x16xf32>
    %910 = arith.addf %884, %909 : vector<16x16xf32>
    %c14_292 = arith.constant 14 : index
    %911 = memref.load %arg5[%c14_292] : memref<81xf32, #tpu.memory_space<smem>>
    %912 = vector.broadcast %911 : f32 to vector<16x16xf32>
    %913 = arith.mulf %912, %898 : vector<16x16xf32>
    %914 = arith.addf %888, %913 : vector<16x16xf32>
    %c41_293 = arith.constant 41 : index
    %915 = memref.load %arg5[%c41_293] : memref<81xf32, #tpu.memory_space<smem>>
    %916 = vector.broadcast %915 : f32 to vector<16x16xf32>
    %917 = arith.mulf %916, %898 : vector<16x16xf32>
    %918 = arith.addf %892, %917 : vector<16x16xf32>
    %c68 = arith.constant 68 : index
    %919 = memref.load %arg5[%c68] : memref<81xf32, #tpu.memory_space<smem>>
    %920 = vector.broadcast %919 : f32 to vector<16x16xf32>
    %921 = arith.mulf %920, %898 : vector<16x16xf32>
    %922 = arith.addf %896, %921 : vector<16x16xf32>
    %c8_294 = arith.constant 8 : index
    %c3_295 = arith.constant 3 : index
    %c0_296 = arith.constant 0 : index
    %923 = vector.load %arg10[%c8_294, %c3_295, %c0_296] : memref<15x20x16xf32, #tpu.memory_space<vmem>>, vector<1x16x16xf32>
    %924 = vector.shape_cast %923 : vector<1x16x16xf32> to vector<16x16xf32>
    %c43_297 = arith.constant 43 : index
    %925 = memref.load %arg7[%c43_297] : memref<225xf32, #tpu.memory_space<smem>>
    %926 = vector.broadcast %925 : f32 to vector<16x16xf32>
    %927 = arith.mulf %926, %924 : vector<16x16xf32>
    %928 = arith.addf %902, %927 : vector<16x16xf32>
    %c118 = arith.constant 118 : index
    %929 = memref.load %arg7[%c118] : memref<225xf32, #tpu.memory_space<smem>>
    %930 = vector.broadcast %929 : f32 to vector<16x16xf32>
    %931 = arith.mulf %930, %924 : vector<16x16xf32>
    %932 = arith.addf %906, %931 : vector<16x16xf32>
    %c193 = arith.constant 193 : index
    %933 = memref.load %arg7[%c193] : memref<225xf32, #tpu.memory_space<smem>>
    %934 = vector.broadcast %933 : f32 to vector<16x16xf32>
    %935 = arith.mulf %934, %924 : vector<16x16xf32>
    %936 = arith.addf %910, %935 : vector<16x16xf32>
    %c17_298 = arith.constant 17 : index
    %937 = memref.load %arg5[%c17_298] : memref<81xf32, #tpu.memory_space<smem>>
    %938 = vector.broadcast %937 : f32 to vector<16x16xf32>
    %939 = arith.mulf %938, %924 : vector<16x16xf32>
    %940 = arith.addf %914, %939 : vector<16x16xf32>
    %c44 = arith.constant 44 : index
    %941 = memref.load %arg5[%c44] : memref<81xf32, #tpu.memory_space<smem>>
    %942 = vector.broadcast %941 : f32 to vector<16x16xf32>
    %943 = arith.mulf %942, %924 : vector<16x16xf32>
    %944 = arith.addf %918, %943 : vector<16x16xf32>
    %c71 = arith.constant 71 : index
    %945 = memref.load %arg5[%c71] : memref<81xf32, #tpu.memory_space<smem>>
    %946 = vector.broadcast %945 : f32 to vector<16x16xf32>
    %947 = arith.mulf %946, %924 : vector<16x16xf32>
    %948 = arith.addf %922, %947 : vector<16x16xf32>
    %c8_299 = arith.constant 8 : index
    %c4_300 = arith.constant 4 : index
    %c0_301 = arith.constant 0 : index
    %949 = vector.load %arg10[%c8_299, %c4_300, %c0_301] : memref<15x20x16xf32, #tpu.memory_space<vmem>>, vector<1x16x16xf32>
    %950 = vector.shape_cast %949 : vector<1x16x16xf32> to vector<16x16xf32>
    %c48 = arith.constant 48 : index
    %951 = memref.load %arg7[%c48] : memref<225xf32, #tpu.memory_space<smem>>
    %952 = vector.broadcast %951 : f32 to vector<16x16xf32>
    %953 = arith.mulf %952, %950 : vector<16x16xf32>
    %954 = arith.addf %928, %953 : vector<16x16xf32>
    %c123 = arith.constant 123 : index
    %955 = memref.load %arg7[%c123] : memref<225xf32, #tpu.memory_space<smem>>
    %956 = vector.broadcast %955 : f32 to vector<16x16xf32>
    %957 = arith.mulf %956, %950 : vector<16x16xf32>
    %958 = arith.addf %932, %957 : vector<16x16xf32>
    %c198 = arith.constant 198 : index
    %959 = memref.load %arg7[%c198] : memref<225xf32, #tpu.memory_space<smem>>
    %960 = vector.broadcast %959 : f32 to vector<16x16xf32>
    %961 = arith.mulf %960, %950 : vector<16x16xf32>
    %962 = arith.addf %936, %961 : vector<16x16xf32>
    %c9_302 = arith.constant 9 : index
    %c0_303 = arith.constant 0 : index
    %c0_304 = arith.constant 0 : index
    %963 = vector.load %arg10[%c9_302, %c0_303, %c0_304] : memref<15x20x16xf32, #tpu.memory_space<vmem>>, vector<1x16x16xf32>
    %964 = vector.shape_cast %963 : vector<1x16x16xf32> to vector<16x16xf32>
    %c29_305 = arith.constant 29 : index
    %965 = memref.load %arg7[%c29_305] : memref<225xf32, #tpu.memory_space<smem>>
    %966 = vector.broadcast %965 : f32 to vector<16x16xf32>
    %967 = arith.mulf %966, %964 : vector<16x16xf32>
    %968 = arith.addf %954, %967 : vector<16x16xf32>
    %c104 = arith.constant 104 : index
    %969 = memref.load %arg7[%c104] : memref<225xf32, #tpu.memory_space<smem>>
    %970 = vector.broadcast %969 : f32 to vector<16x16xf32>
    %971 = arith.mulf %970, %964 : vector<16x16xf32>
    %972 = arith.addf %958, %971 : vector<16x16xf32>
    %c179 = arith.constant 179 : index
    %973 = memref.load %arg7[%c179] : memref<225xf32, #tpu.memory_space<smem>>
    %974 = vector.broadcast %973 : f32 to vector<16x16xf32>
    %975 = arith.mulf %974, %964 : vector<16x16xf32>
    %976 = arith.addf %962, %975 : vector<16x16xf32>
    %c9_306 = arith.constant 9 : index
    %c1_307 = arith.constant 1 : index
    %c0_308 = arith.constant 0 : index
    %977 = vector.load %arg10[%c9_306, %c1_307, %c0_308] : memref<15x20x16xf32, #tpu.memory_space<vmem>>, vector<1x16x16xf32>
    %978 = vector.shape_cast %977 : vector<1x16x16xf32> to vector<16x16xf32>
    %c34_309 = arith.constant 34 : index
    %979 = memref.load %arg7[%c34_309] : memref<225xf32, #tpu.memory_space<smem>>
    %980 = vector.broadcast %979 : f32 to vector<16x16xf32>
    %981 = arith.mulf %980, %978 : vector<16x16xf32>
    %982 = arith.addf %968, %981 : vector<16x16xf32>
    %c109 = arith.constant 109 : index
    %983 = memref.load %arg7[%c109] : memref<225xf32, #tpu.memory_space<smem>>
    %984 = vector.broadcast %983 : f32 to vector<16x16xf32>
    %985 = arith.mulf %984, %978 : vector<16x16xf32>
    %986 = arith.addf %972, %985 : vector<16x16xf32>
    %c184 = arith.constant 184 : index
    %987 = memref.load %arg7[%c184] : memref<225xf32, #tpu.memory_space<smem>>
    %988 = vector.broadcast %987 : f32 to vector<16x16xf32>
    %989 = arith.mulf %988, %978 : vector<16x16xf32>
    %990 = arith.addf %976, %989 : vector<16x16xf32>
    %c9_310 = arith.constant 9 : index
    %c2_311 = arith.constant 2 : index
    %c0_312 = arith.constant 0 : index
    %991 = vector.load %arg10[%c9_310, %c2_311, %c0_312] : memref<15x20x16xf32, #tpu.memory_space<vmem>>, vector<1x16x16xf32>
    %992 = vector.shape_cast %991 : vector<1x16x16xf32> to vector<16x16xf32>
    %c39_313 = arith.constant 39 : index
    %993 = memref.load %arg7[%c39_313] : memref<225xf32, #tpu.memory_space<smem>>
    %994 = vector.broadcast %993 : f32 to vector<16x16xf32>
    %995 = arith.mulf %994, %992 : vector<16x16xf32>
    %996 = arith.addf %982, %995 : vector<16x16xf32>
    %c114 = arith.constant 114 : index
    %997 = memref.load %arg7[%c114] : memref<225xf32, #tpu.memory_space<smem>>
    %998 = vector.broadcast %997 : f32 to vector<16x16xf32>
    %999 = arith.mulf %998, %992 : vector<16x16xf32>
    %1000 = arith.addf %986, %999 : vector<16x16xf32>
    %c189 = arith.constant 189 : index
    %1001 = memref.load %arg7[%c189] : memref<225xf32, #tpu.memory_space<smem>>
    %1002 = vector.broadcast %1001 : f32 to vector<16x16xf32>
    %1003 = arith.mulf %1002, %992 : vector<16x16xf32>
    %1004 = arith.addf %990, %1003 : vector<16x16xf32>
    %c9_314 = arith.constant 9 : index
    %c3_315 = arith.constant 3 : index
    %c0_316 = arith.constant 0 : index
    %1005 = vector.load %arg10[%c9_314, %c3_315, %c0_316] : memref<15x20x16xf32, #tpu.memory_space<vmem>>, vector<1x16x16xf32>
    %1006 = vector.shape_cast %1005 : vector<1x16x16xf32> to vector<16x16xf32>
    %c44_317 = arith.constant 44 : index
    %1007 = memref.load %arg7[%c44_317] : memref<225xf32, #tpu.memory_space<smem>>
    %1008 = vector.broadcast %1007 : f32 to vector<16x16xf32>
    %1009 = arith.mulf %1008, %1006 : vector<16x16xf32>
    %1010 = arith.addf %996, %1009 : vector<16x16xf32>
    %c119 = arith.constant 119 : index
    %1011 = memref.load %arg7[%c119] : memref<225xf32, #tpu.memory_space<smem>>
    %1012 = vector.broadcast %1011 : f32 to vector<16x16xf32>
    %1013 = arith.mulf %1012, %1006 : vector<16x16xf32>
    %1014 = arith.addf %1000, %1013 : vector<16x16xf32>
    %c194 = arith.constant 194 : index
    %1015 = memref.load %arg7[%c194] : memref<225xf32, #tpu.memory_space<smem>>
    %1016 = vector.broadcast %1015 : f32 to vector<16x16xf32>
    %1017 = arith.mulf %1016, %1006 : vector<16x16xf32>
    %1018 = arith.addf %1004, %1017 : vector<16x16xf32>
    %c9_318 = arith.constant 9 : index
    %c4_319 = arith.constant 4 : index
    %c0_320 = arith.constant 0 : index
    %1019 = vector.load %arg10[%c9_318, %c4_319, %c0_320] : memref<15x20x16xf32, #tpu.memory_space<vmem>>, vector<1x16x16xf32>
    %1020 = vector.shape_cast %1019 : vector<1x16x16xf32> to vector<16x16xf32>
    %c49 = arith.constant 49 : index
    %1021 = memref.load %arg7[%c49] : memref<225xf32, #tpu.memory_space<smem>>
    %1022 = vector.broadcast %1021 : f32 to vector<16x16xf32>
    %1023 = arith.mulf %1022, %1020 : vector<16x16xf32>
    %1024 = arith.addf %1010, %1023 : vector<16x16xf32>
    %c124 = arith.constant 124 : index
    %1025 = memref.load %arg7[%c124] : memref<225xf32, #tpu.memory_space<smem>>
    %1026 = vector.broadcast %1025 : f32 to vector<16x16xf32>
    %1027 = arith.mulf %1026, %1020 : vector<16x16xf32>
    %1028 = arith.addf %1014, %1027 : vector<16x16xf32>
    %c199 = arith.constant 199 : index
    %1029 = memref.load %arg7[%c199] : memref<225xf32, #tpu.memory_space<smem>>
    %1030 = vector.broadcast %1029 : f32 to vector<16x16xf32>
    %1031 = arith.mulf %1030, %1020 : vector<16x16xf32>
    %1032 = arith.addf %1018, %1031 : vector<16x16xf32>
    %c10_321 = arith.constant 10 : index
    %c0_322 = arith.constant 0 : index
    %c0_323 = arith.constant 0 : index
    %1033 = vector.load %arg10[%c10_321, %c0_322, %c0_323] : memref<15x20x16xf32, #tpu.memory_space<vmem>>, vector<1x16x16xf32>
    %1034 = vector.shape_cast %1033 : vector<1x16x16xf32> to vector<16x16xf32>
    %c50 = arith.constant 50 : index
    %1035 = memref.load %arg7[%c50] : memref<225xf32, #tpu.memory_space<smem>>
    %1036 = vector.broadcast %1035 : f32 to vector<16x16xf32>
    %1037 = arith.mulf %1036, %1034 : vector<16x16xf32>
    %1038 = arith.addf %1024, %1037 : vector<16x16xf32>
    %c125 = arith.constant 125 : index
    %1039 = memref.load %arg7[%c125] : memref<225xf32, #tpu.memory_space<smem>>
    %1040 = vector.broadcast %1039 : f32 to vector<16x16xf32>
    %1041 = arith.mulf %1040, %1034 : vector<16x16xf32>
    %1042 = arith.addf %1028, %1041 : vector<16x16xf32>
    %c200 = arith.constant 200 : index
    %1043 = memref.load %arg7[%c200] : memref<225xf32, #tpu.memory_space<smem>>
    %1044 = vector.broadcast %1043 : f32 to vector<16x16xf32>
    %1045 = arith.mulf %1044, %1034 : vector<16x16xf32>
    %1046 = arith.addf %1032, %1045 : vector<16x16xf32>
    %c10_324 = arith.constant 10 : index
    %c1_325 = arith.constant 1 : index
    %c0_326 = arith.constant 0 : index
    %1047 = vector.load %arg10[%c10_324, %c1_325, %c0_326] : memref<15x20x16xf32, #tpu.memory_space<vmem>>, vector<1x16x16xf32>
    %1048 = vector.shape_cast %1047 : vector<1x16x16xf32> to vector<16x16xf32>
    %c55_327 = arith.constant 55 : index
    %1049 = memref.load %arg7[%c55_327] : memref<225xf32, #tpu.memory_space<smem>>
    %1050 = vector.broadcast %1049 : f32 to vector<16x16xf32>
    %1051 = arith.mulf %1050, %1048 : vector<16x16xf32>
    %1052 = arith.addf %1038, %1051 : vector<16x16xf32>
    %c130 = arith.constant 130 : index
    %1053 = memref.load %arg7[%c130] : memref<225xf32, #tpu.memory_space<smem>>
    %1054 = vector.broadcast %1053 : f32 to vector<16x16xf32>
    %1055 = arith.mulf %1054, %1048 : vector<16x16xf32>
    %1056 = arith.addf %1042, %1055 : vector<16x16xf32>
    %c205 = arith.constant 205 : index
    %1057 = memref.load %arg7[%c205] : memref<225xf32, #tpu.memory_space<smem>>
    %1058 = vector.broadcast %1057 : f32 to vector<16x16xf32>
    %1059 = arith.mulf %1058, %1048 : vector<16x16xf32>
    %1060 = arith.addf %1046, %1059 : vector<16x16xf32>
    %c10_328 = arith.constant 10 : index
    %c2_329 = arith.constant 2 : index
    %c0_330 = arith.constant 0 : index
    %1061 = vector.load %arg10[%c10_328, %c2_329, %c0_330] : memref<15x20x16xf32, #tpu.memory_space<vmem>>, vector<1x16x16xf32>
    %1062 = vector.shape_cast %1061 : vector<1x16x16xf32> to vector<16x16xf32>
    %c60_331 = arith.constant 60 : index
    %1063 = memref.load %arg7[%c60_331] : memref<225xf32, #tpu.memory_space<smem>>
    %1064 = vector.broadcast %1063 : f32 to vector<16x16xf32>
    %1065 = arith.mulf %1064, %1062 : vector<16x16xf32>
    %1066 = arith.addf %1052, %1065 : vector<16x16xf32>
    %c135 = arith.constant 135 : index
    %1067 = memref.load %arg7[%c135] : memref<225xf32, #tpu.memory_space<smem>>
    %1068 = vector.broadcast %1067 : f32 to vector<16x16xf32>
    %1069 = arith.mulf %1068, %1062 : vector<16x16xf32>
    %1070 = arith.addf %1056, %1069 : vector<16x16xf32>
    %c210 = arith.constant 210 : index
    %1071 = memref.load %arg7[%c210] : memref<225xf32, #tpu.memory_space<smem>>
    %1072 = vector.broadcast %1071 : f32 to vector<16x16xf32>
    %1073 = arith.mulf %1072, %1062 : vector<16x16xf32>
    %1074 = arith.addf %1060, %1073 : vector<16x16xf32>
    %c10_332 = arith.constant 10 : index
    %c3_333 = arith.constant 3 : index
    %c0_334 = arith.constant 0 : index
    %1075 = vector.load %arg10[%c10_332, %c3_333, %c0_334] : memref<15x20x16xf32, #tpu.memory_space<vmem>>, vector<1x16x16xf32>
    %1076 = vector.shape_cast %1075 : vector<1x16x16xf32> to vector<16x16xf32>
    %c65_335 = arith.constant 65 : index
    %1077 = memref.load %arg7[%c65_335] : memref<225xf32, #tpu.memory_space<smem>>
    %1078 = vector.broadcast %1077 : f32 to vector<16x16xf32>
    %1079 = arith.mulf %1078, %1076 : vector<16x16xf32>
    %1080 = arith.addf %1066, %1079 : vector<16x16xf32>
    %c140 = arith.constant 140 : index
    %1081 = memref.load %arg7[%c140] : memref<225xf32, #tpu.memory_space<smem>>
    %1082 = vector.broadcast %1081 : f32 to vector<16x16xf32>
    %1083 = arith.mulf %1082, %1076 : vector<16x16xf32>
    %1084 = arith.addf %1070, %1083 : vector<16x16xf32>
    %c215 = arith.constant 215 : index
    %1085 = memref.load %arg7[%c215] : memref<225xf32, #tpu.memory_space<smem>>
    %1086 = vector.broadcast %1085 : f32 to vector<16x16xf32>
    %1087 = arith.mulf %1086, %1076 : vector<16x16xf32>
    %1088 = arith.addf %1074, %1087 : vector<16x16xf32>
    %c10_336 = arith.constant 10 : index
    %c4_337 = arith.constant 4 : index
    %c0_338 = arith.constant 0 : index
    %1089 = vector.load %arg10[%c10_336, %c4_337, %c0_338] : memref<15x20x16xf32, #tpu.memory_space<vmem>>, vector<1x16x16xf32>
    %1090 = vector.shape_cast %1089 : vector<1x16x16xf32> to vector<16x16xf32>
    %c70_339 = arith.constant 70 : index
    %1091 = memref.load %arg7[%c70_339] : memref<225xf32, #tpu.memory_space<smem>>
    %1092 = vector.broadcast %1091 : f32 to vector<16x16xf32>
    %1093 = arith.mulf %1092, %1090 : vector<16x16xf32>
    %1094 = arith.addf %1080, %1093 : vector<16x16xf32>
    %c145 = arith.constant 145 : index
    %1095 = memref.load %arg7[%c145] : memref<225xf32, #tpu.memory_space<smem>>
    %1096 = vector.broadcast %1095 : f32 to vector<16x16xf32>
    %1097 = arith.mulf %1096, %1090 : vector<16x16xf32>
    %1098 = arith.addf %1084, %1097 : vector<16x16xf32>
    %c220 = arith.constant 220 : index
    %1099 = memref.load %arg7[%c220] : memref<225xf32, #tpu.memory_space<smem>>
    %1100 = vector.broadcast %1099 : f32 to vector<16x16xf32>
    %1101 = arith.mulf %1100, %1090 : vector<16x16xf32>
    %1102 = arith.addf %1088, %1101 : vector<16x16xf32>
    %c11_340 = arith.constant 11 : index
    %c0_341 = arith.constant 0 : index
    %c0_342 = arith.constant 0 : index
    %1103 = vector.load %arg10[%c11_340, %c0_341, %c0_342] : memref<15x20x16xf32, #tpu.memory_space<vmem>>, vector<1x16x16xf32>
    %1104 = vector.shape_cast %1103 : vector<1x16x16xf32> to vector<16x16xf32>
    %c51 = arith.constant 51 : index
    %1105 = memref.load %arg7[%c51] : memref<225xf32, #tpu.memory_space<smem>>
    %1106 = vector.broadcast %1105 : f32 to vector<16x16xf32>
    %1107 = arith.mulf %1106, %1104 : vector<16x16xf32>
    %1108 = arith.addf %1094, %1107 : vector<16x16xf32>
    %c126 = arith.constant 126 : index
    %1109 = memref.load %arg7[%c126] : memref<225xf32, #tpu.memory_space<smem>>
    %1110 = vector.broadcast %1109 : f32 to vector<16x16xf32>
    %1111 = arith.mulf %1110, %1104 : vector<16x16xf32>
    %1112 = arith.addf %1098, %1111 : vector<16x16xf32>
    %c201 = arith.constant 201 : index
    %1113 = memref.load %arg7[%c201] : memref<225xf32, #tpu.memory_space<smem>>
    %1114 = vector.broadcast %1113 : f32 to vector<16x16xf32>
    %1115 = arith.mulf %1114, %1104 : vector<16x16xf32>
    %1116 = arith.addf %1102, %1115 : vector<16x16xf32>
    %c11_343 = arith.constant 11 : index
    %c1_344 = arith.constant 1 : index
    %c0_345 = arith.constant 0 : index
    %1117 = vector.load %arg10[%c11_343, %c1_344, %c0_345] : memref<15x20x16xf32, #tpu.memory_space<vmem>>, vector<1x16x16xf32>
    %1118 = vector.shape_cast %1117 : vector<1x16x16xf32> to vector<16x16xf32>
    %c56_346 = arith.constant 56 : index
    %1119 = memref.load %arg7[%c56_346] : memref<225xf32, #tpu.memory_space<smem>>
    %1120 = vector.broadcast %1119 : f32 to vector<16x16xf32>
    %1121 = arith.mulf %1120, %1118 : vector<16x16xf32>
    %1122 = arith.addf %1108, %1121 : vector<16x16xf32>
    %c131 = arith.constant 131 : index
    %1123 = memref.load %arg7[%c131] : memref<225xf32, #tpu.memory_space<smem>>
    %1124 = vector.broadcast %1123 : f32 to vector<16x16xf32>
    %1125 = arith.mulf %1124, %1118 : vector<16x16xf32>
    %1126 = arith.addf %1112, %1125 : vector<16x16xf32>
    %c206 = arith.constant 206 : index
    %1127 = memref.load %arg7[%c206] : memref<225xf32, #tpu.memory_space<smem>>
    %1128 = vector.broadcast %1127 : f32 to vector<16x16xf32>
    %1129 = arith.mulf %1128, %1118 : vector<16x16xf32>
    %1130 = arith.addf %1116, %1129 : vector<16x16xf32>
    %c18_347 = arith.constant 18 : index
    %1131 = memref.load %arg5[%c18_347] : memref<81xf32, #tpu.memory_space<smem>>
    %1132 = vector.broadcast %1131 : f32 to vector<16x16xf32>
    %1133 = arith.mulf %1132, %1118 : vector<16x16xf32>
    %1134 = arith.addf %940, %1133 : vector<16x16xf32>
    %c45_348 = arith.constant 45 : index
    %1135 = memref.load %arg5[%c45_348] : memref<81xf32, #tpu.memory_space<smem>>
    %1136 = vector.broadcast %1135 : f32 to vector<16x16xf32>
    %1137 = arith.mulf %1136, %1118 : vector<16x16xf32>
    %1138 = arith.addf %944, %1137 : vector<16x16xf32>
    %c72 = arith.constant 72 : index
    %1139 = memref.load %arg5[%c72] : memref<81xf32, #tpu.memory_space<smem>>
    %1140 = vector.broadcast %1139 : f32 to vector<16x16xf32>
    %1141 = arith.mulf %1140, %1118 : vector<16x16xf32>
    %1142 = arith.addf %948, %1141 : vector<16x16xf32>
    %c11_349 = arith.constant 11 : index
    %c2_350 = arith.constant 2 : index
    %c0_351 = arith.constant 0 : index
    %1143 = vector.load %arg10[%c11_349, %c2_350, %c0_351] : memref<15x20x16xf32, #tpu.memory_space<vmem>>, vector<1x16x16xf32>
    %1144 = vector.shape_cast %1143 : vector<1x16x16xf32> to vector<16x16xf32>
    %c61_352 = arith.constant 61 : index
    %1145 = memref.load %arg7[%c61_352] : memref<225xf32, #tpu.memory_space<smem>>
    %1146 = vector.broadcast %1145 : f32 to vector<16x16xf32>
    %1147 = arith.mulf %1146, %1144 : vector<16x16xf32>
    %1148 = arith.addf %1122, %1147 : vector<16x16xf32>
    %c136 = arith.constant 136 : index
    %1149 = memref.load %arg7[%c136] : memref<225xf32, #tpu.memory_space<smem>>
    %1150 = vector.broadcast %1149 : f32 to vector<16x16xf32>
    %1151 = arith.mulf %1150, %1144 : vector<16x16xf32>
    %1152 = arith.addf %1126, %1151 : vector<16x16xf32>
    %c211 = arith.constant 211 : index
    %1153 = memref.load %arg7[%c211] : memref<225xf32, #tpu.memory_space<smem>>
    %1154 = vector.broadcast %1153 : f32 to vector<16x16xf32>
    %1155 = arith.mulf %1154, %1144 : vector<16x16xf32>
    %1156 = arith.addf %1130, %1155 : vector<16x16xf32>
    %c21_353 = arith.constant 21 : index
    %1157 = memref.load %arg5[%c21_353] : memref<81xf32, #tpu.memory_space<smem>>
    %1158 = vector.broadcast %1157 : f32 to vector<16x16xf32>
    %1159 = arith.mulf %1158, %1144 : vector<16x16xf32>
    %1160 = arith.addf %1134, %1159 : vector<16x16xf32>
    %c48_354 = arith.constant 48 : index
    %1161 = memref.load %arg5[%c48_354] : memref<81xf32, #tpu.memory_space<smem>>
    %1162 = vector.broadcast %1161 : f32 to vector<16x16xf32>
    %1163 = arith.mulf %1162, %1144 : vector<16x16xf32>
    %1164 = arith.addf %1138, %1163 : vector<16x16xf32>
    %c75_355 = arith.constant 75 : index
    %1165 = memref.load %arg5[%c75_355] : memref<81xf32, #tpu.memory_space<smem>>
    %1166 = vector.broadcast %1165 : f32 to vector<16x16xf32>
    %1167 = arith.mulf %1166, %1144 : vector<16x16xf32>
    %1168 = arith.addf %1142, %1167 : vector<16x16xf32>
    %c11_356 = arith.constant 11 : index
    %c3_357 = arith.constant 3 : index
    %c0_358 = arith.constant 0 : index
    %1169 = vector.load %arg10[%c11_356, %c3_357, %c0_358] : memref<15x20x16xf32, #tpu.memory_space<vmem>>, vector<1x16x16xf32>
    %1170 = vector.shape_cast %1169 : vector<1x16x16xf32> to vector<16x16xf32>
    %c66_359 = arith.constant 66 : index
    %1171 = memref.load %arg7[%c66_359] : memref<225xf32, #tpu.memory_space<smem>>
    %1172 = vector.broadcast %1171 : f32 to vector<16x16xf32>
    %1173 = arith.mulf %1172, %1170 : vector<16x16xf32>
    %1174 = arith.addf %1148, %1173 : vector<16x16xf32>
    %c141 = arith.constant 141 : index
    %1175 = memref.load %arg7[%c141] : memref<225xf32, #tpu.memory_space<smem>>
    %1176 = vector.broadcast %1175 : f32 to vector<16x16xf32>
    %1177 = arith.mulf %1176, %1170 : vector<16x16xf32>
    %1178 = arith.addf %1152, %1177 : vector<16x16xf32>
    %c216 = arith.constant 216 : index
    %1179 = memref.load %arg7[%c216] : memref<225xf32, #tpu.memory_space<smem>>
    %1180 = vector.broadcast %1179 : f32 to vector<16x16xf32>
    %1181 = arith.mulf %1180, %1170 : vector<16x16xf32>
    %1182 = arith.addf %1156, %1181 : vector<16x16xf32>
    %c24_360 = arith.constant 24 : index
    %1183 = memref.load %arg5[%c24_360] : memref<81xf32, #tpu.memory_space<smem>>
    %1184 = vector.broadcast %1183 : f32 to vector<16x16xf32>
    %1185 = arith.mulf %1184, %1170 : vector<16x16xf32>
    %1186 = arith.addf %1160, %1185 : vector<16x16xf32>
    %c51_361 = arith.constant 51 : index
    %1187 = memref.load %arg5[%c51_361] : memref<81xf32, #tpu.memory_space<smem>>
    %1188 = vector.broadcast %1187 : f32 to vector<16x16xf32>
    %1189 = arith.mulf %1188, %1170 : vector<16x16xf32>
    %1190 = arith.addf %1164, %1189 : vector<16x16xf32>
    %c78_362 = arith.constant 78 : index
    %1191 = memref.load %arg5[%c78_362] : memref<81xf32, #tpu.memory_space<smem>>
    %1192 = vector.broadcast %1191 : f32 to vector<16x16xf32>
    %1193 = arith.mulf %1192, %1170 : vector<16x16xf32>
    %1194 = arith.addf %1168, %1193 : vector<16x16xf32>
    %c11_363 = arith.constant 11 : index
    %c4_364 = arith.constant 4 : index
    %c0_365 = arith.constant 0 : index
    %1195 = vector.load %arg10[%c11_363, %c4_364, %c0_365] : memref<15x20x16xf32, #tpu.memory_space<vmem>>, vector<1x16x16xf32>
    %1196 = vector.shape_cast %1195 : vector<1x16x16xf32> to vector<16x16xf32>
    %c71_366 = arith.constant 71 : index
    %1197 = memref.load %arg7[%c71_366] : memref<225xf32, #tpu.memory_space<smem>>
    %1198 = vector.broadcast %1197 : f32 to vector<16x16xf32>
    %1199 = arith.mulf %1198, %1196 : vector<16x16xf32>
    %1200 = arith.addf %1174, %1199 : vector<16x16xf32>
    %c146 = arith.constant 146 : index
    %1201 = memref.load %arg7[%c146] : memref<225xf32, #tpu.memory_space<smem>>
    %1202 = vector.broadcast %1201 : f32 to vector<16x16xf32>
    %1203 = arith.mulf %1202, %1196 : vector<16x16xf32>
    %1204 = arith.addf %1178, %1203 : vector<16x16xf32>
    %c221 = arith.constant 221 : index
    %1205 = memref.load %arg7[%c221] : memref<225xf32, #tpu.memory_space<smem>>
    %1206 = vector.broadcast %1205 : f32 to vector<16x16xf32>
    %1207 = arith.mulf %1206, %1196 : vector<16x16xf32>
    %1208 = arith.addf %1182, %1207 : vector<16x16xf32>
    %c12_367 = arith.constant 12 : index
    %c0_368 = arith.constant 0 : index
    %c0_369 = arith.constant 0 : index
    %1209 = vector.load %arg10[%c12_367, %c0_368, %c0_369] : memref<15x20x16xf32, #tpu.memory_space<vmem>>, vector<1x16x16xf32>
    %1210 = vector.shape_cast %1209 : vector<1x16x16xf32> to vector<16x16xf32>
    %c52 = arith.constant 52 : index
    %1211 = memref.load %arg7[%c52] : memref<225xf32, #tpu.memory_space<smem>>
    %1212 = vector.broadcast %1211 : f32 to vector<16x16xf32>
    %1213 = arith.mulf %1212, %1210 : vector<16x16xf32>
    %1214 = arith.addf %1200, %1213 : vector<16x16xf32>
    %c127 = arith.constant 127 : index
    %1215 = memref.load %arg7[%c127] : memref<225xf32, #tpu.memory_space<smem>>
    %1216 = vector.broadcast %1215 : f32 to vector<16x16xf32>
    %1217 = arith.mulf %1216, %1210 : vector<16x16xf32>
    %1218 = arith.addf %1204, %1217 : vector<16x16xf32>
    %c202 = arith.constant 202 : index
    %1219 = memref.load %arg7[%c202] : memref<225xf32, #tpu.memory_space<smem>>
    %1220 = vector.broadcast %1219 : f32 to vector<16x16xf32>
    %1221 = arith.mulf %1220, %1210 : vector<16x16xf32>
    %1222 = arith.addf %1208, %1221 : vector<16x16xf32>
    %c12_370 = arith.constant 12 : index
    %c1_371 = arith.constant 1 : index
    %c0_372 = arith.constant 0 : index
    %1223 = vector.load %arg10[%c12_370, %c1_371, %c0_372] : memref<15x20x16xf32, #tpu.memory_space<vmem>>, vector<1x16x16xf32>
    %1224 = vector.shape_cast %1223 : vector<1x16x16xf32> to vector<16x16xf32>
    %c57_373 = arith.constant 57 : index
    %1225 = memref.load %arg7[%c57_373] : memref<225xf32, #tpu.memory_space<smem>>
    %1226 = vector.broadcast %1225 : f32 to vector<16x16xf32>
    %1227 = arith.mulf %1226, %1224 : vector<16x16xf32>
    %1228 = arith.addf %1214, %1227 : vector<16x16xf32>
    %c132 = arith.constant 132 : index
    %1229 = memref.load %arg7[%c132] : memref<225xf32, #tpu.memory_space<smem>>
    %1230 = vector.broadcast %1229 : f32 to vector<16x16xf32>
    %1231 = arith.mulf %1230, %1224 : vector<16x16xf32>
    %1232 = arith.addf %1218, %1231 : vector<16x16xf32>
    %c207 = arith.constant 207 : index
    %1233 = memref.load %arg7[%c207] : memref<225xf32, #tpu.memory_space<smem>>
    %1234 = vector.broadcast %1233 : f32 to vector<16x16xf32>
    %1235 = arith.mulf %1234, %1224 : vector<16x16xf32>
    %1236 = arith.addf %1222, %1235 : vector<16x16xf32>
    %c19_374 = arith.constant 19 : index
    %1237 = memref.load %arg5[%c19_374] : memref<81xf32, #tpu.memory_space<smem>>
    %1238 = vector.broadcast %1237 : f32 to vector<16x16xf32>
    %1239 = arith.mulf %1238, %1224 : vector<16x16xf32>
    %1240 = arith.addf %1186, %1239 : vector<16x16xf32>
    %c46_375 = arith.constant 46 : index
    %1241 = memref.load %arg5[%c46_375] : memref<81xf32, #tpu.memory_space<smem>>
    %1242 = vector.broadcast %1241 : f32 to vector<16x16xf32>
    %1243 = arith.mulf %1242, %1224 : vector<16x16xf32>
    %1244 = arith.addf %1190, %1243 : vector<16x16xf32>
    %c73 = arith.constant 73 : index
    %1245 = memref.load %arg5[%c73] : memref<81xf32, #tpu.memory_space<smem>>
    %1246 = vector.broadcast %1245 : f32 to vector<16x16xf32>
    %1247 = arith.mulf %1246, %1224 : vector<16x16xf32>
    %1248 = arith.addf %1194, %1247 : vector<16x16xf32>
    %c12_376 = arith.constant 12 : index
    %c2_377 = arith.constant 2 : index
    %c0_378 = arith.constant 0 : index
    %1249 = vector.load %arg10[%c12_376, %c2_377, %c0_378] : memref<15x20x16xf32, #tpu.memory_space<vmem>>, vector<1x16x16xf32>
    %1250 = vector.shape_cast %1249 : vector<1x16x16xf32> to vector<16x16xf32>
    %c62_379 = arith.constant 62 : index
    %1251 = memref.load %arg7[%c62_379] : memref<225xf32, #tpu.memory_space<smem>>
    %1252 = vector.broadcast %1251 : f32 to vector<16x16xf32>
    %1253 = arith.mulf %1252, %1250 : vector<16x16xf32>
    %1254 = arith.addf %1228, %1253 : vector<16x16xf32>
    %c137 = arith.constant 137 : index
    %1255 = memref.load %arg7[%c137] : memref<225xf32, #tpu.memory_space<smem>>
    %1256 = vector.broadcast %1255 : f32 to vector<16x16xf32>
    %1257 = arith.mulf %1256, %1250 : vector<16x16xf32>
    %1258 = arith.addf %1232, %1257 : vector<16x16xf32>
    %c212 = arith.constant 212 : index
    %1259 = memref.load %arg7[%c212] : memref<225xf32, #tpu.memory_space<smem>>
    %1260 = vector.broadcast %1259 : f32 to vector<16x16xf32>
    %1261 = arith.mulf %1260, %1250 : vector<16x16xf32>
    %1262 = arith.addf %1236, %1261 : vector<16x16xf32>
    %c22_380 = arith.constant 22 : index
    %1263 = memref.load %arg5[%c22_380] : memref<81xf32, #tpu.memory_space<smem>>
    %1264 = vector.broadcast %1263 : f32 to vector<16x16xf32>
    %1265 = arith.mulf %1264, %1250 : vector<16x16xf32>
    %1266 = arith.addf %1240, %1265 : vector<16x16xf32>
    %c49_381 = arith.constant 49 : index
    %1267 = memref.load %arg5[%c49_381] : memref<81xf32, #tpu.memory_space<smem>>
    %1268 = vector.broadcast %1267 : f32 to vector<16x16xf32>
    %1269 = arith.mulf %1268, %1250 : vector<16x16xf32>
    %1270 = arith.addf %1244, %1269 : vector<16x16xf32>
    %c76_382 = arith.constant 76 : index
    %1271 = memref.load %arg5[%c76_382] : memref<81xf32, #tpu.memory_space<smem>>
    %1272 = vector.broadcast %1271 : f32 to vector<16x16xf32>
    %1273 = arith.mulf %1272, %1250 : vector<16x16xf32>
    %1274 = arith.addf %1248, %1273 : vector<16x16xf32>
    %c2_383 = arith.constant 2 : index
    %1275 = memref.load %arg3[%c2_383] : memref<9xf32, #tpu.memory_space<smem>>
    %1276 = vector.broadcast %1275 : f32 to vector<16x16xf32>
    %1277 = arith.mulf %1276, %1250 : vector<16x16xf32>
    %1278 = arith.addf %808, %1277 : vector<16x16xf32>
    %c5_384 = arith.constant 5 : index
    %1279 = memref.load %arg3[%c5_384] : memref<9xf32, #tpu.memory_space<smem>>
    %1280 = vector.broadcast %1279 : f32 to vector<16x16xf32>
    %1281 = arith.mulf %1280, %1250 : vector<16x16xf32>
    %1282 = arith.addf %812, %1281 : vector<16x16xf32>
    %c8_385 = arith.constant 8 : index
    %1283 = memref.load %arg3[%c8_385] : memref<9xf32, #tpu.memory_space<smem>>
    %1284 = vector.broadcast %1283 : f32 to vector<16x16xf32>
    %1285 = arith.mulf %1284, %1250 : vector<16x16xf32>
    %1286 = arith.addf %816, %1285 : vector<16x16xf32>
    %c12_386 = arith.constant 12 : index
    %c3_387 = arith.constant 3 : index
    %c0_388 = arith.constant 0 : index
    %1287 = vector.load %arg10[%c12_386, %c3_387, %c0_388] : memref<15x20x16xf32, #tpu.memory_space<vmem>>, vector<1x16x16xf32>
    %1288 = vector.shape_cast %1287 : vector<1x16x16xf32> to vector<16x16xf32>
    %c67_389 = arith.constant 67 : index
    %1289 = memref.load %arg7[%c67_389] : memref<225xf32, #tpu.memory_space<smem>>
    %1290 = vector.broadcast %1289 : f32 to vector<16x16xf32>
    %1291 = arith.mulf %1290, %1288 : vector<16x16xf32>
    %1292 = arith.addf %1254, %1291 : vector<16x16xf32>
    %c142 = arith.constant 142 : index
    %1293 = memref.load %arg7[%c142] : memref<225xf32, #tpu.memory_space<smem>>
    %1294 = vector.broadcast %1293 : f32 to vector<16x16xf32>
    %1295 = arith.mulf %1294, %1288 : vector<16x16xf32>
    %1296 = arith.addf %1258, %1295 : vector<16x16xf32>
    %c217 = arith.constant 217 : index
    %1297 = memref.load %arg7[%c217] : memref<225xf32, #tpu.memory_space<smem>>
    %1298 = vector.broadcast %1297 : f32 to vector<16x16xf32>
    %1299 = arith.mulf %1298, %1288 : vector<16x16xf32>
    %1300 = arith.addf %1262, %1299 : vector<16x16xf32>
    %c25_390 = arith.constant 25 : index
    %1301 = memref.load %arg5[%c25_390] : memref<81xf32, #tpu.memory_space<smem>>
    %1302 = vector.broadcast %1301 : f32 to vector<16x16xf32>
    %1303 = arith.mulf %1302, %1288 : vector<16x16xf32>
    %1304 = arith.addf %1266, %1303 : vector<16x16xf32>
    %c52_391 = arith.constant 52 : index
    %1305 = memref.load %arg5[%c52_391] : memref<81xf32, #tpu.memory_space<smem>>
    %1306 = vector.broadcast %1305 : f32 to vector<16x16xf32>
    %1307 = arith.mulf %1306, %1288 : vector<16x16xf32>
    %1308 = arith.addf %1270, %1307 : vector<16x16xf32>
    %c79_392 = arith.constant 79 : index
    %1309 = memref.load %arg5[%c79_392] : memref<81xf32, #tpu.memory_space<smem>>
    %1310 = vector.broadcast %1309 : f32 to vector<16x16xf32>
    %1311 = arith.mulf %1310, %1288 : vector<16x16xf32>
    %1312 = arith.addf %1274, %1311 : vector<16x16xf32>
    %c12_393 = arith.constant 12 : index
    %c4_394 = arith.constant 4 : index
    %c0_395 = arith.constant 0 : index
    %1313 = vector.load %arg10[%c12_393, %c4_394, %c0_395] : memref<15x20x16xf32, #tpu.memory_space<vmem>>, vector<1x16x16xf32>
    %1314 = vector.shape_cast %1313 : vector<1x16x16xf32> to vector<16x16xf32>
    %c72_396 = arith.constant 72 : index
    %1315 = memref.load %arg7[%c72_396] : memref<225xf32, #tpu.memory_space<smem>>
    %1316 = vector.broadcast %1315 : f32 to vector<16x16xf32>
    %1317 = arith.mulf %1316, %1314 : vector<16x16xf32>
    %1318 = arith.addf %1292, %1317 : vector<16x16xf32>
    %c147 = arith.constant 147 : index
    %1319 = memref.load %arg7[%c147] : memref<225xf32, #tpu.memory_space<smem>>
    %1320 = vector.broadcast %1319 : f32 to vector<16x16xf32>
    %1321 = arith.mulf %1320, %1314 : vector<16x16xf32>
    %1322 = arith.addf %1296, %1321 : vector<16x16xf32>
    %c222 = arith.constant 222 : index
    %1323 = memref.load %arg7[%c222] : memref<225xf32, #tpu.memory_space<smem>>
    %1324 = vector.broadcast %1323 : f32 to vector<16x16xf32>
    %1325 = arith.mulf %1324, %1314 : vector<16x16xf32>
    %1326 = arith.addf %1300, %1325 : vector<16x16xf32>
    %c13_397 = arith.constant 13 : index
    %c0_398 = arith.constant 0 : index
    %c0_399 = arith.constant 0 : index
    %1327 = vector.load %arg10[%c13_397, %c0_398, %c0_399] : memref<15x20x16xf32, #tpu.memory_space<vmem>>, vector<1x16x16xf32>
    %1328 = vector.shape_cast %1327 : vector<1x16x16xf32> to vector<16x16xf32>
    %c53 = arith.constant 53 : index
    %1329 = memref.load %arg7[%c53] : memref<225xf32, #tpu.memory_space<smem>>
    %1330 = vector.broadcast %1329 : f32 to vector<16x16xf32>
    %1331 = arith.mulf %1330, %1328 : vector<16x16xf32>
    %1332 = arith.addf %1318, %1331 : vector<16x16xf32>
    %c128 = arith.constant 128 : index
    %1333 = memref.load %arg7[%c128] : memref<225xf32, #tpu.memory_space<smem>>
    %1334 = vector.broadcast %1333 : f32 to vector<16x16xf32>
    %1335 = arith.mulf %1334, %1328 : vector<16x16xf32>
    %1336 = arith.addf %1322, %1335 : vector<16x16xf32>
    %c203 = arith.constant 203 : index
    %1337 = memref.load %arg7[%c203] : memref<225xf32, #tpu.memory_space<smem>>
    %1338 = vector.broadcast %1337 : f32 to vector<16x16xf32>
    %1339 = arith.mulf %1338, %1328 : vector<16x16xf32>
    %1340 = arith.addf %1326, %1339 : vector<16x16xf32>
    %c13_400 = arith.constant 13 : index
    %c1_401 = arith.constant 1 : index
    %c0_402 = arith.constant 0 : index
    %1341 = vector.load %arg10[%c13_400, %c1_401, %c0_402] : memref<15x20x16xf32, #tpu.memory_space<vmem>>, vector<1x16x16xf32>
    %1342 = vector.shape_cast %1341 : vector<1x16x16xf32> to vector<16x16xf32>
    %c58_403 = arith.constant 58 : index
    %1343 = memref.load %arg7[%c58_403] : memref<225xf32, #tpu.memory_space<smem>>
    %1344 = vector.broadcast %1343 : f32 to vector<16x16xf32>
    %1345 = arith.mulf %1344, %1342 : vector<16x16xf32>
    %1346 = arith.addf %1332, %1345 : vector<16x16xf32>
    %c133 = arith.constant 133 : index
    %1347 = memref.load %arg7[%c133] : memref<225xf32, #tpu.memory_space<smem>>
    %1348 = vector.broadcast %1347 : f32 to vector<16x16xf32>
    %1349 = arith.mulf %1348, %1342 : vector<16x16xf32>
    %1350 = arith.addf %1336, %1349 : vector<16x16xf32>
    %c208 = arith.constant 208 : index
    %1351 = memref.load %arg7[%c208] : memref<225xf32, #tpu.memory_space<smem>>
    %1352 = vector.broadcast %1351 : f32 to vector<16x16xf32>
    %1353 = arith.mulf %1352, %1342 : vector<16x16xf32>
    %1354 = arith.addf %1340, %1353 : vector<16x16xf32>
    %c20_404 = arith.constant 20 : index
    %1355 = memref.load %arg5[%c20_404] : memref<81xf32, #tpu.memory_space<smem>>
    %1356 = vector.broadcast %1355 : f32 to vector<16x16xf32>
    %1357 = arith.mulf %1356, %1342 : vector<16x16xf32>
    %1358 = arith.addf %1304, %1357 : vector<16x16xf32>
    %c47_405 = arith.constant 47 : index
    %1359 = memref.load %arg5[%c47_405] : memref<81xf32, #tpu.memory_space<smem>>
    %1360 = vector.broadcast %1359 : f32 to vector<16x16xf32>
    %1361 = arith.mulf %1360, %1342 : vector<16x16xf32>
    %1362 = arith.addf %1308, %1361 : vector<16x16xf32>
    %c74 = arith.constant 74 : index
    %1363 = memref.load %arg5[%c74] : memref<81xf32, #tpu.memory_space<smem>>
    %1364 = vector.broadcast %1363 : f32 to vector<16x16xf32>
    %1365 = arith.mulf %1364, %1342 : vector<16x16xf32>
    %1366 = arith.addf %1312, %1365 : vector<16x16xf32>
    %c13_406 = arith.constant 13 : index
    %c2_407 = arith.constant 2 : index
    %c0_408 = arith.constant 0 : index
    %1367 = vector.load %arg10[%c13_406, %c2_407, %c0_408] : memref<15x20x16xf32, #tpu.memory_space<vmem>>, vector<1x16x16xf32>
    %1368 = vector.shape_cast %1367 : vector<1x16x16xf32> to vector<16x16xf32>
    %c63_409 = arith.constant 63 : index
    %1369 = memref.load %arg7[%c63_409] : memref<225xf32, #tpu.memory_space<smem>>
    %1370 = vector.broadcast %1369 : f32 to vector<16x16xf32>
    %1371 = arith.mulf %1370, %1368 : vector<16x16xf32>
    %1372 = arith.addf %1346, %1371 : vector<16x16xf32>
    %c138 = arith.constant 138 : index
    %1373 = memref.load %arg7[%c138] : memref<225xf32, #tpu.memory_space<smem>>
    %1374 = vector.broadcast %1373 : f32 to vector<16x16xf32>
    %1375 = arith.mulf %1374, %1368 : vector<16x16xf32>
    %1376 = arith.addf %1350, %1375 : vector<16x16xf32>
    %c213 = arith.constant 213 : index
    %1377 = memref.load %arg7[%c213] : memref<225xf32, #tpu.memory_space<smem>>
    %1378 = vector.broadcast %1377 : f32 to vector<16x16xf32>
    %1379 = arith.mulf %1378, %1368 : vector<16x16xf32>
    %1380 = arith.addf %1354, %1379 : vector<16x16xf32>
    %c23_410 = arith.constant 23 : index
    %1381 = memref.load %arg5[%c23_410] : memref<81xf32, #tpu.memory_space<smem>>
    %1382 = vector.broadcast %1381 : f32 to vector<16x16xf32>
    %1383 = arith.mulf %1382, %1368 : vector<16x16xf32>
    %1384 = arith.addf %1358, %1383 : vector<16x16xf32>
    %c50_411 = arith.constant 50 : index
    %1385 = memref.load %arg5[%c50_411] : memref<81xf32, #tpu.memory_space<smem>>
    %1386 = vector.broadcast %1385 : f32 to vector<16x16xf32>
    %1387 = arith.mulf %1386, %1368 : vector<16x16xf32>
    %1388 = arith.addf %1362, %1387 : vector<16x16xf32>
    %c77_412 = arith.constant 77 : index
    %1389 = memref.load %arg5[%c77_412] : memref<81xf32, #tpu.memory_space<smem>>
    %1390 = vector.broadcast %1389 : f32 to vector<16x16xf32>
    %1391 = arith.mulf %1390, %1368 : vector<16x16xf32>
    %1392 = arith.addf %1366, %1391 : vector<16x16xf32>
    %c13_413 = arith.constant 13 : index
    %c3_414 = arith.constant 3 : index
    %c0_415 = arith.constant 0 : index
    %1393 = vector.load %arg10[%c13_413, %c3_414, %c0_415] : memref<15x20x16xf32, #tpu.memory_space<vmem>>, vector<1x16x16xf32>
    %1394 = vector.shape_cast %1393 : vector<1x16x16xf32> to vector<16x16xf32>
    %c68_416 = arith.constant 68 : index
    %1395 = memref.load %arg7[%c68_416] : memref<225xf32, #tpu.memory_space<smem>>
    %1396 = vector.broadcast %1395 : f32 to vector<16x16xf32>
    %1397 = arith.mulf %1396, %1394 : vector<16x16xf32>
    %1398 = arith.addf %1372, %1397 : vector<16x16xf32>
    %c143 = arith.constant 143 : index
    %1399 = memref.load %arg7[%c143] : memref<225xf32, #tpu.memory_space<smem>>
    %1400 = vector.broadcast %1399 : f32 to vector<16x16xf32>
    %1401 = arith.mulf %1400, %1394 : vector<16x16xf32>
    %1402 = arith.addf %1376, %1401 : vector<16x16xf32>
    %c218 = arith.constant 218 : index
    %1403 = memref.load %arg7[%c218] : memref<225xf32, #tpu.memory_space<smem>>
    %1404 = vector.broadcast %1403 : f32 to vector<16x16xf32>
    %1405 = arith.mulf %1404, %1394 : vector<16x16xf32>
    %1406 = arith.addf %1380, %1405 : vector<16x16xf32>
    %c26_417 = arith.constant 26 : index
    %1407 = memref.load %arg5[%c26_417] : memref<81xf32, #tpu.memory_space<smem>>
    %1408 = vector.broadcast %1407 : f32 to vector<16x16xf32>
    %1409 = arith.mulf %1408, %1394 : vector<16x16xf32>
    %1410 = arith.addf %1384, %1409 : vector<16x16xf32>
    %c53_418 = arith.constant 53 : index
    %1411 = memref.load %arg5[%c53_418] : memref<81xf32, #tpu.memory_space<smem>>
    %1412 = vector.broadcast %1411 : f32 to vector<16x16xf32>
    %1413 = arith.mulf %1412, %1394 : vector<16x16xf32>
    %1414 = arith.addf %1388, %1413 : vector<16x16xf32>
    %c80_419 = arith.constant 80 : index
    %1415 = memref.load %arg5[%c80_419] : memref<81xf32, #tpu.memory_space<smem>>
    %1416 = vector.broadcast %1415 : f32 to vector<16x16xf32>
    %1417 = arith.mulf %1416, %1394 : vector<16x16xf32>
    %1418 = arith.addf %1392, %1417 : vector<16x16xf32>
    %c13_420 = arith.constant 13 : index
    %c4_421 = arith.constant 4 : index
    %c0_422 = arith.constant 0 : index
    %1419 = vector.load %arg10[%c13_420, %c4_421, %c0_422] : memref<15x20x16xf32, #tpu.memory_space<vmem>>, vector<1x16x16xf32>
    %1420 = vector.shape_cast %1419 : vector<1x16x16xf32> to vector<16x16xf32>
    %c73_423 = arith.constant 73 : index
    %1421 = memref.load %arg7[%c73_423] : memref<225xf32, #tpu.memory_space<smem>>
    %1422 = vector.broadcast %1421 : f32 to vector<16x16xf32>
    %1423 = arith.mulf %1422, %1420 : vector<16x16xf32>
    %1424 = arith.addf %1398, %1423 : vector<16x16xf32>
    %c148 = arith.constant 148 : index
    %1425 = memref.load %arg7[%c148] : memref<225xf32, #tpu.memory_space<smem>>
    %1426 = vector.broadcast %1425 : f32 to vector<16x16xf32>
    %1427 = arith.mulf %1426, %1420 : vector<16x16xf32>
    %1428 = arith.addf %1402, %1427 : vector<16x16xf32>
    %c223 = arith.constant 223 : index
    %1429 = memref.load %arg7[%c223] : memref<225xf32, #tpu.memory_space<smem>>
    %1430 = vector.broadcast %1429 : f32 to vector<16x16xf32>
    %1431 = arith.mulf %1430, %1420 : vector<16x16xf32>
    %1432 = arith.addf %1406, %1431 : vector<16x16xf32>
    %c14_424 = arith.constant 14 : index
    %c0_425 = arith.constant 0 : index
    %c0_426 = arith.constant 0 : index
    %1433 = vector.load %arg10[%c14_424, %c0_425, %c0_426] : memref<15x20x16xf32, #tpu.memory_space<vmem>>, vector<1x16x16xf32>
    %1434 = vector.shape_cast %1433 : vector<1x16x16xf32> to vector<16x16xf32>
    %c54_427 = arith.constant 54 : index
    %1435 = memref.load %arg7[%c54_427] : memref<225xf32, #tpu.memory_space<smem>>
    %1436 = vector.broadcast %1435 : f32 to vector<16x16xf32>
    %1437 = arith.mulf %1436, %1434 : vector<16x16xf32>
    %1438 = arith.addf %1424, %1437 : vector<16x16xf32>
    %c129 = arith.constant 129 : index
    %1439 = memref.load %arg7[%c129] : memref<225xf32, #tpu.memory_space<smem>>
    %1440 = vector.broadcast %1439 : f32 to vector<16x16xf32>
    %1441 = arith.mulf %1440, %1434 : vector<16x16xf32>
    %1442 = arith.addf %1428, %1441 : vector<16x16xf32>
    %c204 = arith.constant 204 : index
    %1443 = memref.load %arg7[%c204] : memref<225xf32, #tpu.memory_space<smem>>
    %1444 = vector.broadcast %1443 : f32 to vector<16x16xf32>
    %1445 = arith.mulf %1444, %1434 : vector<16x16xf32>
    %1446 = arith.addf %1432, %1445 : vector<16x16xf32>
    %c14_428 = arith.constant 14 : index
    %c1_429 = arith.constant 1 : index
    %c0_430 = arith.constant 0 : index
    %1447 = vector.load %arg10[%c14_428, %c1_429, %c0_430] : memref<15x20x16xf32, #tpu.memory_space<vmem>>, vector<1x16x16xf32>
    %1448 = vector.shape_cast %1447 : vector<1x16x16xf32> to vector<16x16xf32>
    %c59_431 = arith.constant 59 : index
    %1449 = memref.load %arg7[%c59_431] : memref<225xf32, #tpu.memory_space<smem>>
    %1450 = vector.broadcast %1449 : f32 to vector<16x16xf32>
    %1451 = arith.mulf %1450, %1448 : vector<16x16xf32>
    %1452 = arith.addf %1438, %1451 : vector<16x16xf32>
    %c134 = arith.constant 134 : index
    %1453 = memref.load %arg7[%c134] : memref<225xf32, #tpu.memory_space<smem>>
    %1454 = vector.broadcast %1453 : f32 to vector<16x16xf32>
    %1455 = arith.mulf %1454, %1448 : vector<16x16xf32>
    %1456 = arith.addf %1442, %1455 : vector<16x16xf32>
    %c209 = arith.constant 209 : index
    %1457 = memref.load %arg7[%c209] : memref<225xf32, #tpu.memory_space<smem>>
    %1458 = vector.broadcast %1457 : f32 to vector<16x16xf32>
    %1459 = arith.mulf %1458, %1448 : vector<16x16xf32>
    %1460 = arith.addf %1446, %1459 : vector<16x16xf32>
    %c14_432 = arith.constant 14 : index
    %c2_433 = arith.constant 2 : index
    %c0_434 = arith.constant 0 : index
    %1461 = vector.load %arg10[%c14_432, %c2_433, %c0_434] : memref<15x20x16xf32, #tpu.memory_space<vmem>>, vector<1x16x16xf32>
    %1462 = vector.shape_cast %1461 : vector<1x16x16xf32> to vector<16x16xf32>
    %c64_435 = arith.constant 64 : index
    %1463 = memref.load %arg7[%c64_435] : memref<225xf32, #tpu.memory_space<smem>>
    %1464 = vector.broadcast %1463 : f32 to vector<16x16xf32>
    %1465 = arith.mulf %1464, %1462 : vector<16x16xf32>
    %1466 = arith.addf %1452, %1465 : vector<16x16xf32>
    %c139 = arith.constant 139 : index
    %1467 = memref.load %arg7[%c139] : memref<225xf32, #tpu.memory_space<smem>>
    %1468 = vector.broadcast %1467 : f32 to vector<16x16xf32>
    %1469 = arith.mulf %1468, %1462 : vector<16x16xf32>
    %1470 = arith.addf %1456, %1469 : vector<16x16xf32>
    %c214 = arith.constant 214 : index
    %1471 = memref.load %arg7[%c214] : memref<225xf32, #tpu.memory_space<smem>>
    %1472 = vector.broadcast %1471 : f32 to vector<16x16xf32>
    %1473 = arith.mulf %1472, %1462 : vector<16x16xf32>
    %1474 = arith.addf %1460, %1473 : vector<16x16xf32>
    %c14_436 = arith.constant 14 : index
    %c3_437 = arith.constant 3 : index
    %c0_438 = arith.constant 0 : index
    %1475 = vector.load %arg10[%c14_436, %c3_437, %c0_438] : memref<15x20x16xf32, #tpu.memory_space<vmem>>, vector<1x16x16xf32>
    %1476 = vector.shape_cast %1475 : vector<1x16x16xf32> to vector<16x16xf32>
    %c69_439 = arith.constant 69 : index
    %1477 = memref.load %arg7[%c69_439] : memref<225xf32, #tpu.memory_space<smem>>
    %1478 = vector.broadcast %1477 : f32 to vector<16x16xf32>
    %1479 = arith.mulf %1478, %1476 : vector<16x16xf32>
    %1480 = arith.addf %1466, %1479 : vector<16x16xf32>
    %c144 = arith.constant 144 : index
    %1481 = memref.load %arg7[%c144] : memref<225xf32, #tpu.memory_space<smem>>
    %1482 = vector.broadcast %1481 : f32 to vector<16x16xf32>
    %1483 = arith.mulf %1482, %1476 : vector<16x16xf32>
    %1484 = arith.addf %1470, %1483 : vector<16x16xf32>
    %c219 = arith.constant 219 : index
    %1485 = memref.load %arg7[%c219] : memref<225xf32, #tpu.memory_space<smem>>
    %1486 = vector.broadcast %1485 : f32 to vector<16x16xf32>
    %1487 = arith.mulf %1486, %1476 : vector<16x16xf32>
    %1488 = arith.addf %1474, %1487 : vector<16x16xf32>
    %c14_440 = arith.constant 14 : index
    %c4_441 = arith.constant 4 : index
    %c0_442 = arith.constant 0 : index
    %1489 = vector.load %arg10[%c14_440, %c4_441, %c0_442] : memref<15x20x16xf32, #tpu.memory_space<vmem>>, vector<1x16x16xf32>
    %1490 = vector.shape_cast %1489 : vector<1x16x16xf32> to vector<16x16xf32>
    %c74_443 = arith.constant 74 : index
    %1491 = memref.load %arg7[%c74_443] : memref<225xf32, #tpu.memory_space<smem>>
    %1492 = vector.broadcast %1491 : f32 to vector<16x16xf32>
    %1493 = arith.mulf %1492, %1490 : vector<16x16xf32>
    %1494 = arith.addf %1480, %1493 : vector<16x16xf32>
    %c149 = arith.constant 149 : index
    %1495 = memref.load %arg7[%c149] : memref<225xf32, #tpu.memory_space<smem>>
    %1496 = vector.broadcast %1495 : f32 to vector<16x16xf32>
    %1497 = arith.mulf %1496, %1490 : vector<16x16xf32>
    %1498 = arith.addf %1484, %1497 : vector<16x16xf32>
    %c224 = arith.constant 224 : index
    %1499 = memref.load %arg7[%c224] : memref<225xf32, #tpu.memory_space<smem>>
    %1500 = vector.broadcast %1499 : f32 to vector<16x16xf32>
    %1501 = arith.mulf %1500, %1490 : vector<16x16xf32>
    %1502 = arith.addf %1488, %1501 : vector<16x16xf32>
    %c0_444 = arith.constant 0 : index
    %c0_445 = arith.constant 0 : index
    %c0_446 = arith.constant 0 : index
    %c0_447 = arith.constant 0 : index
    %1503 = vector.load %arg9[%c0_444, %c0_445, %c0_446, %c0_447] : memref<1x9x16x16xf32, #tpu.memory_space<vmem>>, vector<1x1x16x16xf32>
    %1504 = vector.shape_cast %1503 : vector<1x1x16x16xf32> to vector<16x16xf32>
    %1505 = vector.shape_cast %1278 : vector<16x16xf32> to vector<1x1x16x16xf32>
    tpu.vector_store %arg9[%c0_444, %c0_445, %c0_446, %c0_447], %1505 {strides = array<i32>} : memref<1x9x16x16xf32, #tpu.memory_space<vmem>>, vector<1x1x16x16xf32>,
    %c0_448 = arith.constant 0 : index
    %c1_449 = arith.constant 1 : index
    %c0_450 = arith.constant 0 : index
    %c0_451 = arith.constant 0 : index
    %1506 = vector.load %arg9[%c0_448, %c1_449, %c0_450, %c0_451] : memref<1x9x16x16xf32, #tpu.memory_space<vmem>>, vector<1x1x16x16xf32>
    %1507 = vector.shape_cast %1506 : vector<1x1x16x16xf32> to vector<16x16xf32>
    %1508 = vector.shape_cast %1282 : vector<16x16xf32> to vector<1x1x16x16xf32>
    tpu.vector_store %arg9[%c0_448, %c1_449, %c0_450, %c0_451], %1508 {strides = array<i32>} : memref<1x9x16x16xf32, #tpu.memory_space<vmem>>, vector<1x1x16x16xf32>,
    %c0_452 = arith.constant 0 : index
    %c2_453 = arith.constant 2 : index
    %c0_454 = arith.constant 0 : index
    %c0_455 = arith.constant 0 : index
    %1509 = vector.load %arg9[%c0_452, %c2_453, %c0_454, %c0_455] : memref<1x9x16x16xf32, #tpu.memory_space<vmem>>, vector<1x1x16x16xf32>
    %1510 = vector.shape_cast %1509 : vector<1x1x16x16xf32> to vector<16x16xf32>
    %1511 = vector.shape_cast %1286 : vector<16x16xf32> to vector<1x1x16x16xf32>
    tpu.vector_store %arg9[%c0_452, %c2_453, %c0_454, %c0_455], %1511 {strides = array<i32>} : memref<1x9x16x16xf32, #tpu.memory_space<vmem>>, vector<1x1x16x16xf32>,
    %c0_456 = arith.constant 0 : index
    %c3_457 = arith.constant 3 : index
    %c0_458 = arith.constant 0 : index
    %c0_459 = arith.constant 0 : index
    %1512 = vector.load %arg9[%c0_456, %c3_457, %c0_458, %c0_459] : memref<1x9x16x16xf32, #tpu.memory_space<vmem>>, vector<1x1x16x16xf32>
    %1513 = vector.shape_cast %1512 : vector<1x1x16x16xf32> to vector<16x16xf32>
    %1514 = vector.shape_cast %1410 : vector<16x16xf32> to vector<1x1x16x16xf32>
    tpu.vector_store %arg9[%c0_456, %c3_457, %c0_458, %c0_459], %1514 {strides = array<i32>} : memref<1x9x16x16xf32, #tpu.memory_space<vmem>>, vector<1x1x16x16xf32>,
    %c0_460 = arith.constant 0 : index
    %c4_461 = arith.constant 4 : index
    %c0_462 = arith.constant 0 : index
    %c0_463 = arith.constant 0 : index
    %1515 = vector.load %arg9[%c0_460, %c4_461, %c0_462, %c0_463] : memref<1x9x16x16xf32, #tpu.memory_space<vmem>>, vector<1x1x16x16xf32>
    %1516 = vector.shape_cast %1515 : vector<1x1x16x16xf32> to vector<16x16xf32>
    %1517 = vector.shape_cast %1414 : vector<16x16xf32> to vector<1x1x16x16xf32>
    tpu.vector_store %arg9[%c0_460, %c4_461, %c0_462, %c0_463], %1517 {strides = array<i32>} : memref<1x9x16x16xf32, #tpu.memory_space<vmem>>, vector<1x1x16x16xf32>,
    %c0_464 = arith.constant 0 : index
    %c5_465 = arith.constant 5 : index
    %c0_466 = arith.constant 0 : index
    %c0_467 = arith.constant 0 : index
    %1518 = vector.load %arg9[%c0_464, %c5_465, %c0_466, %c0_467] : memref<1x9x16x16xf32, #tpu.memory_space<vmem>>, vector<1x1x16x16xf32>
    %1519 = vector.shape_cast %1518 : vector<1x1x16x16xf32> to vector<16x16xf32>
    %1520 = vector.shape_cast %1418 : vector<16x16xf32> to vector<1x1x16x16xf32>
    tpu.vector_store %arg9[%c0_464, %c5_465, %c0_466, %c0_467], %1520 {strides = array<i32>} : memref<1x9x16x16xf32, #tpu.memory_space<vmem>>, vector<1x1x16x16xf32>,
    %c0_468 = arith.constant 0 : index
    %c6_469 = arith.constant 6 : index
    %c0_470 = arith.constant 0 : index
    %c0_471 = arith.constant 0 : index
    %1521 = vector.load %arg9[%c0_468, %c6_469, %c0_470, %c0_471] : memref<1x9x16x16xf32, #tpu.memory_space<vmem>>, vector<1x1x16x16xf32>
    %1522 = vector.shape_cast %1521 : vector<1x1x16x16xf32> to vector<16x16xf32>
    %1523 = vector.shape_cast %1494 : vector<16x16xf32> to vector<1x1x16x16xf32>
    tpu.vector_store %arg9[%c0_468, %c6_469, %c0_470, %c0_471], %1523 {strides = array<i32>} : memref<1x9x16x16xf32, #tpu.memory_space<vmem>>, vector<1x1x16x16xf32>,
    %c0_472 = arith.constant 0 : index
    %c7_473 = arith.constant 7 : index
    %c0_474 = arith.constant 0 : index
    %c0_475 = arith.constant 0 : index
    %1524 = vector.load %arg9[%c0_472, %c7_473, %c0_474, %c0_475] : memref<1x9x16x16xf32, #tpu.memory_space<vmem>>, vector<1x1x16x16xf32>
    %1525 = vector.shape_cast %1524 : vector<1x1x16x16xf32> to vector<16x16xf32>
    %1526 = vector.shape_cast %1498 : vector<16x16xf32> to vector<1x1x16x16xf32>
    tpu.vector_store %arg9[%c0_472, %c7_473, %c0_474, %c0_475], %1526 {strides = array<i32>} : memref<1x9x16x16xf32, #tpu.memory_space<vmem>>, vector<1x1x16x16xf32>,
    %c0_476 = arith.constant 0 : index
    %c8_477 = arith.constant 8 : index
    %c0_478 = arith.constant 0 : index
    %c0_479 = arith.constant 0 : index
    %1527 = vector.load %arg9[%c0_476, %c8_477, %c0_478, %c0_479] : memref<1x9x16x16xf32, #tpu.memory_space<vmem>>, vector<1x1x16x16xf32>
    %1528 = vector.shape_cast %1527 : vector<1x1x16x16xf32> to vector<16x16xf32>
    %1529 = vector.shape_cast %1502 : vector<16x16xf32> to vector<1x1x16x16xf32>
    tpu.vector_store %arg9[%c0_476, %c8_477, %c0_478, %c0_479], %1529 {strides = array<i32>} : memref<1x9x16x16xf32, #tpu.memory_space<vmem>>, vector<1x1x16x16xf32>,
    return
  }
  func.func @transform_0(%arg0: i32, %arg1: i32) -> (i32, i32, i32, i32, i32) {
    %c0_i32 = arith.constant 0 : i32
    %c0_i32_0 = arith.constant 0 : i32
    %c0_i32_1 = arith.constant 0 : i32
    %c0_i32_2 = arith.constant 0 : i32
    return %arg0, %arg1, %c0_i32, %c0_i32_0, %c0_i32_1 : i32, i32, i32, i32, i32
  }
  func.func @transform_1(%arg0: i32, %arg1: i32) -> i32 {
    %c0_i32 = arith.constant 0 : i32
    %c0_i32_0 = arith.constant 0 : i32
    return %c0_i32 : i32
  }
  func.func @transform_2(%arg0: i32, %arg1: i32) -> i32 {
    %c0_i32 = arith.constant 0 : i32
    %c0_i32_0 = arith.constant 0 : i32
    return %c0_i32 : i32
  }
  func.func @transform_3(%arg0: i32, %arg1: i32) -> i32 {
    %c0_i32 = arith.constant 0 : i32
    %c0_i32_0 = arith.constant 0 : i32
    return %c0_i32 : i32
  }
  func.func @transform_4(%arg0: i32, %arg1: i32) -> i32 {
    %c0_i32 = arith.constant 0 : i32
    %c0_i32_0 = arith.constant 0 : i32
    return %c0_i32 : i32
  }
  func.func @transform_5(%arg0: i32, %arg1: i32) -> i32 {
    %c0_i32 = arith.constant 0 : i32
    %c0_i32_0 = arith.constant 0 : i32
    return %c0_i32 : i32
  }
  func.func @transform_6(%arg0: i32, %arg1: i32) -> i32 {
    %c0_i32 = arith.constant 0 : i32
    %c0_i32_0 = arith.constant 0 : i32
    return %c0_i32 : i32
  }
  func.func @transform_7(%arg0: i32, %arg1: i32) -> (i32, i32, i32, i32) {
    %c0_i32 = arith.constant 0 : i32
    %c0_i32_0 = arith.constant 0 : i32
    %c0_i32_1 = arith.constant 0 : i32
    return %arg0, %c0_i32, %arg1, %c0_i32_0 : i32, i32, i32, i32
  }
}

</mosaic_0001>

<bundles_post_ra>
// kernel: tpu_custom_call.1
= control target key start
LH: loop header
LB: loop body
LE: loop exit
PB: predicated region body
PF: predicated region fallthrough
CT: control target
= control target key end

     0   :  { %s6645_s0 = inlined_call_operand.vmem [shape: f32[2,1,3,20,20], index: 0, kind: input, shape index: {}]   ;;  %s6646_s1 = inlined_call_operand.vmem [shape: f32[9], index: 1, kind: input, shape index: {}]   ;;  %s6647_s2 = inlined_call_operand.vmem [shape: f32[3], index: 2, kind: input, shape index: {}]   ;;  %s6648_s3 = inlined_call_operand.vmem [shape: f32[81], index: 3, kind: input, shape index: {}]   ;;  %s6649_s4 = inlined_call_operand.vmem [shape: f32[3], index: 4, kind: input, shape index: {}]   ;;  %s6650_s5 = inlined_call_operand.vmem [shape: f32[225], index: 5, kind: input, shape index: {}]   ;;  %s6651_s6 = inlined_call_operand.vmem [shape: f32[3], index: 6, kind: input, shape index: {}]   ;;  %s6652_s7 = inlined_call_operand.hbm [shape: f32[2,9,16,16], index: 7, kind: output, shape index: {}]  }
   0x1   :  { %6873 = sst [smem:[#allocation109_spill]] %s6645_s0 }
   0x2   :  { %6874 = sst [smem:[#allocation110_spill]] %s6646_s1 }
   0x3   :  { %6875 = sst [smem:[#allocation111_spill]] %s6647_s2 }
   0x4   :  { %6876 = sst [smem:[#allocation112_spill]] %s6648_s3 }
   0x5   :  { %6877 = sst [smem:[#allocation113_spill]] %s6649_s4 }
   0x6   :  { %6878 = sst [smem:[#allocation114_spill]] %s6650_s5 }
   0x7   :  { %6879 = sst [smem:[#allocation115_spill]] %s6651_s6 }
   0x8   :  { %6880 = sst [smem:[#allocation116_spill]] %s6652_s7 }
   0x9   :  { %12 = vsyncpa [#allocation5], 0 }
   0xa   :  { %13 = vsyncpa [#allocation7], 0 }
   0xb   :  { %14 = vsyncpa [#allocation10], 0 }
   0xc   :  { %15 = vsyncpa [#allocation13], 0 }
   0xd   :  { %16 = vsyncpa [#allocation4], 0 }
   0xe   :  { %18 = vsyncpa [#allocation4 + $0x1], 0  ;;  %s3627_s24 = smov 0   ;;  %s3629_s25 = smov 0  }
   0xf   :  { %s3631_s26 = smov 0   ;;  %s3633_s27 = smov 0  }
  0x10   :  { %s3635_s28 = smov 0   ;;  %s3637_s29 = smov 0  }
  0x11 LB: > { %6881 = sst [smem:[#allocation20_spill]] %s3553_s24  ;;  %s2879_s30 = sadd.s32 4294967295, %s3573_s29   ;;  %s3573_s29 = sphi %s3637_s29, %s24_s29   ;;  %s3569_s28 = sphi %s3635_s28, %s7336_s28   ;;  %s3565_s27 = sphi %s3633_s27, %s7335_s27   ;;  %s3561_s26 = sphi %s3631_s26, %s7334_s26   ;;  %s3557_s25 = sphi %s3629_s25, %s7333_s25   ;;  %s3553_s24 = sphi %s3627_s24, %s7332_s24  }
  0x12   : > { %6882 = sst [smem:[#allocation21_spill]] %s3557_s25  ;;  %s2880_s8 = sadd.s32 4294967294, %s3573_s29  }
  0x13   : > { %6883 = sst [smem:[#allocation22_spill]] %s3561_s26  ;;  %s36_s9 = sadd.s32 1, %s3569_s28 }
  0x14   : > { %6884 = sst [smem:[#allocation23_spill]] %s3565_s27  ;;  %s199_s10 = sadd.s32 1, %s3561_s26 }
  0x15   : > { %6885 = sst [smem:[#allocation24_spill]] %s3569_s28  ;;  %p38_p0 = scmp.ge.s32.totalorder %s36_s9, 2 }
  0x16   : > { %6886 = sst [smem:[#allocation25_spill]] %s3573_s29  ;;  %p209_p1 = scmp.ne.s32.totalorder %s3561_s26, %s3557_s25 }
  0x17   : > { %p210_p2 = scmp.eq.s32.totalorder %s2879_s30, 1  ;;  %p215_p3 = scmp.ne.s32.totalorder %s3557_s25, %s3553_s24 }
  0x18   : > { %s7338_s9 = smov (%p38_p0, %s36_s9), 0  ;;  %p216_p5 = scmp.eq.s32.totalorder %s2880_s8, 1 }
  0x19   : > { %6887 = sst [smem:[#allocation26_spill]] %s7338_s9  ;;  %p3667_p4 = por %p210_p2, %p209_p1 }
  0x1a   : > { %s194_s12 = ssub.s32 %s3569_s28, %s7338_s9  ;;  %p2881_p6 = scmp.ge.s32.totalorder %s3573_s29, 1 }
  0x1b   : > { %s6888_s11 = scalar_select %p3667_p4, 1, 0 }
  0x1c   : > { %p197_p7 = scmp.eq.s32.totalorder %s194_s12, 0  ;;  %p3674_p8 = por %p216_p5, %p215_p3 }
  0x1d   : > { %6889 = sst [smem:[#allocation27_spill]] %s6888_s11  ;;  %p223_p9 = scmp.lt.s32.totalorder %s3573_s29, 3 }
  0x1e   : > { %s6890_s13 = scalar_select %p3674_p8, 1, 0 }
  0x1f   : > { %s3680_s14 = scalar_select %p197_p7, %s3561_s26, %s199_s10  }
  0x20   : > { %6891 = sst [smem:[#allocation28_spill]] %s6890_s13  ;;  %p3682_p10 = pnand %p2881_p6, %p223_p9 }
  0x21   : > { %6892 = sst [smem:[#allocation29_spill]] %s3680_s14  ;;  %p3686_p11 = scmp.eq.s32.totalorder %s2879_s30, 0 }
  0x22   : > { %s6895_s2 = sld [smem:[#allocation111_spill]]  ;;  %p3293_p12 = pneg %p3682_p10 }
  0x23   : > { %s6896_s4 = sld [smem:[#allocation113_spill]]  ;;  %s3575_s12 = smov [#allocation6]  }
  0x24   : > { %p3700_p13 = pnand %p3686_p11, %p3293_p12  ;;  %s6898_s1 = sld [smem:[#allocation110_spill]] }
  0x25   : > { %s3576_s17 = smov [#allocation9]   ;;  %s3577_s18 = smov [#allocation3]  }
  0x26   : > { %s6899_s3 = sld [smem:[#allocation112_spill]] }
  0x27   : > { %s6900_s5 = sld [smem:[#allocation114_spill]] }
  0x28   : > { %s245_s19 = sshll.u32 %s6895_s2, 4  ;;  %s6901_s6 = sld [smem:[#allocation115_spill]]  ;;  %s246_s19 = int_to_ptr.vmem [resolvable:$true] %s245_s19 }
  0x29   : > { %s265_s22 = sshll.u32 %s6896_s4, 4  ;;  %s266_s22 = int_to_ptr.vmem [resolvable:$true] %s265_s22 }
  0x2a   : > { %s235_s10 = sshll.u32 %s6898_s1, 4  ;;  %s3578_s1 = smov [#allocation8]   ;;  %s236_s10 = int_to_ptr.vmem [resolvable:$true] %s235_s10 }
  0x2b   : > { %3299 = dma.vmem_to_smem (!%p3700_p13), %s246_s19, 16, %s3575_s12, [#allocation7]  }
  0x2c   : > { %3305 = dma.vmem_to_smem (!%p3700_p13), %s266_s22, 16, %s3576_s17, [#allocation10]  }
  0x2d   : > { %3296 = dma.vmem_to_smem (!%p3700_p13), %s236_s10, 16, %s3577_s18, [#allocation5]  }
  0x2e   : > { %s255_s2 = sshll.u32 %s6899_s3, 4  ;;  %s275_s8 = sshll.u32 %s6900_s5, 4  ;;  %s256_s2 = int_to_ptr.vmem [resolvable:$true] %s255_s2  ;;  %s276_s8 = int_to_ptr.vmem [resolvable:$true] %s275_s8 }
  0x2f   : > { %3302 = dma.vmem_to_smem (!%p3700_p13), %s256_s2, 16, %s3578_s1, [#allocation7]  }
  0x30   : > { %s3579_s19 = smov [#allocation11]   ;;  %s285_s10 = sshll.u32 %s6901_s6, 4  ;;  %s286_s10 = int_to_ptr.vmem [resolvable:$true] %s285_s10 }
  0x31   : > { %3308 = dma.vmem_to_smem (!%p3700_p13), %s276_s8, 32, %s3579_s19, [#allocation10]  }
  0x32   : > { %s3580_s17 = smov [#allocation12]   ;;  %310 = sbr.rel (%p3682_p10) target bundleno = 678 (0x2a6), region = 48 }
  0x33   : > { %3311 = dma.vmem_to_smem (!%p3700_p13), %s286_s10, 16, %s3580_s17, [#allocation13]  }
  0x37   : > { %3532 = dma.done.wait (%p3686_p11), [#allocation5], 16  }
  0x38   : > { %3534 = vsyncadd (%p3686_p11), [#allocation5], 4294967280 }
  0x39   : > { %3536 = dma.done.wait (%p3686_p11), [#allocation7], 32  }
  0x3a   : > { %3538 = vsyncadd (%p3686_p11), [#allocation7], 4294967264 }
  0x3b   : > { %3540 = dma.done.wait (%p3686_p11), [#allocation10], 48  }
  0x3c   : > { %3542 = vsyncadd (%p3686_p11), [#allocation10], 4294967248 }
  0x3d   : > { %3544 = dma.done.wait (%p3686_p11), [#allocation13], 16  }
  0x3e   : > { %3546 = vsyncadd (%p3686_p11), [#allocation13], 4294967280 }
  0x3f   : > { %342 = sfence }
  0x40   : > { %p373_p0 = scmp.lt.s32.totalorder %s3565_s27, 1  ;;  %s6902_s0 = sld [smem:[#allocation109_spill]]  ;;  %vm386_vm0 = vcmask 130048   ;;  %vm389_vm1 = vcmask 125952  }
  0x41   : > { %s6657_s16 = smov 127   ;;  %s6653_s18 = smov 126  }
  0x42   : > { %s374_s1 = scalar_select %p373_p0, %s3565_s27, 1 }
  0x43   : > { %s6655_s20 = smov 125   ;;  %s6663_s21 = smov 124  }
  0x44   : > { %s3265_s2 = smul.u32 72, %s374_s1  ;;  %s3781_s30 = sld [smem:[#allocation11 + $0x2]] }
  0x45   : > { %s3783_s8 = sld [smem:[#allocation11 + $0x4d]]  ;;  %s6922_s13 = smov 127  }
  0x46   : > { %s3751_s23 = scalar_lea.vmem %s6902_s0, %s3265_s2  ;;  %s3785_s19 = sld [smem:[#allocation11 + $0x98]] }
  0x47   : > { %6903 = sst [smem:[#allocation30_spill]] %s3751_s23  ;;  %v393_v0 = vld [vmem:[%s3751_s23 + $0x10] sm:$0xf]  ;;  %v391_v1 = vld [vmem:[%s3751_s23] sm:$0xff]  ;;  %v392_v2 = vld [vmem:[%s3751_s23 + $0x8] sm:$0xff] }
  0x48   : > { %401 = vrot.lane.b32.xlu1 %v393_v0, %s6657_s16  ;;  %397 = vrot.lane.b32.xlu0 %v391_v1, %s6657_s16  ;;  %v412_v3 = vld [vmem:[%s3751_s23 + $0x10] sm:$0xf]  ;;  %v2901_v6 = vld [vmem:[%s3751_s23 + $0x20] sm:$0xff]  ;;  %s3787_s22 = sld [smem:[#allocation12]]  ;;  %387 = vst.msk [vmem:[#allocation2] sm:$0xff] %vm386_vm0, %v391_v1 }
  0x49   : > { %418 = vrot.lane.b32.xlu2 %v392_v2, %s6653_s18  ;;  %v431_v4 = vld [vmem:[%s3751_s23 + $0x10] sm:$0xf]  ;;  %v2900_v7 = vld [vmem:[%s3751_s23 + $0x18] sm:$0xff]  ;;  %v2902_v8 = vld [vmem:[%s3751_s23 + $0x28] sm:$0xf]  ;;  %s3790_s12 = sld [smem:[#allocation12 + $0x1]] }
  0x4a   : > { %v450_v5 = vld [vmem:[%s3751_s23 + $0x10] sm:$0xf]  ;;  %v2905_v9 = vld [vmem:[%s3751_s23 + $0x28] sm:$0xf]  ;;  %6904 = sst [smem:[#allocation31_spill]] %s3781_s30  ;;  %388 = vst.msk [vmem:[#allocation2 + $0x8] sm:$0xff] %vm386_vm0, %v392_v2 }
  0x4b   : > { %6905 = sst [smem:[#allocation32_spill]] %s3783_s8  ;;  %v2908_v10 = vld [vmem:[%s3751_s23 + $0x28] sm:$0xf]  ;;  %v2916_v12 = vld [vmem:[%s3751_s23 + $0x38] sm:$0xff]  ;;  %v2915_v13 = vld [vmem:[%s3751_s23 + $0x30] sm:$0xff] }
  0x4c   : > { %6906 = sst [smem:[#allocation33_spill]] %s3785_s19  ;;  %v2911_v11 = vld [vmem:[%s3751_s23 + $0x28] sm:$0xf]  ;;  %v2917_v14 = vld [vmem:[%s3751_s23 + $0x40] sm:$0xf]  ;;  %s6931_s19 = smov 126  }
  0x4d   : > { %s3792_s10 = sld [smem:[#allocation12 + $0x2]]  ;;  %v2920_v15 = vld [vmem:[%s3751_s23 + $0x40] sm:$0xf]  ;;  %v385_v30 = vld [vmem:[%s3751_s23 + $0x10] sm:$0xf] }
  0x4e   : > { %s3796_s17 = sld [smem:[#allocation11]]  ;;  %v2923_v16 = vld [vmem:[%s3751_s23 + $0x40] sm:$0xf]  ;;  %v648_v21 = vstv %s3787_s22  ;;  %390 = vst.msk [vmem:[#allocation2 + $0x10] sm:$0xf] %vm389_vm1, %v385_v30 }
  0x4f   : > { %6907 = sst [smem:[#allocation34_spill]] %s3790_s12  ;;  %v653_v19 = vld [vmem:[#allocation2] sm:$0xff]  ;;  %v650_v22 = vstv %s3790_s12 }
  0x50   : > { %416 = vrot.lane.b32.xlu1 %v391_v1, %s6653_s18  ;;  %399 = vrot.lane.b32.xlu0 %v392_v2, %s6657_s16  ;;  %s3799_s1 = sld [smem:[#allocation11 + $0x4b]] }
  0x51   : > { %420 = vrot.lane.b32.xlu2 %v412_v3, %s6653_s18  ;;  %s3801_s2 = sld [smem:[#allocation11 + $0x96]]  ;;  %v673_v25 = vld [vmem:[#allocation2 + $0x1] sm:$0xff] }
  0x52   : > { %s3804_s4 = sld [smem:[#allocation11 + $0x5]]  ;;  %v693_v40 = vld [vmem:[#allocation2 + $0x2] sm:$0xff] }
  0x53   : > { %6908 = sst [smem:[#allocation35_spill]] %s3792_s10  ;;  %v652_v26 = vstv %s3792_s10  ;;  %v713_v51 = vld [vmem:[#allocation2 + $0x3] sm:$0xff] }
  0x54   : > { %s3807_s15 = sld [smem:[#allocation11 + $0x50]]  ;;  %v656_v17 = vstv %s3796_s17  ;;  %v654_v53 = vld [vmem:[#allocation2 + $0x8] sm:$0xff] }
  0x55   : > { %s3818_s0 = sld [smem:[#allocation11 + $0xa0]]  ;;  %v657_v28 = vmul.f32 %v656_v17, %v653_v19  ;;  %v733_v62 = vld [vmem:[#allocation2 + $0x4] sm:$0xff]  ;;  %v658_v0 = vmul.f32 %v656_v17, %v654_v53 }
  0x56   : > { %s3821_s3 = sld [smem:[#allocation11 + $0xf]]  ;;  %v662_v18 = vstv %s3799_s1 }
  0x57   : > { %s3823_s5 = sld [smem:[#allocation11 + $0x5a]]  ;;  %v668_v20 = vstv %s3801_s2  ;;  %v663_v29 = vmul.f32 %v662_v18, %v653_v19  ;;  %v659_v32 = vadd.f32 %v657_v28, %v648_v21 }
  0x58   : > { %437 = vrot.lane.b32.xlu1 %v392_v2, %s6655_s20  ;;  %435 = vrot.lane.b32.xlu0 %v391_v1, %s6655_s20  ;;  %6909 = sst [smem:[#allocation36_spill]] %s3804_s4  ;;  %v676_v23 = vstv %s3804_s4  ;;  %v669_v31 = vmul.f32 %v668_v20, %v653_v19 }
  0x59   : > { %439 = vrot.lane.b32.xlu2 %v431_v4, %s6655_s20  ;;  %s3825_s6 = sld [smem:[#allocation11 + $0xa5]]  ;;  %v665_v33 = vadd.f32 %v663_v29, %v650_v22  ;;  %v677_v34 = vmul.f32 %v676_v23, %v673_v25 }
  0x5a   : > { %6910 = sst [smem:[#allocation37_spill]] %s3807_s15  ;;  %v682_v24 = vstv %s3807_s15  ;;  %v671_v38 = vadd.f32 %v669_v31, %v652_v26 }
  0x5b   : > { %6914 = sst [smem:[#allocation41_spill]] %s3818_s0  ;;  %v683_v35 = vmul.f32 %v682_v24, %v673_v25  ;;  %v708_v41 = vstv %s3818_s0  ;;  %v679_v43 = vadd.f32 %v677_v34, %v659_v32 }
  0x5c   : > { %6915 = sst [smem:[#allocation42_spill]] %s3821_s3  ;;  %v716_v47 = vstv %s3821_s3  ;;  %v709_v50 = vmul.f32 %v708_v41, %v693_v40 }
  0x5d   : > { %6916 = sst [smem:[#allocation43_spill]] %s3823_s5  ;;  %v685_v44 = vadd.f32 %v683_v35, %v665_v33  ;;  %v722_v48 = vstv %s3823_s5  ;;  %v717_v56 = vmul.f32 %v716_v47, %v713_v51 }
  0x5e   : > { %s3827_s9 = sld [smem:[#allocation11 + $0x14]]  ;;  %v723_v57 = vmul.f32 %v722_v48, %v713_v51 }
  0x5f   : > { %6917 = sst [smem:[#allocation44_spill]] %s3825_s6  ;;  %v728_v52 = vstv %s3825_s6 }
  0x60   : > { %456 = vrot.lane.b32.xlu1 %v392_v2, %s6663_s21  ;;  %454 = vrot.lane.b32.xlu0 %v391_v1, %s6663_s21  ;;  %s3831_s28 = sld [smem:[#allocation11 + $0x5f]]  ;;  %v729_v61 = vmul.f32 %v728_v52, %v713_v51  ;;  %v910_v1 = vstv %s3781_s30  ;;  %v916_v2 = vstv %s3783_s8 }
  0x61   : > { %458 = vrot.lane.b32.xlu2 %v450_v5, %s6663_s21  ;;  %s3834_s14 = sld [smem:[#allocation11 + $0xaa]] }
  0x62   : > { %s3836_s26 = sld [smem:[#allocation11 + $0x1]] }
  0x63   : > { %s3843_s24 = sld [smem:[#allocation11 + $0x97]] }
  0x64   : > { %6918 = sst [smem:[#allocation45_spill]] %s3827_s9  ;;  %v736_v58 = vstv %s3827_s9 }
  0x65   : > { %s3845_s29 = sld [smem:[#allocation6]] }
  0x66   : > { %6919 = sst [smem:[#allocation46_spill]] %s3831_s28  ;;  %v742_v59 = vstv %s3831_s28 }
  0x67   : > { %6920 = sst [smem:[#allocation47_spill]] %s3834_s14  ;;  %v748_v63 = vstv %s3834_s14 }
  0x68   : > { %483 = vrot.lane.b32.xlu1 %v2901_v6, %s6657_s16  ;;  %481 = vrot.lane.b32.xlu0 %v2900_v7, %s6657_s16  ;;  %6921 = sst [smem:[#allocation48_spill]] %s3836_s26 }
  0x69   : > { %485 = vrot.lane.b32.xlu2 %v2902_v8, %s6657_s16  ;;  %s3814_s16 = sld [smem:[#allocation11 + $0x55]]  ;;  %v743_v8 = vmul.f32 %v742_v59, %v733_v62 }
  0x6a   : > { %6924 = sst [smem:[#allocation50_spill]] %s3843_s24 }
  0x6b   : > { %6925 = sst [smem:[#allocation51_spill]] %s3845_s29 }
  0x6c   : > { %s3847_s11 = sld [smem:[#allocation6 + $0x1]] }
  0x6d   : > { %s3849_s7 = sld [smem:[#allocation6 + $0x2]] }
  0x6e   : > { %s3851_s27 = sld [smem:[#allocation11 + $0x7]] }
  0x6f   : > { %6913 = sst [smem:[#allocation40_spill]] %s3814_s16  ;;  %v702_v37 = vstv %s3814_s16 }
  0x70   : > { %502 = vrot.lane.b32.xlu1 %v2901_v6, %s6653_s18  ;;  %500 = vrot.lane.b32.xlu0 %v2900_v7, %s6653_s18  ;;  %s3854_s25 = sld [smem:[#allocation11 + $0x52]]  ;;  %v703_v46 = vmul.f32 %v702_v37, %v693_v40 }
  0x71   : > { %504 = vrot.lane.b32.xlu2 %v2905_v9, %s6653_s18  ;;  %s3809_s18 = sld [smem:[#allocation11 + $0x9b]] }
  0x72   : > { %6926 = sst [smem:[#allocation52_spill]] %s3847_s11  ;;  %v705_v55 = vadd.f32 %v703_v46, %v685_v44 }
  0x73   : > { %6927 = sst [smem:[#allocation53_spill]] %s3849_s7 }
  0x74   : > { %6928 = sst [smem:[#allocation54_spill]] %s3851_s27 }
  0x75   : > { %s3856_s26 = sld [smem:[#allocation11 + $0x9d]] }
  0x76   : > { %6929 = sst [smem:[#allocation55_spill]] %s3854_s25 }
  0x77   : > { %6911 = sst [smem:[#allocation38_spill]] %s3809_s18  ;;  %v688_v27 = vstv %s3809_s18 }
  0x78   : > { %521 = vrot.lane.b32.xlu1 %v2901_v6, %s6655_s20  ;;  %519 = vrot.lane.b32.xlu0 %v2900_v7, %s6655_s20  ;;  %s3863_s11 = sld [smem:[#allocation8 + $0x1c]]  ;;  %v689_v39 = vmul.f32 %v688_v27, %v673_v25 }
  0x79   : > { %523 = vrot.lane.b32.xlu2 %v2908_v10, %s6655_s20  ;;  %s3812_s20 = sld [smem:[#allocation11 + $0xa]] }
  0x7a   : > { %s3865_s7 = sld [smem:[#allocation8 + $0x37]]  ;;  %v691_v49 = vadd.f32 %v689_v39, %v671_v38 }
  0x7b   : > { %6930 = sst [smem:[#allocation56_spill]] %s3856_s26 }
  0x7c   : > { %s3867_s27 = sld [smem:[#allocation3]]  ;;  %v711_v60 = vadd.f32 %v709_v50, %v691_v49 }
  0x7d   : > { %s3869_s29 = sld [smem:[#allocation3 + $0x3]] }
  0x7e   : > { %6933 = sst [smem:[#allocation58_spill]] %s3863_s11  ;;  %v954_v33 = vstv %s3863_s11 }
  0x7f   : > { %6912 = sst [smem:[#allocation39_spill]] %s3812_s20  ;;  %v696_v36 = vstv %s3812_s20 }
  0x80   : > { %540 = vrot.lane.b32.xlu1 %v2901_v6, %s6663_s21  ;;  %538 = vrot.lane.b32.xlu0 %v2900_v7, %s6663_s21  ;;  %6934 = sst [smem:[#allocation59_spill]] %s3865_s7  ;;  %v697_v45 = vmul.f32 %v696_v36, %v693_v40  ;;  %v725_v6 = vadd.f32 %v723_v57, %v705_v55  ;;  %v737_v7 = vmul.f32 %v736_v58, %v733_v62 }
  0x81   : > { %542 = vrot.lane.b32.xlu2 %v2911_v11, %s6663_s21  ;;  %s3840_s21 = sld [smem:[#allocation11 + $0x4c]]  ;;  %v731_v11 = vadd.f32 %v729_v61, %v711_v60  ;;  %v694_v60 = vld [vmem:[#allocation2 + $0xa] sm:$0xff] }
  0x82   : > { %6935 = sst [smem:[#allocation60_spill]] %s3867_s27  ;;  %v699_v54 = vadd.f32 %v697_v45, %v679_v43  ;;  %v1004_v35 = vstv %s3867_s27 }
  0x83   : > { %6936 = sst [smem:[#allocation61_spill]] %s3869_s29 }
  0x84   : > { %s3871_s26 = sld [smem:[#allocation3 + $0x6]]  ;;  %v719_v5 = vadd.f32 %v717_v56, %v699_v54 }
  0x85   : > { %s3874_s25 = sld [smem:[#allocation11 + $0x11]] }
  0x86   : > { %s3880_s7 = sld [smem:[#allocation11 + $0xa7]]  ;;  %v4007_v29 = vadd.f32 %v737_v7, %v719_v5 }
  0x87   : > { %6923 = sst [smem:[#allocation49_spill]] %s3840_s21  ;;  %v6768_v10 = vstv %s3840_s21 }
  0x88   : > { %567 = vrot.lane.b32.xlu1 %v2916_v12, %s6922_s13  ;;  %565 = vrot.lane.b32.xlu0 %v2915_v13, %s6922_s13  ;;  %s3883_s29 = sld [smem:[#allocation8 + $0x7]] }
  0x89   : > { %569 = vrot.lane.b32.xlu2 %v2917_v14, %s6922_s13  ;;  %s3860_s13 = sld [smem:[#allocation8 + $0x1]]  ;;  %v3995_v14 = vadd.f32 %v658_v0, %v648_v21  ;;  %v4009_v21 = vadd.f32 %v743_v8, %v725_v6  ;;  %v674_v0 = vld [vmem:[#allocation2 + $0x9] sm:$0xff] }
  0x8a   : > { %6937 = sst [smem:[#allocation62_spill]] %s3871_s26  ;;  %v678_v56 = vmul.f32 %v676_v23, %v674_v0  ;;  %v690_v6 = vmul.f32 %v688_v27, %v674_v0  ;;  %v698_v27 = vmul.f32 %v696_v36, %v694_v60 }
  0x8b   : > { %6938 = sst [smem:[#allocation63_spill]] %s3874_s25  ;;  %v6765_v40 = vstv %s3874_s25 }
  0x8c   : > { %6941 = sst [smem:[#allocation65_spill]] %s3880_s7 }
  0x8d   : > { %s3885_s26 = sld [smem:[#allocation8 + $0x22]] }
  0x8e   : > { %6942 = sst [smem:[#allocation66_spill]] %s3883_s29  ;;  %v1042_v44 = vstv %s3883_s29 }
  0x8f   : > { %6932 = sst [smem:[#allocation57_spill]] %s3860_s13 }
  0x90   : > { %586 = vrot.lane.b32.xlu1 %v2916_v12, %s6931_s19  ;;  %584 = vrot.lane.b32.xlu0 %v2915_v13, %s6931_s19  ;;  %s3876_s13 = sld [smem:[#allocation11 + $0x5c]] }
  0x91   : > { %588 = vrot.lane.b32.xlu2 %v2920_v15, %s6931_s19  ;;  %s6940_s19 = smov 125   ;;  %s3892_s7 = sld [smem:[#allocation11 + $0x16]]  ;;  %v664_v15 = vmul.f32 %v662_v18, %v654_v53 }
  0x92   : > { %s3930_s23 = sld [smem:[#allocation9 + $0x2]] }
  0x93   : > { %6943 = sst [smem:[#allocation67_spill]] %s3885_s26  ;;  %v1048_v45 = vstv %s3885_s26  ;;  %v666_v7 = vadd.f32 %v664_v15, %v650_v22  ;;  %v714_v15 = vld [vmem:[#allocation2 + $0xb] sm:$0xff] }
  0x94   : > { %s3933_s15 = sld [smem:[#allocation11 + $0x6]] }
  0x95   : > { %s3935_s4 = sld [smem:[#allocation11 + $0x51]] }
  0x96   : > { %6939 = sst [smem:[#allocation64_spill]] %s3876_s13 }
  0x97   : > { %s3889_s13 = sld [smem:[#allocation8 + $0x3d]] }
  0x98   : > { %605 = vrot.lane.b32.xlu1 %v2916_v12, %s6940_s19  ;;  %603 = vrot.lane.b32.xlu0 %v2915_v13, %s6940_s19  ;;  %6945 = sst [smem:[#allocation69_spill]] %s3892_s7  ;;  %v749_v12 = vmul.f32 %v748_v63, %v733_v62  ;;  %v6767_v13 = vstv %s3843_s24 }
  0x99   : > { %607 = vrot.lane.b32.xlu2 %v2923_v16, %s6940_s19  ;;  %s3898_s19 = sld [smem:[#allocation11 + $0x61]]  ;;  %v670_v16 = vmul.f32 %v668_v20, %v654_v53 }
  0x9a   : > { %s3906_s7 = sld [smem:[#allocation11 + $0xac]]  ;;  %v4015_v31 = vadd.f32 %v749_v12, %v731_v11 }
  0x9b   : > { %6949 = sst [smem:[#allocation73_spill]] %s3930_s23 }
  0x9c   : > { %6950 = sst [smem:[#allocation74_spill]] %s3933_s15 }
  0x9d   : > { %6944 = sst [smem:[#allocation68_spill]] %s3889_s13 }
  0x9e   : > { %s3911_s13 = sld [smem:[#allocation9]] }
  0x9f   : > { %6946 = sst [smem:[#allocation70_spill]] %s3898_s19 }
  0xa0   : > { %s3922_s19 = sld [smem:[#allocation9 + $0x1]]  ;;  %v6775_v55 = vstv %s3906_s7 }
  0xa1   : > { %6951 = sst [smem:[#allocation75_spill]] %s3935_s4 }
  0xa2   : > { %s3942_s18 = sld [smem:[#allocation11 + $0x9c]] }
  0xa3   : > { %v419_v42 = vpop.permute.xlu2 %418  ;;  %s3948_s10 = sld [smem:[#allocation8]] }
  0xa4   : > { %6947 = sst [smem:[#allocation71_spill]] %s3911_s13  ;;  %427 = vst.msk [vmem:[#allocation2 + $0x38] sm:$0xff] %vm386_vm0, %v419_v42 }
  0xa5   : > { %s3951_s20 = sld [smem:[#allocation8 + $0x1b]] }
  0xa6   : > { %6948 = sst [smem:[#allocation72_spill]] %s3922_s19 }
  0xa7   : > { %s3953_s16 = sld [smem:[#allocation8 + $0x36]] }
  0xa8   : > { %6952 = sst [smem:[#allocation76_spill]] %s3942_s18 }
  0xa9   : > { %6953 = sst [smem:[#allocation77_spill]] %s3948_s10 }
  0xaa   : > { %s6956_s12 = sld [smem:[#allocation33_spill]] }
  0xab   : > { %6954 = sst [smem:[#allocation78_spill]] %s3951_s20  ;;  %v421_v4 = vpop.permute.xlu2 %420  ;;  %v908_v20 = vld [vmem:[#allocation2 + $0x38] sm:$0xff] }
  0xac   : > { %s3959_s0 = sld [smem:[#allocation11 + $0xb]]  ;;  %428 = vst.msk [vmem:[#allocation2 + $0x40] sm:$0xf] %vm389_vm1, %v421_v4  ;;  %v4036_v46 = vmul.f32 %v910_v1, %v908_v20  ;;  %v4040_v49 = vmul.f32 %v916_v2, %v908_v20  ;;  %v684_v4 = vmul.f32 %v682_v24, %v674_v0  ;;  %v680_v24 = vadd.f32 %v678_v56, %v3995_v14  ;;  %v734_v14 = vld [vmem:[#allocation2 + $0xc] sm:$0xff] }
  0xad   : > { %6955 = sst [smem:[#allocation79_spill]] %s3953_s16  ;;  %v704_v0 = vmul.f32 %v702_v37, %v694_v60  ;;  %v724_v56 = vmul.f32 %v722_v48, %v714_v15  ;;  %v744_v61 = vmul.f32 %v742_v59, %v734_v14 }
  0xae   : > { %s6958_s16 = sld [smem:[#allocation48_spill]]  ;;  %v686_v57 = vadd.f32 %v684_v4, %v666_v7  ;;  %v700_v7 = vadd.f32 %v698_v27, %v680_v24  ;;  %v730_v24 = vmul.f32 %v728_v52, %v714_v15 }
  0xaf   : > { %s3965_s20 = sld [smem:[#allocation11 + $0x56]] }
  0xb0   : > { %s3968_s10 = sld [smem:[#allocation11 + $0xa1]]  ;;  %v922_v3 = vstv %s6956_s12 }
  0xb1   : > { %s3975_s6 = sld [smem:[#allocation8 + $0x3]]  ;;  %v4044_v50 = vmul.f32 %v922_v3, %v908_v20  ;;  %v672_v20 = vadd.f32 %v670_v16, %v652_v26 }
  0xb2   : > { %6957 = sst [smem:[#allocation80_spill]] %s3959_s0 }
  0xb3   : > { %s6962_s5 = sld [smem:[#allocation51_spill]]  ;;  %v928_v23 = vld [vmem:[#allocation2 + $0x39] sm:$0xff]  ;;  %v692_v16 = vadd.f32 %v690_v6, %v672_v20  ;;  %v706_v20 = vadd.f32 %v704_v0, %v686_v57 }
  0xb4   : > { %s6963_s3 = sld [smem:[#allocation52_spill]]  ;;  %v6769_v9 = vstv %s6958_s16  ;;  %v4105_v4 = vld [vmem:[#allocation2 + $0x3a] sm:$0xff] }
  0xb5   : > { %6959 = sst [smem:[#allocation81_spill]] %s3965_s20  ;;  %v1006_v57 = vmul.f32 %v1004_v35, %v4105_v4  ;;  %v1060_v12 = vld [vmem:[#allocation2 + $0x3c] sm:$0xff]  ;;  %v726_v62 = vadd.f32 %v724_v56, %v706_v20 }
  0xb6   : > { %6960 = sst [smem:[#allocation82_spill]] %s3968_s10 }
  0xb7   : > { %6961 = sst [smem:[#allocation83_spill]] %s3975_s6 }
  0xb8   : > { %s6964_s17 = sld [smem:[#allocation53_spill]] }
  0xb9   : > { %s6965_s10 = sld [smem:[#allocation54_spill]]  ;;  %v636_v17 = vstv %s6962_s5 }
  0xba   : > { %s3982_s20 = sld [smem:[#allocation8 + $0x1e]]  ;;  %v638_v19 = vstv %s6963_s3  ;;  %v402_v5 = vpop.permute.xlu1 %401  ;;  %v398_v22 = vpop.permute.xlu0 %397 }
  0xbb   : > { %s6967_s0 = sld [smem:[#allocation55_spill]]  ;;  %409 = vst.msk [vmem:[#allocation2 + $0x28] sm:$0xf] %vm389_vm1, %v402_v5  ;;  %v710_v5 = vmul.f32 %v708_v41, %v694_v60  ;;  %v1022_v60 = vld [vmem:[#allocation2 + $0x3b] sm:$0xff] }
  0xbc   : > { %s6968_s6 = sld [smem:[#allocation56_spill]]  ;;  %407 = vst.msk [vmem:[#allocation2 + $0x18] sm:$0xff] %vm386_vm0, %v398_v22  ;;  %v718_v22 = vmul.f32 %v716_v47, %v714_v15  ;;  %v4131_v47 = vmul.f32 %v954_v33, %v928_v23  ;;  %v4150_v15 = vmul.f32 %v6765_v40, %v1022_v60 }
  0xbd   : > { %s3988_s18 = sld [smem:[#allocation8 + $0x39]]  ;;  %v712_v8 = vadd.f32 %v710_v5, %v692_v16  ;;  %v738_v5 = vmul.f32 %v736_v58, %v734_v14 }
  0xbe   : > { %s3991_s9 = sld [smem:[#allocation11 + $0x10]]  ;;  %v640_v25 = vstv %s6964_s17  ;;  %v720_v26 = vadd.f32 %v718_v22, %v700_v7  ;;  %v4172_v7 = vadd.f32 %v1006_v57, %v636_v17  ;;  %v4209_v57 = vmul.f32 %v6775_v55, %v1060_v12 }
  0xbf   : > { %s6971_s28 = sld [smem:[#allocation57_spill]]  ;;  %v930_v28 = vstv %s6965_s10 }
  0xc0   : > { %6966 = sst [smem:[#allocation84_spill]] %s3982_s20  ;;  %v4099_v36 = vmul.f32 %v930_v28, %v928_v23  ;;  %7032 = vst [vmem:[#allocation91_spill] sm:$0xff] %v4172_v7 }
  0xc1   : > { %s6972_s16 = sld [smem:[#allocation59_spill]]  ;;  %v936_v18 = vstv %s6967_s0  ;;  %7036 = vst [vmem:[#allocation95_spill] sm:$0xff] %v4209_v57 }
  0xc2   : > { %s6973_s21 = sld [smem:[#allocation61_spill]]  ;;  %v942_v30 = vstv %s6968_s6  ;;  %v4103_v37 = vmul.f32 %v936_v18, %v928_v23  ;;  %v400_v0 = vpop.permute.xlu0 %399 }
  0xc3   : > { %6969 = sst [smem:[#allocation85_spill]] %s3988_s18  ;;  %v4119_v41 = vmul.f32 %v942_v30, %v928_v23  ;;  %v753_v11 = vld [vmem:[#allocation2 + $0x18] sm:$0xff]  ;;  %408 = vst.msk [vmem:[#allocation2 + $0x20] sm:$0xff] %vm386_vm0, %v400_v0 }
  0xc4   : > { %6970 = sst [smem:[#allocation86_spill]] %s3991_s9  ;;  %v757_v40 = vmul.f32 %v6769_v9, %v753_v11  ;;  %v763_v58 = vmul.f32 %v6768_v10, %v753_v11 }
  0xc5   : > { %s6974_s14 = sld [smem:[#allocation62_spill]]  ;;  %v948_v32 = vstv %s6971_s28 }
  0xc6   : > { %s4005_s24 = sld [smem:[#allocation11 + $0x5b]]  ;;  %v4123_v6 = vmul.f32 %v948_v32, %v928_v23  ;;  %v765_v0 = vadd.f32 %v763_v58, %v4009_v21 }
  0xc7   : > { %s6976_s22 = sld [smem:[#allocation64_spill]]  ;;  %v960_v34 = vstv %s6972_s16 }
  0xc8   : > { %s6977_s1 = sld [smem:[#allocation65_spill]]  ;;  %v1010_v38 = vstv %s6973_s21  ;;  %v4135_v48 = vmul.f32 %v960_v34, %v928_v23  ;;  %v417_v23 = vpop.permute.xlu1 %416 }
  0xc9   : > { %s4013_s2 = sld [smem:[#allocation11 + $0xa6]]  ;;  %v1012_v27 = vmul.f32 %v1010_v38, %v4105_v4  ;;  %426 = vst.msk [vmem:[#allocation2 + $0x30] sm:$0xff] %vm386_vm0, %v417_v23  ;;  %v732_v23 = vadd.f32 %v730_v24, %v712_v8  ;;  %v4192_v8 = vmul.f32 %v1048_v45, %v1022_v60 }
  0xca   : > { %s6979_s17 = sld [smem:[#allocation68_spill]] }
  0xcb   : > { %s4020_s3 = sld [smem:[#allocation8 + $0x6]]  ;;  %v6766_v39 = vstv %s6974_s14  ;;  %v4176_v56 = vadd.f32 %v1012_v27, %v638_v19  ;;  %v740_v27 = vadd.f32 %v738_v5, %v720_v26 }
  0xcc   : > { %6975 = sst [smem:[#allocation87_spill]] %s4005_s24  ;;  %v1018_v52 = vmul.f32 %v6766_v39, %v4105_v4  ;;  %v769_v39 = vmul.f32 %v6767_v13, %v753_v11 }
  0xcd   : > { %s6981_s5 = sld [smem:[#allocation69_spill]]  ;;  %v6764_v42 = vstv %s6976_s22  ;;  %7033 = vst [vmem:[#allocation92_spill] sm:$0xff] %v4176_v56 }
  0xce   : > { %s6982_s0 = sld [smem:[#allocation70_spill]]  ;;  %v1036_v43 = vstv %s6977_s1  ;;  %v4154_v16 = vmul.f32 %v6764_v42, %v1022_v60  ;;  %v750_v42 = vmul.f32 %v748_v63, %v734_v14  ;;  %v4184_v63 = vmul.f32 %v1042_v44, %v1022_v60  ;;  %v440_v14 = vpop.permute.xlu2 %439 }
  0xcf   : > { %6978 = sst [smem:[#allocation88_spill]] %s4013_s2  ;;  %v4180_v59 = vmul.f32 %v1036_v43, %v1022_v60  ;;  %v4188_v11 = vadd.f32 %v1018_v52, %v640_v25  ;;  %447 = vst.msk [vmem:[#allocation2 + $0x58] sm:$0xf] %vm389_vm1, %v440_v14  ;;  %v746_v52 = vadd.f32 %v744_v61, %v726_v62  ;;  %v771_v14 = vadd.f32 %v769_v39, %v4015_v31 }
  0xd0   : > { %s4026_s6 = sld [smem:[#allocation8 + $0x21]]  ;;  %v1054_v51 = vstv %s6979_s17  ;;  %v752_v13 = vadd.f32 %v750_v42, %v732_v23  ;;  %v907_v26 = vld [vmem:[#allocation2 + $0x30] sm:$0xff]  ;;  %v438_v42 = vpop.permute.xlu1 %437 }
  0xd1   : > { %6980 = sst [smem:[#allocation89_spill]] %s4020_s3  ;;  %7034 = vst [vmem:[#allocation93_spill] sm:$0xff] %v4188_v11  ;;  %v4196_v20 = vmul.f32 %v1054_v51, %v1022_v60  ;;  %v759_v60 = vadd.f32 %v757_v40, %v4007_v29  ;;  %v927_v61 = vld [vmem:[#allocation2 + $0x31] sm:$0xff]  ;;  %v4242_v62 = vmul.f32 %v910_v1, %v907_v26  ;;  %v4246_v5 = vmul.f32 %v916_v2, %v907_v26 }
  0xd2   : > { %s4032_s16 = sld [smem:[#allocation8 + $0x3c]]  ;;  %v4218_v29 = vld [vmem:[#allocation2 + $0x32] sm:$0xff]  ;;  %v4250_v58 = vmul.f32 %v922_v3, %v907_v26  ;;  %v4254_v23 = vmul.f32 %v930_v28, %v927_v61  ;;  %446 = vst.msk [vmem:[#allocation2 + $0x50] sm:$0xff] %vm386_vm0, %v438_v42  ;;  %v4263_v1 = vmul.f32 %v942_v30, %v927_v61  ;;  %v4267_v2 = vmul.f32 %v948_v32, %v927_v61 }
  0xd3   : > { %s4047_s14 = sld [smem:[#allocation11 + $0x15]]  ;;  %v6776_v53 = vstv %s6981_s5  ;;  %7040 = vst [vmem:[#allocation96_spill] sm:$0xff] %v4218_v29  ;;  %v4271_v3 = vmul.f32 %v954_v33, %v927_v61  ;;  %v4275_v28 = vmul.f32 %v960_v34, %v927_v61  ;;  %v1011_v30 = vmul.f32 %v1010_v38, %v4218_v29  ;;  %v1059_v42 = vld [vmem:[#allocation2 + $0x34] sm:$0xff] }
  0xd4   : > { %v6770_v54 = vstv %s6982_s0  ;;  %s4053_s8 = sld [smem:[#allocation11 + $0x60]]  ;;  %v4200_v22 = vmul.f32 %v6776_v53, %v1060_v12 }
  0xd5   : > { %s4059_s10 = sld [smem:[#allocation11 + $0xab]]  ;;  %v4205_v24 = vmul.f32 %v6770_v54, %v1060_v12 }
  0xd6   : > { %6983 = sst [smem:[#allocation70_spill]] %s4026_s6 }
  0xd7   : > { %s4109_s3 = sld [smem:[#allocation11 + $0xc]]  ;;  %7035 = vst [vmem:[#allocation94_spill] sm:$0xff] %v4205_v24 }
  0xd8   : > { %6984 = sst [smem:[#allocation90_spill]] %s4032_s16 }
  0xd9   : > { %6989 = sst [smem:[#allocation34_spill]] %s4047_s14 }
  0xda   : > { %6994 = sst [smem:[#allocation35_spill]] %s4053_s8 }
  0xdb   : > { %6999 = sst [smem:[#allocation36_spill]] %s4059_s10 }
  0xdc   : > { %s7015_s14 = sld [smem:[#allocation62_spill]] }
  0xdd   : > { %s7016_s16 = sld [smem:[#allocation63_spill]]  ;;  %v6774_v10 = vstv %s4109_s3 }
  0xde   : > { %s7017_s18 = sld [smem:[#allocation64_spill]]  ;;  %v4223_v21 = vmul.f32 %v6774_v10, %v4105_v4  ;;  %v754_v10 = vld [vmem:[#allocation2 + $0x20] sm:$0xff] }
  0xdf   : > { %s4115_s20 = sld [smem:[#allocation11 + $0x57]] }
  0xe0   : > { %s4127_s10 = sld [smem:[#allocation11 + $0xa2]] }
  0xe1   : > { %s7021_s5 = sld [smem:[#allocation48_spill]] }
  0xe2   : > { %s7022_s11 = sld [smem:[#allocation49_spill]]  ;;  %v7041_v26 = vstv %s7015_s14 }
  0xe3   : > { %s4143_s19 = sld [smem:[#allocation8 + $0x4]]  ;;  %v1017_v32 = vmul.f32 %v7041_v26, %v4218_v29  ;;  %v773_v26 = vld [vmem:[#allocation2 + $0x19] sm:$0xff] }
  0xe4   : > { %s7023_s30 = sld [smem:[#allocation50_spill]]  ;;  %v7044_v34 = vstv %s7017_s18 }
  0xe5   : > { %s7031_s15 = sld [smem:[#allocation69_spill]]  ;;  %v6773_v9 = vstv %s4115_s20 }
  0xe6   : > { %v6771_v54 = vstv %s4127_s10  ;;  %v4228_v31 = vmul.f32 %v6773_v9, %v4105_v4  ;;  %v7042_v9 = vstv %s7016_s16  ;;  %s7047_s6 = sld [smem:[#allocation74_spill]] }
  0xe7   : > { %v4233_v39 = vmul.f32 %v6771_v54, %v4105_v4  ;;  %v1021_v54 = vld [vmem:[#allocation2 + $0x33] sm:$0xff]  ;;  %s7049_s24 = sld [smem:[#allocation75_spill]] }
  0xe8   : > { %v4288_v33 = vmul.f32 %v7042_v9, %v1021_v54  ;;  %v4300_v38 = vmul.f32 %v1042_v44, %v1021_v54  ;;  %v4308_v9 = vadd.f32 %v1011_v30, %v638_v19  ;;  %s7052_s9 = sld [smem:[#allocation76_spill]]  ;;  %v774_v44 = vld [vmem:[#allocation2 + $0x21] sm:$0xff]  ;;  %v4320_v53 = vmul.f32 %v1054_v51, %v1021_v54 }
  0xe9   : > { %v6772_v12 = vstv %s4143_s19  ;;  %v7062_v30 = vstv %s7021_s5  ;;  %s7066_s25 = sld [smem:[#allocation77_spill]] }
  0xea   : > { %v4238_v40 = vmul.f32 %v6772_v12, %v4105_v4  ;;  %v4259_v12 = vmul.f32 %v936_v18, %v927_v61  ;;  %v1005_v18 = vmul.f32 %v1004_v35, %v4218_v29  ;;  %7043 = vst [vmem:[#allocation97_spill] sm:$0xff] %v4288_v33  ;;  %v4292_v61 = vmul.f32 %v7044_v34, %v1021_v54  ;;  %s4342_s26 = sld [smem:[#allocation8 + $0x1f]]  ;;  %v849_v33 = vld [vmem:[#allocation2 + $0x1b] sm:$0xff]  ;;  %v850_v29 = vld [vmem:[#allocation2 + $0x23] sm:$0xff] }
  0xeb   : > { %v4296_v35 = vmul.f32 %v1036_v43, %v1021_v54  ;;  %7048 = vst [vmem:[#allocation100_spill] sm:$0xff] %v4300_v38  ;;  %v4312_v34 = vadd.f32 %v1017_v32, %v640_v25  ;;  %v4316_v43 = vmul.f32 %v1048_v45, %v1021_v54  ;;  %v7056_v11 = vstv %s7031_s15  ;;  %s4352_s5 = sld [smem:[#allocation8 + $0x3a]] }
  0xec   : > { %7045 = vst [vmem:[#allocation98_spill] sm:$0xff] %v4292_v61  ;;  %v4304_v55 = vadd.f32 %v1005_v18, %v636_v17  ;;  %v4324_v56 = vmul.f32 %v7056_v11, %v1059_v42  ;;  %v7058_v17 = vstv %s6982_s0  ;;  %v7063_v25 = vstv %s7022_s11  ;;  %s7071_s0 = sld [smem:[#allocation78_spill]] }
  0xed   : > { %7046 = vst [vmem:[#allocation99_spill] sm:$0xff] %v4296_v35  ;;  %v4328_v18 = vmul.f32 %v7058_v17, %v1059_v42  ;;  %v764_v32 = vmul.f32 %v7063_v25, %v754_v10  ;;  %v7064_v45 = vstv %s7023_s30  ;;  %v7065_v7 = vstv %s7047_s6  ;;  %s4354_s29 = sld [smem:[#allocation11 + $0x3]]  ;;  %v811_v35 = vld [vmem:[#allocation2 + $0x1a] sm:$0xff] }
  0xee   : > { %7050 = vst [vmem:[#allocation101_spill] sm:$0xff] %v4304_v55  ;;  %v7060_v55 = vstv %s3906_s7  ;;  %v777_v51 = vmul.f32 %v7065_v7, %v773_v26  ;;  %v7067_v54 = vmov %v7065_v7  ;;  %s7072_s7 = sld [smem:[#allocation71_spill]] }
  0xef   : > { %7051 = vst [vmem:[#allocation102_spill] sm:$0xff] %v4308_v9  ;;  %v4332_v19 = vmul.f32 %v7060_v55, %v1059_v42  ;;  %v758_v9 = vmul.f32 %v7062_v30, %v754_v10  ;;  %v778_v11 = vmul.f32 %v7067_v54, %v774_v44  ;;  %v7070_v55 = vstv %s7052_s9  ;;  %s7073_s11 = sld [smem:[#allocation79_spill]] }
  0xf0   : > { %7053 = vst [vmem:[#allocation103_spill] sm:$0xff] %v4312_v34  ;;  %v770_v34 = vmul.f32 %v7064_v45, %v754_v10  ;;  %v789_v42 = vmul.f32 %v7070_v55, %v773_v26  ;;  %v766_v25 = vadd.f32 %v764_v32, %v746_v52  ;;  %v779_v45 = vadd.f32 %v777_v51, %v759_v60  ;;  %s7076_s14 = sld [smem:[#allocation72_spill]] }
  0xf1   : > { %7054 = vst [vmem:[#allocation104_spill] sm:$0xff] %v4316_v43  ;;  %v760_v30 = vadd.f32 %v758_v9, %v740_v27  ;;  %v7074_v54 = vmov %v7070_v55  ;;  %s7077_s16 = sld [smem:[#allocation80_spill]] }
  0xf2   : > { %7055 = vst [vmem:[#allocation105_spill] sm:$0xff] %v4320_v53  ;;  %v772_v10 = vadd.f32 %v770_v34, %v752_v13  ;;  %s4360_s18 = sld [smem:[#allocation11 + $0x4e]]  ;;  %v7080_v9 = vstv %s7071_s0  ;;  %v812_v34 = vld [vmem:[#allocation2 + $0x22] sm:$0xff] }
  0xf3   : > { %7057 = vst [vmem:[#allocation106_spill] sm:$0xff] %v4324_v56  ;;  %v7068_v56 = vstv %s7049_s24  ;;  %v780_v13 = vadd.f32 %v778_v11, %v760_v30  ;;  %s7079_s21 = sld [smem:[#allocation73_spill]]  ;;  %v7083_v51 = vmov %v7080_v9 }
  0xf4   : > { %7059 = vst [vmem:[#allocation107_spill] sm:$0xff] %v4328_v18  ;;  %v783_v17 = vmul.f32 %v7068_v56, %v773_v26  ;;  %v7069_v18 = vmov %v7068_v56  ;;  %v790_v56 = vmul.f32 %v7074_v54, %v774_v44  ;;  %s7081_s30 = sld [smem:[#allocation81_spill]] }
  0xf5   : > { %7061 = vst [vmem:[#allocation108_spill] sm:$0xff] %v4332_v19  ;;  %v784_v53 = vmul.f32 %v7069_v18, %v774_v44  ;;  %v791_v18 = vadd.f32 %v789_v42, %v771_v14  ;;  %v7075_v19 = vstv %s7066_s25  ;;  %s4366_s4 = sld [smem:[#allocation11 + $0x99]]  ;;  %v7084_v11 = vstv %s7073_s11 }
  0xf6   : > { %v785_v7 = vadd.f32 %v783_v17, %v765_v0  ;;  %v795_v55 = vmul.f32 %v7075_v19, %v773_v26  ;;  %v7078_v52 = vmov %v7075_v19  ;;  %v801_v0 = vmul.f32 %v7080_v9, %v773_v26  ;;  %s7085_s15 = sld [smem:[#allocation82_spill]] }
  0xf7   : > { %v786_v27 = vadd.f32 %v784_v53, %v766_v25  ;;  %v796_v60 = vmul.f32 %v7078_v52, %v774_v44  ;;  %v792_v14 = vadd.f32 %v790_v56, %v772_v10  ;;  %v7082_v19 = vstv %s7072_s7  ;;  %s4374_s13 = sld [smem:[#allocation11 + $0x8]] }
  0xf8   : > { %v797_v32 = vadd.f32 %v795_v55, %v7082_v19  ;;  %v802_v17 = vmul.f32 %v7083_v51, %v774_v44  ;;  %v807_v53 = vmul.f32 %v7084_v11, %v773_v26  ;;  %v7086_v42 = vmov %v7082_v19  ;;  %s7090_s22 = sld [smem:[#allocation83_spill]] }
  0xf9   : > { %v798_v30 = vadd.f32 %v796_v60, %v7086_v42  ;;  %v7087_v25 = vstv %s7076_s14  ;;  %v7088_v52 = vmov %v7084_v11  ;;  %v7089_v43 = vstv %s7077_s16  ;;  %s4384_s2 = sld [smem:[#allocation11 + $0x53]] }
  0xfa   : > { %v803_v54 = vadd.f32 %v801_v0, %v7087_v25  ;;  %v808_v9 = vmul.f32 %v7088_v52, %v774_v44  ;;  %v815_v10 = vmul.f32 %v7089_v43, %v811_v35  ;;  %v7091_v56 = vmov %v7087_v25  ;;  %s7095_s27 = sld [smem:[#allocation84_spill]] }
  0xfb   : > { %v804_v55 = vadd.f32 %v802_v17, %v7091_v56  ;;  %v7092_v19 = vstv %s7079_s21  ;;  %v7093_v38 = vmov %v7089_v43  ;;  %v7094_v11 = vstv %s7081_s30  ;;  %s4394_s28 = sld [smem:[#allocation11 + $0x9e]] }
  0xfc   : > { %v809_v51 = vadd.f32 %v807_v53, %v7092_v19  ;;  %v816_v26 = vmul.f32 %v7093_v38, %v812_v34  ;;  %v821_v61 = vmul.f32 %v7094_v11, %v811_v35  ;;  %v7096_v60 = vmov %v7092_v19  ;;  %s4402_s23 = sld [smem:[#allocation8 + $0x2]] }
  0xfd   : > { %v810_v0 = vadd.f32 %v808_v9, %v7096_v60  ;;  %v817_v44 = vadd.f32 %v815_v10, %v779_v45  ;;  %v7097_v42 = vmov %v7094_v11  ;;  %v7098_v43 = vstv %s7085_s15  ;;  %s7099_s1 = sld [smem:[#allocation85_spill]] }
  0xfe   : > { %v822_v25 = vmul.f32 %v7097_v42, %v812_v34  ;;  %v827_v52 = vmul.f32 %v7098_v43, %v811_v35  ;;  %v818_v17 = vadd.f32 %v816_v26, %v780_v13  ;;  %v823_v53 = vadd.f32 %v821_v61, %v785_v7  ;;  %s7102_s8 = sld [smem:[#allocation86_spill]] }
  0xff   : > { %v7100_v38 = vmov %v7098_v43  ;;  %v7101_v19 = vstv %s7090_s22  ;;  %s4408_s12 = sld [smem:[#allocation8 + $0x1d]] }
 0x100   : > { %v828_v56 = vmul.f32 %v7100_v38, %v812_v34  ;;  %v833_v11 = vmul.f32 %v7101_v19, %v811_v35  ;;  %v824_v45 = vadd.f32 %v822_v25, %v786_v27  ;;  %v829_v9 = vadd.f32 %v827_v52, %v791_v18  ;;  %s7105_s17 = sld [smem:[#allocation87_spill]] }
 0x101   : > { %v7103_v10 = vmov %v7101_v19  ;;  %v7104_v42 = vstv %s7095_s27  ;;  %s4414_s6 = sld [smem:[#allocation8 + $0x38]] }
 0x102   : > { %v834_v60 = vmul.f32 %v7103_v10, %v812_v34  ;;  %v839_v43 = vmul.f32 %v7104_v42, %v811_v35  ;;  %v830_v61 = vadd.f32 %v828_v56, %v792_v14  ;;  %v835_v7 = vadd.f32 %v833_v11, %v797_v32  ;;  %s7109_s24 = sld [smem:[#allocation88_spill]] }
 0x103   : > { %v7107_v13 = vmov %v7104_v42  ;;  %v7108_v38 = vstv %s7099_s1  ;;  %s4420_s9 = sld [smem:[#allocation11 + $0xd]] }
 0x104   : > { %v840_v26 = vmul.f32 %v7107_v13, %v812_v34  ;;  %v845_v19 = vmul.f32 %v7108_v38, %v811_v35  ;;  %v836_v18 = vadd.f32 %v834_v60, %v798_v30  ;;  %v841_v27 = vadd.f32 %v839_v43, %v803_v54  ;;  %s7112_s25 = sld [smem:[#allocation89_spill]] }
 0x105   : > { %v7110_v25 = vmov %v7108_v38  ;;  %v7111_v10 = vstv %s7102_s8  ;;  %s4426_s0 = sld [smem:[#allocation11 + $0x58]]  ;;  %v436_v38 = vpop.permute.xlu0 %435 }
 0x106   : > { %v846_v52 = vmul.f32 %v7110_v25, %v812_v34  ;;  %v853_v42 = vmul.f32 %v7111_v10, %v849_v33  ;;  %v842_v14 = vadd.f32 %v840_v26, %v804_v55  ;;  %v847_v32 = vadd.f32 %v845_v19, %v809_v51  ;;  %s4432_s7 = sld [smem:[#allocation11 + $0xa3]]  ;;  %445 = vst.msk [vmem:[#allocation2 + $0x48] sm:$0xff] %vm386_vm0, %v436_v38 }
 0x107   : > { %7106 = sst [smem:[#allocation37_spill]] %s4414_s6  ;;  %v7114_v56 = vmov %v7111_v10  ;;  %v7115_v13 = vstv %s7105_s17 }
 0x108   : > { %v854_v11 = vmul.f32 %v7114_v56, %v850_v29  ;;  %v859_v57 = vmul.f32 %v7115_v13, %v849_v33  ;;  %v848_v35 = vadd.f32 %v846_v52, %v810_v0  ;;  %s7116_s11 = sld [smem:[#allocation70_spill]]  ;;  %v855_v30 = vadd.f32 %v853_v42, %v817_v44  ;;  %v887_v56 = vld [vmem:[#allocation2 + $0x1c] sm:$0xff] }
 0x109   : > { %v7117_v54 = vmov %v7115_v13  ;;  %v7118_v60 = vstv %s7109_s24  ;;  %s4438_s14 = sld [smem:[#allocation8 + $0x5]] }
 0x10a   : > { %v860_v34 = vmul.f32 %v7117_v54, %v850_v29  ;;  %v865_v43 = vmul.f32 %v7118_v60, %v849_v33  ;;  %v856_v55 = vadd.f32 %v854_v11, %v818_v17  ;;  %s7119_s16 = sld [smem:[#allocation90_spill]]  ;;  %v861_v51 = vadd.f32 %v859_v57, %v823_v53  ;;  %v888_v57 = vld [vmem:[#allocation2 + $0x24] sm:$0xff] }
 0x10b   : > { %7113 = sst [smem:[#allocation38_spill]] %s4426_s0  ;;  %v7120_v26 = vmov %v7118_v60  ;;  %v7121_v25 = vstv %s7112_s25 }
 0x10c   : > { %v866_v19 = vmul.f32 %v7120_v26, %v850_v29  ;;  %v871_v10 = vmul.f32 %v7121_v25, %v849_v33  ;;  %s4444_s21 = sld [smem:[#allocation8 + $0x20]]  ;;  %v862_v0 = vadd.f32 %v860_v34, %v824_v45  ;;  %v867_v44 = vadd.f32 %v865_v43, %v829_v9 }
 0x10d   : > { %s7122_s30 = sld [smem:[#allocation34_spill]]  ;;  %v7123_v52 = vmov %v7121_v25 }
 0x10e   : > { %v872_v42 = vmul.f32 %v7123_v52, %v850_v29  ;;  %v7124_v13 = vstv %s7116_s11  ;;  %s7125_s15 = sld [smem:[#allocation35_spill]]  ;;  %v868_v53 = vadd.f32 %v866_v19, %v830_v61  ;;  %v873_v11 = vadd.f32 %v871_v10, %v835_v7 }
 0x10f   : > { %v877_v17 = vmul.f32 %v7124_v13, %v849_v33  ;;  %s4451_s22 = sld [smem:[#allocation8 + $0x3b]]  ;;  %v7126_v54 = vmov %v7124_v13 }
 0x110   : > { %v878_v60 = vmul.f32 %v7126_v54, %v850_v29  ;;  %v7127_v26 = vstv %s7119_s16  ;;  %s7128_s27 = sld [smem:[#allocation36_spill]]  ;;  %v874_v45 = vadd.f32 %v872_v42, %v836_v18  ;;  %s7138_s16 = smov 124  }
 0x111   : > { %v883_v25 = vmul.f32 %v7127_v26, %v849_v33  ;;  %s4457_s1 = sld [smem:[#allocation11 + $0x12]]  ;;  %v879_v9 = vadd.f32 %v877_v17, %v841_v27  ;;  %v7130_v34 = vmov %v7127_v26 }
 0x112   : > { %s7129_s8 = sld [smem:[#allocation30_spill]]  ;;  %v884_v43 = vmul.f32 %v7130_v34, %v850_v29  ;;  %v880_v61 = vadd.f32 %v878_v60, %v842_v14  ;;  %v4481_v60 = vadd.f32 %v4267_v2, %v873_v11  ;;  %v459_v11 = vpop.permute.xlu2 %458 }
 0x113   : > { %v7131_v38 = vstv %s7122_s30  ;;  %s4463_s17 = sld [smem:[#allocation11 + $0x5d]]  ;;  %v885_v7 = vadd.f32 %v883_v25, %v847_v32  ;;  %v4494_v2 = vadd.f32 %v4271_v3, %v879_v9  ;;  %466 = vst.msk [vmem:[#allocation2 + $0x70] sm:$0xf] %vm389_vm1, %v459_v11  ;;  %v1094_v9 = vstv %s4366_s4 }
 0x114   : > { %v891_v52 = vmul.f32 %v7131_v38, %v887_v56  ;;  %v7133_v19 = vmov %v7131_v38  ;;  %v7134_v13 = vstv %s7125_s15  ;;  %s4469_s24 = sld [smem:[#allocation11 + $0xa8]]  ;;  %v886_v33 = vadd.f32 %v884_v43, %v848_v35 }
 0x115   : > { %v892_v10 = vmul.f32 %v7133_v19, %v888_v57  ;;  %v897_v54 = vmul.f32 %v7134_v13, %v887_v56  ;;  %v7135_v24 = vmov %v7134_v13  ;;  %s4475_s25 = sld [smem:[#allocation8 + $0x8]]  ;;  %v1102_v43 = vstv %s4374_s13 }
 0x116   : > { %v893_v26 = vadd.f32 %v891_v52, %v855_v30  ;;  %v898_v18 = vmul.f32 %v7135_v24, %v888_v57  ;;  %v7136_v27 = vstv %s7128_s27  ;;  %s4483_s11 = sld [smem:[#allocation8 + $0x23]]  ;;  %v1114_v38 = vstv %s4394_s28 }
 0x117   : > { %v903_v29 = vmul.f32 %v7136_v27, %v887_v56  ;;  %v894_v17 = vadd.f32 %v892_v10, %v856_v55  ;;  %v899_v34 = vadd.f32 %v897_v54, %v861_v51  ;;  %v7137_v14 = vmov %v7136_v27  ;;  %s4488_s30 = sld [smem:[#allocation8 + $0x3e]] }
 0x118   : > { %v2924_v42 = vld [vmem:[%s7129_s8 + $0x30] sm:$0xff]  ;;  %v904_v32 = vmul.f32 %v7137_v14, %v888_v57  ;;  %v900_v35 = vadd.f32 %v898_v18, %v862_v0  ;;  %v913_v24 = vadd.f32 %v4242_v62, %v893_v26  ;;  %v952_v56 = vadd.f32 %v4123_v6, %v874_v45  ;;  %v2925_v25 = vld [vmem:[%s7129_s8 + $0x38] sm:$0xff]  ;;  %s4496_s15 = sld [smem:[#allocation11 + $0x17]] }
 0x119   : > { %7132 = sst [smem:[#allocation39_spill]] %s4463_s17  ;;  %622 = vrot.lane.b32.xlu0 %v2924_v42, %s7138_s16  ;;  %v905_v30 = vadd.f32 %v903_v29, %v867_v44  ;;  %v914_v51 = vadd.f32 %v4036_v46, %v894_v17  ;;  %v919_v57 = vadd.f32 %v4246_v5, %v899_v34  ;;  %624 = vrot.lane.b32.xlu1 %v2925_v25, %s7138_s16  ;;  %v457_v5 = vpop.permute.xlu1 %456  ;;  %v1088_v45 = vstv %s4360_s18  ;;  %v1080_v17 = vld [vmem:[#allocation2 + $0x50] sm:$0xff] }
 0x11a   : > { %v906_v55 = vadd.f32 %v904_v32, %v868_v53  ;;  %v920_v62 = vadd.f32 %v4040_v49, %v900_v35  ;;  %v4502_v0 = vadd.f32 %v4254_v23, %v913_v24  ;;  %v958_v46 = vadd.f32 %v4131_v47, %v880_v61  ;;  %s4505_s27 = sld [smem:[#allocation11 + $0x62]]  ;;  %465 = vst.msk [vmem:[#allocation2 + $0x68] sm:$0xff] %vm386_vm0, %v457_v5  ;;  %v455_v23 = vpop.permute.xlu0 %454  ;;  %v2899_v5 = vld [vmem:[%s7129_s8 + $0x28] sm:$0xf] }
 0x11b   : > { %v925_v6 = vadd.f32 %v4250_v58, %v905_v30  ;;  %v934_v49 = vadd.f32 %v4099_v36, %v914_v51  ;;  %v4511_v58 = vadd.f32 %v4259_v12, %v919_v57  ;;  %v4514_v47 = vadd.f32 %v4275_v28, %v885_v7  ;;  %s4516_s16 = sld [smem:[#allocation11 + $0xad]]  ;;  %464 = vst.msk [vmem:[#allocation2 + $0x60] sm:$0xff] %vm386_vm0, %v455_v23 }
 0x11c   : > { %v926_v3 = vadd.f32 %v4044_v50, %v906_v55  ;;  %v940_v50 = vadd.f32 %v4103_v37, %v920_v62  ;;  %v964_v12 = vadd.f32 %v4135_v48, %v886_v33  ;;  %v992_v28 = vstv %s4342_s26  ;;  %474 = vst.msk [vmem:[#allocation2 + $0x88] sm:$0xf] %vm389_vm1, %v2899_v5  ;;  %s4706_s18 = sld [smem:[#allocation11 + $0x63]] }
 0x11d   : > { %v4521_v36 = vadd.f32 %v4263_v1, %v925_v6  ;;  %v994_v53 = vmul.f32 %v992_v28, %v4105_v4  ;;  %v998_v37 = vstv %s4352_s5  ;;  %v1082_v1 = vstv %s4354_s29  ;;  %v2898_v6 = vld [vmem:[%s7129_s8 + $0x20] sm:$0xff]  ;;  %s4699_s5 = sld [smem:[#allocation11 + $0x18]] }
 0x11e   : > { %v946_v44 = vadd.f32 %v4119_v41, %v926_v3  ;;  %v1000_v48 = vmul.f32 %v998_v37, %v4105_v4  ;;  %v1108_v41 = vstv %s4384_s2  ;;  %v1120_v52 = vstv %s4402_s23  ;;  %473 = vst.msk [vmem:[#allocation2 + $0x80] sm:$0xff] %vm386_vm0, %v2898_v6  ;;  %s4715_s4 = sld [smem:[#allocation11 + $0xae]] }
 0x11f   : > { %v1126_v61 = vstv %s4408_s12  ;;  %v1132_v7 = vstv %s4414_s6  ;;  %v1140_v19 = vstv %s4420_s9  ;;  %v1146_v10 = vstv %s4426_s0  ;;  %s4599_s6 = sld [smem:[#allocation11 + $0x4]] }
 0x120   : > { %v1152_v13 = vstv %s4432_s7  ;;  %v1158_v4 = vstv %s4438_s14  ;;  %v1164_v54 = vstv %s4444_s21  ;;  %v1170_v33 = vstv %s4451_s22  ;;  %s4609_s0 = sld [smem:[#allocation11 + $0x4f]] }
 0x121   : > { %v1178_v26 = vstv %s4457_s1  ;;  %v1184_v18 = vstv %s4463_s17  ;;  %v1190_v27 = vstv %s4469_s24  ;;  %v1196_v29 = vstv %s4475_s25  ;;  %s4624_s17 = sld [smem:[#allocation11 + $0x54]] }
 0x122   : > { %v1202_v42 = vstv %s4483_s11  ;;  %v1208_v34 = vstv %s4488_s30  ;;  %v1216_v14 = vstv %s4496_s15  ;;  %v1222_v32 = vstv %s4505_s27  ;;  %s4721_s13 = sld [smem:[#allocation11 + $0x19]] }
 0x123   : > { %v1228_v35 = vstv %s4516_s16  ;;  %v972_v30 = vadd.f32 %v4223_v21, %v934_v49  ;;  %v978_v24 = vadd.f32 %v4228_v31, %v940_v50  ;;  %v984_v25 = vadd.f32 %v4233_v39, %v946_v44  ;;  %s4725_s2 = sld [smem:[#allocation11 + $0x64]] }
 0x124   : > { %v990_v55 = vadd.f32 %v4238_v40, %v952_v56  ;;  %v996_v51 = vadd.f32 %v994_v53, %v958_v46  ;;  %v1002_v57 = vadd.f32 %v1000_v48, %v964_v12  ;;  %v1084_v11 = vmul.f32 %v1082_v1, %v1080_v17  ;;  %v1100_v56 = vld [vmem:[#allocation2 + $0x51] sm:$0xff]  ;;  %s4729_s23 = sld [smem:[#allocation11 + $0xaf]] }
 0x125   : > { %v1090_v62 = vmul.f32 %v1088_v45, %v1080_v17  ;;  %v1028_v21 = vadd.f32 %v4150_v15, %v972_v30  ;;  %v1034_v31 = vadd.f32 %v4154_v16, %v978_v24  ;;  %v1040_v39 = vadd.f32 %v4180_v59, %v984_v25  ;;  %v7139_v59 = vld [vmem:[#allocation94_spill] sm:$0xff]  ;;  %v1138_v48 = vld [vmem:[#allocation2 + $0x52] sm:$0xff]  ;;  %7141 = sst [smem:[#allocation40_spill]] %s4599_s6 }
 0x126   : > { %v1046_v40 = vadd.f32 %v4184_v63, %v990_v55  ;;  %v1052_v46 = vadd.f32 %v4192_v8, %v996_v51  ;;  %v1058_v3 = vadd.f32 %v4196_v20, %v1002_v57  ;;  %v1096_v49 = vmul.f32 %v1094_v9, %v1080_v17  ;;  %v7140_v63 = vld [vmem:[#allocation95_spill] sm:$0xff]  ;;  %7142 = sst [smem:[#allocation41_spill]] %s4609_s0 }
 0x127   : > { %v1104_v15 = vmul.f32 %v1102_v43, %v1100_v56  ;;  %v1066_v16 = vadd.f32 %v4200_v22, %v1028_v21  ;;  %v1072_v23 = vadd.f32 %v7139_v59, %v1034_v31  ;;  %v1078_v50 = vadd.f32 %v7140_v63, %v1040_v39  ;;  %v1176_v39 = vld [vmem:[#allocation2 + $0x53] sm:$0xff]  ;;  %s4613_s6 = sld [smem:[#allocation11 + $0x9a]] }
 0x128   : > { %v1110_v12 = vmul.f32 %v1108_v41, %v1100_v56  ;;  %v1116_v8 = vmul.f32 %v1114_v38, %v1100_v56  ;;  %v1122_v20 = vmul.f32 %v1120_v52, %v1100_v56  ;;  %v1128_v44 = vmul.f32 %v1126_v61, %v1100_v56  ;;  %v1214_v59 = vld [vmem:[#allocation2 + $0x54] sm:$0xff]  ;;  %s4618_s0 = sld [smem:[#allocation11 + $0x9]] }
 0x129   : > { %v1134_v53 = vmul.f32 %v1132_v7, %v1100_v56  ;;  %v1086_v22 = vadd.f32 %v1084_v11, %v1066_v16  ;;  %v1092_v17 = vadd.f32 %v1090_v62, %v1072_v23  ;;  %v1098_v30 = vadd.f32 %v1096_v49, %v1078_v50  ;;  %s4737_s12 = sld [smem:[#allocation11 + $0x1e]] }
 0x12a   : > { %v1142_v24 = vmul.f32 %v1140_v19, %v1138_v48  ;;  %v1124_v25 = vadd.f32 %v1122_v20, %v1046_v40  ;;  %v1130_v55 = vadd.f32 %v1128_v44, %v1052_v46  ;;  %v1148_v57 = vmul.f32 %v1146_v10, %v1138_v48  ;;  %v486_v46 = vpop.permute.xlu2 %485  ;;  %s4744_s9 = sld [smem:[#allocation11 + $0x69]] }
 0x12b   : > { %v1136_v51 = vadd.f32 %v1134_v53, %v1058_v3  ;;  %v1106_v6 = vadd.f32 %v1104_v15, %v1086_v22  ;;  %v1112_v5 = vadd.f32 %v1110_v12, %v1092_v17  ;;  %v1118_v21 = vadd.f32 %v1116_v8, %v1098_v30  ;;  %493 = vst.msk [vmem:[#allocation2 + $0xa0] sm:$0xf] %vm389_vm1, %v486_v46  ;;  %s7162_s7 = sld [smem:[#allocation40_spill]] }
 0x12c   : > { %v1154_v31 = vmul.f32 %v1152_v13, %v1138_v48  ;;  %v1160_v11 = vmul.f32 %v1158_v4, %v1138_v48  ;;  %v1166_v62 = vmul.f32 %v1164_v54, %v1138_v48  ;;  %v1172_v40 = vmul.f32 %v1170_v33, %v1138_v48  ;;  %v2897_v48 = vld [vmem:[%s7129_s8 + $0x18] sm:$0xff]  ;;  %s4645_s8 = sld [smem:[#allocation11 + $0xe]] }
 0x12d   : > { %v1180_v56 = vmul.f32 %v1178_v26, %v1176_v39  ;;  %v1144_v3 = vadd.f32 %v1142_v24, %v1106_v6  ;;  %v1150_v49 = vadd.f32 %v1148_v57, %v1112_v5  ;;  %v1186_v16 = vmul.f32 %v1184_v18, %v1176_v39  ;;  %472 = vst.msk [vmem:[#allocation2 + $0x78] sm:$0xff] %vm386_vm0, %v2897_v48  ;;  %v7145_v57 = vld [vmem:[#allocation96_spill] sm:$0xff]  ;;  %s4746_s14 = sld [smem:[#allocation11 + $0xb4]] }
 0x12e   : > { %v1156_v15 = vadd.f32 %v1154_v31, %v1118_v21  ;;  %v1162_v23 = vadd.f32 %v1160_v11, %v1124_v25  ;;  %v1168_v63 = vadd.f32 %v1166_v62, %v1130_v55  ;;  %v1174_v50 = vadd.f32 %v1172_v40, %v1136_v51  ;;  %7143 = sst [smem:[#allocation54_spill]] %s4618_s0  ;;  %v1079_v21 = vld [vmem:[#allocation2 + $0x48] sm:$0xff] }
 0x12f   : > { %v1192_v12 = vmul.f32 %v1190_v27, %v1176_v39  ;;  %v1182_v8 = vadd.f32 %v1180_v56, %v1144_v3  ;;  %v1188_v20 = vadd.f32 %v1186_v16, %v1150_v49  ;;  %v1198_v44 = vmul.f32 %v1196_v29, %v1176_v39  ;;  %s4633_s0 = sld [smem:[#allocation11 + $0x9f]] }
 0x130   : > { %v1204_v53 = vmul.f32 %v1202_v42, %v1176_v39  ;;  %v1210_v17 = vmul.f32 %v1208_v34, %v1176_v39  ;;  %v1218_v30 = vmul.f32 %v1216_v14, %v1214_v59  ;;  %v1224_v24 = vmul.f32 %v1222_v32, %v1214_v59  ;;  %s4752_s21 = sld [smem:[#allocation11 + $0x23]] }
 0x131   : > { %v1194_v22 = vadd.f32 %v1192_v12, %v1156_v15  ;;  %v4636_v25 = vadd.f32 %v1198_v44, %v1162_v23  ;;  %v1230_v51 = vmul.f32 %v1228_v35, %v1214_v59  ;;  %v7146_v6 = vstv %s4109_s3  ;;  %s4669_s3 = sld [smem:[#allocation11 + $0xa4]]  ;;  %v7151_v44 = vld [vmem:[#allocation98_spill] sm:$0xff] }
 0x132   : > { %v4638_v55 = vadd.f32 %v1204_v53, %v1168_v63  ;;  %v969_v5 = vmul.f32 %v7146_v6, %v7145_v57  ;;  %v4647_v31 = vadd.f32 %v1210_v17, %v1174_v50  ;;  %v4649_v39 = vadd.f32 %v1218_v30, %v1182_v8  ;;  %v7156_v30 = vld [vmem:[#allocation105_spill] sm:$0xff]  ;;  %s7163_s22 = sld [smem:[#allocation41_spill]] }
 0x133   : > { %v4651_v11 = vadd.f32 %v1224_v24, %v1188_v20  ;;  %v7147_v62 = vstv %s4115_s20  ;;  %v4658_v56 = vadd.f32 %v1230_v51, %v1194_v22  ;;  %v7148_v46 = vstv %s4127_s10  ;;  %s4678_s20 = sld [smem:[#allocation11 + $0x13]]  ;;  %v7154_v22 = vld [vmem:[#allocation99_spill] sm:$0xff]  ;;  %v7157_v51 = vld [vmem:[#allocation106_spill] sm:$0xff] }
 0x134   : > { %v975_v40 = vmul.f32 %v7147_v62, %v7145_v57  ;;  %v981_v3 = vmul.f32 %v7148_v46, %v7145_v57  ;;  %v7149_v49 = vstv %s4143_s19  ;;  %v993_v16 = vmul.f32 %v992_v28, %v7145_v57  ;;  %s4685_s10 = sld [smem:[#allocation11 + $0x5e]] }
 0x135   : > { %7144 = sst [smem:[#allocation55_spill]] %s4633_s0  ;;  %v987_v15 = vmul.f32 %v7149_v49, %v7145_v57  ;;  %v999_v59 = vmul.f32 %v998_v37, %v7145_v57  ;;  %v971_v23 = vadd.f32 %v969_v5, %v4502_v0  ;;  %v1083_v50 = vmul.f32 %v1082_v1, %v1079_v21  ;;  %v7150_v37 = vld [vmem:[#allocation97_spill] sm:$0xff]  ;;  %v7158_v57 = vld [vmem:[#allocation107_spill] sm:$0xff] }
 0x136   : > { %s4656_s0 = sld [smem:[#allocation11 + $0x59]]  ;;  %v977_v63 = vadd.f32 %v975_v40, %v4511_v58  ;;  %v995_v8 = vadd.f32 %v993_v16, %v4494_v2  ;;  %v983_v28 = vadd.f32 %v981_v3, %v4521_v36  ;;  %v1089_v20 = vmul.f32 %v1088_v45, %v1079_v21  ;;  %v7152_v2 = vld [vmem:[#allocation100_spill] sm:$0xff] }
 0x137   : > { %v989_v12 = vadd.f32 %v987_v15, %v4481_v60  ;;  %v1001_v0 = vadd.f32 %v999_v59, %v4514_v47  ;;  %v1027_v58 = vadd.f32 %v7150_v37, %v971_v23  ;;  %v1095_v53 = vmul.f32 %v1094_v9, %v1079_v21  ;;  %v1099_v60 = vld [vmem:[#allocation2 + $0x49] sm:$0xff]  ;;  %s4692_s19 = sld [smem:[#allocation11 + $0xa9]] }
 0x138   : > { %v1033_v1 = vadd.f32 %v7151_v44, %v977_v63  ;;  %v7153_v45 = vld [vmem:[#allocation104_spill] sm:$0xff]  ;;  %v1039_v17 = vadd.f32 %v7154_v22, %v983_v28  ;;  %v1103_v47 = vmul.f32 %v1102_v43, %v1099_v60  ;;  %v1109_v5 = vmul.f32 %v1108_v41, %v1099_v60  ;;  %s7164_s1 = sld [smem:[#allocation54_spill]] }
 0x139   : > { %v1045_v36 = vadd.f32 %v7152_v2, %v989_v12  ;;  %v1051_v48 = vadd.f32 %v7153_v45, %v995_v8  ;;  %v1057_v24 = vadd.f32 %v7156_v30, %v1001_v0  ;;  %v1065_v9 = vadd.f32 %v7157_v51, %v1027_v58  ;;  %v7160_v21 = vld [vmem:[#allocation108_spill] sm:$0xff]  ;;  %s4762_s26 = sld [smem:[#allocation11 + $0x6e]] }
 0x13a   : > { %v1071_v6 = vadd.f32 %v7158_v57, %v1033_v1  ;;  %v1077_v62 = vadd.f32 %v7160_v21, %v1039_v17  ;;  %v1115_v40 = vmul.f32 %v1114_v38, %v1099_v60  ;;  %v1121_v43 = vmul.f32 %v1120_v52, %v1099_v60  ;;  %v1137_v3 = vld [vmem:[#allocation2 + $0x4a] sm:$0xff]  ;;  %s7165_s24 = sld [smem:[#allocation55_spill]] }
 0x13b   : > { %v1127_v46 = vmul.f32 %v1126_v61, %v1099_v60  ;;  %v1085_v49 = vadd.f32 %v1083_v50, %v1065_v9  ;;  %v1133_v41 = vmul.f32 %v1132_v7, %v1099_v60  ;;  %v1141_v16 = vmul.f32 %v1140_v19, %v1137_v3  ;;  %v484_v19 = vpop.permute.xlu1 %483  ;;  %s4769_s25 = sld [smem:[#allocation11 + $0xb9]] }
 0x13c   : > { %v1091_v15 = vadd.f32 %v1089_v20, %v1071_v6  ;;  %v1097_v38 = vadd.f32 %v1095_v53, %v1077_v62  ;;  %v1123_v59 = vadd.f32 %v1121_v43, %v1045_v36  ;;  %v1147_v61 = vmul.f32 %v1146_v10, %v1137_v3  ;;  %v1175_v10 = vld [vmem:[#allocation2 + $0x4b] sm:$0xff]  ;;  %492 = vst.msk [vmem:[#allocation2 + $0x98] sm:$0xff] %vm386_vm0, %v484_v19  ;;  %s4779_s11 = sld [smem:[#allocation11 + $0x28]] }
 0x13d   : > { %v1129_v52 = vadd.f32 %v1127_v46, %v1051_v48  ;;  %v1105_v23 = vadd.f32 %v1103_v47, %v1085_v49  ;;  %v1135_v50 = vadd.f32 %v1133_v41, %v1057_v24  ;;  %v1153_v7 = vmul.f32 %v1152_v13, %v1137_v3  ;;  %s4786_s16 = sld [smem:[#allocation11 + $0x73]]  ;;  %v1354_v46 = vld [vmem:[#allocation2 + $0x81] sm:$0xff] }
 0x13e   : > { %v1111_v63 = vadd.f32 %v1109_v5, %v1091_v15  ;;  %v1117_v12 = vadd.f32 %v1115_v40, %v1097_v38  ;;  %v1159_v8 = vmul.f32 %v1158_v4, %v1137_v3  ;;  %v1165_v28 = vmul.f32 %v1164_v54, %v1137_v3  ;;  %v1213_v54 = vld [vmem:[#allocation2 + $0x4c] sm:$0xff]  ;;  %v1334_v5 = vld [vmem:[#allocation2 + $0x80] sm:$0xff]  ;;  %s4792_s30 = sld [smem:[#allocation11 + $0xbe]] }
 0x13f   : > { %v1171_v20 = vmul.f32 %v1170_v33, %v1137_v3  ;;  %v1143_v0 = vadd.f32 %v1141_v16, %v1105_v23  ;;  %v1179_v37 = vmul.f32 %v1178_v26, %v1175_v10  ;;  %v1185_v4 = vmul.f32 %v1184_v18, %v1175_v10  ;;  %s4798_s15 = sld [smem:[#allocation11 + $0x2d]]  ;;  %v482_v3 = vpop.permute.xlu0 %481  ;;  %v1234_v38 = vld [vmem:[#allocation2 + $0x68] sm:$0xff] }
 0x140   : > { %v1149_v13 = vadd.f32 %v1147_v61, %v1111_v63  ;;  %v1155_v33 = vadd.f32 %v1153_v7, %v1117_v12  ;;  %v1161_v58 = vadd.f32 %v1159_v8, %v1123_v59  ;;  %v1167_v44 = vadd.f32 %v1165_v28, %v1129_v52  ;;  %s4804_s27 = sld [smem:[#allocation11 + $0x78]]  ;;  %491 = vst.msk [vmem:[#allocation2 + $0x90] sm:$0xff] %vm386_vm0, %v482_v3  ;;  %v1254_v63 = vld [vmem:[#allocation2 + $0x69] sm:$0xff] }
 0x141   : > { %v1173_v1 = vadd.f32 %v1171_v20, %v1135_v50  ;;  %v1181_v53 = vadd.f32 %v1179_v37, %v1143_v0  ;;  %v1191_v2 = vmul.f32 %v1190_v27, %v1175_v10  ;;  %v1197_v26 = vmul.f32 %v1196_v29, %v1175_v10  ;;  %s4812_s29 = sld [smem:[#allocation11 + $0xc3]]  ;;  %v1274_v8 = vld [vmem:[#allocation2 + $0x6a] sm:$0xff] }
 0x142   : > { %v1187_v60 = vadd.f32 %v1185_v4, %v1149_v13  ;;  %v1203_v18 = vmul.f32 %v1202_v42, %v1175_v10  ;;  %v1209_v36 = vmul.f32 %v1208_v34, %v1175_v10  ;;  %v1217_v45 = vmul.f32 %v1216_v14, %v1213_v54  ;;  %7166 = sst [smem:[#allocation42_spill]] %s4779_s11  ;;  %v1294_v13 = vld [vmem:[#allocation2 + $0x6b] sm:$0xff] }
 0x143   : > { %v1223_v48 = vmul.f32 %v1222_v32, %v1213_v54  ;;  %v1193_v22 = vadd.f32 %v1191_v2, %v1155_v33  ;;  %v4764_v27 = vadd.f32 %v1197_v26, %v1161_v58  ;;  %v1229_v29 = vmul.f32 %v1228_v35, %v1213_v54  ;;  %7167 = sst [smem:[#allocation43_spill]] %s4786_s16 }
 0x144   : > { %v1236_v42 = vstv %s7162_s7  ;;  %v4771_v34 = vadd.f32 %v1203_v18, %v1167_v44  ;;  %v4773_v14 = vadd.f32 %v1209_v36, %v1173_v1  ;;  %v4775_v32 = vadd.f32 %v1217_v45, %v1181_v53  ;;  %s4840_s28 = sld [smem:[#allocation11 + $0xb0]]  ;;  %v1333_v36 = vld [vmem:[#allocation2 + $0x78] sm:$0xff] }
 0x145   : > { %v4777_v17 = vadd.f32 %v1223_v48, %v1187_v60  ;;  %v4781_v47 = vadd.f32 %v1229_v29, %v1193_v22  ;;  %v1242_v35 = vstv %s7163_s22  ;;  %v1248_v30 = vstv %s4613_s6  ;;  %v1314_v60 = vld [vmem:[#allocation2 + $0x6c] sm:$0xff]  ;;  %v1353_v29 = vld [vmem:[#allocation2 + $0x79] sm:$0xff]  ;;  %s4904_s7 = sld [smem:[#allocation11 + $0xba]] }
 0x146   : > { %v1256_v24 = vstv %s7164_s1  ;;  %v1262_v51 = vstv %s4624_s17  ;;  %v1268_v9 = vstv %s7165_s24  ;;  %v1276_v57 = vstv %s4645_s8  ;;  %s4910_s6 = sld [smem:[#allocation8 + $0xc]] }
 0x147   : > { %v1282_v6 = vstv %s4656_s0  ;;  %v1288_v21 = vstv %s4669_s3  ;;  %v1296_v62 = vstv %s4678_s20  ;;  %v1302_v40 = vstv %s4685_s10  ;;  %s4916_s17 = sld [smem:[#allocation8 + $0x27]] }
 0x148   : > { %v1308_v43 = vstv %s4692_s19  ;;  %v1316_v49 = vstv %s4699_s5  ;;  %v1322_v15 = vstv %s4706_s18  ;;  %v1328_v41 = vstv %s4715_s4  ;;  %s4921_s22 = sld [smem:[#allocation8 + $0x42]] }
 0x149   : > { %v1336_v16 = vstv %s4721_s13  ;;  %v1342_v52 = vstv %s4725_s2  ;;  %v1348_v61 = vstv %s4729_s23  ;;  %v1356_v23 = vstv %s4737_s12  ;;  %s4821_s13 = sld [smem:[#allocation11 + $0x1a]] }
 0x14a   : > { %v4807_v59 = vmul.f32 %v1336_v16, %v1334_v5  ;;  %v4814_v50 = vmul.f32 %v1342_v52, %v1334_v5  ;;  %v4816_v7 = vmul.f32 %v1348_v61, %v1334_v5  ;;  %v4818_v19 = vmul.f32 %v1356_v23, %v1354_v46  ;;  %s4830_s2 = sld [smem:[#allocation11 + $0x65]] }
 0x14b   : > { %v1362_v12 = vstv %s4744_s9  ;;  %v1368_v20 = vstv %s4746_s14  ;;  %v1238_v10 = vmul.f32 %v1236_v42, %v1234_v38  ;;  %v1244_v0 = vmul.f32 %v1242_v35, %v1234_v38  ;;  %s4848_s23 = sld [smem:[#allocation11 + $0x1f]] }
 0x14c   : > { %v4823_v28 = vmul.f32 %v1362_v12, %v1354_v46  ;;  %v4832_v37 = vmul.f32 %v1368_v20, %v1354_v46  ;;  %v1250_v4 = vmul.f32 %v1248_v30, %v1234_v38  ;;  %v1258_v54 = vmul.f32 %v1256_v24, %v1254_v63  ;;  %s4857_s12 = sld [smem:[#allocation11 + $0x6a]]  ;;  %v1233_v38 = vld [vmem:[#allocation2 + $0x60] sm:$0xff] }
 0x14d   : > { %v1264_v33 = vmul.f32 %v1262_v51, %v1254_v63  ;;  %v1240_v58 = vadd.f32 %v1238_v10, %v4649_v39  ;;  %v1246_v44 = vadd.f32 %v1244_v0, %v4651_v11  ;;  %v1270_v1 = vmul.f32 %v1268_v9, %v1254_v63  ;;  %s4863_s9 = sld [smem:[#allocation11 + $0xb5]] }
 0x14e   : > { %v1278_v53 = vmul.f32 %v1276_v57, %v1274_v8  ;;  %v1252_v2 = vadd.f32 %v1250_v4, %v4658_v56  ;;  %v1284_v26 = vmul.f32 %v1282_v6, %v1274_v8  ;;  %v1290_v18 = vmul.f32 %v1288_v21, %v1274_v8  ;;  %s4871_s14 = sld [smem:[#allocation8 + $0x9]] }
 0x14f   : > { %v1298_v39 = vmul.f32 %v1296_v62, %v1294_v13  ;;  %v1260_v11 = vadd.f32 %v1258_v54, %v1240_v58  ;;  %v1266_v45 = vadd.f32 %v1264_v33, %v1246_v44  ;;  %v1304_v48 = vmul.f32 %v1302_v40, %v1294_v13  ;;  %7173 = sst [smem:[#allocation60_spill]] %s4916_s17 }
 0x150   : > { %v1310_v22 = vmul.f32 %v1308_v43, %v1294_v13  ;;  %v1272_v5 = vadd.f32 %v1270_v1, %v1252_v2  ;;  %v1318_v56 = vmul.f32 %v1316_v49, %v1314_v60  ;;  %v1324_v46 = vmul.f32 %v1322_v15, %v1314_v60  ;;  %v1253_v13 = vld [vmem:[#allocation2 + $0x61] sm:$0xff]  ;;  %s4931_s8 = sld [smem:[#allocation11 + $0x29]] }
 0x151   : > { %7168 = sst [smem:[#allocation56_spill]] %s4848_s23  ;;  %v1330_v3 = vmul.f32 %v1328_v41, %v1314_v60  ;;  %v1280_v63 = vadd.f32 %v1278_v53, %v1260_v11  ;;  %v1286_v8 = vadd.f32 %v1284_v26, %v1266_v45  ;;  %v4873_v10 = vmul.f32 %v1336_v16, %v1333_v36  ;;  %v1273_v60 = vld [vmem:[#allocation2 + $0x62] sm:$0xff] }
 0x152   : > { %7169 = sst [smem:[#allocation57_spill]] %s4857_s12  ;;  %v4875_v0 = vmul.f32 %v1342_v52, %v1333_v36  ;;  %v1292_v4 = vadd.f32 %v1290_v18, %v1272_v5  ;;  %v4879_v54 = vmul.f32 %v1348_v61, %v1333_v36  ;;  %v4881_v33 = vmul.f32 %v1356_v23, %v1353_v29  ;;  %v1293_v11 = vld [vmem:[#allocation2 + $0x63] sm:$0xff] }
 0x153   : > { %7170 = sst [smem:[#allocation44_spill]] %s4863_s9  ;;  %v4883_v58 = vmul.f32 %v1362_v12, %v1353_v29  ;;  %v1300_v44 = vadd.f32 %v1298_v39, %v1280_v63  ;;  %v1306_v16 = vadd.f32 %v1304_v48, %v1286_v8  ;;  %v4887_v1 = vmul.f32 %v1368_v20, %v1353_v29  ;;  %v1313_v48 = vld [vmem:[#allocation2 + $0x64] sm:$0xff] }
 0x154   : > { %7171 = sst [smem:[#allocation58_spill]] %s4871_s14  ;;  %v1237_v52 = vmul.f32 %v1236_v42, %v1233_v38  ;;  %v1312_v53 = vadd.f32 %v1310_v22, %v1292_v4  ;;  %v1243_v61 = vmul.f32 %v1242_v35, %v1233_v38  ;;  %v1249_v23 = vmul.f32 %v1248_v30, %v1233_v38 }
 0x155   : > { %s4877_s9 = sld [smem:[#allocation8 + $0x24]]  ;;  %v1257_v12 = vmul.f32 %v1256_v24, %v1253_v13  ;;  %v1320_v2 = vadd.f32 %v1318_v56, %v1300_v44  ;;  %v1326_v26 = vadd.f32 %v1324_v46, %v1306_v16  ;;  %v1263_v42 = vmul.f32 %v1262_v51, %v1253_v13 }
 0x156   : > { %s4885_s14 = sld [smem:[#allocation8 + $0x3f]]  ;;  %v1239_v20 = vadd.f32 %v1237_v52, %v4775_v32  ;;  %v1332_v18 = vadd.f32 %v1330_v3, %v1312_v53  ;;  %v1245_v35 = vadd.f32 %v1243_v61, %v4777_v17  ;;  %v1251_v30 = vadd.f32 %v1249_v23, %v4781_v47  ;;  %v1414_v61 = vld [vmem:[#allocation2 + $0x84] sm:$0xff] }
 0x157   : > { %s4891_s12 = sld [smem:[#allocation11 + $0x24]]  ;;  %v1269_v24 = vmul.f32 %v1268_v9, %v1253_v13  ;;  %v1340_v39 = vadd.f32 %v4807_v59, %v1320_v2  ;;  %v1346_v36 = vadd.f32 %v4814_v50, %v1326_v26  ;;  %v1277_v51 = vmul.f32 %v1276_v57, %v1273_v60  ;;  %v505_v26 = vpop.permute.xlu2 %504 }
 0x158   : > { %v1259_v32 = vadd.f32 %v1257_v12, %v1239_v20  ;;  %v1352_v17 = vadd.f32 %v4816_v7, %v1332_v18  ;;  %v1265_v47 = vadd.f32 %v1263_v42, %v1245_v35  ;;  %v1283_v9 = vmul.f32 %v1282_v6, %v1273_v60  ;;  %s4940_s0 = sld [smem:[#allocation11 + $0x74]]  ;;  %512 = vst.msk [vmem:[#allocation2 + $0xb8] sm:$0xf] %vm389_vm1, %v505_v26 }
 0x159   : > { %v1271_v45 = vadd.f32 %v1269_v24, %v1251_v30  ;;  %v4924_v59 = vadd.f32 %v4818_v19, %v1340_v39  ;;  %v4927_v57 = vadd.f32 %v4823_v28, %v1346_v36  ;;  %v1289_v7 = vmul.f32 %v1288_v21, %v1273_v60  ;;  %v1374_v28 = vld [vmem:[#allocation2 + $0x82] sm:$0xff]  ;;  %s4948_s3 = sld [smem:[#allocation11 + $0xbf]] }
 0x15a   : > { %v1279_v50 = vadd.f32 %v1277_v51, %v1259_v32  ;;  %v4934_v6 = vadd.f32 %v4832_v37, %v1352_v17  ;;  %v1285_v22 = vadd.f32 %v1283_v9, %v1265_v47  ;;  %v1297_v29 = vmul.f32 %v1296_v62, %v1293_v11  ;;  %s4953_s20 = sld [smem:[#allocation8 + $0xf]]  ;;  %v503_v17 = vpop.permute.xlu1 %502 }
 0x15b   : > { %7172 = sst [smem:[#allocation59_spill]] %s4877_s9  ;;  %v1303_v19 = vmul.f32 %v1302_v40, %v1293_v11  ;;  %v1291_v5 = vadd.f32 %v1289_v7, %v1271_v45  ;;  %v1309_v21 = vmul.f32 %v1308_v43, %v1293_v11  ;;  %v1317_v56 = vmul.f32 %v1316_v49, %v1313_v48  ;;  %511 = vst.msk [vmem:[#allocation2 + $0xb0] sm:$0xff] %vm386_vm0, %v503_v17 }
 0x15c   : > { %s4899_s9 = sld [smem:[#allocation11 + $0x6f]]  ;;  %v1323_v37 = vmul.f32 %v1322_v15, %v1313_v48  ;;  %v1299_v46 = vadd.f32 %v1297_v29, %v1279_v50  ;;  %v1329_v40 = vmul.f32 %v1328_v41, %v1313_v48  ;;  %v1376_v3 = vstv %s4752_s21  ;;  %v1394_v15 = vld [vmem:[#allocation2 + $0x83] sm:$0xff] }
 0x15d   : > { %v1305_v62 = vadd.f32 %v1303_v19, %v1285_v22  ;;  %v1311_v38 = vadd.f32 %v1309_v21, %v1291_v5  ;;  %v1378_v43 = vmul.f32 %v1376_v3, %v1374_v28  ;;  %v1382_v49 = vstv %s4762_s26  ;;  %s4959_s10 = sld [smem:[#allocation8 + $0x2a]]  ;;  %v1434_v21 = vld [vmem:[#allocation2 + $0x98] sm:$0xff] }
 0x15e   : > { %v1388_v63 = vstv %s4769_s25  ;;  %v1319_v8 = vadd.f32 %v1317_v56, %v1299_v46  ;;  %v1384_v4 = vmul.f32 %v1382_v49, %v1374_v28  ;;  %s4965_s19 = sld [smem:[#allocation8 + $0x45]]  ;;  %v1396_v16 = vstv %s4779_s11 }
 0x15f   : > { %v1325_v13 = vadd.f32 %v1323_v37, %v1305_v62  ;;  %v1390_v41 = vmul.f32 %v1388_v63, %v1374_v28  ;;  %v1331_v44 = vadd.f32 %v1329_v40, %v1311_v38  ;;  %v1402_v52 = vstv %s4786_s16  ;;  %s4970_s5 = sld [smem:[#allocation11 + $0x2e]] }
 0x160   : > { %v1408_v53 = vstv %s4792_s30  ;;  %v1339_v23 = vadd.f32 %v4873_v10, %v1319_v8  ;;  %v1398_v60 = vmul.f32 %v1396_v16, %v1394_v15  ;;  %v1404_v2 = vmul.f32 %v1402_v52, %v1394_v15  ;;  %s4978_s18 = sld [smem:[#allocation11 + $0x79]] }
 0x161   : > { %v1345_v12 = vadd.f32 %v4875_v0, %v1325_v13  ;;  %v1351_v20 = vadd.f32 %v4879_v54, %v1331_v44  ;;  %v1410_v42 = vmul.f32 %v1408_v53, %v1394_v15  ;;  %s7175_s4 = sld [smem:[#allocation57_spill]]  ;;  %v1416_v10 = vstv %s4798_s15  ;;  %v1454_v13 = vld [vmem:[#allocation2 + $0x99] sm:$0xff] }
 0x162   : > { %v6795_v0 = vstv %s4804_s27  ;;  %s7176_s1 = sld [smem:[#allocation44_spill]]  ;;  %v4989_v18 = vadd.f32 %v4881_v33, %v1339_v23  ;;  %v1418_v54 = vmul.f32 %v1416_v10, %v1414_v61  ;;  %v6794_v39 = vstv %s4812_s29 }
 0x163   : > { %7174 = sst [smem:[#allocation61_spill]] %s4959_s10  ;;  %v4992_v35 = vadd.f32 %v4883_v58, %v1345_v12  ;;  %v1424_v30 = vmul.f32 %v6795_v0, %v1414_v61  ;;  %v4999_v24 = vadd.f32 %v4887_v1, %v1351_v20  ;;  %v1436_v36 = vstv %s4821_s13 }
 0x164   : > { %s4985_s24 = sld [smem:[#allocation11 + $0xc4]]  ;;  %v1442_v33 = vstv %s4830_s2  ;;  %v1430_v32 = vmul.f32 %v6794_v39, %v1414_v61  ;;  %v1448_v58 = vstv %s4840_s28  ;;  %v1456_v51 = vstv %s4848_s23 }
 0x165   : > { %s7178_s16 = sld [smem:[#allocation58_spill]]  ;;  %v1486_v9 = vstv %s4885_s14  ;;  %v6798_v48 = vstv %s4891_s12  ;;  %v1500_v50 = vstv %s4899_s9  ;;  %v1506_v7 = vstv %s4904_s7  ;;  %s7200_s14 = smov 124  }
 0x166   : > { %s7179_s11 = sld [smem:[#allocation59_spill]]  ;;  %v1512_v22 = vstv %s4910_s6  ;;  %v1518_v29 = vstv %s4916_s17  ;;  %v1524_v19 = vstv %s4921_s22  ;;  %v1532_v28 = vstv %s4931_s8 }
 0x167   : > { %v1462_v11 = vstv %s7175_s4  ;;  %v1538_v5 = vstv %s4940_s0  ;;  %v1544_v56 = vstv %s4948_s3  ;;  %v1550_v37 = vstv %s4953_s20  ;;  %s5052_s23 = sld [smem:[#allocation11 + $0x1b]] }
 0x168   : > { %v1468_v47 = vstv %s7176_s1  ;;  %v1556_v46 = vstv %s4959_s10  ;;  %v1562_v62 = vstv %s4965_s19  ;;  %v1570_v40 = vstv %s4970_s5  ;;  %s5080_s17 = sld [smem:[#allocation11 + $0xb6]] }
 0x169   : > { %v1576_v38 = vstv %s4978_s18  ;;  %v1380_v8 = vadd.f32 %v1378_v43, %v4924_v59  ;;  %v1386_v44 = vadd.f32 %v1384_v4, %v4927_v57  ;;  %v1392_v61 = vadd.f32 %v1390_v41, %v4934_v6  ;;  %v1492_v6 = vld [vmem:[#allocation2 + $0x9a] sm:$0xff]  ;;  %s5100_s10 = sld [smem:[#allocation8 + $0x40]] }
 0x16a   : > { %7177 = sst [smem:[#allocation62_spill]] %s4985_s24  ;;  %v1582_v15 = vstv %s4985_s24  ;;  %v1438_v23 = vmul.f32 %v1436_v36, %v1434_v21  ;;  %v1444_v12 = vmul.f32 %v1442_v33, %v1434_v21  ;;  %v1450_v20 = vmul.f32 %v1448_v58, %v1434_v21 }
 0x16b   : > { %v1474_v1 = vstv %s7178_s16  ;;  %v1400_v26 = vadd.f32 %v1398_v60, %v1380_v8  ;;  %v1458_v17 = vmul.f32 %v1456_v51, %v1454_v13  ;;  %v1464_v59 = vmul.f32 %v1462_v11, %v1454_v13  ;;  %s5057_s16 = sld [smem:[#allocation11 + $0x66]] }
 0x16c   : > { %v1480_v45 = vstv %s7179_s11  ;;  %v1406_v43 = vadd.f32 %v1404_v2, %v1386_v44  ;;  %v1412_v39 = vadd.f32 %v1410_v42, %v1392_v61  ;;  %v1470_v0 = vmul.f32 %v1468_v47, %v1454_v13  ;;  %s5126_s24 = sld [smem:[#allocation11 + $0xbb]] }
 0x16d   : > { %v1476_v57 = vmul.f32 %v1474_v1, %v1454_v13  ;;  %v1420_v4 = vadd.f32 %v1418_v54, %v1400_v26  ;;  %v1482_v41 = vmul.f32 %v1480_v45, %v1454_v13  ;;  %v1488_v60 = vmul.f32 %v1486_v9, %v1454_v13  ;;  %7180 = sst [smem:[#allocation63_spill]] %s5052_s23  ;;  %v501_v54 = vpop.permute.xlu0 %500 }
 0x16e   : > { %v1496_v21 = vmul.f32 %v6798_v48, %v1492_v6  ;;  %v1426_v8 = vadd.f32 %v1424_v30, %v1406_v43  ;;  %v1432_v2 = vadd.f32 %v1430_v32, %v1412_v39  ;;  %v1502_v44 = vmul.f32 %v1500_v50, %v1492_v6  ;;  %s5063_s23 = sld [smem:[#allocation11 + $0xb1]]  ;;  %510 = vst.msk [vmem:[#allocation2 + $0xa8] sm:$0xff] %vm386_vm0, %v501_v54  ;;  %v1530_v43 = vld [vmem:[#allocation2 + $0x9b] sm:$0xff] }
 0x16f   : > { %v1478_v42 = vadd.f32 %v1476_v57, %v4636_v25  ;;  %v1440_v61 = vadd.f32 %v1438_v23, %v1420_v4  ;;  %v1484_v13 = vadd.f32 %v1482_v41, %v4638_v55  ;;  %v1490_v26 = vadd.f32 %v1488_v60, %v4647_v31  ;;  %v1568_v60 = vld [vmem:[#allocation2 + $0x9c] sm:$0xff]  ;;  %7185 = sst [smem:[#allocation48_spill]] %s5080_s17 }
 0x170   : > { %v1508_v48 = vmul.f32 %v1506_v7, %v1492_v6  ;;  %v1446_v25 = vadd.f32 %v1444_v12, %v1426_v8  ;;  %v1452_v30 = vadd.f32 %v1450_v20, %v1432_v2  ;;  %v1514_v39 = vmul.f32 %v1512_v22, %v1492_v6  ;;  %7190 = sst [smem:[#allocation51_spill]] %s5100_s10 }
 0x171   : > { %7181 = sst [smem:[#allocation64_spill]] %s5057_s16  ;;  %v1520_v32 = vmul.f32 %v1518_v29, %v1492_v6  ;;  %v1460_v55 = vadd.f32 %v1458_v17, %v1440_v61  ;;  %v1526_v31 = vmul.f32 %v1524_v19, %v1492_v6  ;;  %v1534_v23 = vmul.f32 %v1532_v28, %v1530_v43 }
 0x172   : > { %s5070_s16 = sld [smem:[#allocation11 + $0x20]]  ;;  %v1540_v57 = vmul.f32 %v1538_v5, %v1530_v43  ;;  %v1466_v12 = vadd.f32 %v1464_v59, %v1446_v25  ;;  %v1472_v20 = vadd.f32 %v1470_v0, %v1452_v30  ;;  %v1516_v4 = vadd.f32 %v1514_v39, %v1478_v42  ;;  %v1373_v42 = vld [vmem:[#allocation2 + $0x7a] sm:$0xff] }
 0x173   : > { %v1522_v41 = vadd.f32 %v1520_v32, %v1484_v13  ;;  %v1498_v17 = vadd.f32 %v1496_v21, %v1460_v55  ;;  %v1528_v8 = vadd.f32 %v1526_v31, %v1490_v26  ;;  %v1546_v6 = vmul.f32 %v1544_v56, %v1530_v43  ;;  %s5116_s10 = sld [smem:[#allocation11 + $0x70]] }
 0x174   : > { %7182 = sst [smem:[#allocation45_spill]] %s5063_s23  ;;  %v1552_v2 = vmul.f32 %v1550_v37, %v1530_v43  ;;  %v1504_v54 = vadd.f32 %v1502_v44, %v1466_v12  ;;  %v1510_v61 = vadd.f32 %v1508_v48, %v1472_v20  ;;  %v1558_v59 = vmul.f32 %v1556_v46, %v1530_v43  ;;  %v1393_v48 = vld [vmem:[#allocation2 + $0x7b] sm:$0xff] }
 0x175   : > { %s5078_s23 = sld [smem:[#allocation11 + $0x6b]]  ;;  %v1564_v0 = vmul.f32 %v1562_v62, %v1530_v43  ;;  %v1536_v21 = vadd.f32 %v1534_v23, %v1498_v17  ;;  %v1572_v26 = vmul.f32 %v1570_v40, %v1568_v60  ;;  %v1578_v25 = vmul.f32 %v1576_v38, %v1568_v60  ;;  %v1413_v43 = vld [vmem:[#allocation2 + $0x7c] sm:$0xff]  ;;  %v1433_v17 = vld [vmem:[#allocation2 + $0x90] sm:$0xff] }
 0x176   : > { %v5094_v13 = vadd.f32 %v1552_v2, %v1516_v4  ;;  %v1542_v44 = vadd.f32 %v1540_v57, %v1504_v54  ;;  %v1548_v30 = vadd.f32 %v1546_v6, %v1510_v61  ;;  %v5102_v39 = vadd.f32 %v1558_v59, %v1522_v41  ;;  %s5136_s21 = sld [smem:[#allocation8 + $0xd]] }
 0x177   : > { %v5104_v32 = vadd.f32 %v1564_v0, %v1528_v8  ;;  %v5108_v55 = vadd.f32 %v1572_v26, %v1536_v21  ;;  %v1584_v31 = vmul.f32 %v1582_v15, %v1568_v60  ;;  %v1377_v23 = vmul.f32 %v1376_v3, %v1373_v42  ;;  %s5143_s25 = sld [smem:[#allocation8 + $0x28]] }
 0x178   : > { %7183 = sst [smem:[#allocation46_spill]] %s5070_s16  ;;  %v1383_v57 = vmul.f32 %v1382_v49, %v1373_v42  ;;  %v5118_v12 = vadd.f32 %v1578_v25, %v1542_v44  ;;  %v1389_v20 = vmul.f32 %v1388_v63, %v1373_v42  ;;  %v1397_v4 = vmul.f32 %v1396_v16, %v1393_v48 }
 0x179   : > { %s5086_s16 = sld [smem:[#allocation8 + $0xa]]  ;;  %v1403_v41 = vmul.f32 %v1402_v52, %v1393_v48  ;;  %v5128_v3 = vadd.f32 %v1584_v31, %v1548_v30  ;;  %v1409_v49 = vmul.f32 %v1408_v53, %v1393_v48  ;;  %v1417_v60 = vmul.f32 %v1416_v10, %v1413_v43  ;;  %v1453_v53 = vld [vmem:[#allocation2 + $0x91] sm:$0xff] }
 0x17a   : > { %v7193_v8 = vstv %s4804_s27  ;;  %v7194_v63 = vstv %s4812_s29  ;;  %v1379_v52 = vadd.f32 %v1377_v23, %v4989_v18  ;;  %v1385_v2 = vadd.f32 %v1383_v57, %v4992_v35  ;;  %s5157_s30 = sld [smem:[#allocation3 + $0x1]]  ;;  %v1529_v57 = vld [vmem:[#allocation2 + $0x93] sm:$0xff] }
 0x17b   : > { %7184 = sst [smem:[#allocation47_spill]] %s5078_s23  ;;  %v1423_v6 = vmul.f32 %v7193_v8, %v1413_v43  ;;  %v1429_v16 = vmul.f32 %v7194_v63, %v1413_v43  ;;  %v1391_v54 = vadd.f32 %v1389_v20, %v4999_v24  ;;  %v1437_v10 = vmul.f32 %v1436_v36, %v1433_v17 }
 0x17c   : > { %s5092_s23 = sld [smem:[#allocation8 + $0x25]]  ;;  %v1443_v61 = vmul.f32 %v1442_v33, %v1433_v17  ;;  %v1449_v59 = vmul.f32 %v1448_v58, %v1433_v17  ;;  %v1457_v0 = vmul.f32 %v1456_v51, %v1453_v53  ;;  %v1399_v18 = vadd.f32 %v1397_v4, %v1379_v52  ;;  %v1491_v51 = vld [vmem:[#allocation2 + $0x92] sm:$0xff] }
 0x17d   : > { %v1405_v35 = vadd.f32 %v1403_v41, %v1385_v2  ;;  %v1411_v42 = vadd.f32 %v1409_v49, %v1391_v54  ;;  %v1463_v24 = vmul.f32 %v1462_v11, %v1453_v53  ;;  %v1469_v21 = vmul.f32 %v1468_v47, %v1453_v53  ;;  %s5167_s15 = sld [smem:[#allocation3 + $0x4]]  ;;  %v1567_v17 = vld [vmem:[#allocation2 + $0x94] sm:$0xff] }
 0x17e   : > { %v1475_v36 = vmul.f32 %v1474_v1, %v1453_v53  ;;  %v1481_v33 = vmul.f32 %v1480_v45, %v1453_v53  ;;  %v1487_v58 = vmul.f32 %v1486_v9, %v1453_v53  ;;  %v1419_v26 = vadd.f32 %v1417_v60, %v1399_v18  ;;  %s5171_s29 = sld [smem:[#allocation3 + $0x7]]  ;;  %v524_v60 = vpop.permute.xlu2 %523 }
 0x17f   : > { %7186 = sst [smem:[#allocation49_spill]] %s5086_s16  ;;  %v1425_v25 = vadd.f32 %v1423_v6, %v1405_v35  ;;  %v1431_v11 = vadd.f32 %v1429_v16, %v1411_v42  ;;  %v7197_v48 = vstv %s4891_s12  ;;  %v1501_v9 = vmul.f32 %v1500_v50, %v1491_v51  ;;  %531 = vst.msk [vmem:[#allocation2 + $0xd0] sm:$0xf] %vm389_vm1, %v524_v60  ;;  %v522_v16 = vpop.permute.xlu1 %521 }
 0x180   : > { %s5153_s16 = sld [smem:[#allocation8 + $0x43]]  ;;  %v1495_v44 = vmul.f32 %v7197_v48, %v1491_v51  ;;  %v1477_v47 = vadd.f32 %v1475_v36, %v4764_v27  ;;  %v1483_v1 = vadd.f32 %v1481_v33, %v4771_v34  ;;  %v1489_v45 = vadd.f32 %v1487_v58, %v4773_v14  ;;  %530 = vst.msk [vmem:[#allocation2 + $0xc8] sm:$0xff] %vm386_vm0, %v522_v16 }
 0x181   : > { %s5178_s11 = sld [smem:[#allocation11 + $0x2a]]  ;;  %v1439_v30 = vadd.f32 %v1437_v10, %v1419_v26  ;;  %v1445_v43 = vadd.f32 %v1443_v61, %v1425_v25  ;;  %v1451_v31 = vadd.f32 %v1449_v59, %v1431_v11  ;;  %v1507_v23 = vmul.f32 %v1506_v7, %v1491_v51 }
 0x182   : > { %7187 = sst [smem:[#allocation50_spill]] %s5092_s23  ;;  %v1513_v27 = vmul.f32 %v1512_v22, %v1491_v51  ;;  %v1519_v34 = vmul.f32 %v1518_v29, %v1491_v51  ;;  %v1525_v14 = vmul.f32 %v1524_v19, %v1491_v51  ;;  %v1533_v50 = vmul.f32 %v1532_v28, %v1529_v57 }
 0x183   : > { %s5106_s23 = sld [smem:[#allocation11 + $0x25]]  ;;  %v1459_v20 = vadd.f32 %v1457_v0, %v1439_v30  ;;  %v1465_v4 = vadd.f32 %v1463_v24, %v1445_v43  ;;  %v1471_v41 = vadd.f32 %v1469_v21, %v1451_v31  ;;  %v1539_v7 = vmul.f32 %v1538_v5, %v1529_v57  ;;  %v520_v30 = vpop.permute.xlu0 %519 }
 0x184   : > { %s7198_s13 = sld [smem:[#allocation30_spill]]  ;;  %v1515_v22 = vadd.f32 %v1513_v27, %v1477_v47  ;;  %v1521_v29 = vadd.f32 %v1519_v34, %v1483_v1  ;;  %v1527_v19 = vadd.f32 %v1525_v14, %v1489_v45  ;;  %v1545_v28 = vmul.f32 %v1544_v56, %v1529_v57  ;;  %v1608_v27 = vld [vmem:[#allocation2 + $0xb1] sm:$0xff]  ;;  %529 = vst.msk [vmem:[#allocation2 + $0xc0] sm:$0xff] %vm386_vm0, %v520_v30 }
 0x185   : > { %s5182_s2 = sld [smem:[#allocation11 + $0x75]]  ;;  %v1497_v8 = vadd.f32 %v1495_v44, %v1459_v20  ;;  %v1503_v5 = vadd.f32 %v1501_v9, %v1465_v4  ;;  %v1509_v6 = vadd.f32 %v1507_v23, %v1471_v41  ;;  %v1551_v63 = vmul.f32 %v1550_v37, %v1529_v57  ;;  %v1588_v9 = vld [vmem:[#allocation2 + $0xb0] sm:$0xff] }
 0x186   : > { %s5192_s28 = sld [smem:[#allocation11 + $0xc0]]  ;;  %v1557_v52 = vmul.f32 %v1556_v46, %v1529_v57  ;;  %v1563_v56 = vmul.f32 %v1562_v62, %v1529_v57  ;;  %v1571_v2 = vmul.f32 %v1570_v40, %v1567_v17  ;;  %v1577_v54 = vmul.f32 %v1576_v38, %v1567_v17  ;;  %v1702_v30 = vld [vmem:[#allocation2 + $0xb3] sm:$0xff] }
 0x187   : > { %s5201_s9 = sld [smem:[#allocation8 + $0x2b]]  ;;  %v1535_v37 = vadd.f32 %v1533_v50, %v1497_v8  ;;  %v1541_v53 = vadd.f32 %v1539_v7, %v1503_v5  ;;  %v1547_v10 = vadd.f32 %v1545_v28, %v1509_v6  ;;  %v5220_v46 = vadd.f32 %v1551_v63, %v1515_v22  ;;  %v1646_v6 = vld [vmem:[#allocation2 + $0xb2] sm:$0xff] }
 0x188   : > { %s5206_s7 = sld [smem:[#allocation8 + $0x46]]  ;;  %v5224_v62 = vadd.f32 %v1557_v52, %v1521_v29  ;;  %v5226_v40 = vadd.f32 %v1563_v56, %v1527_v19  ;;  %v1583_v38 = vmul.f32 %v1582_v15, %v1567_v17  ;;  %v1654_v26 = vstv %s5116_s10 }
 0x189   : > { %7191 = sst [smem:[#allocation52_spill]] %s5106_s23  ;;  %v5233_v59 = vadd.f32 %v1571_v2, %v1535_v37  ;;  %v5235_v0 = vadd.f32 %v1577_v54, %v1541_v53  ;;  %v1660_v25 = vstv %s5126_s24  ;;  %v1666_v11 = vstv %s5136_s21 }
 0x18a   : > { %s5196_s23 = sld [smem:[#allocation8 + $0x10]]  ;;  %v2926_v49 = vld [vmem:[%s7198_s13 + $0x40] sm:$0xf]  ;;  %v5239_v42 = vadd.f32 %v1583_v38, %v1547_v10  ;;  %v1672_v48 = vstv %s5143_s25  ;;  %v1678_v44 = vstv %s5153_s16  ;;  %v1684_v47 = vstv %s5157_s30 }
 0x18b   : > { %626 = vrot.lane.b32.xlu2 %v2926_v49, %s7200_s14  ;;  %s7202_s17 = sld [smem:[#allocation63_spill]]  ;;  %v1690_v1 = vstv %s5167_s15  ;;  %v1696_v45 = vstv %s5171_s29  ;;  %v1704_v43 = vstv %s5178_s11  ;;  %v1662_v54 = vmul.f32 %v1660_v25, %v1646_v6 }
 0x18c   : > { %s7203_s22 = sld [smem:[#allocation64_spill]]  ;;  %v1710_v31 = vstv %s5182_s2  ;;  %v1716_v23 = vstv %s5192_s28  ;;  %v1668_v37 = vmul.f32 %v1666_v11, %v1646_v6  ;;  %v1674_v53 = vmul.f32 %v1672_v48, %v1646_v6 }
 0x18d   : > { %s7204_s8 = sld [smem:[#allocation45_spill]]  ;;  %v1728_v34 = vstv %s5201_s9 }
 0x18e   : > { %s5217_s0 = sld [smem:[#allocation11 + $0x2f]]  ;;  %v1734_v14 = vstv %s5206_s7 }
 0x18f   : > { %s7205_s3 = sld [smem:[#allocation46_spill]] }
 0x190   : > { %s7206_s20 = sld [smem:[#allocation47_spill]]  ;;  %v1722_v57 = vstv %s5196_s23 }
 0x191   : > { %s7207_s4 = sld [smem:[#allocation48_spill]]  ;;  %v1590_v61 = vstv %s7202_s17 }
 0x192   : > { %s7208_s1 = sld [smem:[#allocation49_spill]]  ;;  %v1596_v18 = vstv %s7203_s22  ;;  %v1592_v41 = vmul.f32 %v1590_v61, %v1588_v9 }
 0x193   : > { %s7209_s19 = sld [smem:[#allocation50_spill]]  ;;  %v1602_v35 = vstv %s7204_s8  ;;  %v1598_v7 = vmul.f32 %v1596_v18, %v1588_v9 }
 0x194   : > { %s5222_s5 = sld [smem:[#allocation11 + $0x7a]]  ;;  %v1742_v50 = vstv %s5217_s0  ;;  %v1604_v17 = vmul.f32 %v1602_v35, %v1588_v9  ;;  %v1594_v28 = vadd.f32 %v1592_v41, %v5108_v55  ;;  %v1656_v55 = vmul.f32 %v1654_v26, %v1646_v6 }
 0x195   : > { %s7210_s18 = sld [smem:[#allocation51_spill]]  ;;  %v1610_v24 = vstv %s7205_s3  ;;  %v1600_v60 = vadd.f32 %v1598_v7, %v5118_v12  ;;  %v1680_v9 = vmul.f32 %v1678_v44, %v1646_v6  ;;  %v1692_v7 = vmul.f32 %v1690_v1, %v1646_v6 }
 0x196   : > { %s7211_s26 = sld [smem:[#allocation52_spill]]  ;;  %v1616_v15 = vstv %s7206_s20  ;;  %v1612_v49 = vmul.f32 %v1610_v24, %v1608_v27  ;;  %v1606_v8 = vadd.f32 %v1604_v17, %v5128_v3 }
 0x197   : > { %s5231_s27 = sld [smem:[#allocation11 + $0xc5]]  ;;  %v1622_v21 = vstv %s7207_s4  ;;  %v1618_v22 = vmul.f32 %v1616_v15, %v1608_v27 }
 0x198   : > { %v1628_v36 = vstv %s7208_s1  ;;  %v1624_v29 = vmul.f32 %v1622_v21, %v1608_v27  ;;  %s5285_s12 = sld [smem:[#allocation8 + $0xb]]  ;;  %v1614_v12 = vadd.f32 %v1612_v49, %v1594_v28  ;;  %v7217_v49 = vld [vmem:[#allocation91_spill] sm:$0xff]  ;;  %v1740_v28 = vld [vmem:[#allocation2 + $0xb4] sm:$0xff] }
 0x199   : > { %v1634_v33 = vstv %s7209_s19  ;;  %v1630_v19 = vmul.f32 %v1628_v36, %v1608_v27  ;;  %s5294_s14 = sld [smem:[#allocation8 + $0x26]]  ;;  %v1620_v3 = vadd.f32 %v1618_v22, %v1600_v60  ;;  %v7219_v60 = vld [vmem:[#allocation92_spill] sm:$0xff] }
 0x19a   : > { %v1748_v20 = vstv %s5222_s5  ;;  %v1636_v5 = vmul.f32 %v1634_v33, %v1608_v27  ;;  %v1626_v56 = vadd.f32 %v1624_v29, %v1606_v8  ;;  %s5297_s6 = sld [smem:[#allocation11 + $0x1c]]  ;;  %v1698_v29 = vmul.f32 %v1696_v45, %v1646_v6 }
 0x19b   : > { %v1640_v58 = vstv %s7210_s18  ;;  %v1632_v63 = vadd.f32 %v1630_v19, %v5094_v13  ;;  %v1658_v38 = vadd.f32 %v1656_v55, %v1620_v3  ;;  %v1706_v19 = vmul.f32 %v1704_v43, %v1702_v30  ;;  %s5381_s17 = sld [smem:[#allocation8 + $0xe]] }
 0x19c   : > { %v1648_v51 = vstv %s7211_s26  ;;  %v1642_v16 = vmul.f32 %v1640_v58, %v1608_v27  ;;  %v1638_v2 = vadd.f32 %v1636_v5, %v5102_v39  ;;  %v1686_v39 = vmul.f32 %v1684_v47, %v1646_v6  ;;  %s5388_s22 = sld [smem:[#allocation8 + $0x29]] }
 0x19d   : > { %v1754_v4 = vstv %s5231_s27  ;;  %v1650_v52 = vmul.f32 %v1648_v51, %v1646_v6  ;;  %v1670_v27 = vadd.f32 %v1668_v37, %v1632_v63  ;;  %v5328_v8 = vadd.f32 %v1692_v7, %v7219_v60  ;;  %v7221_v6 = vld [vmem:[#allocation93_spill] sm:$0xff]  ;;  %s5398_s8 = sld [smem:[#allocation8 + $0x44]] }
 0x19e   : > { %7212 = sst [smem:[#allocation65_spill]] %s5285_s12  ;;  %v1644_v13 = vadd.f32 %v1642_v16, %v5104_v32  ;;  %v1664_v32 = vadd.f32 %v1662_v54, %v1626_v56  ;;  %v1676_v41 = vadd.f32 %v1674_v53, %v1638_v2  ;;  %v5319_v22 = vadd.f32 %v1686_v39, %v7217_v49  ;;  %v1587_v56 = vld [vmem:[#allocation2 + $0xa8] sm:$0xff] }
 0x19f   : > { %7213 = sst [smem:[#allocation66_spill]] %s5294_s14  ;;  %v1652_v10 = vadd.f32 %v1650_v52, %v1614_v12  ;;  %v1712_v5 = vmul.f32 %v1710_v31, %v1702_v30  ;;  %v1718_v63 = vmul.f32 %v1716_v23, %v1702_v30  ;;  %v1724_v16 = vmul.f32 %v1722_v57, %v1702_v30 }
 0x1a0   : > { %s5306_s12 = sld [smem:[#allocation11 + $0x67]]  ;;  %v1682_v17 = vadd.f32 %v1680_v9, %v1644_v13  ;;  %v5339_v52 = vadd.f32 %v1698_v29, %v7221_v6  ;;  %v1730_v12 = vmul.f32 %v1728_v34, %v1702_v30  ;;  %v1736_v3 = vmul.f32 %v1734_v14, %v1702_v30 }
 0x1a1   : > { %s5312_s14 = sld [smem:[#allocation11 + $0xb2]]  ;;  %v1708_v55 = vadd.f32 %v1706_v19, %v1652_v10  ;;  %v1714_v2 = vadd.f32 %v1712_v5, %v1658_v38  ;;  %v1720_v13 = vadd.f32 %v1718_v63, %v1664_v32  ;;  %v5347_v54 = vadd.f32 %v1724_v16, %v1670_v27  ;;  %v543_v63 = vpop.permute.xlu2 %542  ;;  %v541_v16 = vpop.permute.xlu1 %540 }
 0x1a2   : > { %v1744_v37 = vmul.f32 %v1742_v50, %v1740_v28  ;;  %v5353_v53 = vadd.f32 %v1730_v12, %v1676_v41  ;;  %v5355_v10 = vadd.f32 %v1736_v3, %v1682_v17  ;;  %v1750_v9 = vmul.f32 %v1748_v20, %v1740_v28  ;;  %v1607_v41 = vld [vmem:[#allocation2 + $0xa9] sm:$0xff]  ;;  %s5402_s3 = sld [smem:[#allocation11 + $0x2b]]  ;;  %550 = vst.msk [vmem:[#allocation2 + $0xe8] sm:$0xf] %vm389_vm1, %v543_v63 }
 0x1a3   : > { %v1756_v39 = vmul.f32 %v1754_v4, %v1740_v28  ;;  %v1591_v30 = vmul.f32 %v1590_v61, %v1587_v56  ;;  %v1597_v32 = vmul.f32 %v1596_v18, %v1587_v56  ;;  %v1603_v27 = vmul.f32 %v1602_v35, %v1587_v56  ;;  %v1645_v28 = vld [vmem:[#allocation2 + $0xaa] sm:$0xff]  ;;  %s5409_s20 = sld [smem:[#allocation11 + $0x76]]  ;;  %549 = vst.msk [vmem:[#allocation2 + $0xe0] sm:$0xff] %vm386_vm0, %v541_v16 }
 0x1a4   : > { %v5363_v38 = vadd.f32 %v1744_v37, %v1708_v55  ;;  %v5373_v7 = vadd.f32 %v1750_v9, %v1714_v2  ;;  %v1611_v49 = vmul.f32 %v1610_v24, %v1607_v41  ;;  %v1617_v29 = vmul.f32 %v1616_v15, %v1607_v41  ;;  %s5416_s10 = sld [smem:[#allocation11 + $0xc1]]  ;;  %v1701_v56 = vld [vmem:[#allocation2 + $0xab] sm:$0xff]  ;;  %v7225_v9 = vld [vmem:[#allocation102_spill] sm:$0xff] }
 0x1a5   : > { %v5375_v17 = vadd.f32 %v1756_v39, %v1720_v13  ;;  %v1593_v61 = vadd.f32 %v1591_v30, %v5233_v59  ;;  %v1599_v18 = vadd.f32 %v1597_v32, %v5235_v0  ;;  %v1605_v35 = vadd.f32 %v1603_v27, %v5239_v42  ;;  %s5425_s24 = sld [smem:[#allocation8 + $0x11]] }
 0x1a6   : > { %7214 = sst [smem:[#allocation53_spill]] %s5306_s12  ;;  %v1623_v19 = vmul.f32 %v1622_v21, %v1607_v41  ;;  %v1629_v60 = vmul.f32 %v1628_v36, %v1607_v41  ;;  %v1635_v24 = vmul.f32 %v1634_v33, %v1607_v41  ;;  %v1641_v15 = vmul.f32 %v1640_v58, %v1607_v41 }
 0x1a7   : > { %7215 = sst [smem:[#allocation67_spill]] %s5312_s14  ;;  %v1649_v5 = vmul.f32 %v1648_v51, %v1645_v28  ;;  %v1613_v59 = vadd.f32 %v1611_v49, %v1593_v61  ;;  %v1619_v0 = vadd.f32 %v1617_v29, %v1599_v18  ;;  %v1655_v21 = vmul.f32 %v1654_v26, %v1645_v28 }
 0x1a8   : > { %s5316_s12 = sld [smem:[#allocation11 + $0x21]]  ;;  %v1625_v42 = vadd.f32 %v1623_v19, %v1605_v35  ;;  %v1631_v36 = vadd.f32 %v1629_v60, %v5220_v46  ;;  %v1637_v33 = vadd.f32 %v1635_v24, %v5224_v62  ;;  %v1643_v58 = vadd.f32 %v1641_v15, %v5226_v40  ;;  %v539_v62 = vpop.permute.xlu0 %538 }
 0x1a9   : > { %s5325_s14 = sld [smem:[#allocation11 + $0x6c]]  ;;  %v1661_v51 = vmul.f32 %v1660_v25, %v1645_v28  ;;  %v1651_v26 = vadd.f32 %v1649_v5, %v1613_v59  ;;  %v1657_v6 = vadd.f32 %v1655_v21, %v1619_v0  ;;  %v1667_v55 = vmul.f32 %v1666_v11, %v1645_v28  ;;  %548 = vst.msk [vmem:[#allocation2 + $0xd8] sm:$0xff] %vm386_vm0, %v539_v62 }
 0x1aa   : > { %v1673_v46 = vmul.f32 %v1672_v48, %v1645_v28  ;;  %v1679_v25 = vmul.f32 %v1678_v44, %v1645_v28  ;;  %v1685_v12 = vmul.f32 %v1684_v47, %v1645_v28  ;;  %v1691_v3 = vmul.f32 %v1690_v1, %v1645_v28  ;;  %v1739_v44 = vld [vmem:[#allocation2 + $0xac] sm:$0xff]  ;;  %s5432_s21 = sld [smem:[#allocation8 + $0x2c]]  ;;  %v7224_v1 = vld [vmem:[#allocation101_spill] sm:$0xff] }
 0x1ab   : > { %v1663_v40 = vadd.f32 %v1661_v51, %v1625_v42  ;;  %v1669_v11 = vadd.f32 %v1667_v55, %v1631_v36  ;;  %v1697_v2 = vmul.f32 %v1696_v45, %v1645_v28  ;;  %v1705_v13 = vmul.f32 %v1704_v43, %v1701_v56  ;;  %s5442_s25 = sld [smem:[#allocation8 + $0x47]]  ;;  %v7226_v45 = vld [vmem:[#allocation103_spill] sm:$0xff] }
 0x1ac   : > { %v1675_v48 = vadd.f32 %v1673_v46, %v1637_v33  ;;  %v1681_v47 = vadd.f32 %v1679_v25, %v1643_v58  ;;  %v5435_v37 = vadd.f32 %v1685_v12, %v7224_v1  ;;  %v5438_v39 = vadd.f32 %v1691_v3, %v7225_v9  ;;  %s5451_s16 = sld [smem:[#allocation11 + $0x30]]  ;;  %v1760_v55 = vld [vmem:[#allocation2 + $0xc8] sm:$0xff] }
 0x1ad   : > { %v1711_v30 = vmul.f32 %v1710_v31, %v1701_v56  ;;  %v5445_v43 = vadd.f32 %v1697_v2, %v7226_v45  ;;  %v1707_v32 = vadd.f32 %v1705_v13, %v1651_v26  ;;  %v1717_v27 = vmul.f32 %v1716_v23, %v1701_v56  ;;  %s5459_s30 = sld [smem:[#allocation11 + $0x7b]]  ;;  %v1780_v12 = vld [vmem:[#allocation2 + $0xc9] sm:$0xff] }
 0x1ae   : > { %7216 = sst [smem:[#allocation68_spill]] %s5316_s12  ;;  %v1723_v41 = vmul.f32 %v1722_v57, %v1701_v56  ;;  %v1729_v29 = vmul.f32 %v1728_v34, %v1701_v56  ;;  %v1735_v31 = vmul.f32 %v1734_v14, %v1701_v56  ;;  %v1743_v61 = vmul.f32 %v1742_v50, %v1739_v44  ;;  %v2913_v34 = vld [vmem:[%s7198_s13 + $0x38] sm:$0xff]  ;;  %v2914_v14 = vld [vmem:[%s7198_s13 + $0x40] sm:$0xf]  ;;  %v570_v50 = vpop.permute.xlu2 %569 }
 0x1af   : > { %7218 = sst [smem:[#allocation69_spill]] %s5325_s14  ;;  %v1713_v49 = vadd.f32 %v1711_v30, %v1657_v6  ;;  %v1719_v18 = vadd.f32 %v1717_v27, %v1663_v40  ;;  %v1749_v23 = vmul.f32 %v1748_v20, %v1739_v44  ;;  %v1755_v57 = vmul.f32 %v1754_v4, %v1739_v44  ;;  %557 = vst.msk [vmem:[#allocation2 + $0xf8] sm:$0xff] %vm386_vm0, %v2913_v34 }
 0x1b0   : > { %s5336_s12 = sld [smem:[#allocation11 + $0xb7]]  ;;  %v5461_v35 = vadd.f32 %v1723_v41, %v1669_v11  ;;  %v5471_v19 = vadd.f32 %v1729_v29, %v1675_v48  ;;  %v5473_v28 = vadd.f32 %v1735_v31, %v1681_v47  ;;  %v5475_v60 = vadd.f32 %v1743_v61, %v1707_v32  ;;  %558 = vst.msk [vmem:[#allocation2 + $0x100] sm:$0xf] %vm389_vm1, %v2914_v14  ;;  %v1818_v29 = vld [vmem:[#allocation2 + $0xca] sm:$0xff] }
 0x1b1   : > { %s5345_s14 = sld [smem:[#allocation8 + $0x41]]  ;;  %v1762_v20 = vstv %s5297_s6  ;;  %v5479_v4 = vadd.f32 %v1749_v23, %v1713_v49  ;;  %v5481_v24 = vadd.f32 %v1755_v57, %v1719_v18  ;;  %577 = vst.msk [vmem:[#allocation2 + $0x118] sm:$0xf] %vm389_vm1, %v570_v50  ;;  %v1838_v16 = vstv %s5381_s17 }
 0x1b2   : > { %s7227_s15 = sld [smem:[#allocation53_spill]]  ;;  %v1844_v26 = vstv %s5388_s22  ;;  %v1850_v6 = vstv %s5398_s8  ;;  %v1858_v46 = vstv %s5402_s3  ;;  %v1864_v62 = vstv %s5409_s20 }
 0x1b3   : > { %s7228_s29 = sld [smem:[#allocation67_spill]]  ;;  %v1870_v40 = vstv %s5416_s10  ;;  %v1876_v25 = vstv %s5425_s24  ;;  %v1882_v3 = vstv %s5432_s21  ;;  %v1888_v56 = vstv %s5442_s25 }
 0x1b4   : > { %s7229_s11 = sld [smem:[#allocation68_spill]]  ;;  %v1896_v11 = vstv %s5451_s16  ;;  %v1902_v48 = vstv %s5459_s30  ;;  %v1764_v13 = vmul.f32 %v1762_v20, %v1760_v55  ;;  %v1840_v14 = vmul.f32 %v1838_v16, %v1818_v29 }
 0x1b5   : > { %s7230_s2 = sld [smem:[#allocation69_spill]]  ;;  %v1846_v50 = vmul.f32 %v1844_v26, %v1818_v29 }
 0x1b6   : > { %7220 = sst [smem:[#allocation31_spill]] %s5336_s12  ;;  %v1766_v32 = vadd.f32 %v1764_v13, %v5363_v38 }
 0x1b7   : > { %7222 = sst [smem:[#allocation32_spill]] %s5345_s14 }
 0x1b8   : > { %s5351_s12 = sld [smem:[#allocation11 + $0x26]]  ;;  %v1768_v15 = vstv %s7227_s15 }
 0x1b9   : > { %s5361_s14 = sld [smem:[#allocation11 + $0x71]]  ;;  %v1774_v5 = vstv %s7228_s29  ;;  %v1770_v44 = vmul.f32 %v1768_v15, %v1760_v55 }
 0x1ba   : > { %s5467_s28 = sld [smem:[#allocation11 + $0xc6]]  ;;  %v1782_v59 = vstv %s7229_s11  ;;  %v1776_v47 = vmul.f32 %v1774_v5, %v1760_v55  ;;  %v1856_v55 = vld [vmem:[#allocation2 + $0xcb] sm:$0xff] }
 0x1bb   : > { %s7231_s23 = sld [smem:[#allocation31_spill]]  ;;  %v1788_v0 = vstv %s7230_s2  ;;  %v1784_v1 = vmul.f32 %v1782_v59, %v1780_v12  ;;  %v1772_v27 = vadd.f32 %v1770_v44, %v5373_v7  ;;  %v1860_v44 = vmul.f32 %v1858_v46, %v1856_v55 }
 0x1bc   : > { %s7232_s9 = sld [smem:[#allocation65_spill]]  ;;  %v1790_v9 = vmul.f32 %v1788_v0, %v1780_v12  ;;  %v1778_v41 = vadd.f32 %v1776_v47, %v5375_v17 }
 0x1bd   : > { %s7233_s7 = sld [smem:[#allocation66_spill]]  ;;  %v1786_v7 = vadd.f32 %v1784_v1, %v1766_v32 }
 0x1be   : > { %7223 = sst [smem:[#allocation33_spill]] %s5351_s12  ;;  %v1792_v17 = vadd.f32 %v1790_v9, %v1772_v27  ;;  %v1872_v27 = vmul.f32 %v1870_v40, %v1856_v55 }
 0x1bf   : > { %s5371_s12 = sld [smem:[#allocation11 + $0xbc]]  ;;  %v1826_v58 = vstv %s5361_s14 }
 0x1c0   : > { %s7234_s0 = sld [smem:[#allocation32_spill]]  ;;  %v1908_v2 = vstv %s5467_s28  ;;  %v1828_v38 = vmul.f32 %v1826_v58, %v1818_v29 }
 0x1c1   : > { %s7235_s4 = sld [smem:[#allocation33_spill]]  ;;  %v1794_v42 = vstv %s7231_s23 }
 0x1c2   : > { %v1800_v21 = vstv %s7232_s9  ;;  %s5507_s1 = sld [smem:[#allocation11 + $0x1d]]  ;;  %v1796_v30 = vmul.f32 %v1794_v42, %v1780_v12  ;;  %v1830_v13 = vadd.f32 %v1828_v38, %v1792_v17 }
 0x1c3   : > { %v1806_v63 = vstv %s7233_s7  ;;  %s5516_s19 = sld [smem:[#allocation11 + $0x68]]  ;;  %v1802_v45 = vmul.f32 %v1800_v21, %v1780_v12 }
 0x1c4   : > { %s5526_s5 = sld [smem:[#allocation11 + $0xb3]]  ;;  %v1808_v49 = vmul.f32 %v1806_v63, %v1780_v12  ;;  %v1798_v23 = vadd.f32 %v1796_v30, %v1778_v41  ;;  %v1866_v30 = vmul.f32 %v1864_v62, %v1856_v55  ;;  %v1878_v41 = vmul.f32 %v1876_v25, %v1856_v55 }
 0x1c5   : > { %v1832_v51 = vstv %s5371_s12  ;;  %s5533_s18 = sld [smem:[#allocation11 + $0x22]]  ;;  %v1804_v31 = vadd.f32 %v1802_v45, %v5347_v54 }
 0x1c6   : > { %v1812_v36 = vstv %s7234_s0  ;;  %s5542_s26 = sld [smem:[#allocation11 + $0x6d]]  ;;  %v1810_v57 = vadd.f32 %v1808_v49, %v5353_v53  ;;  %v1834_v34 = vmul.f32 %v1832_v51, %v1818_v29  ;;  %v1852_v53 = vmul.f32 %v1850_v6, %v1818_v29  ;;  %v1759_v49 = vld [vmem:[#allocation2 + $0xc0] sm:$0xff] }
 0x1c7   : > { %v1820_v33 = vstv %s7235_s4  ;;  %v1814_v61 = vmul.f32 %v1812_v36, %v1780_v12  ;;  %s5545_s27 = sld [smem:[#allocation11 + $0xb8]]  ;;  %v1842_v1 = vadd.f32 %v1840_v14, %v1804_v31  ;;  %v1884_v31 = vmul.f32 %v1882_v3, %v1856_v55 }
 0x1c8   : > { %v1822_v18 = vmul.f32 %v1820_v33, %v1818_v29  ;;  %v1836_v47 = vadd.f32 %v1834_v34, %v1798_v23  ;;  %v1848_v9 = vadd.f32 %v1846_v50, %v1810_v57  ;;  %v1868_v29 = vadd.f32 %v1866_v30, %v1830_v13  ;;  %v1779_v50 = vld [vmem:[#allocation2 + $0xc1] sm:$0xff]  ;;  %s5615_s6 = sld [smem:[#allocation11 + $0xc7]] }
 0x1c9   : > { %v1816_v54 = vadd.f32 %v1814_v61, %v5355_v10  ;;  %v1894_v10 = vld [vmem:[#allocation2 + $0xcc] sm:$0xff]  ;;  %v1890_v61 = vmul.f32 %v1888_v56, %v1856_v55  ;;  %v1763_v14 = vmul.f32 %v1762_v20, %v1759_v49  ;;  %v1769_v13 = vmul.f32 %v1768_v15, %v1759_v49  ;;  %s5624_s15 = sld [smem:[#allocation11 + $0x32]] }
 0x1ca   : > { %v1824_v12 = vadd.f32 %v1822_v18, %v1786_v7  ;;  %v1898_v18 = vmul.f32 %v1896_v11, %v1894_v10  ;;  %v1874_v38 = vadd.f32 %v1872_v27, %v1836_v47  ;;  %v5580_v7 = vadd.f32 %v1878_v41, %v1842_v1  ;;  %v2912_v1 = vld [vmem:[%s7198_s13 + $0x30] sm:$0xff]  ;;  %s5633_s13 = sld [smem:[#allocation11 + $0x7d]]  ;;  %v1855_v27 = vld [vmem:[#allocation2 + $0xc3] sm:$0xff]  ;;  %v568_v41 = vpop.permute.xlu1 %567 }
 0x1cb   : > { %7236 = sst [smem:[#allocation74_spill]] %s5533_s18  ;;  %v1854_v45 = vadd.f32 %v1852_v53, %v1816_v54  ;;  %v1904_v17 = vmul.f32 %v1902_v48, %v1894_v10  ;;  %v1910_v23 = vmul.f32 %v1908_v2, %v1894_v10  ;;  %v5588_v57 = vadd.f32 %v1884_v31, %v1848_v9  ;;  %556 = vst.msk [vmem:[#allocation2 + $0xf0] sm:$0xff] %vm386_vm0, %v2912_v1 }
 0x1cc   : > { %7237 = sst [smem:[#allocation75_spill]] %s5542_s26  ;;  %v1862_v32 = vadd.f32 %v1860_v44, %v1824_v12  ;;  %v1775_v53 = vmul.f32 %v1774_v5, %v1759_v49  ;;  %v1765_v44 = vadd.f32 %v1763_v14, %v5475_v60  ;;  %v1783_v20 = vmul.f32 %v1782_v59, %v1779_v50  ;;  %v1817_v60 = vld [vmem:[#allocation2 + $0xc2] sm:$0xff]  ;;  %576 = vst.msk [vmem:[#allocation2 + $0x110] sm:$0xff] %vm386_vm0, %v568_v41 }
 0x1cd   : > { %7238 = sst [smem:[#allocation76_spill]] %s5545_s27  ;;  %v5590_v54 = vadd.f32 %v1890_v61, %v1854_v45  ;;  %v5598_v55 = vadd.f32 %v1904_v17, %v1868_v29  ;;  %v5600_v12 = vadd.f32 %v1910_v23, %v1874_v38  ;;  %v1789_v10 = vmul.f32 %v1788_v0, %v1779_v50 }
 0x1ce   : > { %s5554_s26 = sld [smem:[#allocation11 + $0x27]]  ;;  %v5592_v34 = vadd.f32 %v1898_v18, %v1862_v32  ;;  %v1795_v47 = vmul.f32 %v1794_v42, %v1779_v50  ;;  %v1771_v15 = vadd.f32 %v1769_v13, %v5479_v4  ;;  %v1777_v5 = vadd.f32 %v1775_v53, %v5481_v24 }
 0x1cf   : > { %s5560_s27 = sld [smem:[#allocation11 + $0x72]]  ;;  %v1801_v9 = vmul.f32 %v1800_v21, %v1779_v50  ;;  %v1807_v30 = vmul.f32 %v1806_v63, %v1779_v50  ;;  %v1785_v59 = vadd.f32 %v1783_v20, %v1765_v44  ;;  %v1813_v0 = vmul.f32 %v1812_v36, %v1779_v50 }
 0x1d0   : > { %s5570_s18 = sld [smem:[#allocation11 + $0x2c]]  ;;  %v1821_v42 = vmul.f32 %v1820_v33, %v1817_v60  ;;  %v1827_v4 = vmul.f32 %v1826_v58, %v1817_v60  ;;  %v1791_v24 = vadd.f32 %v1789_v10, %v1771_v15  ;;  %v1797_v21 = vadd.f32 %v1795_v47, %v1777_v5 }
 0x1d1   : > { %v1803_v63 = vadd.f32 %v1801_v9, %v5461_v35  ;;  %v1809_v45 = vadd.f32 %v1807_v30, %v5471_v19  ;;  %s5637_s29 = sld [smem:[#allocation11 + $0xc8]]  ;;  %v1815_v36 = vadd.f32 %v1813_v0, %v5473_v28  ;;  %v1833_v32 = vmul.f32 %v1832_v51, %v1817_v60 }
 0x1d2   : > { %v1823_v33 = vadd.f32 %v1821_v42, %v1785_v59  ;;  %v1839_v58 = vmul.f32 %v1838_v16, %v1817_v60  ;;  %s5644_s14 = sld [smem:[#allocation11 + $0x37]]  ;;  %v1829_v49 = vadd.f32 %v1827_v4, %v1791_v24  ;;  %v1845_v35 = vmul.f32 %v1844_v26, %v1817_v60  ;;  %v1893_v26 = vld [vmem:[#allocation2 + $0xc4] sm:$0xff]  ;;  %v2034_v59 = vld [vmem:[#allocation2 + $0xf9] sm:$0xff] }
 0x1d3   : > { %v1851_v19 = vmul.f32 %v1850_v6, %v1817_v60  ;;  %v1859_v29 = vmul.f32 %v1858_v46, %v1855_v27  ;;  %s5652_s11 = sld [smem:[#allocation11 + $0x82]]  ;;  %v1835_v28 = vadd.f32 %v1833_v32, %v1797_v21  ;;  %v1865_v16 = vmul.f32 %v1864_v62, %v1855_v27  ;;  %v2014_v60 = vld [vmem:[#allocation2 + $0xf8] sm:$0xff]  ;;  %v1914_v21 = vld [vmem:[#allocation2 + $0xe0] sm:$0xff] }
 0x1d4   : > { %7239 = sst [smem:[#allocation77_spill]] %s5554_s26  ;;  %v1841_v51 = vadd.f32 %v1839_v58, %v1803_v63  ;;  %v1871_v31 = vmul.f32 %v1870_v40, %v1855_v27  ;;  %v1847_v6 = vadd.f32 %v1845_v35, %v1809_v45  ;;  %v1877_v18 = vmul.f32 %v1876_v25, %v1855_v27  ;;  %v566_v63 = vpop.permute.xlu0 %565  ;;  %v1934_v58 = vld [vmem:[#allocation2 + $0xe1] sm:$0xff] }
 0x1d5   : > { %s5564_s26 = sld [smem:[#allocation11 + $0xbd]]  ;;  %v1853_v46 = vadd.f32 %v1851_v19, %v1815_v36  ;;  %v1861_v61 = vadd.f32 %v1859_v29, %v1823_v33  ;;  %v1867_v38 = vadd.f32 %v1865_v16, %v1829_v49  ;;  %v1883_v62 = vmul.f32 %v1882_v3, %v1855_v27  ;;  %575 = vst.msk [vmem:[#allocation2 + $0x108] sm:$0xff] %vm386_vm0, %v566_v63  ;;  %v1954_v16 = vld [vmem:[#allocation2 + $0xe2] sm:$0xff] }
 0x1d6   : > { %7241 = sst [smem:[#allocation71_spill]] %s5570_s18  ;;  %v1873_v17 = vadd.f32 %v1871_v31, %v1835_v28  ;;  %v1889_v40 = vmul.f32 %v1888_v56, %v1855_v27  ;;  %v5671_v23 = vadd.f32 %v1877_v18, %v1841_v51  ;;  %v1897_v14 = vmul.f32 %v1896_v11, %v1893_v26 }
 0x1d7   : > { %s5586_s18 = sld [smem:[#allocation11 + $0xc2]]  ;;  %v1903_v25 = vmul.f32 %v1902_v48, %v1893_v26  ;;  %v1909_v50 = vmul.f32 %v1908_v2, %v1893_v26  ;;  %v5681_v3 = vadd.f32 %v1883_v62, %v1847_v6  ;;  %v1916_v13 = vstv %s5507_s1 }
 0x1d8   : > { %s5659_s12 = sld [smem:[#allocation11 + $0xcd]]  ;;  %v5683_v56 = vadd.f32 %v1889_v40, %v1853_v46  ;;  %v1922_v53 = vstv %s5516_s19  ;;  %v5689_v11 = vadd.f32 %v1897_v14, %v1861_v61  ;;  %v1928_v44 = vstv %s5526_s5  ;;  %v1974_v61 = vld [vmem:[#allocation2 + $0xe3] sm:$0xff] }
 0x1d9   : > { %s5663_s17 = sld [smem:[#allocation8 + $0x12]]  ;;  %v5691_v48 = vadd.f32 %v1903_v25, %v1867_v38  ;;  %v5693_v2 = vadd.f32 %v1909_v50, %v1873_v17  ;;  %v1962_v15 = vstv %s5560_s27  ;;  %v2008_v24 = vstv %s5615_s6  ;;  %v1994_v40 = vld [vmem:[#allocation2 + $0xe4] sm:$0xff] }
 0x1da   : > { %s5669_s22 = sld [smem:[#allocation8 + $0x2d]]  ;;  %v2016_v45 = vstv %s5624_s15  ;;  %v2022_v36 = vstv %s5633_s13  ;;  %v2028_v33 = vstv %s5637_s29  ;;  %v2036_v32 = vstv %s5644_s14 }
 0x1db   : > { %7240 = sst [smem:[#allocation78_spill]] %s5564_s26  ;;  %v5723_v27 = vmul.f32 %v2016_v45, %v2014_v60  ;;  %v5725_v41 = vmul.f32 %v2022_v36, %v2014_v60  ;;  %v5727_v49 = vmul.f32 %v2028_v33, %v2014_v60  ;;  %v5729_v35 = vmul.f32 %v2036_v32, %v2034_v59 }
 0x1dc   : > { %s5578_s26 = sld [smem:[#allocation11 + $0x77]]  ;;  %v2042_v19 = vstv %s5652_s11  ;;  %v1918_v28 = vmul.f32 %v1916_v13, %v1914_v21  ;;  %v1924_v51 = vmul.f32 %v1922_v53, %v1914_v21  ;;  %v1930_v6 = vmul.f32 %v1928_v44, %v1914_v21 }
 0x1dd   : > { %7243 = sst [smem:[#allocation72_spill]] %s5586_s18  ;;  %v5741_v31 = vmul.f32 %v2042_v19, %v2034_v59  ;;  %v1964_v50 = vmul.f32 %v1962_v15, %v1954_v16 }
 0x1de   : > { %s5606_s18 = sld [smem:[#allocation11 + $0x7c]]  ;;  %v2048_v29 = vstv %s5659_s12  ;;  %v1920_v18 = vadd.f32 %v1918_v28, %v5592_v34  ;;  %v1926_v38 = vadd.f32 %v1924_v51, %v5598_v55  ;;  %v1932_v14 = vadd.f32 %v1930_v6, %v5600_v12  ;;  %v2013_v55 = vld [vmem:[#allocation2 + $0xf0] sm:$0xff] }
 0x1df   : > { %7244 = sst [smem:[#allocation80_spill]] %s5663_s17  ;;  %v5743_v26 = vmul.f32 %v2048_v29, %v2034_v59 }
 0x1e0   : > { %7245 = sst [smem:[#allocation73_spill]] %s5669_s22 }
 0x1e1   : > { %s7246_s8 = sld [smem:[#allocation74_spill]] }
 0x1e2   : > { %7242 = sst [smem:[#allocation79_spill]] %s5578_s26 }
 0x1e3   : > { %s5596_s26 = sld [smem:[#allocation11 + $0x31]] }
 0x1e4   : > { %s7247_s3 = sld [smem:[#allocation75_spill]]  ;;  %v2002_v4 = vstv %s5606_s18 }
 0x1e5   : > { %s7248_s20 = sld [smem:[#allocation76_spill]] }
 0x1e6   : > { %s7249_s10 = sld [smem:[#allocation77_spill]] }
 0x1e7   : > { %s5679_s24 = sld [smem:[#allocation8 + $0x48]]  ;;  %v1936_v20 = vstv %s7246_s8 }
 0x1e8   : > { %s7251_s21 = sld [smem:[#allocation78_spill]]  ;;  %v1938_v46 = vmul.f32 %v1936_v20, %v1934_v58 }
 0x1e9   : > { %s7252_s25 = sld [smem:[#allocation71_spill]]  ;;  %v1996_v42 = vstv %s5596_s26 }
 0x1ea   : > { %s7253_s2 = sld [smem:[#allocation79_spill]]  ;;  %v1942_v10 = vstv %s7247_s3  ;;  %v1940_v60 = vadd.f32 %v1938_v46, %v1920_v18  ;;  %v1998_v51 = vmul.f32 %v1996_v42, %v1994_v40  ;;  %v2010_v46 = vmul.f32 %v2008_v24, %v1994_v40 }
 0x1eb   : > { %s5687_s16 = sld [smem:[#allocation8 + $0x15]]  ;;  %v1948_v47 = vstv %s7248_s20  ;;  %v1944_v17 = vmul.f32 %v1942_v10, %v1934_v58  ;;  %v5784_v18 = vmul.f32 %v2016_v45, %v2013_v55 }
 0x1ec   : > { %s7255_s30 = sld [smem:[#allocation72_spill]]  ;;  %v1956_v1 = vstv %s7249_s10  ;;  %v1950_v62 = vmul.f32 %v1948_v47, %v1934_v58  ;;  %v2033_v58 = vld [vmem:[#allocation2 + $0xf1] sm:$0xff] }
 0x1ed   : > { %7250 = sst [smem:[#allocation81_spill]] %s5679_s24  ;;  %v1958_v25 = vmul.f32 %v1956_v1, %v1954_v16  ;;  %v1946_v59 = vadd.f32 %v1944_v17, %v1926_v38  ;;  %v1913_v38 = vld [vmem:[#allocation2 + $0xd8] sm:$0xff] }
 0x1ee   : > { %s5696_s28 = sld [smem:[#allocation11 + $0x3c]]  ;;  %v6829_v5 = vstv %s7251_s21  ;;  %v1952_v12 = vadd.f32 %v1950_v62, %v1932_v14  ;;  %v5790_v62 = vmul.f32 %v2028_v33, %v2013_v55  ;;  %v5792_v14 = vmul.f32 %v2036_v32, %v2033_v58 }
 0x1ef   : > { %s5702_s23 = sld [smem:[#allocation11 + $0x87]]  ;;  %v1976_v9 = vstv %s7252_s25  ;;  %v1970_v34 = vmul.f32 %v6829_v5, %v1954_v16  ;;  %v2004_v16 = vmul.f32 %v2002_v4, %v1994_v40  ;;  %v1960_v6 = vadd.f32 %v1958_v25, %v1940_v60  ;;  %v1933_v25 = vld [vmem:[#allocation2 + $0xd9] sm:$0xff] }
 0x1f0   : > { %v1982_v30 = vstv %s7253_s2  ;;  %s5708_s9 = sld [smem:[#allocation11 + $0xd2]]  ;;  %v1978_v21 = vmul.f32 %v1976_v9, %v1974_v61  ;;  %v1966_v5 = vadd.f32 %v1964_v50, %v1946_v59  ;;  %v5796_v50 = vmul.f32 %v2042_v19, %v2033_v58 }
 0x1f1   : > { %7254 = sst [smem:[#allocation82_spill]] %s5687_s16  ;;  %v1984_v63 = vmul.f32 %v1982_v30, %v1974_v61  ;;  %v1972_v17 = vadd.f32 %v1970_v34, %v1952_v12  ;;  %v5798_v60 = vmul.f32 %v2048_v29, %v2033_v58  ;;  %v1923_v33 = vmul.f32 %v1922_v53, %v1913_v38  ;;  %v1973_v12 = vld [vmem:[#allocation2 + $0xdb] sm:$0xff] }
 0x1f2   : > { %v1988_v0 = vstv %s7255_s30  ;;  %s5714_s7 = sld [smem:[#allocation11 + $0x41]]  ;;  %v1980_v40 = vadd.f32 %v1978_v21, %v1960_v6  ;;  %v1929_v32 = vmul.f32 %v1928_v44, %v1913_v38  ;;  %v1937_v19 = vmul.f32 %v1936_v20, %v1933_v25 }
 0x1f3   : > { %s5720_s0 = sld [smem:[#allocation11 + $0x8c]]  ;;  %v1990_v28 = vmul.f32 %v1988_v0, %v1974_v61  ;;  %v5788_v61 = vmul.f32 %v2022_v36, %v2013_v55  ;;  %v1986_v45 = vadd.f32 %v1984_v63, %v1966_v5  ;;  %v1917_v36 = vmul.f32 %v1916_v13, %v1913_v38  ;;  %v1953_v55 = vld [vmem:[#allocation2 + $0xda] sm:$0xff] }
 0x1f4   : > { %s5731_s4 = sld [smem:[#allocation11 + $0xd7]]  ;;  %v2000_v59 = vadd.f32 %v1998_v51, %v1980_v40  ;;  %v1943_v29 = vmul.f32 %v1942_v10, %v1933_v25  ;;  %v1925_v53 = vadd.f32 %v1923_v33, %v5691_v48  ;;  %v1931_v44 = vadd.f32 %v1929_v32, %v5693_v2  ;;  %v1993_v51 = vld [vmem:[#allocation2 + $0xdc] sm:$0xff] }
 0x1f5   : > { %s5739_s15 = sld [smem:[#allocation11 + $0x46]]  ;;  %v1992_v34 = vadd.f32 %v1990_v28, %v1972_v17  ;;  %v2006_v5 = vadd.f32 %v2004_v16, %v1986_v45  ;;  %v1919_v13 = vadd.f32 %v1917_v36, %v5689_v11  ;;  %v1949_v20 = vmul.f32 %v1948_v47, %v1933_v25 }
 0x1f6   : > { %s5749_s13 = sld [smem:[#allocation11 + $0x91]]  ;;  %v2020_v63 = vadd.f32 %v5723_v27, %v2000_v59  ;;  %v1957_v10 = vmul.f32 %v1956_v1, %v1953_v55  ;;  %v1945_v28 = vadd.f32 %v1943_v29, %v1925_v53  ;;  %v1963_v2 = vmul.f32 %v1962_v15, %v1953_v55  ;;  %v2094_v29 = vld [vmem:[#allocation2 + $0xfc] sm:$0xff] }
 0x1f7   : > { %s5757_s29 = sld [smem:[#allocation11 + $0xdc]]  ;;  %v2012_v21 = vadd.f32 %v2010_v46, %v1992_v34  ;;  %v2026_v58 = vadd.f32 %v5725_v41, %v2006_v5  ;;  %v1939_v48 = vadd.f32 %v1937_v19, %v1919_v13  ;;  %v1951_v27 = vadd.f32 %v1949_v20, %v1931_v44  ;;  %v2074_v34 = vld [vmem:[#allocation2 + $0xfb] sm:$0xff] }
 0x1f8   : > { %7256 = sst [smem:[#allocation83_spill]] %s5714_s7  ;;  %v5835_v47 = vadd.f32 %v5729_v35, %v2020_v63  ;;  %v7260_v41 = vstv %s7251_s21  ;;  %v1965_v6 = vadd.f32 %v1963_v2, %v1945_v28  ;;  %v1977_v46 = vmul.f32 %v1976_v9, %v1973_v12  ;;  %v2054_v35 = vld [vmem:[#allocation2 + $0xfa] sm:$0xff]  ;;  %v589_v63 = vpop.permute.xlu2 %588 }
 0x1f9   : > { %s5766_s14 = sld [smem:[#allocation11 + $0x33]]  ;;  %v2032_v11 = vadd.f32 %v5727_v49, %v2012_v21  ;;  %v5838_v1 = vadd.f32 %v5741_v31, %v2026_v58  ;;  %v1969_v49 = vmul.f32 %v7260_v41, %v1953_v55  ;;  %v1959_v16 = vadd.f32 %v1957_v10, %v1939_v48  ;;  %596 = vst.msk [vmem:[#allocation2 + $0x130] sm:$0xf] %vm389_vm1, %v589_v63 }
 0x1fa   : > { %7257 = sst [smem:[#allocation84_spill]] %s5731_s4  ;;  %v1983_v38 = vmul.f32 %v1982_v30, %v1973_v12  ;;  %v1989_v17 = vmul.f32 %v1988_v0, %v1973_v12  ;;  %v1997_v25 = vmul.f32 %v1996_v42, %v1993_v51  ;;  %v2003_v9 = vmul.f32 %v2002_v4, %v1993_v51 }
 0x1fb   : > { %s5772_s11 = sld [smem:[#allocation11 + $0x7e]]  ;;  %v5845_v15 = vadd.f32 %v5743_v26, %v2032_v11  ;;  %v1971_v31 = vadd.f32 %v1969_v49, %v1951_v27  ;;  %v1979_v26 = vadd.f32 %v1977_v46, %v1959_v16  ;;  %v2009_v40 = vmul.f32 %v2008_v24, %v1993_v51  ;;  %v587_v46 = vpop.permute.xlu1 %586 }
 0x1fc   : > { %s5780_s12 = sld [smem:[#allocation11 + $0xc9]]  ;;  %v2056_v45 = vstv %s5696_s28  ;;  %v1985_v30 = vadd.f32 %v1983_v38, %v1965_v6  ;;  %v2062_v42 = vstv %s5702_s23  ;;  %v6843_v24 = vstv %s5708_s9  ;;  %595 = vst.msk [vmem:[#allocation2 + $0x128] sm:$0xff] %vm386_vm0, %v587_v46 }
 0x1fd   : > { %s5786_s16 = sld [smem:[#allocation11 + $0x38]]  ;;  %v1991_v36 = vadd.f32 %v1989_v17, %v1971_v31  ;;  %v2058_v0 = vmul.f32 %v2056_v45, %v2054_v35  ;;  %v1999_v33 = vadd.f32 %v1997_v25, %v1979_v26  ;;  %v2064_v4 = vmul.f32 %v2062_v42, %v2054_v35 }
 0x1fe   : > { %s5794_s24 = sld [smem:[#allocation11 + $0x83]]  ;;  %v6842_v32 = vstv %s5714_s7  ;;  %v2005_v55 = vadd.f32 %v2003_v9, %v1985_v30  ;;  %v2070_v5 = vmul.f32 %v6843_v24, %v2054_v35  ;;  %v6841_v13 = vstv %s5720_s0 }
 0x1ff   : > { %s5800_s22 = sld [smem:[#allocation11 + $0xce]]  ;;  %v2011_v59 = vadd.f32 %v2009_v40, %v1991_v36  ;;  %v2078_v19 = vmul.f32 %v6842_v32, %v2074_v34  ;;  %v2019_v21 = vadd.f32 %v5784_v18, %v1999_v33  ;;  %v6840_v53 = vstv %s5731_s4 }
 0x200   : > { %s5808_s17 = sld [smem:[#allocation11 + $0x3d]]  ;;  %v6839_v44 = vstv %s5739_s15  ;;  %v2025_v58 = vadd.f32 %v5788_v61, %v2005_v55  ;;  %v2084_v10 = vmul.f32 %v6841_v13, %v2074_v34  ;;  %v2090_v18 = vmul.f32 %v6840_v53, %v2074_v34  ;;  %v2114_v34 = vld [vmem:[#allocation2 + $0x110] sm:$0xff] }
 0x201   : > { %s5819_s1 = sld [smem:[#allocation11 + $0xd3]]  ;;  %v2031_v20 = vadd.f32 %v5790_v62, %v2011_v59  ;;  %v5899_v12 = vadd.f32 %v5792_v14, %v2019_v21  ;;  %v2098_v61 = vmul.f32 %v6839_v44, %v2094_v29  ;;  %v6838_v62 = vstv %s5749_s13 }
 0x202   : > { %s5827_s19 = sld [smem:[#allocation8 + $0x30]]  ;;  %v6837_v11 = vstv %s5757_s29  ;;  %v5906_v48 = vadd.f32 %v5796_v50, %v2025_v58  ;;  %v2104_v2 = vmul.f32 %v6838_v62, %v2094_v29  ;;  %v2116_v51 = vstv %s5766_s14  ;;  %v2134_v62 = vld [vmem:[#allocation2 + $0x111] sm:$0xff] }
 0x203   : > { %7258 = sst [smem:[#allocation85_spill]] %s5786_s16  ;;  %v5909_v28 = vadd.f32 %v5798_v60, %v2031_v20  ;;  %v2110_v14 = vmul.f32 %v6837_v11, %v2094_v29  ;;  %v6844_v27 = vstv %s5772_s11  ;;  %v2128_v41 = vstv %s5780_s12 }
 0x204   : > { %s5832_s5 = sld [smem:[#allocation8 + $0x4b]]  ;;  %v6846_v49 = vstv %s5786_s16  ;;  %v6847_v16 = vstv %s5794_s24  ;;  %v2060_v58 = vadd.f32 %v2058_v0, %v5835_v47  ;;  %v2066_v20 = vadd.f32 %v2064_v4, %v5838_v1  ;;  %v2172_v4 = vld [vmem:[#allocation2 + $0x112] sm:$0xff] }
 0x205   : > { %7259 = sst [smem:[#allocation86_spill]] %s5800_s22  ;;  %v2072_v46 = vadd.f32 %v2070_v5, %v5845_v15  ;;  %v2118_v11 = vmul.f32 %v2116_v51, %v2114_v34  ;;  %v2124_v44 = vmul.f32 %v6844_v27, %v2114_v34  ;;  %v2130_v53 = vmul.f32 %v2128_v41, %v2114_v34 }
 0x206   : > { %s5814_s22 = sld [smem:[#allocation11 + $0x88]]  ;;  %v2174_v31 = vstv %s5808_s17  ;;  %v2138_v13 = vmul.f32 %v6846_v49, %v2134_v62  ;;  %v2144_v32 = vmul.f32 %v6847_v16, %v2134_v62  ;;  %v2080_v24 = vadd.f32 %v2078_v19, %v2060_v58 }
 0x207   : > { %s5842_s27 = sld [smem:[#allocation11 + $0x42]]  ;;  %v2186_v17 = vstv %s5819_s1  ;;  %v2086_v47 = vadd.f32 %v2084_v10, %v2066_v20  ;;  %v2092_v0 = vadd.f32 %v2090_v18, %v2072_v46  ;;  %v2176_v34 = vmul.f32 %v2174_v31, %v2172_v4 }
 0x208   : > { %s5849_s8 = sld [smem:[#allocation11 + $0x8d]]  ;;  %v2198_v26 = vstv %s5827_s19  ;;  %v2100_v49 = vadd.f32 %v2098_v61, %v2080_v24  ;;  %v2188_v20 = vmul.f32 %v2186_v17, %v2172_v4  ;;  %v585_v24 = vpop.permute.xlu0 %584 }
 0x209   : > { %s5857_s3 = sld [smem:[#allocation11 + $0xd8]]  ;;  %v2106_v16 = vadd.f32 %v2104_v2, %v2086_v47  ;;  %v2112_v19 = vadd.f32 %v2110_v14, %v2092_v0  ;;  %v2210_v47 = vld [vmem:[#allocation2 + $0x113] sm:$0xff]  ;;  %594 = vst.msk [vmem:[#allocation2 + $0x120] sm:$0xff] %vm386_vm0, %v585_v24 }
 0x20a   : > { %s5864_s20 = sld [smem:[#allocation8 + $0x18]]  ;;  %v2204_v9 = vstv %s5832_s5  ;;  %v2120_v61 = vadd.f32 %v2118_v11, %v2100_v49 }
 0x20b   : > { %s5869_s26 = sld [smem:[#allocation8 + $0x33]]  ;;  %v2126_v2 = vadd.f32 %v2124_v44, %v2106_v16  ;;  %v2132_v14 = vadd.f32 %v2130_v53, %v2112_v19  ;;  %v2248_v16 = vld [vmem:[#allocation2 + $0x114] sm:$0xff] }
 0x20c   : > { %s5875_s18 = sld [smem:[#allocation8 + $0x4e]]  ;;  %v2180_v38 = vstv %s5814_s22  ;;  %v2140_v53 = vadd.f32 %v2138_v13, %v2120_v61 }
 0x20d   : > { %s5881_s6 = sld [smem:[#allocation11 + $0x47]]  ;;  %v2212_v40 = vstv %s5842_s27  ;;  %v2182_v10 = vmul.f32 %v2180_v38, %v2172_v4  ;;  %v2146_v44 = vadd.f32 %v2144_v32, %v2126_v2 }
 0x20e   : > { %7261 = sst [smem:[#allocation87_spill]] %s5849_s8  ;;  %v2218_v30 = vstv %s5849_s8  ;;  %v2178_v19 = vadd.f32 %v2176_v34, %v2140_v53  ;;  %v2073_v34 = vld [vmem:[#allocation2 + $0xf3] sm:$0xff] }
 0x20f   : > { %s5887_s10 = sld [smem:[#allocation11 + $0x92]]  ;;  %v2224_v36 = vstv %s5857_s3  ;;  %v2184_v24 = vadd.f32 %v2182_v10, %v2146_v44  ;;  %v7280_v44 = vstv %s5708_s9 }
 0x210   : > { %s7263_s21 = sld [smem:[#allocation86_spill]]  ;;  %v2230_v33 = vstv %s5864_s20 }
 0x211   : > { %s5895_s25 = sld [smem:[#allocation11 + $0xdd]]  ;;  %v2236_v55 = vstv %s5869_s26 }
 0x212   : > { %7262 = sst [smem:[#allocation88_spill]] %s5875_s18  ;;  %v2242_v59 = vstv %s5875_s18  ;;  %v2238_v32 = vmul.f32 %v2236_v55, %v2210_v47 }
 0x213   : > { %s7264_s2 = sld [smem:[#allocation80_spill]]  ;;  %v2250_v29 = vstv %s5881_s6 }
 0x214   : > { %s7265_s30 = sld [smem:[#allocation73_spill]] }
 0x215   : > { %s7266_s7 = sld [smem:[#allocation81_spill]]  ;;  %v2256_v21 = vstv %s5887_s10 }
 0x216   : > { %s7267_s4 = sld [smem:[#allocation82_spill]]  ;;  %v2148_v50 = vstv %s7263_s21  ;;  %v2258_v61 = vmul.f32 %v2256_v21, %v2248_v16 }
 0x217   : > { %v2262_v63 = vstv %s5895_s25  ;;  %v2150_v1 = vmul.f32 %v2148_v50, %v2134_v62  ;;  %s5963_s16 = sld [smem:[#allocation8 + $0x13]] }
 0x218   : > { %s5967_s21 = sld [smem:[#allocation8 + $0x2e]] }
 0x219   : > { %v2154_v6 = vstv %s7264_s2  ;;  %v2152_v11 = vadd.f32 %v2150_v1, %v2132_v14  ;;  %s5997_s8 = sld [smem:[#allocation11 + $0x34]]  ;;  %v2053_v1 = vld [vmem:[#allocation2 + $0xf2] sm:$0xff] }
 0x21a   : > { %v2160_v60 = vstv %s7265_s30  ;;  %v2156_v15 = vmul.f32 %v2154_v6, %v2134_v62  ;;  %s6015_s18 = sld [smem:[#allocation11 + $0x39]] }
 0x21b   : > { %v2166_v35 = vstv %s7266_s7  ;;  %v2162_v5 = vmul.f32 %v2160_v60, %v2134_v62  ;;  %v2190_v13 = vadd.f32 %v2188_v20, %v2152_v11  ;;  %v2069_v11 = vmul.f32 %v7280_v44, %v2053_v1  ;;  %s7285_s28 = sld [smem:[#allocation85_spill]] }
 0x21c   : > { %v2192_v25 = vstv %s7267_s4  ;;  %v2168_v27 = vmul.f32 %v2166_v35, %v2134_v62  ;;  %v2158_v18 = vadd.f32 %v2156_v15, %v5580_v7  ;;  %v2200_v7 = vmul.f32 %v2198_v26, %v2172_v4  ;;  %s6045_s23 = sld [smem:[#allocation11 + $0x3e]] }
 0x21d   : > { %7268 = sst [smem:[#allocation89_spill]] %s5963_s16  ;;  %v2164_v62 = vadd.f32 %v2162_v5, %v5588_v57  ;;  %v2194_v46 = vmul.f32 %v2192_v25, %v2172_v4  ;;  %v2206_v57 = vmul.f32 %v2204_v9, %v2172_v4  ;;  %v2226_v4 = vmul.f32 %v2224_v36, %v2210_v47 }
 0x21e   : > { %7269 = sst [smem:[#allocation70_spill]] %s5967_s21  ;;  %v2170_v58 = vadd.f32 %v2168_v27, %v5590_v54  ;;  %v2214_v54 = vmul.f32 %v2212_v40, %v2210_v47  ;;  %v2220_v27 = vmul.f32 %v2218_v30, %v2210_v47  ;;  %v2232_v5 = vmul.f32 %v2230_v33, %v2210_v47 }
 0x21f   : > { %s5974_s16 = sld [smem:[#allocation8 + $0x49]]  ;;  %v2196_v49 = vadd.f32 %v2194_v46, %v2158_v18  ;;  %v2202_v0 = vadd.f32 %v2200_v7, %v2164_v62  ;;  %v2244_v62 = vmul.f32 %v2242_v59, %v2210_v47  ;;  %v2228_v2 = vadd.f32 %v2226_v4, %v2190_v13  ;;  %v2093_v46 = vld [vmem:[#allocation2 + $0xf4] sm:$0xff] }
 0x220   : > { %s5978_s21 = sld [smem:[#allocation8 + $0x16]]  ;;  %v2208_v15 = vadd.f32 %v2206_v57, %v2170_v58  ;;  %v2252_v58 = vmul.f32 %v2250_v29, %v2248_v16  ;;  %v2216_v10 = vadd.f32 %v2214_v54, %v2178_v19  ;;  %v2222_v20 = vadd.f32 %v2220_v27, %v2184_v24 }
 0x221   : > { %7274 = sst [smem:[#allocation37_spill]] %s5997_s8  ;;  %v6003_v18 = vadd.f32 %v2232_v5, %v2196_v49  ;;  %v6013_v14 = vadd.f32 %v2238_v32, %v2202_v0  ;;  %v2264_v7 = vmul.f32 %v2262_v63, %v2248_v16  ;;  %v2057_v57 = vmul.f32 %v2056_v45, %v2053_v1 }
 0x222   : > { %s6011_s8 = sld [smem:[#allocation11 + $0xca]]  ;;  %v6017_v47 = vadd.f32 %v2244_v62, %v2208_v15  ;;  %v2063_v54 = vmul.f32 %v2062_v42, %v2053_v1  ;;  %v6027_v27 = vadd.f32 %v2252_v58, %v2216_v10  ;;  %v6029_v53 = vadd.f32 %v2258_v61, %v2222_v20  ;;  %v2113_v15 = vld [vmem:[#allocation2 + $0x108] sm:$0xff] }
 0x223   : > { %7279 = sst [smem:[#allocation40_spill]] %s6015_s18  ;;  %v6037_v16 = vadd.f32 %v2264_v7, %v2228_v2  ;;  %v7282_v45 = vstv %s5720_s0  ;;  %v7284_v19 = vstv %s5739_s15  ;;  %v7286_v13 = vstv %s5749_s13  ;;  %v2133_v10 = vld [vmem:[#allocation2 + $0x109] sm:$0xff] }
 0x224   : > { %s6035_s18 = sld [smem:[#allocation11 + $0xcf]]  ;;  %v2083_v42 = vmul.f32 %v7282_v45, %v2073_v34  ;;  %v2097_v24 = vmul.f32 %v7284_v19, %v2093_v46  ;;  %v2103_v32 = vmul.f32 %v7286_v13, %v2093_v46  ;;  %v7287_v1 = vstv %s5757_s29 }
 0x225   : > { %7270 = sst [smem:[#allocation90_spill]] %s5974_s16  ;;  %v2109_v62 = vmul.f32 %v7287_v1, %v2093_v46  ;;  %v2059_v58 = vadd.f32 %v2057_v57, %v5899_v12  ;;  %v2065_v61 = vadd.f32 %v2063_v54, %v5906_v48  ;;  %v2117_v20 = vmul.f32 %v2116_v51, %v2113_v15 }
 0x226   : > { %7271 = sst [smem:[#allocation34_spill]] %s5978_s21  ;;  %v7289_v2 = vstv %s5772_s11  ;;  %v2129_v44 = vmul.f32 %v2128_v41, %v2113_v15  ;;  %v7290_v57 = vstv %s7285_s28  ;;  %v7291_v54 = vstv %s5794_s24  ;;  %v2171_v41 = vld [vmem:[#allocation2 + $0x10a] sm:$0xff] }
 0x227   : > { %s5989_s16 = sld [smem:[#allocation8 + $0x31]]  ;;  %v2123_v7 = vmul.f32 %v7289_v2, %v2113_v15  ;;  %v2085_v46 = vadd.f32 %v2083_v42, %v2065_v61  ;;  %v2137_v48 = vmul.f32 %v7290_v57, %v2133_v10  ;;  %v2149_v51 = vmul.f32 %v2148_v50, %v2133_v10  ;;  %v606_v2 = vpop.permute.xlu1 %605 }
 0x228   : > { %s5991_s21 = sld [smem:[#allocation8 + $0x4c]]  ;;  %v2161_v45 = vmul.f32 %v2160_v60, %v2133_v10  ;;  %v2167_v42 = vmul.f32 %v2166_v35, %v2133_v10  ;;  %v2187_v13 = vmul.f32 %v2186_v17, %v2171_v41  ;;  %614 = vst.msk [vmem:[#allocation2 + $0x140] sm:$0xff] %vm386_vm0, %v606_v2 }
 0x229   : > { %7277 = sst [smem:[#allocation39_spill]] %s6011_s8  ;;  %v2105_v15 = vadd.f32 %v2103_v32, %v2085_v46  ;;  %v2193_v32 = vmul.f32 %v2192_v25, %v2171_v41 }
 0x22a   : > { %s6025_s8 = sld [smem:[#allocation11 + $0x84]]  ;;  %v2163_v60 = vadd.f32 %v2161_v45, %v5681_v3  ;;  %v2169_v35 = vadd.f32 %v2167_v42, %v5683_v56  ;;  %v2205_v3 = vmul.f32 %v2204_v9, %v2171_v41 }
 0x22b   : > { %s6062_s0 = sld [smem:[#allocation11 + $0xd4]] }
 0x22c   : > { %s6068_s15 = sld [smem:[#allocation3 + $0x2]]  ;;  %v2207_v61 = vadd.f32 %v2205_v3, %v2169_v35 }
 0x22d   : > { %7272 = sst [smem:[#allocation35_spill]] %s5989_s16 }
 0x22e   : > { %7273 = sst [smem:[#allocation36_spill]] %s5991_s21 }
 0x22f   : > { %s6001_s16 = sld [smem:[#allocation11 + $0x7f]] }
 0x230   : > { %s7276_s21 = sld [smem:[#allocation83_spill]] }
 0x231   : > { %s6076_s13 = sld [smem:[#allocation3 + $0x5]] }
 0x232   : > { %s6082_s24 = sld [smem:[#allocation3 + $0x8]]  ;;  %v2364_v35 = vstv %s6068_s15 }
 0x233   : > { %s6088_s14 = sld [smem:[#allocation11 + $0x43]] }
 0x234   : > { %s6093_s17 = sld [smem:[#allocation11 + $0x8e]] }
 0x235   : > { %7275 = sst [smem:[#allocation38_spill]] %s6001_s16 }
 0x236   : > { %s7278_s16 = sld [smem:[#allocation84_spill]]  ;;  %v7281_v49 = vstv %s7276_s21 }
 0x237   : > { %v2077_v0 = vmul.f32 %v7281_v49, %v2073_v34  ;;  %v2143_v49 = vmul.f32 %v7291_v54, %v2133_v10  ;;  %s6101_s22 = sld [smem:[#allocation11 + $0xd9]] }
 0x238   : > { %s6107_s4 = sld [smem:[#allocation8 + $0x19]] }
 0x239   : > { %v2079_v12 = vadd.f32 %v2077_v0, %v2059_v58  ;;  %v2247_v58 = vld [vmem:[#allocation2 + $0x10c] sm:$0xff]  ;;  %s6109_s11 = sld [smem:[#allocation8 + $0x34]] }
 0x23a   : > { %s6115_s12 = sld [smem:[#allocation8 + $0x4f]]  ;;  %v2251_v46 = vmul.f32 %v2250_v29, %v2247_v58  ;;  %v2263_v54 = vmul.f32 %v2262_v63, %v2247_v58  ;;  %v2296_v63 = vstv %s6025_s8  ;;  %v2390_v3 = vstv %s6093_s17 }
 0x23b   : > { %v2099_v0 = vadd.f32 %v2097_v24, %v2079_v12  ;;  %v2125_v24 = vadd.f32 %v2123_v7, %v2105_v15  ;;  %s7294_s1 = sld [smem:[#allocation37_spill]] }
 0x23c   : > { %v7283_v4 = vstv %s7278_s16  ;;  %s6053_s16 = sld [smem:[#allocation11 + $0x89]] }
 0x23d   : > { %v2089_v5 = vmul.f32 %v7283_v4, %v2073_v34  ;;  %v2071_v34 = vadd.f32 %v2069_v11, %v5909_v28  ;;  %v2155_v11 = vmul.f32 %v2154_v6, %v2133_v10  ;;  %v2175_v4 = vmul.f32 %v2174_v31, %v2171_v41  ;;  %s6123_s19 = sld [smem:[#allocation11 + $0x48]] }
 0x23e   : > { %v2119_v19 = vadd.f32 %v2117_v20, %v2099_v0  ;;  %s7295_s5 = sld [smem:[#allocation38_spill]]  ;;  %v2302_v0 = vstv %s6035_s18 }
 0x23f   : > { %v2091_v28 = vadd.f32 %v2089_v5, %v2071_v34  ;;  %v2157_v6 = vadd.f32 %v2155_v11, %v5671_v23  ;;  %v2181_v5 = vmul.f32 %v2180_v38, %v2171_v41  ;;  %v2199_v23 = vmul.f32 %v2198_v26, %v2171_v41  ;;  %v2209_v38 = vld [vmem:[#allocation2 + $0x10b] sm:$0xff]  ;;  %s7296_s27 = sld [smem:[#allocation39_spill]] }
 0x240   : > { %v2139_v1 = vadd.f32 %v2137_v48, %v2119_v19  ;;  %v2213_v56 = vmul.f32 %v2212_v40, %v2209_v38  ;;  %v2219_v17 = vmul.f32 %v2218_v30, %v2209_v38  ;;  %v2225_v20 = vmul.f32 %v2224_v36, %v2209_v38  ;;  %v608_v30 = vpop.permute.xlu2 %607  ;;  %s7297_s3 = sld [smem:[#allocation40_spill]] }
 0x241   : > { %v2111_v50 = vadd.f32 %v2109_v62, %v2091_v28  ;;  %v2145_v62 = vadd.f32 %v2143_v49, %v2125_v24  ;;  %v2195_v26 = vadd.f32 %v2193_v32, %v2157_v6  ;;  %v2201_v9 = vadd.f32 %v2199_v23, %v2163_v60  ;;  %615 = vst.msk [vmem:[#allocation2 + $0x148] sm:$0xf] %vm389_vm1, %v608_v30  ;;  %s6130_s20 = sld [smem:[#allocation11 + $0x93]] }
 0x242   : > { %v2177_v10 = vadd.f32 %v2175_v4, %v2139_v1  ;;  %v2231_v40 = vmul.f32 %v2230_v33, %v2209_v38  ;;  %v2243_v12 = vmul.f32 %v2242_v59, %v2209_v38  ;;  %v2257_v48 = vmul.f32 %v2256_v21, %v2247_v58  ;;  %s7298_s26 = sld [smem:[#allocation89_spill]]  ;;  %v604_v1 = vpop.permute.xlu0 %603 }
 0x243   : > { %v2131_v31 = vadd.f32 %v2129_v44, %v2111_v50  ;;  %v2183_v34 = vadd.f32 %v2181_v5, %v2145_v62  ;;  %v2237_v44 = vmul.f32 %v2236_v55, %v2209_v38  ;;  %s7299_s6 = sld [smem:[#allocation70_spill]]  ;;  %v2270_v28 = vstv %s7294_s1  ;;  %613 = vst.msk [vmem:[#allocation2 + $0x138] sm:$0xff] %vm386_vm0, %v604_v1 }
 0x244   : > { %v2215_v36 = vadd.f32 %v2213_v56, %v2177_v10  ;;  %v6126_v57 = vadd.f32 %v2231_v40, %v2195_v26  ;;  %s7300_s21 = sld [smem:[#allocation90_spill]]  ;;  %v6135_v29 = vadd.f32 %v2243_v12, %v2207_v61  ;;  %v2328_v50 = vstv %s6045_s23 }
 0x245   : > { %v2151_v25 = vadd.f32 %v2149_v51, %v2131_v31  ;;  %v2221_v33 = vadd.f32 %v2219_v17, %v2183_v34  ;;  %v6133_v59 = vadd.f32 %v2237_v44, %v2201_v9  ;;  %s6139_s10 = sld [smem:[#allocation11 + $0xde]]  ;;  %v2276_v51 = vstv %s7295_s5  ;;  %v2268_v31 = vld [vmem:[#allocation2 + $0x128] sm:$0xff] }
 0x246   : > { %s7301_s2 = sld [smem:[#allocation34_spill]]  ;;  %v6141_v21 = vadd.f32 %v2251_v46, %v2215_v36  ;;  %v2282_v45 = vstv %s7296_s27  ;;  %v2290_v41 = vstv %s7297_s3  ;;  %v2334_v6 = vstv %s6053_s16  ;;  %v2326_v46 = vld [vmem:[#allocation2 + $0x12a] sm:$0xff] }
 0x247   : > { %v2189_v7 = vadd.f32 %v2187_v13, %v2151_v25  ;;  %s7302_s30 = sld [smem:[#allocation35_spill]]  ;;  %v6143_v49 = vadd.f32 %v2257_v48, %v2221_v33  ;;  %v2340_v60 = vstv %s6062_s0  ;;  %v2370_v13 = vstv %s6076_s13  ;;  %v2288_v25 = vld [vmem:[#allocation2 + $0x129] sm:$0xff] }
 0x248   : > { %s7303_s28 = sld [smem:[#allocation36_spill]]  ;;  %v2308_v15 = vstv %s7298_s26  ;;  %v2376_v32 = vstv %s6082_s24  ;;  %v2384_v23 = vstv %s6088_s14  ;;  %v2396_v38 = vstv %s6101_s22 }
 0x249   : > { %v2227_v55 = vadd.f32 %v2225_v20, %v2189_v7  ;;  %v2314_v42 = vstv %s7299_s6  ;;  %s7304_s25 = sld [smem:[#allocation21_spill]]  ;;  %v2402_v62 = vstv %s6107_s4  ;;  %v2408_v56 = vstv %s6109_s11 }
 0x24a   : > { %v2320_v4 = vstv %s7300_s21  ;;  %v2414_v17 = vstv %s6115_s12  ;;  %v2422_v58 = vstv %s6123_s19  ;;  %v2428_v26 = vstv %s6130_s20  ;;  %s6194_s29 = sld [smem:[#allocation8 + $0x14]] }
 0x24b   : > { %v6147_v11 = vadd.f32 %v2263_v54, %v2227_v55  ;;  %v2434_v9 = vstv %s6139_s10  ;;  %v2272_v61 = vmul.f32 %v2270_v28, %v2268_v31  ;;  %v2278_v10 = vmul.f32 %v2276_v51, %v2268_v31  ;;  %s6203_s7 = sld [smem:[#allocation8 + $0x2f]] }
 0x24c   : > { %v2346_v5 = vstv %s7301_s2  ;;  %v2284_v34 = vmul.f32 %v2282_v45, %v2268_v31  ;;  %v2292_v20 = vmul.f32 %v2290_v41, %v2288_v25  ;;  %v2298_v40 = vmul.f32 %v2296_v63, %v2288_v25  ;;  %s6296_s1 = sld [smem:[#allocation11 + $0xd5]] }
 0x24d   : > { %v2352_v19 = vstv %s7302_s30  ;;  %v2304_v30 = vmul.f32 %v2302_v0, %v2288_v25  ;;  %v2274_v2 = vadd.f32 %v2272_v61, %v6027_v27  ;;  %v2280_v7 = vadd.f32 %v2278_v10, %v6029_v53  ;;  %s6304_s5 = sld [smem:[#allocation8 + $0x32]] }
 0x24e   : > { %v2358_v24 = vstv %s7303_s28  ;;  %v2310_v44 = vmul.f32 %v2308_v15, %v2288_v25  ;;  %v2316_v12 = vmul.f32 %v2314_v42, %v2288_v25  ;;  %v2286_v36 = vadd.f32 %v2284_v34, %v6037_v16  ;;  %s6313_s27 = sld [smem:[#allocation8 + $0x4d]] }
 0x24f   : > { %s6863_s9 = sand.u32 1, %s7304_s25   ;;  %v2322_v33 = vmul.f32 %v2320_v4, %v2288_v25  ;;  %v2330_v48 = vmul.f32 %v2328_v50, %v2326_v46  ;;  %v2336_v27 = vmul.f32 %v2334_v6, %v2326_v46  ;;  %v2294_v53 = vadd.f32 %v2292_v20, %v2274_v2  ;;  %s6224_s25 = sld [smem:[#allocation11 + $0x35]]  ;;  %v2382_v2 = vld [vmem:[#allocation2 + $0x12b] sm:$0xff] }
 0x250   : > { %7305 = sst [smem:[#allocation41_spill]] %s6194_s29  ;;  %s6207_s6 = smul.u32 144, %s6863_s9  ;;  %v2300_v55 = vadd.f32 %v2298_v40, %v2280_v7  ;;  %v2312_v54 = vadd.f32 %v2310_v44, %v6003_v18  ;;  %v2318_v16 = vadd.f32 %v2316_v12, %v6013_v14  ;;  %v2306_v31 = vadd.f32 %v2304_v30, %v2286_v36 }
 0x251   : > { %7306 = sst [smem:[#allocation54_spill]] %s6203_s7  ;;  %v2324_v1 = vadd.f32 %v2322_v33, %v6017_v47  ;;  %v2342_v25 = vmul.f32 %v2340_v60, %v2326_v46  ;;  %v2348_v61 = vmul.f32 %v2346_v5, %v2326_v46  ;;  %v2332_v10 = vadd.f32 %v2330_v48, %v2294_v53  ;;  %v2420_v33 = vld [vmem:[#allocation2 + $0x12c] sm:$0xff] }
 0x252   : > { %s6211_s29 = sld [smem:[#allocation8 + $0x4a]]  ;;  %v2338_v34 = vadd.f32 %v2336_v27, %v2300_v55  ;;  %v2354_v18 = vmul.f32 %v2352_v19, %v2326_v46  ;;  %v2360_v20 = vmul.f32 %v2358_v24, %v2326_v46  ;;  %v2366_v40 = vmul.f32 %v2364_v35, %v2326_v46 }
 0x253   : > { %s6218_s9 = sld [smem:[#allocation8 + $0x17]]  ;;  %v2344_v14 = vadd.f32 %v2342_v25, %v2306_v31  ;;  %v2350_v47 = vadd.f32 %v2348_v61, %v2312_v54  ;;  %v2372_v30 = vmul.f32 %v2370_v13, %v2326_v46  ;;  %v2378_v12 = vmul.f32 %v2376_v32, %v2326_v46 }
 0x254   : > { %v2356_v7 = vadd.f32 %v2354_v18, %v2318_v16  ;;  %v2362_v44 = vadd.f32 %v2360_v20, %v2324_v1  ;;  %v2386_v36 = vmul.f32 %v2384_v23, %v2382_v2  ;;  %v2368_v48 = vadd.f32 %v2366_v40, %v5319_v22  ;;  %s6244_s7 = sld [smem:[#allocation11 + $0x3a]]  ;;  %v2267_v1 = vld [vmem:[#allocation2 + $0x120] sm:$0xff] }
 0x255   : > { %v2374_v27 = vadd.f32 %v2372_v30, %v5328_v8  ;;  %v2392_v53 = vmul.f32 %v2390_v3, %v2382_v2  ;;  %v2398_v55 = vmul.f32 %v2396_v38, %v2382_v2  ;;  %v2380_v46 = vadd.f32 %v2378_v12, %v5339_v52  ;;  %v2287_v30 = vld [vmem:[#allocation2 + $0x121] sm:$0xff]  ;;  %s6319_s8 = sld [smem:[#allocation11 + $0x44]] }
 0x256   : > { %v2388_v54 = vadd.f32 %v2386_v36, %v2332_v10  ;;  %v2404_v16 = vmul.f32 %v2402_v62, %v2382_v2  ;;  %v2410_v31 = vmul.f32 %v2408_v56, %v2382_v2  ;;  %v2416_v25 = vmul.f32 %v2414_v17, %v2382_v2  ;;  %s6324_s18 = sld [smem:[#allocation11 + $0x8f]] }
 0x257   : > { %v2394_v22 = vadd.f32 %v2392_v53, %v2338_v34  ;;  %v2400_v8 = vadd.f32 %v2398_v55, %v2344_v14  ;;  %v2424_v61 = vmul.f32 %v2422_v58, %v2420_v33  ;;  %v2430_v34 = vmul.f32 %v2428_v26, %v2420_v33  ;;  %v2325_v53 = vld [vmem:[#allocation2 + $0x122] sm:$0xff]  ;;  %s6330_s23 = sld [smem:[#allocation11 + $0xda]] }
 0x258   : > { %7307 = sst [smem:[#allocation55_spill]] %s6211_s29  ;;  %v6264_v52 = vadd.f32 %v2404_v16, %v2350_v47  ;;  %v6266_v10 = vadd.f32 %v2410_v31, %v2356_v7  ;;  %v2436_v18 = vmul.f32 %v2434_v9, %v2420_v33  ;;  %v6276_v20 = vadd.f32 %v2416_v25, %v2362_v44 }
 0x259   : > { %7308 = sst [smem:[#allocation57_spill]] %s6218_s9  ;;  %v6278_v14 = vadd.f32 %v2424_v61, %v2388_v54  ;;  %v2271_v47 = vmul.f32 %v2270_v28, %v2267_v1  ;;  %v2277_v40 = vmul.f32 %v2276_v51, %v2267_v1  ;;  %v6288_v2 = vadd.f32 %v2430_v34, %v2394_v22 }
 0x25a   : > { %s6230_s9 = sld [smem:[#allocation11 + $0x80]]  ;;  %v6290_v7 = vadd.f32 %v2436_v18, %v2400_v8  ;;  %v2283_v44 = vmul.f32 %v2282_v45, %v2267_v1  ;;  %v2291_v12 = vmul.f32 %v2290_v41, %v2287_v30  ;;  %v2297_v36 = vmul.f32 %v2296_v63, %v2287_v30 }
 0x25b   : > { %s6236_s29 = sld [smem:[#allocation11 + $0xcb]]  ;;  %v2273_v28 = vadd.f32 %v2271_v47, %v6141_v21  ;;  %v2279_v51 = vadd.f32 %v2277_v40, %v6143_v49  ;;  %v2303_v33 = vmul.f32 %v2302_v0, %v2287_v30  ;;  %v2309_v45 = vmul.f32 %v2308_v15, %v2287_v30 }
 0x25c   : > { %7311 = sst [smem:[#allocation42_spill]] %s6244_s7  ;;  %s6258_s7 = scalar_lea.vmem [#allocation14], %s6207_s6  ;;  %v2321_v41 = vmul.f32 %v2320_v4, %v2287_v30  ;;  %v2329_v63 = vmul.f32 %v2328_v50, %v2325_v53  ;;  %v2341_v50 = vmul.f32 %v2340_v60, %v2325_v53  ;;  %v2347_v54 = vmul.f32 %v2346_v5, %v2325_v53 }
 0x25d   : > { %2694 = vst.msk [vmem:[%s6258_s7 + $0x8] sm:$0xff] %vm386_vm0, %v2368_v48  ;;  %s6274_s6 = sld [smem:[#allocation11 + $0x3f]]  ;;  %v2285_v48 = vadd.f32 %v2283_v44, %v6147_v11  ;;  %v2293_v21 = vadd.f32 %v2291_v12, %v2273_v28  ;;  %v2299_v49 = vadd.f32 %v2297_v36, %v2279_v51  ;;  %v2335_v11 = vmul.f32 %v2334_v6, %v2325_v53  ;;  %v627_v36 = vpop.permute.xlu2 %626 }
 0x25e   : > { %3246 = vst.msk [vmem:[%s6258_s7 + $0x18] sm:$0xff] %vm386_vm0, %v2374_v27  ;;  %v2315_v27 = vmul.f32 %v2314_v42, %v2287_v30  ;;  %v2311_v15 = vadd.f32 %v2309_v45, %v6126_v57  ;;  %v2323_v4 = vadd.f32 %v2321_v41, %v6135_v29  ;;  %v2353_v6 = vmul.f32 %v2352_v19, %v2325_v53  ;;  %v2381_v29 = vld [vmem:[#allocation2 + $0x123] sm:$0xff]  ;;  %s6340_s16 = sld [smem:[#allocation8 + $0x1a]]  ;;  %v623_v30 = vpop.permute.xlu0 %622 }
 0x25f   : > { %3248 = vst.msk [vmem:[%s6258_s7 + $0x28] sm:$0xff] %vm386_vm0, %v2380_v46  ;;  %v2305_v0 = vadd.f32 %v2303_v33, %v2285_v48  ;;  %v2331_v55 = vadd.f32 %v2329_v63, %v2293_v21  ;;  %v2337_v46 = vadd.f32 %v2335_v11, %v2299_v49  ;;  %v2359_v57 = vmul.f32 %v2358_v24, %v2325_v53  ;;  %v2419_v24 = vld [vmem:[#allocation2 + $0x124] sm:$0xff]  ;;  %s6346_s0 = sld [smem:[#allocation8 + $0x35]]  ;;  %v625_v11 = vpop.permute.xlu1 %624 }
 0x260   : > { %7309 = sst [smem:[#allocation44_spill]] %s6230_s9  ;;  %v2317_v42 = vadd.f32 %v2315_v27, %v6133_v59  ;;  %v2365_v59 = vmul.f32 %v2364_v35, %v2325_v53  ;;  %v2371_v16 = vmul.f32 %v2370_v13, %v2325_v53  ;;  %v2349_v60 = vadd.f32 %v2347_v54, %v2311_v15  ;;  %632 = vst.msk [vmem:[#allocation2 + $0x150] sm:$0xff] %vm386_vm0, %v623_v30  ;;  %v2440_v63 = vld [vmem:[#allocation2 + $0x140] sm:$0xff] }
 0x261   : > { %7310 = sst [smem:[#allocation59_spill]] %s6236_s29  ;;  %v2343_v31 = vadd.f32 %v2341_v50, %v2305_v0  ;;  %v2377_v5 = vmul.f32 %v2376_v32, %v2325_v53  ;;  %v2385_v19 = vmul.f32 %v2384_v23, %v2381_v29  ;;  %v2361_v13 = vadd.f32 %v2359_v57, %v2323_v4  ;;  %634 = vst.msk [vmem:[#allocation2 + $0x160] sm:$0xf] %vm389_vm1, %v627_v36 }
 0x262   : > { %s6251_s29 = sld [smem:[#allocation11 + $0x85]]  ;;  %v2355_v35 = vadd.f32 %v2353_v6, %v2317_v42  ;;  %v2367_v1 = vadd.f32 %v2365_v59, %v5435_v37  ;;  %v2373_v22 = vadd.f32 %v2371_v16, %v5438_v39  ;;  %v2391_v23 = vmul.f32 %v2390_v3, %v2381_v29  ;;  %633 = vst.msk [vmem:[#allocation2 + $0x158] sm:$0xff] %vm386_vm0, %v625_v11  ;;  %v2460_v6 = vld [vmem:[#allocation2 + $0x141] sm:$0xff] }
 0x263   : > { %s6262_s9 = sld [smem:[#allocation11 + $0xd0]]  ;;  %v2379_v32 = vadd.f32 %v2377_v5, %v5445_v43  ;;  %v2387_v8 = vadd.f32 %v2385_v19, %v2331_v55  ;;  %v2397_v25 = vmul.f32 %v2396_v38, %v2381_v29  ;;  %v2403_v61 = vmul.f32 %v2402_v62, %v2381_v29  ;;  %v2574_v11 = vld [vmem:[#allocation2 + $0x144] sm:$0xff] }
 0x264   : > { %s6350_s15 = sld [smem:[#allocation8 + $0x50]]  ;;  %v2409_v37 = vmul.f32 %v2408_v56, %v2381_v29  ;;  %v2415_v39 = vmul.f32 %v2414_v17, %v2381_v29  ;;  %v2423_v34 = vmul.f32 %v2422_v58, %v2419_v24  ;;  %2693 = vst.msk [vmem:[%s6258_s7] sm:$0xff] %vm386_vm0, %v2367_v1  ;;  %v2393_v43 = vadd.f32 %v2391_v23, %v2337_v46 }
 0x265   : > { %s6357_s13 = sld [smem:[#allocation11 + $0x49]]  ;;  %v2399_v3 = vadd.f32 %v2397_v25, %v2343_v31  ;;  %v2429_v38 = vmul.f32 %v2428_v26, %v2419_v24  ;;  %v2435_v62 = vmul.f32 %v2434_v9, %v2419_v24  ;;  %3245 = vst.msk [vmem:[%s6258_s7 + $0x10] sm:$0xff] %vm386_vm0, %v2373_v22  ;;  %v6379_v56 = vadd.f32 %v2403_v61, %v2349_v60  ;;  %v2498_v22 = vld [vmem:[#allocation2 + $0x142] sm:$0xff] }
 0x266   : > { %s7315_s24 = sld [smem:[#allocation44_spill]]  ;;  %v6381_v17 = vadd.f32 %v2409_v37, %v2355_v35  ;;  %v6383_v58 = vadd.f32 %v2415_v39, %v2361_v13  ;;  %v6385_v18 = vadd.f32 %v2423_v34, %v2387_v8  ;;  %3247 = vst.msk [vmem:[%s6258_s7 + $0x20] sm:$0xff] %vm386_vm0, %v2379_v32  ;;  %v2442_v47 = vstv %s6224_s25 }
 0x267   : > { %s6369_s14 = sld [smem:[#allocation11 + $0x94]]  ;;  %v6389_v26 = vadd.f32 %v2429_v38, %v2393_v43  ;;  %v6391_v9 = vadd.f32 %v2435_v62, %v2399_v3  ;;  %v2500_v27 = vstv %s6274_s6  ;;  %v2512_v53 = vstv %s6296_s1  ;;  %v2536_v3 = vld [vmem:[#allocation2 + $0x143] sm:$0xff] }
 0x268   : > { %7312 = sst [smem:[#allocation43_spill]] %s6251_s29  ;;  %v2524_v49 = vstv %s6304_s5  ;;  %v2530_v0 = vstv %s6313_s27  ;;  %v2538_v15 = vstv %s6319_s8  ;;  %v2544_v42 = vstv %s6324_s18 }
 0x269   : > { %7313 = sst [smem:[#allocation56_spill]] %s6262_s9  ;;  %v2550_v4 = vstv %s6330_s23  ;;  %v2556_v55 = vstv %s6340_s16  ;;  %v2562_v46 = vstv %s6346_s0  ;;  %v2444_v16 = vmul.f32 %v2442_v47, %v2440_v63 }
 0x26a   : > { %s6286_s29 = sld [smem:[#allocation11 + $0x8a]]  ;;  %v2568_v50 = vstv %s6350_s15  ;;  %v2502_v23 = vmul.f32 %v2500_v27, %v2498_v22  ;;  %v2526_v30 = vmul.f32 %v2524_v49, %v2498_v22  ;;  %v2532_v36 = vmul.f32 %v2530_v0, %v2498_v22 }
 0x26b   : > { %s7316_s17 = sld [smem:[#allocation59_spill]]  ;;  %v2576_v54 = vstv %s6357_s13  ;;  %v2446_v24 = vadd.f32 %v2444_v16, %v6278_v14 }
 0x26c   : > { %s7317_s22 = sld [smem:[#allocation42_spill]]  ;;  %v2448_v40 = vstv %s7315_s24 }
 0x26d   : > { %s7318_s4 = sld [smem:[#allocation43_spill]]  ;;  %v2582_v57 = vstv %s6369_s14  ;;  %v2450_v29 = vmul.f32 %v2448_v40, %v2440_v63  ;;  %s2734_s14 = sshll.u32 %s6258_s7, 4  ;;  %s2735_s14 = int_to_ptr.vmem [resolvable:$true] %s2734_s14 }
 0x26e   : > { %s7319_s11 = sld [smem:[#allocation56_spill]] }
 0x26f   : > { %s6377_s12 = sld [smem:[#allocation11 + $0xdf]]  ;;  %v2452_v35 = vadd.f32 %v2450_v29, %v6288_v2  ;;  %v2552_v29 = vmul.f32 %v2550_v4, %v2536_v3 }
 0x270   : > { %s7320_s19 = sld [smem:[#allocation41_spill]]  ;;  %v2506_v41 = vstv %s6286_s29 }
 0x271   : > { %s7321_s3 = sld [smem:[#allocation54_spill]]  ;;  %v2454_v44 = vstv %s7316_s17  ;;  %v2508_v25 = vmul.f32 %v2506_v41, %v2498_v22 }
 0x272   : > { %s7322_s26 = sld [smem:[#allocation55_spill]]  ;;  %v2462_v12 = vstv %s7317_s22  ;;  %v2456_v31 = vmul.f32 %v2454_v44, %v2440_v63  ;;  %v2540_v63 = vmul.f32 %v2538_v15, %v2536_v3 }
 0x273   : > { %s7323_s20 = sld [smem:[#allocation57_spill]]  ;;  %v2468_v28 = vstv %s7318_s4  ;;  %v2464_v60 = vmul.f32 %v2462_v12, %v2460_v6 }
 0x274   : > { %v2474_v51 = vstv %s7319_s11  ;;  %v2470_v5 = vmul.f32 %v2468_v28, %v2460_v6  ;;  %v2458_v32 = vadd.f32 %v2456_v31, %v6290_v7  ;;  %v2514_v7 = vmul.f32 %v2512_v53, %v2498_v22  ;;  %s6460_s21 = sld [smem:[#allocation11 + $0x36]] }
 0x275   : > { %v2588_v59 = vstv %s6377_s12  ;;  %v2476_v19 = vmul.f32 %v2474_v51, %v2460_v6  ;;  %v2466_v14 = vadd.f32 %v2464_v60, %v2446_v24  ;;  %v2558_v31 = vmul.f32 %v2556_v55, %v2536_v3  ;;  %v2439_v60 = vld [vmem:[#allocation2 + $0x138] sm:$0xff]  ;;  %s6466_s10 = sld [smem:[#allocation11 + $0x81]] }
 0x276   : > { %v2480_v33 = vstv %s7320_s19  ;;  %v2472_v61 = vadd.f32 %v2470_v5, %v2452_v35  ;;  %v2564_v24 = vmul.f32 %v2562_v46, %v2536_v3  ;;  %v2570_v35 = vmul.f32 %v2568_v50, %v2536_v3  ;;  %s6472_s2 = sld [smem:[#allocation11 + $0xcc]] }
 0x277   : > { %v2486_v48 = vstv %s7321_s3  ;;  %v2482_v13 = vmul.f32 %v2480_v33, %v2460_v6  ;;  %v2478_v39 = vadd.f32 %v2476_v19, %v2458_v32  ;;  %v2504_v38 = vadd.f32 %v2502_v23, %v2466_v14  ;;  %s6478_s30 = sld [smem:[#allocation11 + $0x3b]] }
 0x278   : > { %v2492_v45 = vstv %s7322_s26  ;;  %v2488_v1 = vmul.f32 %v2486_v48, %v2460_v6  ;;  %v2510_v62 = vadd.f32 %v2508_v25, %v2472_v61  ;;  %v2584_v32 = vmul.f32 %v2582_v57, %v2574_v11  ;;  %v2459_v61 = vld [vmem:[#allocation2 + $0x139] sm:$0xff]  ;;  %s6484_s28 = sld [smem:[#allocation11 + $0x86]] }
 0x279   : > { %v2518_v21 = vstv %s7323_s20  ;;  %v2494_v8 = vmul.f32 %v2492_v45, %v2460_v6  ;;  %v2484_v2 = vadd.f32 %v2482_v13, %v6264_v52  ;;  %v2516_v52 = vadd.f32 %v2514_v7, %v2478_v39  ;;  %s6496_s9 = sld [smem:[#allocation11 + $0xd1]] }
 0x27a   : > { %v2490_v37 = vadd.f32 %v2488_v1, %v6266_v10  ;;  %v2520_v43 = vmul.f32 %v2518_v21, %v2498_v22  ;;  %v2542_v5 = vadd.f32 %v2540_v63, %v2504_v38  ;;  %v2578_v22 = vmul.f32 %v2576_v54, %v2574_v11  ;;  %s6507_s25 = sld [smem:[#allocation11 + $0x40]] }
 0x27b   : > { %v2496_v34 = vadd.f32 %v2494_v8, %v6276_v20  ;;  %v2546_v20 = vmul.f32 %v2544_v42, %v2536_v3  ;;  %v2554_v13 = vadd.f32 %v2552_v29, %v2516_v52  ;;  %v2590_v25 = vmul.f32 %v2588_v59, %v2574_v11  ;;  %s6517_s24 = sld [smem:[#allocation11 + $0x8b]] }
 0x27c   : > { %v2522_v10 = vadd.f32 %v2520_v43, %v2484_v2  ;;  %v2528_v6 = vadd.f32 %v2526_v30, %v2490_v37  ;;  %v2443_v14 = vmul.f32 %v2442_v47, %v2439_v60  ;;  %v6486_v2 = vadd.f32 %v2578_v22, %v2542_v5  ;;  %v2497_v30 = vld [vmem:[#allocation2 + $0x13a] sm:$0xff]  ;;  %s6525_s17 = sld [smem:[#allocation11 + $0xd6]] }
 0x27d   : > { %v2534_v16 = vadd.f32 %v2532_v36, %v2496_v34  ;;  %v2548_v19 = vadd.f32 %v2546_v20, %v2510_v62  ;;  %v2449_v39 = vmul.f32 %v2448_v40, %v2439_v60  ;;  %v2455_v34 = vmul.f32 %v2454_v44, %v2439_v60  ;;  %s6530_s22 = sld [smem:[#allocation11 + $0x45]] }
 0x27e   : > { %v2560_v1 = vadd.f32 %v2558_v31, %v2522_v10  ;;  %v2566_v8 = vadd.f32 %v2564_v24, %v2528_v6  ;;  %v6498_v47 = vadd.f32 %v2590_v25, %v2554_v13  ;;  %v2445_v7 = vadd.f32 %v2443_v14, %v6385_v18  ;;  %v2535_v10 = vld [vmem:[#allocation2 + $0x13b] sm:$0xff]  ;;  %s6536_s6 = sld [smem:[#allocation11 + $0x90]] }
 0x27f   : > { %v2572_v23 = vadd.f32 %v2570_v35, %v2534_v16  ;;  %v6488_v37 = vadd.f32 %v2584_v32, %v2548_v19  ;;  %v2463_v43 = vmul.f32 %v2462_v12, %v2459_v61  ;;  %v2469_v3 = vmul.f32 %v2468_v28, %v2459_v61  ;;  %s6544_s29 = sld [smem:[#allocation11 + $0xdb]]  ;;  %v2573_v6 = vld [vmem:[#allocation2 + $0x13c] sm:$0xff] }
 0x280   : > { %3250 = vst.msk [vmem:[%s6258_s7 + $0x38] sm:$0xff] %vm386_vm0, %v2560_v1  ;;  %v2451_v40 = vadd.f32 %v2449_v39, %v6389_v26  ;;  %v2457_v44 = vadd.f32 %v2455_v34, %v6391_v9  ;;  %v2475_v38 = vmul.f32 %v2474_v51, %v2459_v61  ;;  %v2481_v62 = vmul.f32 %v2480_v33, %v2459_v61  ;;  %s6552_s1 = sld [smem:[#allocation11 + $0x4a]]  ;;  %v2594_v1 = vld [vmem:[#allocation2 + $0x158] sm:$0xff] }
 0x281   : > { %3252 = vst.msk [vmem:[%s6258_s7 + $0x48] sm:$0xff] %vm386_vm0, %v2566_v8  ;;  %v2465_v18 = vadd.f32 %v2463_v43, %v2445_v7  ;;  %v2487_v12 = vmul.f32 %v2486_v48, %v2459_v61  ;;  %v2493_v28 = vmul.f32 %v2492_v45, %v2459_v61  ;;  %v2501_v36 = vmul.f32 %v2500_v27, %v2497_v30  ;;  %s6556_s5 = sld [smem:[#allocation11 + $0x95]] }
 0x282   : > { %3254 = vst.msk [vmem:[%s6258_s7 + $0x58] sm:$0xff] %vm386_vm0, %v2572_v23  ;;  %v2471_v26 = vadd.f32 %v2469_v3, %v2451_v40  ;;  %v2477_v9 = vadd.f32 %v2475_v38, %v2457_v44  ;;  %v2483_v51 = vadd.f32 %v2481_v62, %v6379_v56  ;;  %v2507_v33 = vmul.f32 %v2506_v41, %v2497_v30  ;;  %s6560_s27 = sld [smem:[#allocation11 + $0xe0]]  ;;  %v2613_v40 = vld [vmem:[#allocation2 + $0x151] sm:$0xff] }
 0x283   : > { %v2489_v48 = vadd.f32 %v2487_v12, %v6381_v17  ;;  %v2495_v45 = vadd.f32 %v2493_v28, %v6383_v58  ;;  %v2503_v52 = vadd.f32 %v2501_v36, %v2465_v18  ;;  %v2513_v27 = vmul.f32 %v2512_v53, %v2497_v30  ;;  %v2614_v18 = vld [vmem:[#allocation2 + $0x159] sm:$0xff]  ;;  %s7324_s8 = sld [smem:[#allocation23_spill]] }
 0x284   : > { %v2509_v63 = vadd.f32 %v2507_v33, %v2471_v26  ;;  %v2519_v56 = vmul.f32 %v2518_v21, %v2497_v30  ;;  %v2525_v20 = vmul.f32 %v2524_v49, %v2497_v30  ;;  %v2531_v41 = vmul.f32 %v2530_v0, %v2497_v30  ;;  %s7325_s0 = sld [smem:[#allocation116_spill]] }
 0x285   : > { %v2515_v17 = vadd.f32 %v2513_v27, %v2477_v9  ;;  %v2539_v58 = vmul.f32 %v2538_v15, %v2535_v10  ;;  %v2545_v53 = vmul.f32 %v2544_v42, %v2535_v10  ;;  %v2551_v11 = vmul.f32 %v2550_v4, %v2535_v10  ;;  %s7326_s13 = sld [smem:[#allocation21_spill]] }
 0x286   : > { %v2521_v21 = vadd.f32 %v2519_v56, %v2483_v51  ;;  %v2527_v49 = vadd.f32 %v2525_v20, %v2489_v48  ;;  %v2533_v0 = vadd.f32 %v2531_v41, %v2495_v45  ;;  %v2557_v16 = vmul.f32 %v2556_v55, %v2535_v10  ;;  %v2593_v55 = vld [vmem:[#allocation2 + $0x150] sm:$0xff]  ;;  %v2634_v56 = vld [vmem:[#allocation2 + $0x15a] sm:$0xff] }
 0x287   : > { %v2541_v15 = vadd.f32 %v2539_v58, %v2503_v52  ;;  %v2547_v29 = vadd.f32 %v2545_v53, %v2509_v63  ;;  %v2553_v42 = vadd.f32 %v2551_v11, %v2515_v17  ;;  %v2563_v4 = vmul.f32 %v2562_v46, %v2535_v10  ;;  %v2633_v45 = vld [vmem:[#allocation2 + $0x152] sm:$0xff] }
 0x288   : > { %v2559_v31 = vadd.f32 %v2557_v16, %v2521_v21  ;;  %v2569_v60 = vmul.f32 %v2568_v50, %v2535_v10  ;;  %v2577_v5 = vmul.f32 %v2576_v54, %v2573_v6  ;;  %v2583_v19 = vmul.f32 %v2582_v57, %v2573_v6 }
 0x289   : > { %v2565_v24 = vadd.f32 %v2563_v4, %v2527_v49  ;;  %v2589_v35 = vmul.f32 %v2588_v59, %v2573_v6  ;;  %v2596_v13 = vstv %s6460_s21  ;;  %v2602_v46 = vstv %s6466_s10  ;;  %v2654_v49 = vld [vmem:[#allocation2 + $0x15b] sm:$0xff]  ;;  %s3266_s18 = smul.u32 144, %s7324_s8 }
 0x28a   : > { %v2571_v22 = vadd.f32 %v2569_v60, %v2533_v0  ;;  %v2579_v32 = vadd.f32 %v2577_v5, %v2541_v15  ;;  %v2585_v8 = vadd.f32 %v2583_v19, %v2547_v29  ;;  %3249 = vst.msk [vmem:[%s6258_s7 + $0x30] sm:$0xff] %vm386_vm0, %v2559_v31  ;;  %v2608_v50 = vstv %s6472_s2  ;;  %s3499_s10 = scalar_lea.hbm %s7325_s0, 288 }
 0x28b   : > { %v2591_v54 = vadd.f32 %v2589_v35, %v2553_v42  ;;  %3251 = vst.msk [vmem:[%s6258_s7 + $0x40] sm:$0xff] %vm386_vm0, %v2565_v24  ;;  %v2597_v57 = vmul.f32 %v2596_v13, %v2593_v55  ;;  %v2603_v59 = vmul.f32 %v2602_v46, %v2593_v55  ;;  %v2609_v23 = vmul.f32 %v2608_v50, %v2593_v55  ;;  %v2673_v55 = vld [vmem:[#allocation2 + $0x154] sm:$0xff]  ;;  %v2674_v24 = vld [vmem:[#allocation2 + $0x15c] sm:$0xff]  ;;  %s2733_s15 = scalar_lea.hbm %s7325_s0, %s3266_s18  ;;  %s7328_s12 = sand.u32 1, %s7326_s13  }
 0x28c   : > { %3253 = vst.msk [vmem:[%s6258_s7 + $0x50] sm:$0xff] %vm386_vm0, %v2571_v22  ;;  %v2616_v25 = vstv %s6478_s30  ;;  %v2622_v14 = vstv %s6484_s28  ;;  %v2628_v61 = vstv %s6496_s9  ;;  %v2598_v39 = vmul.f32 %v2596_v13, %v2594_v1  ;;  %s2736_s11 = sshll.u32 %s2733_s15, 4  ;;  %s2720_s19 = scalar_lea.sflag [#allocation4], %s7328_s12  ;;  %s2737_s11 = int_to_ptr.hbm [resolvable:$true] %s2736_s11 }
 0x28d   : > { %v2599_v34 = vadd.f32 %v2597_v57, %v2579_v32  ;;  %v2605_v7 = vadd.f32 %v2603_v59, %v2585_v8  ;;  %v2611_v43 = vadd.f32 %v2609_v23, %v2591_v54  ;;  %v2636_v3 = vstv %s6507_s25  ;;  %s3493_s3 = sshra.s32 %s2737_s11, 4  ;;  %s3494_s3 = int_to_ptr.hbm [resolvable:$true] %s3493_s3 }
 0x28e   : > { %v2642_v44 = vstv %s6517_s24  ;;  %v2648_v38 = vstv %s6525_s17  ;;  %v2656_v62 = vstv %s6530_s22  ;;  %v2662_v30 = vstv %s6536_s6  ;;  %s3495_s26 = scalar_lea.hbm %s3494_s3, 144  ;;  %p3500_p5 = scmp.lt.s32.totalorder %s3494_s3, %s7325_s0 }
 0x28f   : > { %v2668_v12 = vstv %s6544_s29  ;;  %v2676_v28 = vstv %s6552_s1  ;;  %v2682_v36 = vstv %s6556_s5  ;;  %v2688_v26 = vstv %s6560_s27  ;;  %p3496_p1 = scmp.ne.s32.totalorder %s3494_s3, %s3495_s26  ;;  %p3501_p6 = scmp.lt.s32.totalorder %s3499_s10, %s3495_s26 }
 0x290   : > { %v2600_v9 = vadd.f32 %v2598_v39, %v6486_v2  ;;  %v2604_v51 = vmul.f32 %v2602_v46, %v2594_v1  ;;  %v2610_v33 = vmul.f32 %v2608_v50, %v2594_v1  ;;  %v2617_v48 = vmul.f32 %v2616_v25, %v2613_v40  ;;  %v2653_v2 = vld [vmem:[#allocation2 + $0x153] sm:$0xff] }
 0x291   : > { %v2618_v52 = vmul.f32 %v2616_v25, %v2614_v18  ;;  %v2623_v27 = vmul.f32 %v2622_v14, %v2613_v40  ;;  %v2624_v10 = vmul.f32 %v2622_v14, %v2614_v18  ;;  %v2629_v63 = vmul.f32 %v2628_v61, %v2613_v40  ;;  %p3497_p2 = pnand %p3496_p1, %p3667_p4  ;;  %p3502_p7 = por %p3501_p6, %p3500_p5 }
 0x292   : > { %v2606_v20 = vadd.f32 %v2604_v51, %v6488_v37  ;;  %v2612_v41 = vadd.f32 %v2610_v33, %v6498_v47  ;;  %v2619_v17 = vadd.f32 %v2617_v48, %v2599_v34  ;;  %v2630_v58 = vmul.f32 %v2628_v61, %v2614_v18 }
 0x293   : > { %v2620_v53 = vadd.f32 %v2618_v52, %v2600_v9  ;;  %v2625_v11 = vadd.f32 %v2623_v27, %v2605_v7  ;;  %v2631_v6 = vadd.f32 %v2629_v63, %v2611_v43  ;;  %v2637_v21 = vmul.f32 %v2636_v3, %v2633_v45  ;;  %p3498_p3 = pneg %p3497_p2 }
 0x294   : > { %v2626_v0 = vadd.f32 %v2624_v10, %v2606_v20  ;;  %v2632_v16 = vadd.f32 %v2630_v58, %v2612_v41  ;;  %v2638_v15 = vmul.f32 %v2636_v3, %v2634_v56  ;;  %v2643_v29 = vmul.f32 %v2642_v44, %v2633_v45 }
 0x295   : > { %v2639_v42 = vadd.f32 %v2637_v21, %v2619_v17  ;;  %v2644_v4 = vmul.f32 %v2642_v44, %v2634_v56  ;;  %v2649_v31 = vmul.f32 %v2648_v38, %v2633_v45  ;;  %v2650_v60 = vmul.f32 %v2648_v38, %v2634_v56  ;;  %p3503_p9 = pnand %p3502_p7, %p3498_p3 }
 0x296   : > { %v2640_v37 = vadd.f32 %v2638_v15, %v2620_v53  ;;  %v2645_v5 = vadd.f32 %v2643_v29, %v2625_v11  ;;  %v2657_v47 = vmul.f32 %v2656_v62, %v2653_v2  ;;  %v2658_v19 = vmul.f32 %v2656_v62, %v2654_v49 }
 0x297   : > { %v2646_v35 = vadd.f32 %v2644_v4, %v2626_v0  ;;  %v2651_v13 = vadd.f32 %v2649_v31, %v2631_v6  ;;  %v2652_v46 = vadd.f32 %v2650_v60, %v2632_v16  ;;  %v2663_v1 = vmul.f32 %v2662_v30, %v2653_v2 }
 0x298   : > { %v2659_v22 = vadd.f32 %v2657_v47, %v2639_v42  ;;  %v2660_v32 = vadd.f32 %v2658_v19, %v2640_v37  ;;  %v2664_v8 = vmul.f32 %v2662_v30, %v2654_v49  ;;  %v2669_v50 = vmul.f32 %v2668_v12, %v2653_v2 }
 0x299   : > { %v2665_v54 = vadd.f32 %v2663_v1, %v2645_v5  ;;  %v2670_v57 = vmul.f32 %v2668_v12, %v2654_v49  ;;  %v2677_v59 = vmul.f32 %v2676_v28, %v2673_v55  ;;  %v2678_v23 = vmul.f32 %v2676_v28, %v2674_v24 }
 0x29a   : > { %v2666_v25 = vadd.f32 %v2664_v8, %v2646_v35  ;;  %v2671_v14 = vadd.f32 %v2669_v50, %v2651_v13  ;;  %v2683_v61 = vmul.f32 %v2682_v36, %v2673_v55  ;;  %v2684_v39 = vmul.f32 %v2682_v36, %v2674_v24 }
 0x29b   : > { %v2672_v34 = vadd.f32 %v2670_v57, %v2652_v46  ;;  %v2679_v7 = vadd.f32 %v2677_v59, %v2659_v22  ;;  %v2680_v43 = vadd.f32 %v2678_v23, %v2660_v32  ;;  %v2689_v3 = vmul.f32 %v2688_v26, %v2673_v55 }
 0x29c   : > { %v2685_v40 = vadd.f32 %v2683_v61, %v2665_v54  ;;  %v2686_v44 = vadd.f32 %v2684_v39, %v2666_v25  ;;  %v2690_v38 = vmul.f32 %v2688_v26, %v2674_v24 }
 0x29d   : > { %v2691_v62 = vadd.f32 %v2689_v3, %v2671_v14  ;;  %3255 = vst.msk [vmem:[%s6258_s7 + $0x60] sm:$0xff] %vm386_vm0, %v2679_v7 }
 0x29e   : > { %v2692_v30 = vadd.f32 %v2690_v38, %v2672_v34  ;;  %3256 = vst.msk [vmem:[%s6258_s7 + $0x68] sm:$0xff] %vm386_vm0, %v2680_v43 }
 0x29f   : > { %3257 = vst.msk [vmem:[%s6258_s7 + $0x70] sm:$0xff] %vm386_vm0, %v2685_v40 }
 0x2a0   : > { %3258 = vst.msk [vmem:[%s6258_s7 + $0x78] sm:$0xff] %vm386_vm0, %v2686_v44 }
 0x2a1   : > { %3259 = vst.msk [vmem:[%s6258_s7 + $0x80] sm:$0xff] %vm386_vm0, %v2691_v62 }
 0x2a2   : > { %3260 = vst.msk [vmem:[%s6258_s7 + $0x88] sm:$0xff] %vm386_vm0, %v2692_v30 }
 0x2a3   : > { %3506 = shalt.err (!%p3503_p9)
}
 0x2a4   : > { %s3585_s7 = smov 128   ;;  %s3586_s28 = smov 8  }
 0x2a5   : > { %3291 = dma.vmem_to_hbm [thread:$0]  (%p3667_p4), %s2735_s14, 2304, %s2737_s11, %s2720_s19, %s3585_s7, %s3585_s7, %s3586_s28  }
 0x2a6 PF: > { %s7329_s9 = sld [smem:[#allocation25_spill]] }
 0x2a7   : > { %s7330_s25 = sld [smem:[#allocation20_spill]] }
 0x2ac   : > { %p3328_p10 = scmp.ge.s32.totalorder %s7329_s9, 2 }
 0x2ad   : > { %s2751_s17 = sand.u32 1, %s7330_s25  }
 0x2ae   : > { %p3313_p11 = pnand %p3328_p10, %p3674_p8  ;;  %s2752_s22 = scalar_lea.sflag [#allocation4], %s2751_s17 }
 0x2b0   : > { %p3314_p12 = pneg %p3313_p11 }
 0x2b2   : > { %3548 = dma.done.wait (%p3314_p12), %s2752_s22, 2304  }
 0x2b3   : > { %3550 = vsyncadd (%p3314_p12), %s2752_s22, 4294964992  ;;  %s24_s29 = sadd.s32 1, %s7329_s9   ;;  %s7332_s24 = sld [smem:[#allocation21_spill]] }
 0x2b4   : > { %p21_p13 = scmp.ge.s32.totalorder %s24_s29, 4   ;;  %s7333_s25 = sld [smem:[#allocation22_spill]] }
 0x2b5   : > { %s7334_s26 = sld [smem:[#allocation29_spill]] }
 0x2b6   : > { %s7335_s27 = sld [smem:[#allocation24_spill]]  ;;  %23 = sbr.rel (!%p21_p13) target bundleno = 17 (0x11), region = 132 }
 0x2b7   : > { %s7336_s28 = sld [smem:[#allocation26_spill]] }
 0x2bb   :  { %2758 = vsyncpa [#allocation4], 1 }
 0x2bc   :  { %2760 = vsyncpa [#allocation4 + $0x1], 1 }
 0x2bd   :  { %2761 = vsyncpa [#allocation5], 1 }
 0x2be   :  { %2763 = vsyncpa [#allocation5 + $0x1], 1 }
 0x2bf   :  { %2764 = vsyncpa [#allocation7], 1 }
 0x2c0   :  { %2765 = vsyncpa [#allocation10], 1 }
 0x2c1   :  { %2766 = vsyncpa [#allocation13], 1 }

</bundles_post_ra>
